<compile_context>
chip_gen: v6e
topology: v6e:2x2x1
jax: 0.10.0
libtpu: 0.0.40
codegen_flags: <defaults>
</compile_context>

<pallas_src>
import math

import numpy as np

import jax
import jax.numpy as jnp
from jax.experimental import pallas as pl
from jax.experimental.pallas import tpu as pltpu


# ----------------------------- layout constants ---------------------------- #
_LANES = 128          # channel lanes (all channel dims zero-padded to 128)
_RS = 16              # row stride of the "rows = h*16 + w" activation storage
_ROWS0 = 288          # input   16x16 spatial  (16*16 + 32 pad rows)
_ROWS1 = 248          # conv    14x14          (14*16 + 24 pad rows)
_ROWS2 = 224          # conv1   13x13          (13*16 + 16 pad rows)
_ROWS3 = 200          # conv2 (stride-1 form) 12x12 (12*16 + 8 pad rows)
_ROWS5 = 48           # compact 6x6 = 36 positions, padded to 48
_OUT_ROWS = 16        # conv4 windowed-matmul rows (valid rows: 0 and 9)


# ------------------------------ fused kernel ------------------------------- #
def _fused_kernel(x_ref, w1_ref, b1_ref, w2_ref, b2_ref, w3_ref, sel_ref,
                  w4_ref, w5_ref, b5_ref, o_ref, a1_ref, a2_ref, a5_ref):
    """Entire forward pass for one batch element; everything stays in VMEM."""

    def conv(src_ref, kh, kw, out_rows, w_ref, b_ref=None):
        # Stride-1 conv on an activation stored as rows = h*16 + w, lanes = C.
        # Each tap (i, j) is a contiguous row-slice of the source ref; per-tap
        # (out_rows,128)@(128,128) matmuls accumulate in f32 on the MXU.
        acc = None
        for i in range(kh):
            for j in range(kw):
                tap = i * kw + j
                lhs = src_ref[i * _RS + j: i * _RS + j + out_rows, :]
                rhs = w_ref[tap * _LANES:(tap + 1) * _LANES, :]
                d = jnp.dot(lhs, rhs, preferred_element_type=jnp.float32)
                acc = d if acc is None else acc + d
        if b_ref is not None:
            acc = acc + b_ref[...]
        return acc

    # conv  : Conv2d(4->8, k=3)              16x16 -> 14x14
    a1_ref[...] = conv(x_ref, 3, 3, _ROWS1, w1_ref, b1_ref)
    # conv1 : Conv2d(8->7, k=2)              14x14 -> 13x13
    a2_ref[...] = conv(a1_ref, 2, 2, _ROWS2, w2_ref, b2_ref)
    # conv2 : Conv2d(7->6, k=2, stride=2, no bias): computed at stride 1
    #         (13x13 -> 12x12), then the even (h, w) positions are compacted
    #         to row-major 6x6 = 36 rows with a constant 0/1 selection matmul.
    f3 = conv(a2_ref, 2, 2, _ROWS3, w3_ref)                        # (200, 128)
    compact = jnp.dot(sel_ref[...], f3,
                      preferred_element_type=jnp.float32)          # (48, 128)
    # conv3 : Conv1d(6->3, k=1, no bias) == pointwise channel mix.
    a5_ref[...] = jnp.dot(compact, w4_ref[...],
                          preferred_element_type=jnp.float32)      # (48, 128)
    # conv4 : Conv3d(3->5, k=3) on the (4,3,3) volume flattened to 36 rows.
    #         27-tap windowed matmul; valid output depths d=0/1 are rows 0/9.
    acc = None
    for t in range(27):
        lhs = a5_ref[t: t + _OUT_ROWS, :]                          # (16, 128)
        rhs = w5_ref[t * _LANES:(t + 1) * _LANES, :]
        d = jnp.dot(lhs, rhs, preferred_element_type=jnp.float32)
        acc = d if acc is None else acc + d
    o_ref[...] = acc + b5_ref[...]                                 # (16, 128)


# --------------------------- one-time weight packing ------------------------ #
def _pack_bias(b):
    return jnp.pad(b, (0, _LANES - b.shape[0])).reshape(1, _LANES)


def _pack_conv2d_w(w):
    # torch layout (O, C, kh, kw) -> (kh*kw*128, 128), row = (i*kw+j)*128 + c
    o, c, kh, kw = w.shape
    wt = jnp.transpose(w, (2, 3, 1, 0))                            # (kh,kw,C,O)
    wt = jnp.pad(wt, ((0, 0), (0, 0), (0, _LANES - c), (0, _LANES - o)))
    return wt.reshape(kh * kw * _LANES, _LANES)


def _pack_conv1d_w(w):
    # torch layout (O, C, 1) -> (128, 128), row = c, col = o
    o, c, _ = w.shape
    wt = jnp.transpose(w[:, :, 0])                                 # (C, O)
    return jnp.pad(wt, ((0, _LANES - c), (0, _LANES - o)))


def _pack_conv3d_w(w):
    # torch layout (O, C, kd, kh, kw) -> (27*128, 128),
    # row = (kd*9 + kh*3 + kw)*128 + c
    o, c, kd, kh, kw = w.shape
    wt = jnp.transpose(w, (2, 3, 4, 1, 0))                         # (kd,kh,kw,C,O)
    wt = jnp.pad(wt, ((0, 0), (0, 0), (0, 0),
                      (0, _LANES - c), (0, _LANES - o)))
    return wt.reshape(kd * kh * kw * _LANES, _LANES)


def _build_select():
    # Row l (< 36) of the compact 6x6 output picks the stride-1 conv2 output
    # at spatial (2*(l//6), 2*(l%6)), i.e. stored row 32*(l//6) + 2*(l%6).
    s = np.zeros((_ROWS5, _ROWS3), np.float32)
    for l in range(36):
        s[l, 32 * (l // 6) + 2 * (l % 6)] = 1.0
    return jnp.asarray(s)


def pack_params(p):
    return (
        _pack_conv2d_w(p["conv_w"]),   # (1152, 128)
        _pack_bias(p["conv_b"]),       # (1, 128)
        _pack_conv2d_w(p["conv1_w"]),  # (512, 128)
        _pack_bias(p["conv1_b"]),      # (1, 128)
        _pack_conv2d_w(p["conv2_w"]),  # (512, 128)   (no bias)
        _build_select(),               # (48, 200)
        _pack_conv1d_w(p["conv3_w"]),  # (128, 128)   (no bias)
        _pack_conv3d_w(p["conv4_w"]),  # (3456, 128)
        _pack_bias(p["conv4_b"]),      # (1, 128)
    )


# ------------------------------- parameters -------------------------------- #
def _uniform(key, shape, bound):
    return jax.random.uniform(key, shape, jnp.float32, -bound, bound)


def init_params(key):
    ks = jax.random.split(key, 8)
    params = {}
    # conv:  Conv2d(4, 8, 3)
    bd = 1.0 / math.sqrt(4 * 3 * 3)
    params["conv_w"] = _uniform(ks[0], (8, 4, 3, 3), bd)
    params["conv_b"] = _uniform(ks[1], (8,), bd)
    # conv1: Conv2d(4->8 adjusted, 7, 2)
    bd = 1.0 / math.sqrt(8 * 2 * 2)
    params["conv1_w"] = _uniform(ks[2], (7, 8, 2, 2), bd)
    params["conv1_b"] = _uniform(ks[3], (7,), bd)
    # conv2: Conv2d(8->7 adjusted, 6, 2, stride=2, bias=False)
    bd = 1.0 / math.sqrt(7 * 2 * 2)
    params["conv2_w"] = _uniform(ks[4], (6, 7, 2, 2), bd)
    # conv3: Conv1d(2->6 adjusted, 3, 1, bias=False)
    bd = 1.0 / math.sqrt(6)
    params["conv3_w"] = _uniform(ks[5], (3, 6, 1), bd)
    # conv4: Conv3d(3, 5, 3)
    bd = 1.0 / math.sqrt(3 * 3 * 3 * 3)
    params["conv4_w"] = _uniform(ks[6], (5, 3, 3, 3, 3), bd)
    params["conv4_b"] = _uniform(ks[7], (5,), bd)
    return params


# --------------------------------- forward --------------------------------- #
@jax.jit
def forward(packed, x):
    (w1, b1, w2, b2, w3, sel, w4, w5, b5) = packed
    n, c, h, w = x.shape                                   # (N, 4, 16, 16)
    # Layout plumbing: NCHW -> rows = h*16 + w, lanes = channel (zero padded).
    xh = jnp.transpose(x, (0, 2, 3, 1)).reshape(n, h * w, c)
    xp = jnp.pad(xh, ((0, 0), (0, _ROWS0 - h * w), (0, _LANES - c)))

    res = pl.pallas_call(
        _fused_kernel,
        out_shape=jax.ShapeDtypeStruct((n, _OUT_ROWS, _LANES), jnp.float32),
        grid=(n,),
        in_specs=[
            pl.BlockSpec((None, _ROWS0, _LANES), lambda b: (b, 0, 0)),   # x
            pl.BlockSpec((9 * _LANES, _LANES), lambda b: (0, 0)),        # w1
            pl.BlockSpec((1, _LANES), lambda b: (0, 0)),                 # b1
            pl.BlockSpec((4 * _LANES, _LANES), lambda b: (0, 0)),        # w2
            pl.BlockSpec((1, _LANES), lambda b: (0, 0)),                 # b2
            pl.BlockSpec((4 * _LANES, _LANES), lambda b: (0, 0)),        # w3
            pl.BlockSpec((_ROWS5, _ROWS3), lambda b: (0, 0)),            # sel
            pl.BlockSpec((_LANES, _LANES), lambda b: (0, 0)),            # w4
            pl.BlockSpec((27 * _LANES, _LANES), lambda b: (0, 0)),       # w5
            pl.BlockSpec((1, _LANES), lambda b: (0, 0)),                 # b5
        ],
        out_specs=pl.BlockSpec((None, _OUT_ROWS, _LANES), lambda b: (b, 0, 0)),
        scratch_shapes=[
            pltpu.VMEM((_ROWS1, _LANES), jnp.float32),   # conv   output
            pltpu.VMEM((_ROWS2, _LANES), jnp.float32),   # conv1  output
            pltpu.VMEM((_ROWS5, _LANES), jnp.float32),   # conv3  output
        ],
        compiler_params=pltpu.CompilerParams(
            dimension_semantics=("parallel",),
            vmem_limit_bytes=32 * 1024 * 1024,
        ),
    )(xp, w1, b1, w2, b2, w3, sel, w4, w5, b5)

    # Valid outputs: rows 0 and 9 (depth 0/1), lanes 0..4 (output channels).
    out = jnp.stack([res[:, 0, :5], res[:, 9, :5]], axis=2)        # (N, 5, 2)
    return out.reshape(n, 5, 2, 1, 1)


if __name__ == "__main__":
    key = jax.random.PRNGKey(0)
    pkey, xkey = jax.random.split(key)
    params = init_params(pkey)
    packed = pack_params(params)
    x = jax.random.normal(xkey, (2, 4, 16, 16), jnp.float32)
    out = forward(packed, x)
    jax.block_until_ready(out)
    assert out.shape == (2, 5, 2, 1, 1), out.shape
    assert bool(jnp.all(jnp.isfinite(out)))
    print("KERNEL_OK")
</pallas_src>

<mosaic_0001>
module attributes {stable_mosaic.version = 11 : i64} {
  func.func @_fused_kernel(%arg0: i32, %arg1: memref<1x288x128xf32, #tpu.memory_space<vmem>>, %arg2: memref<1152x128xf32, #tpu.memory_space<vmem>>, %arg3: memref<1x128xf32, #tpu.memory_space<vmem>>, %arg4: memref<512x128xf32, #tpu.memory_space<vmem>>, %arg5: memref<1x128xf32, #tpu.memory_space<vmem>>, %arg6: memref<512x128xf32, #tpu.memory_space<vmem>>, %arg7: memref<48x200xf32, #tpu.memory_space<vmem>>, %arg8: memref<128x128xf32, #tpu.memory_space<vmem>>, %arg9: memref<3456x128xf32, #tpu.memory_space<vmem>>, %arg10: memref<1x128xf32, #tpu.memory_space<vmem>>, %arg11: memref<1x16x128xf32, #tpu.memory_space<vmem>>, %arg12: memref<248x128xf32, #tpu.memory_space<vmem>>, %arg13: memref<224x128xf32, #tpu.memory_space<vmem>>, %arg14: memref<48x128xf32, #tpu.memory_space<vmem>>) attributes {dimension_semantics = [#tpu.dimension_semantics<parallel>], iteration_bounds = array<i64: 2>, scalar_prefetch = 0 : i64, scratch_operands = 3 : i64, tpu.core_type = #tpu.core_type<tc>, window_params = [{transform_indices = @transform_0, window_bounds = array<i64: 1, 288, 128>}, {pipeline_mode = #tpu.pipeline_mode<synchronous>, transform_indices = @transform_1, window_bounds = array<i64: 1152, 128>}, {pipeline_mode = #tpu.pipeline_mode<synchronous>, transform_indices = @transform_2, window_bounds = array<i64: 1, 128>}, {pipeline_mode = #tpu.pipeline_mode<synchronous>, transform_indices = @transform_3, window_bounds = array<i64: 512, 128>}, {pipeline_mode = #tpu.pipeline_mode<synchronous>, transform_indices = @transform_4, window_bounds = array<i64: 1, 128>}, {pipeline_mode = #tpu.pipeline_mode<synchronous>, transform_indices = @transform_5, window_bounds = array<i64: 512, 128>}, {pipeline_mode = #tpu.pipeline_mode<synchronous>, transform_indices = @transform_6, window_bounds = array<i64: 48, 200>}, {pipeline_mode = #tpu.pipeline_mode<synchronous>, transform_indices = @transform_7, window_bounds = array<i64: 128, 128>}, {pipeline_mode = #tpu.pipeline_mode<synchronous>, transform_indices = @transform_8, window_bounds = array<i64: 3456, 128>}, {pipeline_mode = #tpu.pipeline_mode<synchronous>, transform_indices = @transform_9, window_bounds = array<i64: 1, 128>}, {transform_indices = @transform_10, window_bounds = array<i64: 1, 16, 128>}]} {
    %c0 = arith.constant 0 : index
    %c0_0 = arith.constant 0 : index
    %c0_1 = arith.constant 0 : index
    %0 = vector.load %arg1[%c0, %c0_0, %c0_1] : memref<1x288x128xf32, #tpu.memory_space<vmem>>, vector<1x248x128xf32>
    %1 = vector.shape_cast %0 : vector<1x248x128xf32> to vector<248x128xf32>
    %c0_2 = arith.constant 0 : index
    %c0_3 = arith.constant 0 : index
    %2 = vector.load %arg2[%c0_2, %c0_3] : memref<1152x128xf32, #tpu.memory_space<vmem>>, vector<128x128xf32>
    %cst = arith.constant dense<0.000000e+00> : vector<248x128xf32>
    %3 = tpu.matmul %1, %2, %cst {dimension_numbers = #tpu.dot_dimension_numbers<[1], [0], [0], [1], [0, 0, 1, 1], [], []>} : vector<248x128xf32>, vector<128x128xf32>, vector<248x128xf32> -> vector<248x128xf32>
    %c0_4 = arith.constant 0 : index
    %c1 = arith.constant 1 : index
    %c0_5 = arith.constant 0 : index
    %4 = vector.load %arg1[%c0_4, %c1, %c0_5] : memref<1x288x128xf32, #tpu.memory_space<vmem>>, vector<1x248x128xf32>
    %5 = vector.shape_cast %4 : vector<1x248x128xf32> to vector<248x128xf32>
    %c128 = arith.constant 128 : index
    %c0_6 = arith.constant 0 : index
    %6 = vector.load %arg2[%c128, %c0_6] : memref<1152x128xf32, #tpu.memory_space<vmem>>, vector<128x128xf32>
    %cst_7 = arith.constant dense<0.000000e+00> : vector<248x128xf32>
    %7 = tpu.matmul %5, %6, %cst_7 {dimension_numbers = #tpu.dot_dimension_numbers<[1], [0], [0], [1], [0, 0, 1, 1], [], []>} : vector<248x128xf32>, vector<128x128xf32>, vector<248x128xf32> -> vector<248x128xf32>
    %8 = arith.addf %3, %7 : vector<248x128xf32>
    %c0_8 = arith.constant 0 : index
    %c2 = arith.constant 2 : index
    %c0_9 = arith.constant 0 : index
    %9 = vector.load %arg1[%c0_8, %c2, %c0_9] : memref<1x288x128xf32, #tpu.memory_space<vmem>>, vector<1x248x128xf32>
    %10 = vector.shape_cast %9 : vector<1x248x128xf32> to vector<248x128xf32>
    %c256 = arith.constant 256 : index
    %c0_10 = arith.constant 0 : index
    %11 = vector.load %arg2[%c256, %c0_10] : memref<1152x128xf32, #tpu.memory_space<vmem>>, vector<128x128xf32>
    %cst_11 = arith.constant dense<0.000000e+00> : vector<248x128xf32>
    %12 = tpu.matmul %10, %11, %cst_11 {dimension_numbers = #tpu.dot_dimension_numbers<[1], [0], [0], [1], [0, 0, 1, 1], [], []>} : vector<248x128xf32>, vector<128x128xf32>, vector<248x128xf32> -> vector<248x128xf32>
    %13 = arith.addf %8, %12 : vector<248x128xf32>
    %c0_12 = arith.constant 0 : index
    %c16 = arith.constant 16 : index
    %c0_13 = arith.constant 0 : index
    %14 = vector.load %arg1[%c0_12, %c16, %c0_13] : memref<1x288x128xf32, #tpu.memory_space<vmem>>, vector<1x248x128xf32>
    %15 = vector.shape_cast %14 : vector<1x248x128xf32> to vector<248x128xf32>
    %c384 = arith.constant 384 : index
    %c0_14 = arith.constant 0 : index
    %16 = vector.load %arg2[%c384, %c0_14] : memref<1152x128xf32, #tpu.memory_space<vmem>>, vector<128x128xf32>
    %cst_15 = arith.constant dense<0.000000e+00> : vector<248x128xf32>
    %17 = tpu.matmul %15, %16, %cst_15 {dimension_numbers = #tpu.dot_dimension_numbers<[1], [0], [0], [1], [0, 0, 1, 1], [], []>} : vector<248x128xf32>, vector<128x128xf32>, vector<248x128xf32> -> vector<248x128xf32>
    %18 = arith.addf %13, %17 : vector<248x128xf32>
    %c0_16 = arith.constant 0 : index
    %c17 = arith.constant 17 : index
    %c0_17 = arith.constant 0 : index
    %19 = vector.load %arg1[%c0_16, %c17, %c0_17] : memref<1x288x128xf32, #tpu.memory_space<vmem>>, vector<1x248x128xf32>
    %20 = vector.shape_cast %19 : vector<1x248x128xf32> to vector<248x128xf32>
    %c512 = arith.constant 512 : index
    %c0_18 = arith.constant 0 : index
    %21 = vector.load %arg2[%c512, %c0_18] : memref<1152x128xf32, #tpu.memory_space<vmem>>, vector<128x128xf32>
    %cst_19 = arith.constant dense<0.000000e+00> : vector<248x128xf32>
    %22 = tpu.matmul %20, %21, %cst_19 {dimension_numbers = #tpu.dot_dimension_numbers<[1], [0], [0], [1], [0, 0, 1, 1], [], []>} : vector<248x128xf32>, vector<128x128xf32>, vector<248x128xf32> -> vector<248x128xf32>
    %23 = arith.addf %18, %22 : vector<248x128xf32>
    %c0_20 = arith.constant 0 : index
    %c18 = arith.constant 18 : index
    %c0_21 = arith.constant 0 : index
    %24 = vector.load %arg1[%c0_20, %c18, %c0_21] : memref<1x288x128xf32, #tpu.memory_space<vmem>>, vector<1x248x128xf32>
    %25 = vector.shape_cast %24 : vector<1x248x128xf32> to vector<248x128xf32>
    %c640 = arith.constant 640 : index
    %c0_22 = arith.constant 0 : index
    %26 = vector.load %arg2[%c640, %c0_22] : memref<1152x128xf32, #tpu.memory_space<vmem>>, vector<128x128xf32>
    %cst_23 = arith.constant dense<0.000000e+00> : vector<248x128xf32>
    %27 = tpu.matmul %25, %26, %cst_23 {dimension_numbers = #tpu.dot_dimension_numbers<[1], [0], [0], [1], [0, 0, 1, 1], [], []>} : vector<248x128xf32>, vector<128x128xf32>, vector<248x128xf32> -> vector<248x128xf32>
    %28 = arith.addf %23, %27 : vector<248x128xf32>
    %c0_24 = arith.constant 0 : index
    %c32 = arith.constant 32 : index
    %c0_25 = arith.constant 0 : index
    %29 = vector.load %arg1[%c0_24, %c32, %c0_25] : memref<1x288x128xf32, #tpu.memory_space<vmem>>, vector<1x248x128xf32>
    %30 = vector.shape_cast %29 : vector<1x248x128xf32> to vector<248x128xf32>
    %c768 = arith.constant 768 : index
    %c0_26 = arith.constant 0 : index
    %31 = vector.load %arg2[%c768, %c0_26] : memref<1152x128xf32, #tpu.memory_space<vmem>>, vector<128x128xf32>
    %cst_27 = arith.constant dense<0.000000e+00> : vector<248x128xf32>
    %32 = tpu.matmul %30, %31, %cst_27 {dimension_numbers = #tpu.dot_dimension_numbers<[1], [0], [0], [1], [0, 0, 1, 1], [], []>} : vector<248x128xf32>, vector<128x128xf32>, vector<248x128xf32> -> vector<248x128xf32>
    %33 = arith.addf %28, %32 : vector<248x128xf32>
    %c0_28 = arith.constant 0 : index
    %c33 = arith.constant 33 : index
    %c0_29 = arith.constant 0 : index
    %34 = vector.load %arg1[%c0_28, %c33, %c0_29] : memref<1x288x128xf32, #tpu.memory_space<vmem>>, vector<1x248x128xf32>
    %35 = vector.shape_cast %34 : vector<1x248x128xf32> to vector<248x128xf32>
    %c896 = arith.constant 896 : index
    %c0_30 = arith.constant 0 : index
    %36 = vector.load %arg2[%c896, %c0_30] : memref<1152x128xf32, #tpu.memory_space<vmem>>, vector<128x128xf32>
    %cst_31 = arith.constant dense<0.000000e+00> : vector<248x128xf32>
    %37 = tpu.matmul %35, %36, %cst_31 {dimension_numbers = #tpu.dot_dimension_numbers<[1], [0], [0], [1], [0, 0, 1, 1], [], []>} : vector<248x128xf32>, vector<128x128xf32>, vector<248x128xf32> -> vector<248x128xf32>
    %38 = arith.addf %33, %37 : vector<248x128xf32>
    %c0_32 = arith.constant 0 : index
    %c34 = arith.constant 34 : index
    %c0_33 = arith.constant 0 : index
    %39 = vector.load %arg1[%c0_32, %c34, %c0_33] : memref<1x288x128xf32, #tpu.memory_space<vmem>>, vector<1x248x128xf32>
    %40 = vector.shape_cast %39 : vector<1x248x128xf32> to vector<248x128xf32>
    %c1024 = arith.constant 1024 : index
    %c0_34 = arith.constant 0 : index
    %41 = vector.load %arg2[%c1024, %c0_34] : memref<1152x128xf32, #tpu.memory_space<vmem>>, vector<128x128xf32>
    %cst_35 = arith.constant dense<0.000000e+00> : vector<248x128xf32>
    %42 = tpu.matmul %40, %41, %cst_35 {dimension_numbers = #tpu.dot_dimension_numbers<[1], [0], [0], [1], [0, 0, 1, 1], [], []>} : vector<248x128xf32>, vector<128x128xf32>, vector<248x128xf32> -> vector<248x128xf32>
    %43 = arith.addf %38, %42 : vector<248x128xf32>
    %c0_36 = arith.constant 0 : index
    %c0_37 = arith.constant 0 : index
    %44 = vector.load %arg3[%c0_36, %c0_37] : memref<1x128xf32, #tpu.memory_space<vmem>>, vector<1x128xf32>
    %45 = vector.broadcast %44 : vector<1x128xf32> to vector<248x128xf32>
    %46 = arith.addf %43, %45 : vector<248x128xf32>
    %c0_38 = arith.constant 0 : index
    %c0_39 = arith.constant 0 : index
    %47 = vector.load %arg12[%c0_38, %c0_39] : memref<248x128xf32, #tpu.memory_space<vmem>>, vector<248x128xf32>
    tpu.vector_store %arg12[%c0_38, %c0_39], %46 {strides = array<i32>} : memref<248x128xf32, #tpu.memory_space<vmem>>, vector<248x128xf32>,
    %c0_40 = arith.constant 0 : index
    %c0_41 = arith.constant 0 : index
    %48 = vector.load %arg12[%c0_40, %c0_41] : memref<248x128xf32, #tpu.memory_space<vmem>>, vector<224x128xf32>
    %c0_42 = arith.constant 0 : index
    %c0_43 = arith.constant 0 : index
    %49 = vector.load %arg4[%c0_42, %c0_43] : memref<512x128xf32, #tpu.memory_space<vmem>>, vector<128x128xf32>
    %cst_44 = arith.constant dense<0.000000e+00> : vector<224x128xf32>
    %50 = tpu.matmul %48, %49, %cst_44 {dimension_numbers = #tpu.dot_dimension_numbers<[1], [0], [0], [1], [0, 0, 1, 1], [], []>} : vector<224x128xf32>, vector<128x128xf32>, vector<224x128xf32> -> vector<224x128xf32>
    %c1_45 = arith.constant 1 : index
    %c0_46 = arith.constant 0 : index
    %51 = vector.load %arg12[%c1_45, %c0_46] : memref<248x128xf32, #tpu.memory_space<vmem>>, vector<224x128xf32>
    %c128_47 = arith.constant 128 : index
    %c0_48 = arith.constant 0 : index
    %52 = vector.load %arg4[%c128_47, %c0_48] : memref<512x128xf32, #tpu.memory_space<vmem>>, vector<128x128xf32>
    %cst_49 = arith.constant dense<0.000000e+00> : vector<224x128xf32>
    %53 = tpu.matmul %51, %52, %cst_49 {dimension_numbers = #tpu.dot_dimension_numbers<[1], [0], [0], [1], [0, 0, 1, 1], [], []>} : vector<224x128xf32>, vector<128x128xf32>, vector<224x128xf32> -> vector<224x128xf32>
    %54 = arith.addf %50, %53 : vector<224x128xf32>
    %c16_50 = arith.constant 16 : index
    %c0_51 = arith.constant 0 : index
    %55 = vector.load %arg12[%c16_50, %c0_51] : memref<248x128xf32, #tpu.memory_space<vmem>>, vector<224x128xf32>
    %c256_52 = arith.constant 256 : index
    %c0_53 = arith.constant 0 : index
    %56 = vector.load %arg4[%c256_52, %c0_53] : memref<512x128xf32, #tpu.memory_space<vmem>>, vector<128x128xf32>
    %cst_54 = arith.constant dense<0.000000e+00> : vector<224x128xf32>
    %57 = tpu.matmul %55, %56, %cst_54 {dimension_numbers = #tpu.dot_dimension_numbers<[1], [0], [0], [1], [0, 0, 1, 1], [], []>} : vector<224x128xf32>, vector<128x128xf32>, vector<224x128xf32> -> vector<224x128xf32>
    %58 = arith.addf %54, %57 : vector<224x128xf32>
    %c17_55 = arith.constant 17 : index
    %c0_56 = arith.constant 0 : index
    %59 = vector.load %arg12[%c17_55, %c0_56] : memref<248x128xf32, #tpu.memory_space<vmem>>, vector<224x128xf32>
    %c384_57 = arith.constant 384 : index
    %c0_58 = arith.constant 0 : index
    %60 = vector.load %arg4[%c384_57, %c0_58] : memref<512x128xf32, #tpu.memory_space<vmem>>, vector<128x128xf32>
    %cst_59 = arith.constant dense<0.000000e+00> : vector<224x128xf32>
    %61 = tpu.matmul %59, %60, %cst_59 {dimension_numbers = #tpu.dot_dimension_numbers<[1], [0], [0], [1], [0, 0, 1, 1], [], []>} : vector<224x128xf32>, vector<128x128xf32>, vector<224x128xf32> -> vector<224x128xf32>
    %62 = arith.addf %58, %61 : vector<224x128xf32>
    %c0_60 = arith.constant 0 : index
    %c0_61 = arith.constant 0 : index
    %63 = vector.load %arg5[%c0_60, %c0_61] : memref<1x128xf32, #tpu.memory_space<vmem>>, vector<1x128xf32>
    %64 = vector.broadcast %63 : vector<1x128xf32> to vector<224x128xf32>
    %65 = arith.addf %62, %64 : vector<224x128xf32>
    %c0_62 = arith.constant 0 : index
    %c0_63 = arith.constant 0 : index
    %66 = vector.load %arg13[%c0_62, %c0_63] : memref<224x128xf32, #tpu.memory_space<vmem>>, vector<224x128xf32>
    tpu.vector_store %arg13[%c0_62, %c0_63], %65 {strides = array<i32>} : memref<224x128xf32, #tpu.memory_space<vmem>>, vector<224x128xf32>,
    %c0_64 = arith.constant 0 : index
    %c0_65 = arith.constant 0 : index
    %67 = vector.load %arg13[%c0_64, %c0_65] : memref<224x128xf32, #tpu.memory_space<vmem>>, vector<200x128xf32>
    %c0_66 = arith.constant 0 : index
    %c0_67 = arith.constant 0 : index
    %68 = vector.load %arg6[%c0_66, %c0_67] : memref<512x128xf32, #tpu.memory_space<vmem>>, vector<128x128xf32>
    %cst_68 = arith.constant dense<0.000000e+00> : vector<200x128xf32>
    %69 = tpu.matmul %67, %68, %cst_68 {dimension_numbers = #tpu.dot_dimension_numbers<[1], [0], [0], [1], [0, 0, 1, 1], [], []>} : vector<200x128xf32>, vector<128x128xf32>, vector<200x128xf32> -> vector<200x128xf32>
    %c1_69 = arith.constant 1 : index
    %c0_70 = arith.constant 0 : index
    %70 = vector.load %arg13[%c1_69, %c0_70] : memref<224x128xf32, #tpu.memory_space<vmem>>, vector<200x128xf32>
    %c128_71 = arith.constant 128 : index
    %c0_72 = arith.constant 0 : index
    %71 = vector.load %arg6[%c128_71, %c0_72] : memref<512x128xf32, #tpu.memory_space<vmem>>, vector<128x128xf32>
    %cst_73 = arith.constant dense<0.000000e+00> : vector<200x128xf32>
    %72 = tpu.matmul %70, %71, %cst_73 {dimension_numbers = #tpu.dot_dimension_numbers<[1], [0], [0], [1], [0, 0, 1, 1], [], []>} : vector<200x128xf32>, vector<128x128xf32>, vector<200x128xf32> -> vector<200x128xf32>
    %73 = arith.addf %69, %72 : vector<200x128xf32>
    %c16_74 = arith.constant 16 : index
    %c0_75 = arith.constant 0 : index
    %74 = vector.load %arg13[%c16_74, %c0_75] : memref<224x128xf32, #tpu.memory_space<vmem>>, vector<200x128xf32>
    %c256_76 = arith.constant 256 : index
    %c0_77 = arith.constant 0 : index
    %75 = vector.load %arg6[%c256_76, %c0_77] : memref<512x128xf32, #tpu.memory_space<vmem>>, vector<128x128xf32>
    %cst_78 = arith.constant dense<0.000000e+00> : vector<200x128xf32>
    %76 = tpu.matmul %74, %75, %cst_78 {dimension_numbers = #tpu.dot_dimension_numbers<[1], [0], [0], [1], [0, 0, 1, 1], [], []>} : vector<200x128xf32>, vector<128x128xf32>, vector<200x128xf32> -> vector<200x128xf32>
    %77 = arith.addf %73, %76 : vector<200x128xf32>
    %c17_79 = arith.constant 17 : index
    %c0_80 = arith.constant 0 : index
    %78 = vector.load %arg13[%c17_79, %c0_80] : memref<224x128xf32, #tpu.memory_space<vmem>>, vector<200x128xf32>
    %c384_81 = arith.constant 384 : index
    %c0_82 = arith.constant 0 : index
    %79 = vector.load %arg6[%c384_81, %c0_82] : memref<512x128xf32, #tpu.memory_space<vmem>>, vector<128x128xf32>
    %cst_83 = arith.constant dense<0.000000e+00> : vector<200x128xf32>
    %80 = tpu.matmul %78, %79, %cst_83 {dimension_numbers = #tpu.dot_dimension_numbers<[1], [0], [0], [1], [0, 0, 1, 1], [], []>} : vector<200x128xf32>, vector<128x128xf32>, vector<200x128xf32> -> vector<200x128xf32>
    %81 = arith.addf %77, %80 : vector<200x128xf32>
    %c0_84 = arith.constant 0 : index
    %c0_85 = arith.constant 0 : index
    %82 = vector.load %arg7[%c0_84, %c0_85] : memref<48x200xf32, #tpu.memory_space<vmem>>, vector<48x200xf32>
    %cst_86 = arith.constant dense<0.000000e+00> : vector<48x128xf32>
    %83 = tpu.matmul %82, %81, %cst_86 {dimension_numbers = #tpu.dot_dimension_numbers<[1], [0], [0], [1], [0, 0, 1, 1], [], []>} : vector<48x200xf32>, vector<200x128xf32>, vector<48x128xf32> -> vector<48x128xf32>
    %c0_87 = arith.constant 0 : index
    %c0_88 = arith.constant 0 : index
    %84 = vector.load %arg8[%c0_87, %c0_88] : memref<128x128xf32, #tpu.memory_space<vmem>>, vector<128x128xf32>
    %cst_89 = arith.constant dense<0.000000e+00> : vector<48x128xf32>
    %85 = tpu.matmul %83, %84, %cst_89 {dimension_numbers = #tpu.dot_dimension_numbers<[1], [0], [0], [1], [0, 0, 1, 1], [], []>} : vector<48x128xf32>, vector<128x128xf32>, vector<48x128xf32> -> vector<48x128xf32>
    %c0_90 = arith.constant 0 : index
    %c0_91 = arith.constant 0 : index
    %86 = vector.load %arg14[%c0_90, %c0_91] : memref<48x128xf32, #tpu.memory_space<vmem>>, vector<48x128xf32>
    tpu.vector_store %arg14[%c0_90, %c0_91], %85 {strides = array<i32>} : memref<48x128xf32, #tpu.memory_space<vmem>>, vector<48x128xf32>,
    %c0_92 = arith.constant 0 : index
    %c0_93 = arith.constant 0 : index
    %87 = vector.load %arg14[%c0_92, %c0_93] : memref<48x128xf32, #tpu.memory_space<vmem>>, vector<16x128xf32>
    %c0_94 = arith.constant 0 : index
    %c0_95 = arith.constant 0 : index
    %88 = vector.load %arg9[%c0_94, %c0_95] : memref<3456x128xf32, #tpu.memory_space<vmem>>, vector<128x128xf32>
    %cst_96 = arith.constant dense<0.000000e+00> : vector<16x128xf32>
    %89 = tpu.matmul %87, %88, %cst_96 {dimension_numbers = #tpu.dot_dimension_numbers<[1], [0], [0], [1], [0, 0, 1, 1], [], []>} : vector<16x128xf32>, vector<128x128xf32>, vector<16x128xf32> -> vector<16x128xf32>
    %c1_97 = arith.constant 1 : index
    %c0_98 = arith.constant 0 : index
    %90 = vector.load %arg14[%c1_97, %c0_98] : memref<48x128xf32, #tpu.memory_space<vmem>>, vector<16x128xf32>
    %c128_99 = arith.constant 128 : index
    %c0_100 = arith.constant 0 : index
    %91 = vector.load %arg9[%c128_99, %c0_100] : memref<3456x128xf32, #tpu.memory_space<vmem>>, vector<128x128xf32>
    %cst_101 = arith.constant dense<0.000000e+00> : vector<16x128xf32>
    %92 = tpu.matmul %90, %91, %cst_101 {dimension_numbers = #tpu.dot_dimension_numbers<[1], [0], [0], [1], [0, 0, 1, 1], [], []>} : vector<16x128xf32>, vector<128x128xf32>, vector<16x128xf32> -> vector<16x128xf32>
    %93 = arith.addf %89, %92 : vector<16x128xf32>
    %c2_102 = arith.constant 2 : index
    %c0_103 = arith.constant 0 : index
    %94 = vector.load %arg14[%c2_102, %c0_103] : memref<48x128xf32, #tpu.memory_space<vmem>>, vector<16x128xf32>
    %c256_104 = arith.constant 256 : index
    %c0_105 = arith.constant 0 : index
    %95 = vector.load %arg9[%c256_104, %c0_105] : memref<3456x128xf32, #tpu.memory_space<vmem>>, vector<128x128xf32>
    %cst_106 = arith.constant dense<0.000000e+00> : vector<16x128xf32>
    %96 = tpu.matmul %94, %95, %cst_106 {dimension_numbers = #tpu.dot_dimension_numbers<[1], [0], [0], [1], [0, 0, 1, 1], [], []>} : vector<16x128xf32>, vector<128x128xf32>, vector<16x128xf32> -> vector<16x128xf32>
    %97 = arith.addf %93, %96 : vector<16x128xf32>
    %c3 = arith.constant 3 : index
    %c0_107 = arith.constant 0 : index
    %98 = vector.load %arg14[%c3, %c0_107] : memref<48x128xf32, #tpu.memory_space<vmem>>, vector<16x128xf32>
    %c384_108 = arith.constant 384 : index
    %c0_109 = arith.constant 0 : index
    %99 = vector.load %arg9[%c384_108, %c0_109] : memref<3456x128xf32, #tpu.memory_space<vmem>>, vector<128x128xf32>
    %cst_110 = arith.constant dense<0.000000e+00> : vector<16x128xf32>
    %100 = tpu.matmul %98, %99, %cst_110 {dimension_numbers = #tpu.dot_dimension_numbers<[1], [0], [0], [1], [0, 0, 1, 1], [], []>} : vector<16x128xf32>, vector<128x128xf32>, vector<16x128xf32> -> vector<16x128xf32>
    %101 = arith.addf %97, %100 : vector<16x128xf32>
    %c4 = arith.constant 4 : index
    %c0_111 = arith.constant 0 : index
    %102 = vector.load %arg14[%c4, %c0_111] : memref<48x128xf32, #tpu.memory_space<vmem>>, vector<16x128xf32>
    %c512_112 = arith.constant 512 : index
    %c0_113 = arith.constant 0 : index
    %103 = vector.load %arg9[%c512_112, %c0_113] : memref<3456x128xf32, #tpu.memory_space<vmem>>, vector<128x128xf32>
    %cst_114 = arith.constant dense<0.000000e+00> : vector<16x128xf32>
    %104 = tpu.matmul %102, %103, %cst_114 {dimension_numbers = #tpu.dot_dimension_numbers<[1], [0], [0], [1], [0, 0, 1, 1], [], []>} : vector<16x128xf32>, vector<128x128xf32>, vector<16x128xf32> -> vector<16x128xf32>
    %105 = arith.addf %101, %104 : vector<16x128xf32>
    %c5 = arith.constant 5 : index
    %c0_115 = arith.constant 0 : index
    %106 = vector.load %arg14[%c5, %c0_115] : memref<48x128xf32, #tpu.memory_space<vmem>>, vector<16x128xf32>
    %c640_116 = arith.constant 640 : index
    %c0_117 = arith.constant 0 : index
    %107 = vector.load %arg9[%c640_116, %c0_117] : memref<3456x128xf32, #tpu.memory_space<vmem>>, vector<128x128xf32>
    %cst_118 = arith.constant dense<0.000000e+00> : vector<16x128xf32>
    %108 = tpu.matmul %106, %107, %cst_118 {dimension_numbers = #tpu.dot_dimension_numbers<[1], [0], [0], [1], [0, 0, 1, 1], [], []>} : vector<16x128xf32>, vector<128x128xf32>, vector<16x128xf32> -> vector<16x128xf32>
    %109 = arith.addf %105, %108 : vector<16x128xf32>
    %c6 = arith.constant 6 : index
    %c0_119 = arith.constant 0 : index
    %110 = vector.load %arg14[%c6, %c0_119] : memref<48x128xf32, #tpu.memory_space<vmem>>, vector<16x128xf32>
    %c768_120 = arith.constant 768 : index
    %c0_121 = arith.constant 0 : index
    %111 = vector.load %arg9[%c768_120, %c0_121] : memref<3456x128xf32, #tpu.memory_space<vmem>>, vector<128x128xf32>
    %cst_122 = arith.constant dense<0.000000e+00> : vector<16x128xf32>
    %112 = tpu.matmul %110, %111, %cst_122 {dimension_numbers = #tpu.dot_dimension_numbers<[1], [0], [0], [1], [0, 0, 1, 1], [], []>} : vector<16x128xf32>, vector<128x128xf32>, vector<16x128xf32> -> vector<16x128xf32>
    %113 = arith.addf %109, %112 : vector<16x128xf32>
    %c7 = arith.constant 7 : index
    %c0_123 = arith.constant 0 : index
    %114 = vector.load %arg14[%c7, %c0_123] : memref<48x128xf32, #tpu.memory_space<vmem>>, vector<16x128xf32>
    %c896_124 = arith.constant 896 : index
    %c0_125 = arith.constant 0 : index
    %115 = vector.load %arg9[%c896_124, %c0_125] : memref<3456x128xf32, #tpu.memory_space<vmem>>, vector<128x128xf32>
    %cst_126 = arith.constant dense<0.000000e+00> : vector<16x128xf32>
    %116 = tpu.matmul %114, %115, %cst_126 {dimension_numbers = #tpu.dot_dimension_numbers<[1], [0], [0], [1], [0, 0, 1, 1], [], []>} : vector<16x128xf32>, vector<128x128xf32>, vector<16x128xf32> -> vector<16x128xf32>
    %117 = arith.addf %113, %116 : vector<16x128xf32>
    %c8 = arith.constant 8 : index
    %c0_127 = arith.constant 0 : index
    %118 = vector.load %arg14[%c8, %c0_127] : memref<48x128xf32, #tpu.memory_space<vmem>>, vector<16x128xf32>
    %c1024_128 = arith.constant 1024 : index
    %c0_129 = arith.constant 0 : index
    %119 = vector.load %arg9[%c1024_128, %c0_129] : memref<3456x128xf32, #tpu.memory_space<vmem>>, vector<128x128xf32>
    %cst_130 = arith.constant dense<0.000000e+00> : vector<16x128xf32>
    %120 = tpu.matmul %118, %119, %cst_130 {dimension_numbers = #tpu.dot_dimension_numbers<[1], [0], [0], [1], [0, 0, 1, 1], [], []>} : vector<16x128xf32>, vector<128x128xf32>, vector<16x128xf32> -> vector<16x128xf32>
    %121 = arith.addf %117, %120 : vector<16x128xf32>
    %c9 = arith.constant 9 : index
    %c0_131 = arith.constant 0 : index
    %122 = vector.load %arg14[%c9, %c0_131] : memref<48x128xf32, #tpu.memory_space<vmem>>, vector<16x128xf32>
    %c1152 = arith.constant 1152 : index
    %c0_132 = arith.constant 0 : index
    %123 = vector.load %arg9[%c1152, %c0_132] : memref<3456x128xf32, #tpu.memory_space<vmem>>, vector<128x128xf32>
    %cst_133 = arith.constant dense<0.000000e+00> : vector<16x128xf32>
    %124 = tpu.matmul %122, %123, %cst_133 {dimension_numbers = #tpu.dot_dimension_numbers<[1], [0], [0], [1], [0, 0, 1, 1], [], []>} : vector<16x128xf32>, vector<128x128xf32>, vector<16x128xf32> -> vector<16x128xf32>
    %125 = arith.addf %121, %124 : vector<16x128xf32>
    %c10 = arith.constant 10 : index
    %c0_134 = arith.constant 0 : index
    %126 = vector.load %arg14[%c10, %c0_134] : memref<48x128xf32, #tpu.memory_space<vmem>>, vector<16x128xf32>
    %c1280 = arith.constant 1280 : index
    %c0_135 = arith.constant 0 : index
    %127 = vector.load %arg9[%c1280, %c0_135] : memref<3456x128xf32, #tpu.memory_space<vmem>>, vector<128x128xf32>
    %cst_136 = arith.constant dense<0.000000e+00> : vector<16x128xf32>
    %128 = tpu.matmul %126, %127, %cst_136 {dimension_numbers = #tpu.dot_dimension_numbers<[1], [0], [0], [1], [0, 0, 1, 1], [], []>} : vector<16x128xf32>, vector<128x128xf32>, vector<16x128xf32> -> vector<16x128xf32>
    %129 = arith.addf %125, %128 : vector<16x128xf32>
    %c11 = arith.constant 11 : index
    %c0_137 = arith.constant 0 : index
    %130 = vector.load %arg14[%c11, %c0_137] : memref<48x128xf32, #tpu.memory_space<vmem>>, vector<16x128xf32>
    %c1408 = arith.constant 1408 : index
    %c0_138 = arith.constant 0 : index
    %131 = vector.load %arg9[%c1408, %c0_138] : memref<3456x128xf32, #tpu.memory_space<vmem>>, vector<128x128xf32>
    %cst_139 = arith.constant dense<0.000000e+00> : vector<16x128xf32>
    %132 = tpu.matmul %130, %131, %cst_139 {dimension_numbers = #tpu.dot_dimension_numbers<[1], [0], [0], [1], [0, 0, 1, 1], [], []>} : vector<16x128xf32>, vector<128x128xf32>, vector<16x128xf32> -> vector<16x128xf32>
    %133 = arith.addf %129, %132 : vector<16x128xf32>
    %c12 = arith.constant 12 : index
    %c0_140 = arith.constant 0 : index
    %134 = vector.load %arg14[%c12, %c0_140] : memref<48x128xf32, #tpu.memory_space<vmem>>, vector<16x128xf32>
    %c1536 = arith.constant 1536 : index
    %c0_141 = arith.constant 0 : index
    %135 = vector.load %arg9[%c1536, %c0_141] : memref<3456x128xf32, #tpu.memory_space<vmem>>, vector<128x128xf32>
    %cst_142 = arith.constant dense<0.000000e+00> : vector<16x128xf32>
    %136 = tpu.matmul %134, %135, %cst_142 {dimension_numbers = #tpu.dot_dimension_numbers<[1], [0], [0], [1], [0, 0, 1, 1], [], []>} : vector<16x128xf32>, vector<128x128xf32>, vector<16x128xf32> -> vector<16x128xf32>
    %137 = arith.addf %133, %136 : vector<16x128xf32>
    %c13 = arith.constant 13 : index
    %c0_143 = arith.constant 0 : index
    %138 = vector.load %arg14[%c13, %c0_143] : memref<48x128xf32, #tpu.memory_space<vmem>>, vector<16x128xf32>
    %c1664 = arith.constant 1664 : index
    %c0_144 = arith.constant 0 : index
    %139 = vector.load %arg9[%c1664, %c0_144] : memref<3456x128xf32, #tpu.memory_space<vmem>>, vector<128x128xf32>
    %cst_145 = arith.constant dense<0.000000e+00> : vector<16x128xf32>
    %140 = tpu.matmul %138, %139, %cst_145 {dimension_numbers = #tpu.dot_dimension_numbers<[1], [0], [0], [1], [0, 0, 1, 1], [], []>} : vector<16x128xf32>, vector<128x128xf32>, vector<16x128xf32> -> vector<16x128xf32>
    %141 = arith.addf %137, %140 : vector<16x128xf32>
    %c14 = arith.constant 14 : index
    %c0_146 = arith.constant 0 : index
    %142 = vector.load %arg14[%c14, %c0_146] : memref<48x128xf32, #tpu.memory_space<vmem>>, vector<16x128xf32>
    %c1792 = arith.constant 1792 : index
    %c0_147 = arith.constant 0 : index
    %143 = vector.load %arg9[%c1792, %c0_147] : memref<3456x128xf32, #tpu.memory_space<vmem>>, vector<128x128xf32>
    %cst_148 = arith.constant dense<0.000000e+00> : vector<16x128xf32>
    %144 = tpu.matmul %142, %143, %cst_148 {dimension_numbers = #tpu.dot_dimension_numbers<[1], [0], [0], [1], [0, 0, 1, 1], [], []>} : vector<16x128xf32>, vector<128x128xf32>, vector<16x128xf32> -> vector<16x128xf32>
    %145 = arith.addf %141, %144 : vector<16x128xf32>
    %c15 = arith.constant 15 : index
    %c0_149 = arith.constant 0 : index
    %146 = vector.load %arg14[%c15, %c0_149] : memref<48x128xf32, #tpu.memory_space<vmem>>, vector<16x128xf32>
    %c1920 = arith.constant 1920 : index
    %c0_150 = arith.constant 0 : index
    %147 = vector.load %arg9[%c1920, %c0_150] : memref<3456x128xf32, #tpu.memory_space<vmem>>, vector<128x128xf32>
    %cst_151 = arith.constant dense<0.000000e+00> : vector<16x128xf32>
    %148 = tpu.matmul %146, %147, %cst_151 {dimension_numbers = #tpu.dot_dimension_numbers<[1], [0], [0], [1], [0, 0, 1, 1], [], []>} : vector<16x128xf32>, vector<128x128xf32>, vector<16x128xf32> -> vector<16x128xf32>
    %149 = arith.addf %145, %148 : vector<16x128xf32>
    %c16_152 = arith.constant 16 : index
    %c0_153 = arith.constant 0 : index
    %150 = vector.load %arg14[%c16_152, %c0_153] : memref<48x128xf32, #tpu.memory_space<vmem>>, vector<16x128xf32>
    %c2048 = arith.constant 2048 : index
    %c0_154 = arith.constant 0 : index
    %151 = vector.load %arg9[%c2048, %c0_154] : memref<3456x128xf32, #tpu.memory_space<vmem>>, vector<128x128xf32>
    %cst_155 = arith.constant dense<0.000000e+00> : vector<16x128xf32>
    %152 = tpu.matmul %150, %151, %cst_155 {dimension_numbers = #tpu.dot_dimension_numbers<[1], [0], [0], [1], [0, 0, 1, 1], [], []>} : vector<16x128xf32>, vector<128x128xf32>, vector<16x128xf32> -> vector<16x128xf32>
    %153 = arith.addf %149, %152 : vector<16x128xf32>
    %c17_156 = arith.constant 17 : index
    %c0_157 = arith.constant 0 : index
    %154 = vector.load %arg14[%c17_156, %c0_157] : memref<48x128xf32, #tpu.memory_space<vmem>>, vector<16x128xf32>
    %c2176 = arith.constant 2176 : index
    %c0_158 = arith.constant 0 : index
    %155 = vector.load %arg9[%c2176, %c0_158] : memref<3456x128xf32, #tpu.memory_space<vmem>>, vector<128x128xf32>
    %cst_159 = arith.constant dense<0.000000e+00> : vector<16x128xf32>
    %156 = tpu.matmul %154, %155, %cst_159 {dimension_numbers = #tpu.dot_dimension_numbers<[1], [0], [0], [1], [0, 0, 1, 1], [], []>} : vector<16x128xf32>, vector<128x128xf32>, vector<16x128xf32> -> vector<16x128xf32>
    %157 = arith.addf %153, %156 : vector<16x128xf32>
    %c18_160 = arith.constant 18 : index
    %c0_161 = arith.constant 0 : index
    %158 = vector.load %arg14[%c18_160, %c0_161] : memref<48x128xf32, #tpu.memory_space<vmem>>, vector<16x128xf32>
    %c2304 = arith.constant 2304 : index
    %c0_162 = arith.constant 0 : index
    %159 = vector.load %arg9[%c2304, %c0_162] : memref<3456x128xf32, #tpu.memory_space<vmem>>, vector<128x128xf32>
    %cst_163 = arith.constant dense<0.000000e+00> : vector<16x128xf32>
    %160 = tpu.matmul %158, %159, %cst_163 {dimension_numbers = #tpu.dot_dimension_numbers<[1], [0], [0], [1], [0, 0, 1, 1], [], []>} : vector<16x128xf32>, vector<128x128xf32>, vector<16x128xf32> -> vector<16x128xf32>
    %161 = arith.addf %157, %160 : vector<16x128xf32>
    %c19 = arith.constant 19 : index
    %c0_164 = arith.constant 0 : index
    %162 = vector.load %arg14[%c19, %c0_164] : memref<48x128xf32, #tpu.memory_space<vmem>>, vector<16x128xf32>
    %c2432 = arith.constant 2432 : index
    %c0_165 = arith.constant 0 : index
    %163 = vector.load %arg9[%c2432, %c0_165] : memref<3456x128xf32, #tpu.memory_space<vmem>>, vector<128x128xf32>
    %cst_166 = arith.constant dense<0.000000e+00> : vector<16x128xf32>
    %164 = tpu.matmul %162, %163, %cst_166 {dimension_numbers = #tpu.dot_dimension_numbers<[1], [0], [0], [1], [0, 0, 1, 1], [], []>} : vector<16x128xf32>, vector<128x128xf32>, vector<16x128xf32> -> vector<16x128xf32>
    %165 = arith.addf %161, %164 : vector<16x128xf32>
    %c20 = arith.constant 20 : index
    %c0_167 = arith.constant 0 : index
    %166 = vector.load %arg14[%c20, %c0_167] : memref<48x128xf32, #tpu.memory_space<vmem>>, vector<16x128xf32>
    %c2560 = arith.constant 2560 : index
    %c0_168 = arith.constant 0 : index
    %167 = vector.load %arg9[%c2560, %c0_168] : memref<3456x128xf32, #tpu.memory_space<vmem>>, vector<128x128xf32>
    %cst_169 = arith.constant dense<0.000000e+00> : vector<16x128xf32>
    %168 = tpu.matmul %166, %167, %cst_169 {dimension_numbers = #tpu.dot_dimension_numbers<[1], [0], [0], [1], [0, 0, 1, 1], [], []>} : vector<16x128xf32>, vector<128x128xf32>, vector<16x128xf32> -> vector<16x128xf32>
    %169 = arith.addf %165, %168 : vector<16x128xf32>
    %c21 = arith.constant 21 : index
    %c0_170 = arith.constant 0 : index
    %170 = vector.load %arg14[%c21, %c0_170] : memref<48x128xf32, #tpu.memory_space<vmem>>, vector<16x128xf32>
    %c2688 = arith.constant 2688 : index
    %c0_171 = arith.constant 0 : index
    %171 = vector.load %arg9[%c2688, %c0_171] : memref<3456x128xf32, #tpu.memory_space<vmem>>, vector<128x128xf32>
    %cst_172 = arith.constant dense<0.000000e+00> : vector<16x128xf32>
    %172 = tpu.matmul %170, %171, %cst_172 {dimension_numbers = #tpu.dot_dimension_numbers<[1], [0], [0], [1], [0, 0, 1, 1], [], []>} : vector<16x128xf32>, vector<128x128xf32>, vector<16x128xf32> -> vector<16x128xf32>
    %173 = arith.addf %169, %172 : vector<16x128xf32>
    %c22 = arith.constant 22 : index
    %c0_173 = arith.constant 0 : index
    %174 = vector.load %arg14[%c22, %c0_173] : memref<48x128xf32, #tpu.memory_space<vmem>>, vector<16x128xf32>
    %c2816 = arith.constant 2816 : index
    %c0_174 = arith.constant 0 : index
    %175 = vector.load %arg9[%c2816, %c0_174] : memref<3456x128xf32, #tpu.memory_space<vmem>>, vector<128x128xf32>
    %cst_175 = arith.constant dense<0.000000e+00> : vector<16x128xf32>
    %176 = tpu.matmul %174, %175, %cst_175 {dimension_numbers = #tpu.dot_dimension_numbers<[1], [0], [0], [1], [0, 0, 1, 1], [], []>} : vector<16x128xf32>, vector<128x128xf32>, vector<16x128xf32> -> vector<16x128xf32>
    %177 = arith.addf %173, %176 : vector<16x128xf32>
    %c23 = arith.constant 23 : index
    %c0_176 = arith.constant 0 : index
    %178 = vector.load %arg14[%c23, %c0_176] : memref<48x128xf32, #tpu.memory_space<vmem>>, vector<16x128xf32>
    %c2944 = arith.constant 2944 : index
    %c0_177 = arith.constant 0 : index
    %179 = vector.load %arg9[%c2944, %c0_177] : memref<3456x128xf32, #tpu.memory_space<vmem>>, vector<128x128xf32>
    %cst_178 = arith.constant dense<0.000000e+00> : vector<16x128xf32>
    %180 = tpu.matmul %178, %179, %cst_178 {dimension_numbers = #tpu.dot_dimension_numbers<[1], [0], [0], [1], [0, 0, 1, 1], [], []>} : vector<16x128xf32>, vector<128x128xf32>, vector<16x128xf32> -> vector<16x128xf32>
    %181 = arith.addf %177, %180 : vector<16x128xf32>
    %c24 = arith.constant 24 : index
    %c0_179 = arith.constant 0 : index
    %182 = vector.load %arg14[%c24, %c0_179] : memref<48x128xf32, #tpu.memory_space<vmem>>, vector<16x128xf32>
    %c3072 = arith.constant 3072 : index
    %c0_180 = arith.constant 0 : index
    %183 = vector.load %arg9[%c3072, %c0_180] : memref<3456x128xf32, #tpu.memory_space<vmem>>, vector<128x128xf32>
    %cst_181 = arith.constant dense<0.000000e+00> : vector<16x128xf32>
    %184 = tpu.matmul %182, %183, %cst_181 {dimension_numbers = #tpu.dot_dimension_numbers<[1], [0], [0], [1], [0, 0, 1, 1], [], []>} : vector<16x128xf32>, vector<128x128xf32>, vector<16x128xf32> -> vector<16x128xf32>
    %185 = arith.addf %181, %184 : vector<16x128xf32>
    %c25 = arith.constant 25 : index
    %c0_182 = arith.constant 0 : index
    %186 = vector.load %arg14[%c25, %c0_182] : memref<48x128xf32, #tpu.memory_space<vmem>>, vector<16x128xf32>
    %c3200 = arith.constant 3200 : index
    %c0_183 = arith.constant 0 : index
    %187 = vector.load %arg9[%c3200, %c0_183] : memref<3456x128xf32, #tpu.memory_space<vmem>>, vector<128x128xf32>
    %cst_184 = arith.constant dense<0.000000e+00> : vector<16x128xf32>
    %188 = tpu.matmul %186, %187, %cst_184 {dimension_numbers = #tpu.dot_dimension_numbers<[1], [0], [0], [1], [0, 0, 1, 1], [], []>} : vector<16x128xf32>, vector<128x128xf32>, vector<16x128xf32> -> vector<16x128xf32>
    %189 = arith.addf %185, %188 : vector<16x128xf32>
    %c26 = arith.constant 26 : index
    %c0_185 = arith.constant 0 : index
    %190 = vector.load %arg14[%c26, %c0_185] : memref<48x128xf32, #tpu.memory_space<vmem>>, vector<16x128xf32>
    %c3328 = arith.constant 3328 : index
    %c0_186 = arith.constant 0 : index
    %191 = vector.load %arg9[%c3328, %c0_186] : memref<3456x128xf32, #tpu.memory_space<vmem>>, vector<128x128xf32>
    %cst_187 = arith.constant dense<0.000000e+00> : vector<16x128xf32>
    %192 = tpu.matmul %190, %191, %cst_187 {dimension_numbers = #tpu.dot_dimension_numbers<[1], [0], [0], [1], [0, 0, 1, 1], [], []>} : vector<16x128xf32>, vector<128x128xf32>, vector<16x128xf32> -> vector<16x128xf32>
    %193 = arith.addf %189, %192 : vector<16x128xf32>
    %c0_188 = arith.constant 0 : index
    %c0_189 = arith.constant 0 : index
    %194 = vector.load %arg10[%c0_188, %c0_189] : memref<1x128xf32, #tpu.memory_space<vmem>>, vector<1x128xf32>
    %195 = vector.broadcast %194 : vector<1x128xf32> to vector<16x128xf32>
    %196 = arith.addf %193, %195 : vector<16x128xf32>
    %c0_190 = arith.constant 0 : index
    %c0_191 = arith.constant 0 : index
    %c0_192 = arith.constant 0 : index
    %197 = vector.load %arg11[%c0_190, %c0_191, %c0_192] : memref<1x16x128xf32, #tpu.memory_space<vmem>>, vector<1x16x128xf32>
    %198 = vector.shape_cast %197 : vector<1x16x128xf32> to vector<16x128xf32>
    %199 = vector.shape_cast %196 : vector<16x128xf32> to vector<1x16x128xf32>
    tpu.vector_store %arg11[%c0_190, %c0_191, %c0_192], %199 {strides = array<i32>} : memref<1x16x128xf32, #tpu.memory_space<vmem>>, vector<1x16x128xf32>,
    return
  }
  func.func @transform_0(%arg0: i32) -> (i32, i32, i32) {
    %c0_i32 = arith.constant 0 : i32
    %c0_i32_0 = arith.constant 0 : i32
    %c0_i32_1 = arith.constant 0 : i32
    return %arg0, %c0_i32, %c0_i32_0 : i32, i32, i32
  }
  func.func @transform_1(%arg0: i32) -> (i32, i32) {
    %c0_i32 = arith.constant 0 : i32
    %c0_i32_0 = arith.constant 0 : i32
    %c0_i32_1 = arith.constant 0 : i32
    return %c0_i32, %c0_i32_0 : i32, i32
  }
  func.func @transform_2(%arg0: i32) -> (i32, i32) {
    %c0_i32 = arith.constant 0 : i32
    %c0_i32_0 = arith.constant 0 : i32
    %c0_i32_1 = arith.constant 0 : i32
    return %c0_i32, %c0_i32_0 : i32, i32
  }
  func.func @transform_3(%arg0: i32) -> (i32, i32) {
    %c0_i32 = arith.constant 0 : i32
    %c0_i32_0 = arith.constant 0 : i32
    %c0_i32_1 = arith.constant 0 : i32
    return %c0_i32, %c0_i32_0 : i32, i32
  }
  func.func @transform_4(%arg0: i32) -> (i32, i32) {
    %c0_i32 = arith.constant 0 : i32
    %c0_i32_0 = arith.constant 0 : i32
    %c0_i32_1 = arith.constant 0 : i32
    return %c0_i32, %c0_i32_0 : i32, i32
  }
  func.func @transform_5(%arg0: i32) -> (i32, i32) {
    %c0_i32 = arith.constant 0 : i32
    %c0_i32_0 = arith.constant 0 : i32
    %c0_i32_1 = arith.constant 0 : i32
    return %c0_i32, %c0_i32_0 : i32, i32
  }
  func.func @transform_6(%arg0: i32) -> (i32, i32) {
    %c0_i32 = arith.constant 0 : i32
    %c0_i32_0 = arith.constant 0 : i32
    %c0_i32_1 = arith.constant 0 : i32
    return %c0_i32, %c0_i32_0 : i32, i32
  }
  func.func @transform_7(%arg0: i32) -> (i32, i32) {
    %c0_i32 = arith.constant 0 : i32
    %c0_i32_0 = arith.constant 0 : i32
    %c0_i32_1 = arith.constant 0 : i32
    return %c0_i32, %c0_i32_0 : i32, i32
  }
  func.func @transform_8(%arg0: i32) -> (i32, i32) {
    %c0_i32 = arith.constant 0 : i32
    %c0_i32_0 = arith.constant 0 : i32
    %c0_i32_1 = arith.constant 0 : i32
    return %c0_i32, %c0_i32_0 : i32, i32
  }
  func.func @transform_9(%arg0: i32) -> (i32, i32) {
    %c0_i32 = arith.constant 0 : i32
    %c0_i32_0 = arith.constant 0 : i32
    %c0_i32_1 = arith.constant 0 : i32
    return %c0_i32, %c0_i32_0 : i32, i32
  }
  func.func @transform_10(%arg0: i32) -> (i32, i32, i32) {
    %c0_i32 = arith.constant 0 : i32
    %c0_i32_0 = arith.constant 0 : i32
    %c0_i32_1 = arith.constant 0 : i32
    return %arg0, %c0_i32, %c0_i32_0 : i32, i32, i32
  }
}

</mosaic_0001>

<bundles_post_ra>
// kernel: forward.1
= control target key start
LH: loop header
LB: loop body
LE: loop exit
PB: predicated region body
PF: predicated region fallthrough
CT: control target
= control target key end

     0   :  { %15 = vsyncpa [#allocation6], 0  ;;  %s15701_s0 = inlined_call_operand.vmem [shape: f32[2,288,128], index: 0, kind: input, shape index: {}]   ;;  %s15702_s1 = inlined_call_operand.hbm [shape: f32[1152,128], index: 1, kind: input, shape index: {}]   ;;  %s15703_s2 = inlined_call_operand.hbm [shape: f32[1,128], index: 2, kind: input, shape index: {}]   ;;  %s15704_s3 = inlined_call_operand.hbm [shape: f32[512,128], index: 3, kind: input, shape index: {}]   ;;  %s15705_s4 = inlined_call_operand.hbm [shape: f32[1,128], index: 4, kind: input, shape index: {}]   ;;  %s15706_s5 = inlined_call_operand.hbm [shape: f32[512,128], index: 5, kind: input, shape index: {}]   ;;  %s15707_s6 = inlined_call_operand.hbm [shape: f32[48,200], index: 6, kind: input, shape index: {}]   ;;  %s15708_s7 = inlined_call_operand.hbm [shape: f32[128,128], index: 7, kind: input, shape index: {}]   ;;  %s15709_s8 = inlined_call_operand.hbm [shape: f32[3456,128], index: 8, kind: input, shape index: {}]   ;;  %s15710_s9 = inlined_call_operand.hbm [shape: f32[1,128], index: 9, kind: input, shape index: {}]   ;;  %s15711_s10 = inlined_call_operand.vmem [shape: f32[2,16,128], index: 10, kind: output, shape index: {}]  }
   0x1   :  { %16 = vsyncpa [#allocation8], 0 }
   0x2   :  { %17 = vsyncpa [#allocation11], 0 }
   0x3   :  { %18 = vsyncpa [#allocation14], 0 }
   0x4   :  { %19 = vsyncpa [#allocation17], 0  ;;  %s12803_s13 = smov 0  }
   0x5 LB: > { %s12733_s14 = smov [#allocation7]   ;;  %s12809_s16 = sadd.s32 4294967295, %s12731_s13   ;;  %s12731_s13 = sphi %s12803_s13, %s25_s13  }
   0x6   : > { %s297_s15 = sshll.u32 %s12733_s14, 4  ;;  %p8223_p0 = scmp.ge.s32.totalorder %s12731_s13, 1  ;;  %s298_s15 = int_to_ptr.vmem [resolvable:$true] %s297_s15 }
   0x7   : > { %p271_p1 = scmp.lt.s32.totalorder %s12731_s13, 3  ;;  %p15712_p2 = scmp.eq.s32.totalorder %s12809_s16, 0 }
   0x8   : > { %s12734_s18 = smov [#allocation10]   ;;  %s12735_s20 = smov [#allocation13]  }
   0x9   : > { %p12814_p3 = pnand %p8223_p0, %p271_p1  ;;  %s321_s19 = sshll.u32 %s12734_s18, 4  ;;  %s322_s19 = int_to_ptr.vmem [resolvable:$true] %s321_s19 }
   0xa   : > { %s344_s21 = sshll.u32 %s12735_s20, 4  ;;  %s12482_s24 = scalar_lea.vmem %s298_s15, 16  ;;  %s12826_s21 = int_to_ptr.vmem [resolvable:$true] %s344_s21 }
   0xb   : > { %s15716_s17 = scalar_select %p12814_p3, 1, 0 }
   0xc   : > { %p12402_p4 = pneg %p12814_p3  ;;  %p12483_p7 = scmp.ne.s32.totalorder %s298_s15, %s12482_s24 }
   0xd   : > { %s12489_s25 = scalar_lea.vmem %s298_s15, 32  ;;  %p12490_p10 = scmp.lt.s32.totalorder %s298_s15, %s298_s15 }
   0xe   : > { %p12822_p5 = pnand %p15712_p2, %p12402_p4  ;;  %p12491_p11 = scmp.lt.s32.totalorder %s12489_s25, %s12482_s24 }
  0x10   : > { %p12830_p6 = pneg %p12822_p5  ;;  %p12492_p12 = por %p12491_p11, %p12490_p10 }
  0x12   : > { %p12485_p8 = pnand %p12483_p7, %p12830_p6 }
  0x14   : > { %p12486_p9 = pneg %p12485_p8 }
  0x16   : > { %p12493_p13 = pnand %p12492_p12, %p12486_p9 }
  0x18   : > { %12496 = shalt.err (!%p12493_p13)
}
  0x19   : > { %12408 = dma.hbm_to_vmem [thread:$0]  (!%p12822_p5), %s15703_s2, 16, %s298_s15, [#allocation8]  }
  0x1a   : > { %s12508_s28 = scalar_lea.vmem %s322_s19, 16  ;;  %s12515_s29 = scalar_lea.vmem %s322_s19, 32 }
  0x1b   : > { %p12509_p0 = scmp.ne.s32.totalorder %s322_s19, %s12508_s28  ;;  %p12516_p7 = scmp.lt.s32.totalorder %s322_s19, %s322_s19 }
  0x1c   : > { %p12517_p8 = scmp.lt.s32.totalorder %s12515_s29, %s12508_s28 }
  0x1d   : > { %p12511_p1 = pnand %p12509_p0, %p12830_p6 }
  0x1e   : > { %p12518_p2 = por %p12517_p8, %p12516_p7 }
  0x1f   : > { %p12512_p4 = pneg %p12511_p1 }
  0x21   : > { %p12519_p3 = pnand %p12518_p2, %p12512_p4 }
  0x23   : > { %12522 = shalt.err (!%p12519_p3)
}
  0x24   : > { %12414 = dma.hbm_to_vmem [thread:$0]  (!%p12822_p5), %s15705_s4, 16, %s322_s19, [#allocation11]  }
  0x25   : > { %s12534_s12 = scalar_lea.vmem %s12826_s21, 1536  ;;  %p12542_p12 = scmp.lt.s32.totalorder %s12826_s21, %s12826_s21 }
  0x26   : > { %p12535_p9 = scmp.ne.s32.totalorder %s12826_s21, %s12534_s12  ;;  %p12543_p13 = scmp.lt.s32.totalorder %s12534_s12, %s12534_s12 }
  0x28   : > { %p12537_p10 = pnand %p12535_p9, %p12830_p6  ;;  %p12544_p2 = por %p12543_p13, %p12542_p12 }
  0x2a   : > { %p12538_p11 = pneg %p12537_p10 }
  0x2c   : > { %p12545_p3 = pnand %p12544_p2, %p12538_p11 }
  0x2e   : > { %12548 = shalt.err (!%p12545_p3)
}
  0x2f   : > { %s12736_s14 = smov 256   ;;  %s12737_s15 = smov 16  }
  0x30   : > { %12420 = dma.hbm_to_vmem [thread:$0]  (!%p12822_p5), %s15707_s6, 1536, %s12826_s21, [#allocation14], %s12736_s14, %s12736_s14, %s12737_s15  }
  0x31   : > { %s12738_s19 = smov [#allocation16]   ;;  %s12739_s25 = smov [#allocation5]  }
  0x32   : > { %s370_s24 = sshll.u32 %s12738_s19, 4  ;;  %s283_s26 = sshll.u32 %s12739_s25, 4  ;;  %s371_s24 = int_to_ptr.vmem [resolvable:$true] %s370_s24  ;;  %s284_s26 = int_to_ptr.vmem [resolvable:$true] %s283_s26 }
  0x33   : > { %s12560_s27 = scalar_lea.vmem %s371_s24, 55296  ;;  %p12568_p7 = scmp.lt.s32.totalorder %s371_s24, %s371_s24 }
  0x34   : > { %p12561_p0 = scmp.ne.s32.totalorder %s371_s24, %s12560_s27  ;;  %p12569_p8 = scmp.lt.s32.totalorder %s12560_s27, %s12560_s27 }
  0x36   : > { %p12563_p1 = pnand %p12561_p0, %p12830_p6  ;;  %p12570_p9 = por %p12569_p8, %p12568_p7 }
  0x38   : > { %p12564_p4 = pneg %p12563_p1 }
  0x3a   : > { %p12571_p10 = pnand %p12570_p9, %p12564_p4 }
  0x3c   : > { %12574 = shalt.err (!%p12571_p10)
}
  0x3d   : > { %s12740_s28 = smov 128   ;;  %s12741_s21 = smov 8  }
  0x3e   : > { %12426 = dma.hbm_to_vmem [thread:$0]  (!%p12822_p5), %s15709_s8, 55296, %s371_s24, [#allocation17], %s12740_s28, %s12740_s28, %s12741_s21  }
  0x3f   : > { %s12586_s11 = scalar_lea.vmem %s284_s26, 18432  ;;  %p12594_p2 = scmp.lt.s32.totalorder %s284_s26, %s284_s26 }
  0x40   : > { %p12587_p11 = scmp.ne.s32.totalorder %s284_s26, %s12586_s11  ;;  %p12595_p3 = scmp.lt.s32.totalorder %s12586_s11, %s12586_s11 }
  0x42   : > { %p12589_p12 = pnand %p12587_p11, %p12830_p6  ;;  %p12596_p0 = por %p12595_p3, %p12594_p2 }
  0x44   : > { %p12590_p13 = pneg %p12589_p12 }
  0x46   : > { %p12597_p1 = pnand %p12596_p0, %p12590_p13 }
  0x48   : > { %12600 = shalt.err (!%p12597_p1)
}
  0x49   : > { %12405 = dma.hbm_to_vmem [thread:$0]  (!%p12822_p5), %s15702_s1, 18432, %s284_s26, [#allocation6], %s12740_s28, %s12740_s28, %s12741_s21  }
  0x4a   : > { %s12742_s15 = smov [#allocation9]   ;;  %s12743_s20 = smov [#allocation12]  }
  0x4b   : > { %s307_s18 = sshll.u32 %s12742_s15, 4  ;;  %s331_s19 = sshll.u32 %s12743_s20, 4  ;;  %s308_s18 = int_to_ptr.vmem [resolvable:$true] %s307_s18  ;;  %s332_s19 = int_to_ptr.vmem [resolvable:$true] %s331_s19 }
  0x4c   : > { %s12612_s24 = scalar_lea.vmem %s308_s18, 8192  ;;  %p12620_p9 = scmp.lt.s32.totalorder %s308_s18, %s308_s18 }
  0x4d   : > { %p12613_p4 = scmp.ne.s32.totalorder %s308_s18, %s12612_s24  ;;  %p12621_p10 = scmp.lt.s32.totalorder %s12612_s24, %s12612_s24 }
  0x4f   : > { %p12615_p7 = pnand %p12613_p4, %p12830_p6  ;;  %p12622_p11 = por %p12621_p10, %p12620_p9 }
  0x51   : > { %p12616_p8 = pneg %p12615_p7 }
  0x53   : > { %p12623_p12 = pnand %p12622_p11, %p12616_p8 }
  0x55   : > { %12626 = shalt.err (!%p12623_p12)
}
  0x56   : > { %12411 = dma.hbm_to_vmem [thread:$0]  (!%p12822_p5), %s15704_s3, 8192, %s308_s18, [#allocation8], %s12740_s28, %s12740_s28, %s12741_s21  }
  0x57   : > { %s12638_s27 = scalar_lea.vmem %s332_s19, 8192  ;;  %p12646_p0 = scmp.lt.s32.totalorder %s332_s19, %s332_s19 }
  0x58   : > { %p12639_p13 = scmp.ne.s32.totalorder %s332_s19, %s12638_s27  ;;  %p12647_p1 = scmp.lt.s32.totalorder %s12638_s27, %s12638_s27 }
  0x5a   : > { %p12641_p2 = pnand %p12639_p13, %p12830_p6  ;;  %p12648_p4 = por %p12647_p1, %p12646_p0 }
  0x5c   : > { %p12642_p3 = pneg %p12641_p2 }
  0x5e   : > { %p12649_p7 = pnand %p12648_p4, %p12642_p3 }
  0x60   : > { %12652 = shalt.err (!%p12649_p7)
}
  0x61   : > { %12417 = dma.hbm_to_vmem [thread:$0]  (!%p12822_p5), %s15706_s5, 8192, %s332_s19, [#allocation11], %s12740_s28, %s12740_s28, %s12741_s21  }
  0x62   : > { %s12744_s11 = smov [#allocation15]   ;;  %s12745_s14 = smov [#allocation18]  }
  0x63   : > { %s357_s12 = sshll.u32 %s12744_s11, 4  ;;  %s384_s15 = sshll.u32 %s12745_s14, 4  ;;  %s358_s12 = int_to_ptr.vmem [resolvable:$true] %s357_s12  ;;  %s385_s15 = int_to_ptr.vmem [resolvable:$true] %s384_s15 }
  0x64   : > { %s12664_s18 = scalar_lea.vmem %s358_s12, 2048  ;;  %p12672_p11 = scmp.lt.s32.totalorder %s358_s12, %s358_s12 }
  0x65   : > { %p12665_p8 = scmp.ne.s32.totalorder %s358_s12, %s12664_s18  ;;  %p12673_p12 = scmp.lt.s32.totalorder %s12664_s18, %s12664_s18 }
  0x67   : > { %p12667_p9 = pnand %p12665_p8, %p12830_p6  ;;  %p12674_p13 = por %p12673_p12, %p12672_p11 }
  0x69   : > { %p12668_p10 = pneg %p12667_p9 }
  0x6b   : > { %p12675_p2 = pnand %p12674_p13, %p12668_p10 }
  0x6d   : > { %12678 = shalt.err (!%p12675_p2)
}
  0x6e   : > { %12423 = dma.hbm_to_vmem [thread:$0]  (!%p12822_p5), %s15708_s7, 2048, %s358_s12, [#allocation14], %s12740_s28, %s12740_s28, %s12741_s21  }
  0x6f   : > { %s12690_s24 = scalar_lea.vmem %s385_s15, 16  ;;  %s12697_s25 = scalar_lea.vmem %s385_s15, 32 }
  0x70   : > { %p12691_p3 = scmp.ne.s32.totalorder %s385_s15, %s12690_s24  ;;  %p12698_p4 = scmp.lt.s32.totalorder %s385_s15, %s385_s15 }
  0x71   : > { %p12699_p7 = scmp.lt.s32.totalorder %s12697_s25, %s12690_s24 }
  0x72   : > { %p12693_p0 = pnand %p12691_p3, %p12830_p6 }
  0x73   : > { %p12700_p8 = por %p12699_p7, %p12698_p4 }
  0x74   : > { %p12694_p1 = pneg %p12693_p0 }
  0x76   : > { %p12701_p9 = pnand %p12700_p8, %p12694_p1 }
  0x78   : > { %12704 = shalt.err (!%p12701_p9)
}
  0x79   : > { %12429 = dma.hbm_to_vmem [thread:$0]  (!%p12822_p5), %s15710_s9, 16, %s385_s15, [#allocation17]  }
  0x7a   : > { %p15719_p10 = scmp.ne.s32.totalorder %s15716_s17, 0 }
  0x7c   : > { %405 = sbr.rel (%p15719_p10) target bundleno = 2715 (0xa9b), region = 60 }
  0x81   : > { %p15720_p11 = scmp.eq.s32.totalorder %s12809_s16, 0 }
  0x83   : > { %12710 = dma.done.wait (%p15720_p11), [#allocation6], 18432   ;;  %p15721_p6 = pmov %p15720_p11 }
  0x85   : > { %12712 = vsyncadd (%p15721_p6), [#allocation6], 4294948864  ;;  %p15722_p12 = pmov %p15721_p6 }
  0x86   : > { %p15723_p13 = pmov %p15721_p6 }
  0x87   : > { %12714 = dma.done.wait (%p15722_p12), [#allocation8], 8208  }
  0x88   : > { %12716 = vsyncadd (%p15723_p13), [#allocation8], 4294959088  ;;  %p15724_p2 = pmov %p15721_p6 }
  0x8a   : > { %12718 = dma.done.wait (%p15724_p2), [#allocation11], 8208   ;;  %p15725_p5 = pmov %p15724_p2 }
  0x8b   : > { %p15726_p3 = pmov %p15724_p2 }
  0x8c   : > { %12720 = vsyncadd (%p15725_p5), [#allocation11], 4294959088 }
  0x8d   : > { %12722 = dma.done.wait (%p15726_p3), [#allocation14], 3584   ;;  %p15727_p0 = pmov %p15724_p2 }
  0x8f   : > { %12724 = vsyncadd (%p15727_p0), [#allocation14], 4294963712  ;;  %p15728_p1 = pmov %p15727_p0 }
  0x90   : > { %p15729_p4 = pmov %p15727_p0 }
  0x91   : > { %12726 = dma.done.wait (%p15728_p1), [#allocation17], 55312  }
  0x92   : > { %12728 = vsyncadd (%p15729_p4), [#allocation17], 4294911984  ;;  %v15714_v0 = vmov 0.0   ;;  %vm12747_vm0 = vmmov 0   ;;  %v578_v1 = vld [vmem:[#allocation5 + $0xf8] sm:$0xff]  ;;  %v577_v3 = vld [vmem:[#allocation5 + $0xf0] sm:$0xff] }
  0x93   : > { %9530 = vmatprep.subr.mxu0 %v15714_v0  ;;  %9655 = vmatprep.subr.mxu1 %v15714_v0  ;;  %v531_v2 = vld [vmem:[#allocation5 + $0x78] sm:$0xff]  ;;  %v530_v4 = vld [vmem:[#allocation5 + $0x70] sm:$0xff]  ;;  %v576_v5 = vld [vmem:[#allocation5 + $0xe8] sm:$0xff]  ;;  %p475_p7 = scmp.lt.s32.totalorder %s12809_s16, 1  ;;  %vm5275_vm1 = vcmask 588800  }
  0x94   : > { %9562 = vmatprep.mubr.msk.f32.mxu0 %vm12747_vm0, %v15714_v0  ;;  %9687 = vmatprep.mubr.msk.f32.mxu1 %vm12747_vm0, %v15714_v0  ;;  %v529_v6 = vld [vmem:[#allocation5 + $0x68] sm:$0xff]  ;;  %v575_v7 = vld [vmem:[#allocation5 + $0xe0] sm:$0xff]  ;;  %v574_v9 = vld [vmem:[#allocation5 + $0xd8] sm:$0xff] }
  0x95   : > { %9531 = vmatpush3.msra.mxu0 %v578_v1  ;;  %9656 = vmatpush3.msra.mxu1 %v531_v2  ;;  %v528_v8 = vld [vmem:[#allocation5 + $0x60] sm:$0xff]  ;;  %v527_v10 = vld [vmem:[#allocation5 + $0x58] sm:$0xff]  ;;  %v573_v11 = vld [vmem:[#allocation5 + $0xd0] sm:$0xff]  ;;  %s15780_s16 = smov (!%p475_p7, %s12809_s16), 1 }
  0x96   : > { %9532 = vmatprep.subr.mxu0 %v15714_v0  ;;  %9657 = vmatprep.subr.mxu1 %v15714_v0  ;;  %v526_v12 = vld [vmem:[#allocation5 + $0x50] sm:$0xff]  ;;  %v572_v13 = vld [vmem:[#allocation5 + $0xc8] sm:$0xff]  ;;  %v571_v15 = vld [vmem:[#allocation5 + $0xc0] sm:$0xff]  ;;  %s12365_s17 = smul.u32 288, %s15780_s16  ;;  %s8258_s21 = sshll.u32 %s15780_s16, 4 }
  0x97   : > { %9533 = vmatpush3.msra.mxu0 %v577_v3  ;;  %9658 = vmatpush3.msra.mxu1 %v530_v4  ;;  %v525_v14 = vld [vmem:[#allocation5 + $0x48] sm:$0xff]  ;;  %v524_v16 = vld [vmem:[#allocation5 + $0x40] sm:$0xff]  ;;  %v570_v17 = vld [vmem:[#allocation5 + $0xb8] sm:$0xff]  ;;  %s484_s11 = scalar_lea.vmem %s15711_s10, %s8258_s21 }
  0x98   : > { %9534 = vmatprep.subr.mxu0 %v15714_v0  ;;  %9659 = vmatprep.subr.mxu1 %v15714_v0  ;;  %v523_v18 = vld [vmem:[#allocation5 + $0x38] sm:$0xff]  ;;  %v569_v19 = vld [vmem:[#allocation5 + $0xb0] sm:$0xff]  ;;  %v568_v21 = vld [vmem:[#allocation5 + $0xa8] sm:$0xff]  ;;  %s12979_s28 = scalar_lea.vmem %s15701_s0, %s12365_s17 }
  0x99   : > { %9535 = vmatpush3.msra.mxu0 %v576_v5  ;;  %9660 = vmatpush3.msra.mxu1 %v529_v6  ;;  %v522_v20 = vld [vmem:[#allocation5 + $0x30] sm:$0xff]  ;;  %v521_v22 = vld [vmem:[#allocation5 + $0x28] sm:$0xff]  ;;  %v567_v23 = vld [vmem:[#allocation5 + $0xa0] sm:$0xff] }
  0x9a   : > { %9536 = vmatprep.subr.mxu0 %v15714_v0  ;;  %9661 = vmatprep.subr.mxu1 %v15714_v0  ;;  %v520_v24 = vld [vmem:[#allocation5 + $0x20] sm:$0xff]  ;;  %v566_v25 = vld [vmem:[#allocation5 + $0x98] sm:$0xff]  ;;  %v565_v27 = vld [vmem:[#allocation5 + $0x90] sm:$0xff] }
  0x9b   : > { %9537 = vmatpush3.msra.mxu0 %v575_v7  ;;  %9662 = vmatpush3.msra.mxu1 %v528_v8  ;;  %v519_v26 = vld [vmem:[#allocation5 + $0x18] sm:$0xff]  ;;  %v518_v28 = vld [vmem:[#allocation5 + $0x10] sm:$0xff]  ;;  %v564_v29 = vld [vmem:[#allocation5 + $0x88] sm:$0xff] }
  0x9c   : > { %9538 = vmatprep.subr.mxu0 %v15714_v0  ;;  %9663 = vmatprep.subr.mxu1 %v15714_v0  ;;  %v517_v30 = vld [vmem:[#allocation5 + $0x8] sm:$0xff]  ;;  %v563_v31 = vld [vmem:[#allocation5 + $0x80] sm:$0xff]  ;;  %v485_v34 = vld [vmem:[%s12979_s28] sm:$0xff] }
  0x9d   : > { %9539 = vmatpush3.msra.mxu0 %v574_v9  ;;  %9664 = vmatpush3.msra.mxu1 %v527_v10  ;;  %v516_v32 = vld [vmem:[#allocation5] sm:$0xff]  ;;  %v1065_v35 = vld [vmem:[#allocation5 + $0x178] sm:$0xff]  ;;  %v1064_v39 = vld [vmem:[#allocation5 + $0x170] sm:$0xff] }
  0x9e   : > { %9540 = vmatprep.subr.mxu0 %v15714_v0  ;;  %9665 = vmatprep.subr.mxu1 %v15714_v0  ;;  %v532_v33 = vld [vmem:[%s12979_s28 + $0x1] sm:$0xff]  ;;  %v533_v37 = vld [vmem:[%s12979_s28 + $0x9] sm:$0xff]  ;;  %v1362_v40 = vld [vmem:[#allocation5 + $0x1f0] sm:$0xff] }
  0x9f   : > { %9541 = vmatpush3.msra.mxu0 %v573_v11  ;;  %9666 = vmatpush3.msra.mxu1 %v526_v12  ;;  %v1363_v36 = vld [vmem:[#allocation5 + $0x1f8] sm:$0xff]  ;;  %v486_v38 = vld [vmem:[%s12979_s28 + $0x8] sm:$0xff]  ;;  %v534_v41 = vld [vmem:[%s12979_s28 + $0x11] sm:$0xff] }
  0xa0   : > { %9542 = vmatprep.subr.mxu0 %v15714_v0  ;;  %9667 = vmatprep.subr.mxu1 %v15714_v0  ;;  %v13001_v42 = vld [vmem:[%s12979_s28 + $0x10] sm:$0xff]  ;;  %v535_v45 = vld [vmem:[%s12979_s28 + $0x19] sm:$0xff]  ;;  %v1062_v47 = vld [vmem:[#allocation5 + $0x160] sm:$0xff] }
  0xa1   : > { %9543 = vmatpush3.msra.mxu0 %v572_v13  ;;  %9668 = vmatpush3.msra.mxu1 %v525_v14  ;;  %v1063_v43 = vld [vmem:[#allocation5 + $0x168] sm:$0xff]  ;;  %v13012_v46 = vld [vmem:[%s12979_s28 + $0x18] sm:$0xff]  ;;  %v1360_v48 = vld [vmem:[#allocation5 + $0x1e0] sm:$0xff] }
  0xa2   : > { %9544 = vmatprep.subr.mxu0 %v15714_v0  ;;  %9669 = vmatprep.subr.mxu1 %v15714_v0  ;;  %v1361_v44 = vld [vmem:[#allocation5 + $0x1e8] sm:$0xff]  ;;  %v536_v49 = vld [vmem:[%s12979_s28 + $0x21] sm:$0xff]  ;;  %v1060_v55 = vld [vmem:[#allocation5 + $0x150] sm:$0xff] }
  0xa3   : > { %9545 = vmatpush3.msra.mxu0 %v571_v15  ;;  %9670 = vmatpush3.msra.mxu1 %v524_v16  ;;  %v13023_v50 = vld [vmem:[%s12979_s28 + $0x20] sm:$0xff]  ;;  %v537_v53 = vld [vmem:[%s12979_s28 + $0x29] sm:$0xff]  ;;  %v1358_v56 = vld [vmem:[#allocation5 + $0x1d0] sm:$0xff] }
  0xa4   : > { %9546 = vmatprep.subr.mxu0 %v15714_v0  ;;  %9671 = vmatprep.subr.mxu1 %v15714_v0  ;;  %v1061_v51 = vld [vmem:[#allocation5 + $0x158] sm:$0xff]  ;;  %v13034_v54 = vld [vmem:[%s12979_s28 + $0x28] sm:$0xff]  ;;  %v538_v57 = vld [vmem:[%s12979_s28 + $0x31] sm:$0xff] }
  0xa5   : > { %9547 = vmatpush3.msra.mxu0 %v570_v17  ;;  %9672 = vmatpush3.msra.mxu1 %v523_v18  ;;  %v1359_v52 = vld [vmem:[#allocation5 + $0x1d8] sm:$0xff]  ;;  %v13045_v58 = vld [vmem:[%s12979_s28 + $0x30] sm:$0xff]  ;;  %v13056_v62 = vld [vmem:[%s12979_s28 + $0x38] sm:$0xff] }
  0xa6   : > { %9548 = vmatprep.subr.mxu0 %v15714_v0  ;;  %9673 = vmatprep.subr.mxu1 %v15714_v0  ;;  %v1059_v59 = vld [vmem:[#allocation5 + $0x148] sm:$0xff]  ;;  %v539_v61 = vld [vmem:[%s12979_s28 + $0x39] sm:$0xff]  ;;  %v1058_v63 = vld [vmem:[#allocation5 + $0x140] sm:$0xff] }
  0xa7   : > { %9549 = vmatpush3.msra.mxu0 %v569_v19  ;;  %9674 = vmatpush3.msra.mxu1 %v522_v20  ;;  %v1357_v60 = vld [vmem:[#allocation5 + $0x1c8] sm:$0xff]  ;;  %v1356_v1 = vld [vmem:[#allocation5 + $0x1c0] sm:$0xff]  ;;  %v13067_v3 = vld [vmem:[%s12979_s28 + $0x40] sm:$0xff] }
  0xa8   : > { %9550 = vmatprep.subr.mxu0 %v15714_v0  ;;  %9675 = vmatprep.subr.mxu1 %v15714_v0  ;;  %v540_v2 = vld [vmem:[%s12979_s28 + $0x41] sm:$0xff]  ;;  %v541_v6 = vld [vmem:[%s12979_s28 + $0x49] sm:$0xff]  ;;  %v1056_v8 = vld [vmem:[#allocation5 + $0x130] sm:$0xff] }
  0xa9   : > { %9551 = vmatpush3.msra.mxu0 %v568_v21  ;;  %9676 = vmatpush3.msra.mxu1 %v521_v22  ;;  %v1057_v4 = vld [vmem:[#allocation5 + $0x138] sm:$0xff]  ;;  %v13078_v7 = vld [vmem:[%s12979_s28 + $0x48] sm:$0xff]  ;;  %v1354_v9 = vld [vmem:[#allocation5 + $0x1b0] sm:$0xff] }
  0xaa   : > { %9552 = vmatprep.subr.mxu0 %v15714_v0  ;;  %9677 = vmatprep.subr.mxu1 %v15714_v0  ;;  %v1355_v5 = vld [vmem:[#allocation5 + $0x1b8] sm:$0xff]  ;;  %v542_v10 = vld [vmem:[%s12979_s28 + $0x51] sm:$0xff]  ;;  %v1054_v16 = vld [vmem:[#allocation5 + $0x120] sm:$0xff] }
  0xab   : > { %9553 = vmatpush3.msra.mxu0 %v567_v23  ;;  %9678 = vmatpush3.msra.mxu1 %v520_v24  ;;  %v13089_v11 = vld [vmem:[%s12979_s28 + $0x50] sm:$0xff]  ;;  %v543_v14 = vld [vmem:[%s12979_s28 + $0x59] sm:$0xff]  ;;  %v1352_v17 = vld [vmem:[#allocation5 + $0x1a0] sm:$0xff] }
  0xac   : > { %9554 = vmatprep.subr.mxu0 %v15714_v0  ;;  %9679 = vmatprep.subr.mxu1 %v15714_v0  ;;  %v1055_v12 = vld [vmem:[#allocation5 + $0x128] sm:$0xff]  ;;  %v13100_v15 = vld [vmem:[%s12979_s28 + $0x58] sm:$0xff]  ;;  %v544_v18 = vld [vmem:[%s12979_s28 + $0x61] sm:$0xff] }
  0xad   : > { %9555 = vmatpush3.msra.mxu0 %v566_v25  ;;  %9680 = vmatpush3.msra.mxu1 %v519_v26  ;;  %v1353_v13 = vld [vmem:[#allocation5 + $0x1a8] sm:$0xff]  ;;  %v13111_v19 = vld [vmem:[%s12979_s28 + $0x60] sm:$0xff]  ;;  %v13122_v23 = vld [vmem:[%s12979_s28 + $0x68] sm:$0xff] }
  0xae   : > { %9556 = vmatprep.subr.mxu0 %v15714_v0  ;;  %9681 = vmatprep.subr.mxu1 %v15714_v0  ;;  %v1053_v20 = vld [vmem:[#allocation5 + $0x118] sm:$0xff]  ;;  %v545_v22 = vld [vmem:[%s12979_s28 + $0x69] sm:$0xff]  ;;  %v1052_v24 = vld [vmem:[#allocation5 + $0x110] sm:$0xff] }
  0xaf   : > { %9557 = vmatpush3.msra.mxu0 %v565_v27  ;;  %9682 = vmatpush3.msra.mxu1 %v518_v28  ;;  %v1351_v21 = vld [vmem:[#allocation5 + $0x198] sm:$0xff]  ;;  %v1350_v25 = vld [vmem:[#allocation5 + $0x190] sm:$0xff]  ;;  %v13133_v27 = vld [vmem:[%s12979_s28 + $0x70] sm:$0xff] }
  0xb0   : > { %9558 = vmatprep.subr.mxu0 %v15714_v0  ;;  %9683 = vmatprep.subr.mxu1 %v15714_v0  ;;  %v546_v26 = vld [vmem:[%s12979_s28 + $0x71] sm:$0xff] }
  0xb1   : > { %9559 = vmatpush3.msra.mxu0 %v564_v29  ;;  %9684 = vmatpush3.msra.mxu1 %v517_v30  ;;  %v1051_v28 = vld [vmem:[#allocation5 + $0x108] sm:$0xff]  ;;  %v547_v30 = vld [vmem:[%s12979_s28 + $0x79] sm:$0xff] }
  0xb2   : > { %9560 = vmatprep.subr.mxu0 %v15714_v0  ;;  %9685 = vmatprep.subr.mxu1 %v15714_v0  ;;  %v1349_v29 = vld [vmem:[#allocation5 + $0x188] sm:$0xff] }
  0xb3   : > { %9561 = vmatpush3.msra.mxu0 %v563_v31  ;;  %9686 = vmatpush3.msra.mxu1 %v516_v32  ;;  %v13144_v31 = vld [vmem:[%s12979_s28 + $0x78] sm:$0xff]  ;;  %v1050_v32 = vld [vmem:[#allocation5 + $0x100] sm:$0xff] }
  0xb4   : > { %9563 = vmatmul.mubr.f32.vlgmr.msra.gmra.mxu0 %v532_v33  ;;  %9688 = vmatmul.mubr.f32.vlgmr.msra.gmra.mxu1 %v485_v34  ;;  %v1348_v33 = vld [vmem:[#allocation5 + $0x180] sm:$0xff] }
  0xb5   : > { %9565 = vmatprep.mubr.msk.f32.mxu0 %vm12747_vm0, %v15714_v0  ;;  %9690 = vmatprep.mubr.msk.f32.mxu1 %vm12747_vm0, %v15714_v0  ;;  %v548_v34 = vld [vmem:[%s12979_s28 + $0x81] sm:$0xff] }
  0xb6   : > { %9780 = vmatprep.subr.mxu0 %v15714_v0  ;;  %9905 = vmatprep.subr.mxu1 %v15714_v0 }
  0xb7   : > { %9781 = vmatpush3.msra.mxu0 %v1065_v35  ;;  %9906 = vmatpush3.msra.mxu1 %v1363_v36  ;;  %v13155_v35 = vld [vmem:[%s12979_s28 + $0x80] sm:$0xff]  ;;  %v549_v36 = vld [vmem:[%s12979_s28 + $0x89] sm:$0xff] }
  0xb8   : > { %9566 = vmatmul.mubr.f32.gmra.mxu0 %v533_v37  ;;  %9691 = vmatmul.mubr.f32.gmra.mxu1 %v486_v38  ;;  %v13166_v37 = vld [vmem:[%s12979_s28 + $0x88] sm:$0xff]  ;;  %v550_v38 = vld [vmem:[%s12979_s28 + $0x91] sm:$0xff] }
  0xb9   : > { %9568 = vmatprep.mubr.msk.f32.mxu0 %vm12747_vm0, %v15714_v0  ;;  %9693 = vmatprep.mubr.msk.f32.mxu1 %vm12747_vm0, %v15714_v0 }
  0xba   : > { %9782 = vmatprep.subr.mxu0 %v15714_v0  ;;  %9907 = vmatprep.subr.mxu1 %v15714_v0 }
  0xbb   : > { %9783 = vmatpush3.msra.mxu0 %v1064_v39  ;;  %9908 = vmatpush3.msra.mxu1 %v1362_v40  ;;  %v13177_v39 = vld [vmem:[%s12979_s28 + $0x90] sm:$0xff]  ;;  %v551_v40 = vld [vmem:[%s12979_s28 + $0x99] sm:$0xff] }
  0xbc   : > { %9569 = vmatmul.mubr.f32.gmra.mxu0 %v534_v41  ;;  %9694 = vmatmul.mubr.f32.gmra.mxu1 %v13001_v42  ;;  %v13186_v41 = vld [vmem:[%s12979_s28 + $0x98] sm:$0xff] }
  0xbd   : > { %9571 = vmatprep.mubr.msk.f32.mxu0 %vm12747_vm0, %v15714_v0  ;;  %9696 = vmatprep.mubr.msk.f32.mxu1 %vm12747_vm0, %v15714_v0 }
  0xbe   : > { %9784 = vmatprep.subr.mxu0 %v15714_v0  ;;  %9909 = vmatprep.subr.mxu1 %v15714_v0 }
  0xbf   : > { %9785 = vmatpush3.msra.mxu0 %v1063_v43  ;;  %9910 = vmatpush3.msra.mxu1 %v1361_v44  ;;  %v552_v43 = vld [vmem:[%s12979_s28 + $0xa1] sm:$0xff] }
  0xc0   : > { %9572 = vmatmul.mubr.f32.gmra.mxu0 %v535_v45  ;;  %9697 = vmatmul.mubr.f32.gmra.mxu1 %v13012_v46  ;;  %v13195_v44 = vld [vmem:[%s12979_s28 + $0xa0] sm:$0xff]  ;;  %v553_v45 = vld [vmem:[%s12979_s28 + $0xa9] sm:$0xff] }
  0xc1   : > { %9574 = vmatprep.mubr.msk.f32.mxu0 %vm12747_vm0, %v15714_v0  ;;  %9699 = vmatprep.mubr.msk.f32.mxu1 %vm12747_vm0, %v15714_v0 }
  0xc2   : > { %9786 = vmatprep.subr.mxu0 %v15714_v0  ;;  %9911 = vmatprep.subr.mxu1 %v15714_v0 }
  0xc3   : > { %9787 = vmatpush3.msra.mxu0 %v1062_v47  ;;  %9912 = vmatpush3.msra.mxu1 %v1360_v48  ;;  %v13204_v47 = vld [vmem:[%s12979_s28 + $0xa8] sm:$0xff]  ;;  %v554_v48 = vld [vmem:[%s12979_s28 + $0xb1] sm:$0xff] }
  0xc4   : > { %9575 = vmatmul.mubr.f32.gmra.mxu0 %v536_v49  ;;  %9700 = vmatmul.mubr.f32.gmra.mxu1 %v13023_v50  ;;  %v13213_v49 = vld [vmem:[%s12979_s28 + $0xb0] sm:$0xff] }
  0xc5   : > { %9577 = vmatprep.mubr.msk.f32.mxu0 %vm12747_vm0, %v15714_v0  ;;  %9702 = vmatprep.mubr.msk.f32.mxu1 %vm12747_vm0, %v15714_v0 }
  0xc6   : > { %9788 = vmatprep.subr.mxu0 %v15714_v0  ;;  %9913 = vmatprep.subr.mxu1 %v15714_v0 }
  0xc7   : > { %9789 = vmatpush3.msra.mxu0 %v1061_v51  ;;  %9914 = vmatpush3.msra.mxu1 %v1359_v52  ;;  %v555_v51 = vld [vmem:[%s12979_s28 + $0xb9] sm:$0xff] }
  0xc8   : > { %9578 = vmatmul.mubr.f32.gmra.mxu0 %v537_v53  ;;  %9703 = vmatmul.mubr.f32.gmra.mxu1 %v13034_v54  ;;  %v13222_v52 = vld [vmem:[%s12979_s28 + $0xb8] sm:$0xff]  ;;  %v556_v53 = vld [vmem:[%s12979_s28 + $0xc1] sm:$0xff] }
  0xc9   : > { %9580 = vmatprep.mubr.msk.f32.mxu0 %vm12747_vm0, %v15714_v0  ;;  %9705 = vmatprep.mubr.msk.f32.mxu1 %vm12747_vm0, %v15714_v0 }
  0xca   : > { %9790 = vmatprep.subr.mxu0 %v15714_v0  ;;  %9915 = vmatprep.subr.mxu1 %v15714_v0 }
  0xcb   : > { %9791 = vmatpush3.msra.mxu0 %v1060_v55  ;;  %9916 = vmatpush3.msra.mxu1 %v1358_v56  ;;  %v13231_v55 = vld [vmem:[%s12979_s28 + $0xc0] sm:$0xff]  ;;  %v557_v56 = vld [vmem:[%s12979_s28 + $0xc9] sm:$0xff] }
  0xcc   : > { %9581 = vmatmul.mubr.f32.gmra.mxu0 %v538_v57  ;;  %9706 = vmatmul.mubr.f32.gmra.mxu1 %v13045_v58  ;;  %v13240_v57 = vld [vmem:[%s12979_s28 + $0xc8] sm:$0xff] }
  0xcd   : > { %9583 = vmatprep.mubr.msk.f32.mxu0 %vm12747_vm0, %v15714_v0  ;;  %9708 = vmatprep.mubr.msk.f32.mxu1 %vm12747_vm0, %v15714_v0 }
  0xce   : > { %9792 = vmatprep.subr.mxu0 %v15714_v0  ;;  %9917 = vmatprep.subr.mxu1 %v15714_v0 }
  0xcf   : > { %9793 = vmatpush3.msra.mxu0 %v1059_v59  ;;  %9918 = vmatpush3.msra.mxu1 %v1357_v60  ;;  %v558_v59 = vld [vmem:[%s12979_s28 + $0xd1] sm:$0xff] }
  0xd0   : > { %9584 = vmatmul.mubr.f32.gmra.mxu0 %v539_v61  ;;  %9709 = vmatmul.mubr.f32.gmra.mxu1 %v13056_v62  ;;  %v13249_v60 = vld [vmem:[%s12979_s28 + $0xd0] sm:$0xff]  ;;  %v559_v61 = vld [vmem:[%s12979_s28 + $0xd9] sm:$0xff] }
  0xd1   : > { %9586 = vmatprep.mubr.msk.f32.mxu0 %vm12747_vm0, %v15714_v0  ;;  %9711 = vmatprep.mubr.msk.f32.mxu1 %vm12747_vm0, %v15714_v0 }
  0xd2   : > { %9794 = vmatprep.subr.mxu0 %v15714_v0  ;;  %9919 = vmatprep.subr.mxu1 %v15714_v0 }
  0xd3   : > { %9795 = vmatpush3.msra.mxu0 %v1058_v63  ;;  %9920 = vmatpush3.msra.mxu1 %v1356_v1  ;;  %v13258_v63 = vld [vmem:[%s12979_s28 + $0xd8] sm:$0xff]  ;;  %v560_v1 = vld [vmem:[%s12979_s28 + $0xe1] sm:$0xff] }
  0xd4   : > { %9587 = vmatmul.mubr.f32.gmra.mxu0 %v540_v2  ;;  %9712 = vmatmul.mubr.f32.gmra.mxu1 %v13067_v3  ;;  %v13267_v2 = vld [vmem:[%s12979_s28 + $0xe0] sm:$0xff] }
  0xd5   : > { %9589 = vmatprep.mubr.msk.f32.mxu0 %vm12747_vm0, %v15714_v0  ;;  %9714 = vmatprep.mubr.msk.f32.mxu1 %vm12747_vm0, %v15714_v0 }
  0xd6   : > { %9796 = vmatprep.subr.mxu0 %v15714_v0  ;;  %9921 = vmatprep.subr.mxu1 %v15714_v0 }
  0xd7   : > { %9797 = vmatpush3.msra.mxu0 %v1057_v4  ;;  %9922 = vmatpush3.msra.mxu1 %v1355_v5  ;;  %v561_v4 = vld [vmem:[%s12979_s28 + $0xe9] sm:$0xff] }
  0xd8   : > { %9590 = vmatmul.mubr.f32.gmra.mxu0 %v541_v6  ;;  %9715 = vmatmul.mubr.f32.gmra.mxu1 %v13078_v7  ;;  %v13276_v5 = vld [vmem:[%s12979_s28 + $0xe8] sm:$0xff]  ;;  %v562_v6 = vld [vmem:[%s12979_s28 + $0xf1] sm:$0xff] }
  0xd9   : > { %9592 = vmatprep.mubr.msk.f32.mxu0 %vm12747_vm0, %v15714_v0  ;;  %9717 = vmatprep.mubr.msk.f32.mxu1 %vm12747_vm0, %v15714_v0 }
  0xda   : > { %9798 = vmatprep.subr.mxu0 %v15714_v0  ;;  %9923 = vmatprep.subr.mxu1 %v15714_v0 }
  0xdb   : > { %9799 = vmatpush3.msra.mxu0 %v1056_v8  ;;  %9924 = vmatpush3.msra.mxu1 %v1354_v9  ;;  %v13285_v8 = vld [vmem:[%s12979_s28 + $0xf0] sm:$0xff]  ;;  %v1019_v9 = vld [vmem:[%s12979_s28 + $0x2] sm:$0xff] }
  0xdc   : > { %9593 = vmatmul.mubr.f32.gmra.mxu0 %v542_v10  ;;  %9718 = vmatmul.mubr.f32.gmra.mxu1 %v13089_v11  ;;  %v1661_v10 = vld [vmem:[#allocation5 + $0x278] sm:$0xff] }
  0xdd   : > { %9595 = vmatprep.mubr.msk.f32.mxu0 %vm12747_vm0, %v15714_v0  ;;  %9720 = vmatprep.mubr.msk.f32.mxu1 %vm12747_vm0, %v15714_v0 }
  0xde   : > { %9800 = vmatprep.subr.mxu0 %v15714_v0  ;;  %9925 = vmatprep.subr.mxu1 %v15714_v0 }
  0xdf   : > { %9801 = vmatpush3.msra.mxu0 %v1055_v12  ;;  %9926 = vmatpush3.msra.mxu1 %v1353_v13  ;;  %v1959_v12 = vld [vmem:[#allocation5 + $0x2f8] sm:$0xff]  ;;  %v1020_v13 = vld [vmem:[%s12979_s28 + $0xa] sm:$0xff] }
  0xe0   : > { %9596 = vmatmul.mubr.f32.gmra.mxu0 %v543_v14  ;;  %9721 = vmatmul.mubr.f32.gmra.mxu1 %v13100_v15  ;;  %v1660_v14 = vld [vmem:[#allocation5 + $0x270] sm:$0xff] }
  0xe1   : > { %9598 = vmatprep.mubr.msk.f32.mxu0 %vm12747_vm0, %v15714_v0  ;;  %9723 = vmatprep.mubr.msk.f32.mxu1 %vm12747_vm0, %v15714_v0 }
  0xe2   : > { %9802 = vmatprep.subr.mxu0 %v15714_v0  ;;  %9927 = vmatprep.subr.mxu1 %v15714_v0 }
  0xe3   : > { %9803 = vmatpush3.msra.mxu0 %v1054_v16  ;;  %9928 = vmatpush3.msra.mxu1 %v1352_v17  ;;  %v1958_v16 = vld [vmem:[#allocation5 + $0x2f0] sm:$0xff]  ;;  %v1659_v17 = vld [vmem:[#allocation5 + $0x268] sm:$0xff] }
  0xe4   : > { %9599 = vmatmul.mubr.f32.gmra.mxu0 %v544_v18  ;;  %9724 = vmatmul.mubr.f32.gmra.mxu1 %v13111_v19  ;;  %v1957_v18 = vld [vmem:[#allocation5 + $0x2e8] sm:$0xff] }
  0xe5   : > { %9601 = vmatprep.mubr.msk.f32.mxu0 %vm12747_vm0, %v15714_v0  ;;  %9726 = vmatprep.mubr.msk.f32.mxu1 %vm12747_vm0, %v15714_v0 }
  0xe6   : > { %9804 = vmatprep.subr.mxu0 %v15714_v0  ;;  %9929 = vmatprep.subr.mxu1 %v15714_v0 }
  0xe7   : > { %9805 = vmatpush3.msra.mxu0 %v1053_v20  ;;  %9930 = vmatpush3.msra.mxu1 %v1351_v21  ;;  %v1658_v20 = vld [vmem:[#allocation5 + $0x260] sm:$0xff] }
  0xe8   : > { %9602 = vmatmul.mubr.f32.gmra.mxu0 %v545_v22  ;;  %9727 = vmatmul.mubr.f32.gmra.mxu1 %v13122_v23  ;;  %v1956_v21 = vld [vmem:[#allocation5 + $0x2e0] sm:$0xff]  ;;  %v1657_v22 = vld [vmem:[#allocation5 + $0x258] sm:$0xff] }
  0xe9   : > { %9604 = vmatprep.mubr.msk.f32.mxu0 %vm12747_vm0, %v15714_v0  ;;  %9729 = vmatprep.mubr.msk.f32.mxu1 %vm12747_vm0, %v15714_v0 }
  0xea   : > { %9806 = vmatprep.subr.mxu0 %v15714_v0  ;;  %9931 = vmatprep.subr.mxu1 %v15714_v0 }
  0xeb   : > { %9807 = vmatpush3.msra.mxu0 %v1052_v24  ;;  %9932 = vmatpush3.msra.mxu1 %v1350_v25  ;;  %v1955_v24 = vld [vmem:[#allocation5 + $0x2d8] sm:$0xff]  ;;  %v1656_v25 = vld [vmem:[#allocation5 + $0x250] sm:$0xff] }
  0xec   : > { %9605 = vmatmul.mubr.f32.gmra.mxu0 %v546_v26  ;;  %9730 = vmatmul.mubr.f32.gmra.mxu1 %v13133_v27  ;;  %v1954_v26 = vld [vmem:[#allocation5 + $0x2d0] sm:$0xff] }
  0xed   : > { %9607 = vmatprep.mubr.msk.f32.mxu0 %vm12747_vm0, %v15714_v0  ;;  %9732 = vmatprep.mubr.msk.f32.mxu1 %vm12747_vm0, %v15714_v0 }
  0xee   : > { %9808 = vmatprep.subr.mxu0 %v15714_v0  ;;  %9933 = vmatprep.subr.mxu1 %v15714_v0 }
  0xef   : > { %9809 = vmatpush3.msra.mxu0 %v1051_v28  ;;  %9934 = vmatpush3.msra.mxu1 %v1349_v29  ;;  %v1655_v28 = vld [vmem:[#allocation5 + $0x248] sm:$0xff] }
  0xf0   : > { %9608 = vmatmul.mubr.f32.gmra.mxu0 %v547_v30  ;;  %9733 = vmatmul.mubr.f32.gmra.mxu1 %v13144_v31  ;;  %v1953_v29 = vld [vmem:[#allocation5 + $0x2c8] sm:$0xff]  ;;  %v1654_v30 = vld [vmem:[#allocation5 + $0x240] sm:$0xff] }
  0xf1   : > { %9610 = vmatprep.mubr.msk.f32.mxu0 %vm12747_vm0, %v15714_v0  ;;  %9735 = vmatprep.mubr.msk.f32.mxu1 %vm12747_vm0, %v15714_v0 }
  0xf2   : > { %9810 = vmatprep.subr.mxu0 %v15714_v0  ;;  %9935 = vmatprep.subr.mxu1 %v15714_v0 }
  0xf3   : > { %9811 = vmatpush3.msra.mxu0 %v1050_v32  ;;  %9936 = vmatpush3.msra.mxu1 %v1348_v33  ;;  %v1952_v32 = vld [vmem:[#allocation5 + $0x2c0] sm:$0xff]  ;;  %v1653_v33 = vld [vmem:[#allocation5 + $0x238] sm:$0xff] }
  0xf4   : > { %9611 = vmatmul.mubr.f32.gmra.mxu0 %v548_v34  ;;  %9736 = vmatmul.mubr.f32.gmra.mxu1 %v13155_v35  ;;  %v1951_v34 = vld [vmem:[#allocation5 + $0x2b8] sm:$0xff] }
  0xf5   : > { %9613 = vmatprep.mubr.msk.f32.mxu0 %vm12747_vm0, %v15714_v0  ;;  %9738 = vmatprep.mubr.msk.f32.mxu1 %vm12747_vm0, %v15714_v0 }
  0xf6   : > { %10030 = vmatprep.subr.mxu0 %v15714_v0  ;;  %10155 = vmatprep.subr.mxu1 %v15714_v0 }
  0xf8   : > { %9614 = vmatmul.mubr.f32.gmra.mxu0 %v549_v36  ;;  %9739 = vmatmul.mubr.f32.gmra.mxu1 %v13166_v37  ;;  %v1652_v36 = vld [vmem:[#allocation5 + $0x230] sm:$0xff] }
  0xf9   : > { %9616 = vmatprep.mubr.msk.f32.mxu0 %vm12747_vm0, %v15714_v0  ;;  %9741 = vmatprep.mubr.msk.f32.mxu1 %vm12747_vm0, %v15714_v0 }
  0xfc   : > { %9617 = vmatmul.mubr.f32.gmra.mxu0 %v550_v38  ;;  %9742 = vmatmul.mubr.f32.gmra.mxu1 %v13177_v39  ;;  %v1950_v38 = vld [vmem:[#allocation5 + $0x2b0] sm:$0xff] }
  0xfd   : > { %9619 = vmatprep.mubr.msk.f32.mxu0 %vm12747_vm0, %v15714_v0  ;;  %9744 = vmatprep.mubr.msk.f32.mxu1 %vm12747_vm0, %v15714_v0 }
 0x100   : > { %9620 = vmatmul.mubr.f32.gmra.mxu0 %v551_v40  ;;  %9745 = vmatmul.mubr.f32.gmra.mxu1 %v13186_v41  ;;  %v1651_v40 = vld [vmem:[#allocation5 + $0x228] sm:$0xff] }
 0x101   : > { %9622 = vmatprep.mubr.msk.f32.mxu0 %vm12747_vm0, %v15714_v0  ;;  %9747 = vmatprep.mubr.msk.f32.mxu1 %vm12747_vm0, %v15714_v0 }
 0x104   : > { %9623 = vmatmul.mubr.f32.gmra.mxu0 %v552_v43  ;;  %9748 = vmatmul.mubr.f32.gmra.mxu1 %v13195_v44  ;;  %v1949_v43 = vld [vmem:[#allocation5 + $0x2a8] sm:$0xff] }
 0x105   : > { %9625 = vmatprep.mubr.msk.f32.mxu0 %vm12747_vm0, %v15714_v0  ;;  %9750 = vmatprep.mubr.msk.f32.mxu1 %vm12747_vm0, %v15714_v0 }
 0x108   : > { %9626 = vmatmul.mubr.f32.gmra.mxu0 %v553_v45  ;;  %9751 = vmatmul.mubr.f32.gmra.mxu1 %v13204_v47  ;;  %v1650_v45 = vld [vmem:[#allocation5 + $0x220] sm:$0xff] }
 0x109   : > { %9628 = vmatprep.mubr.msk.f32.mxu0 %vm12747_vm0, %v15714_v0  ;;  %9753 = vmatprep.mubr.msk.f32.mxu1 %vm12747_vm0, %v15714_v0 }
 0x10c   : > { %9629 = vmatmul.mubr.f32.gmra.mxu0 %v554_v48  ;;  %9754 = vmatmul.mubr.f32.gmra.mxu1 %v13213_v49  ;;  %v1948_v48 = vld [vmem:[#allocation5 + $0x2a0] sm:$0xff] }
 0x10d   : > { %9631 = vmatprep.mubr.msk.f32.mxu0 %vm12747_vm0, %v15714_v0  ;;  %9756 = vmatprep.mubr.msk.f32.mxu1 %vm12747_vm0, %v15714_v0 }
 0x110   : > { %9632 = vmatmul.mubr.f32.gmra.mxu0 %v555_v51  ;;  %9757 = vmatmul.mubr.f32.gmra.mxu1 %v13222_v52  ;;  %v1649_v51 = vld [vmem:[#allocation5 + $0x218] sm:$0xff] }
 0x111   : > { %9634 = vmatprep.mubr.msk.f32.mxu0 %vm12747_vm0, %v15714_v0  ;;  %9759 = vmatprep.mubr.msk.f32.mxu1 %vm12747_vm0, %v15714_v0 }
 0x114   : > { %9635 = vmatmul.mubr.f32.gmra.mxu0 %v556_v53  ;;  %9760 = vmatmul.mubr.f32.gmra.mxu1 %v13231_v55  ;;  %v1947_v53 = vld [vmem:[#allocation5 + $0x298] sm:$0xff] }
 0x115   : > { %9637 = vmatprep.mubr.msk.f32.mxu0 %vm12747_vm0, %v15714_v0  ;;  %9762 = vmatprep.mubr.msk.f32.mxu1 %vm12747_vm0, %v15714_v0 }
 0x118   : > { %9638 = vmatmul.mubr.f32.gmra.mxu0 %v557_v56  ;;  %9763 = vmatmul.mubr.f32.gmra.mxu1 %v13240_v57  ;;  %v1648_v56 = vld [vmem:[#allocation5 + $0x210] sm:$0xff] }
 0x119   : > { %9640 = vmatprep.mubr.msk.f32.mxu0 %vm12747_vm0, %v15714_v0  ;;  %9765 = vmatprep.mubr.msk.f32.mxu1 %vm12747_vm0, %v15714_v0 }
 0x11c   : > { %9641 = vmatmul.mubr.f32.gmra.mxu0 %v558_v59  ;;  %9766 = vmatmul.mubr.f32.gmra.mxu1 %v13249_v60  ;;  %v1946_v59 = vld [vmem:[#allocation5 + $0x290] sm:$0xff] }
 0x11d   : > { %9643 = vmatprep.mubr.msk.f32.mxu0 %vm12747_vm0, %v15714_v0  ;;  %9768 = vmatprep.mubr.msk.f32.mxu1 %vm12747_vm0, %v15714_v0 }
 0x120   : > { %9644 = vmatmul.mubr.f32.gmra.mxu0 %v559_v61  ;;  %9769 = vmatmul.mubr.f32.gmra.mxu1 %v13258_v63  ;;  %v1647_v61 = vld [vmem:[#allocation5 + $0x208] sm:$0xff] }
 0x121   : > { %9646 = vmatprep.mubr.msk.f32.mxu0 %vm12747_vm0, %v15714_v0  ;;  %9771 = vmatprep.mubr.msk.f32.mxu1 %vm12747_vm0, %v15714_v0 }
 0x124   : > { %9647 = vmatmul.mubr.f32.gmra.mxu0 %v560_v1  ;;  %9772 = vmatmul.mubr.f32.gmra.mxu1 %v13267_v2  ;;  %v1945_v1 = vld [vmem:[#allocation5 + $0x288] sm:$0xff] }
 0x125   : > { %9649 = vmatprep.mubr.msk.f32.mxu0 %vm12747_vm0, %v15714_v0  ;;  %9774 = vmatprep.mubr.msk.f32.mxu1 %vm12747_vm0, %v15714_v0 }
 0x128   : > { %9650 = vmatmul.mubr.f32.gmra.mxu0 %v561_v4  ;;  %9775 = vmatmul.mubr.f32.gmra.mxu1 %v13276_v5  ;;  %v1646_v4 = vld [vmem:[#allocation5 + $0x200] sm:$0xff] }
 0x129   : > { %9652 = vmatprep.mubr.msk.f32.mxu0 %vm12747_vm0, %v15714_v0  ;;  %9777 = vmatprep.mubr.msk.f32.mxu1 %vm12747_vm0, %v15714_v0 }
 0x12c   : > { %9653 = vmatmul.mubr.f32.gmra.mxu0 %v562_v6  ;;  %9778 = vmatmul.mubr.f32.gmra.mxu1 %v13285_v8  ;;  %v1944_v6 = vld [vmem:[#allocation5 + $0x280] sm:$0xff] }
 0x12d   : > { %9812 = vmatprep.mubr.msk.f32.mxu0 %vm12747_vm0, %v15714_v0  ;;  %9937 = vmatprep.mubr.msk.f32.mxu1 %vm12747_vm0, %v15714_v0 }
 0x130   : > { %9813 = vmatmul.mubr.f32.vlgmr.msra.gmra.mxu0 %v1019_v9  ;;  %9938 = vmatmul.mubr.f32.vlgmr.msra.gmra.mxu1 %v13001_v42  ;;  %v13305_v42 = vld [vmem:[%s12979_s28 + $0x12] sm:$0xff] }
 0x131   : > { %9815 = vmatprep.mubr.msk.f32.mxu0 %vm12747_vm0, %v15714_v0  ;;  %9940 = vmatprep.mubr.msk.f32.mxu1 %vm12747_vm0, %v15714_v0 }
 0x132   : > { %10031 = vmatpush3.msra.mxu0 %v1661_v10  ;;  %10156 = vmatpush3.msra.mxu1 %v1959_v12 }
 0x133   : > { %10032 = vmatprep.subr.mxu0 %v15714_v0  ;;  %10157 = vmatprep.subr.mxu1 %v15714_v0 }
 0x134   : > { %9816 = vmatmul.mubr.f32.gmra.mxu0 %v1020_v13  ;;  %9941 = vmatmul.mubr.f32.gmra.mxu1 %v13012_v46  ;;  %v13316_v46 = vld [vmem:[%s12979_s28 + $0x1a] sm:$0xff] }
 0x135   : > { %9818 = vmatprep.mubr.msk.f32.mxu0 %vm12747_vm0, %v15714_v0  ;;  %9943 = vmatprep.mubr.msk.f32.mxu1 %vm12747_vm0, %v15714_v0 }
 0x136   : > { %10033 = vmatpush3.msra.mxu0 %v1660_v14  ;;  %10158 = vmatpush3.msra.mxu1 %v1958_v16 }
 0x137   : > { %10034 = vmatprep.subr.mxu0 %v15714_v0  ;;  %10159 = vmatprep.subr.mxu1 %v15714_v0 }
 0x138   : > { %9819 = vmatmul.mubr.f32.gmra.mxu0 %v13305_v42  ;;  %9944 = vmatmul.mubr.f32.gmra.mxu1 %v13023_v50  ;;  %v13327_v50 = vld [vmem:[%s12979_s28 + $0x22] sm:$0xff] }
 0x139   : > { %9821 = vmatprep.mubr.msk.f32.mxu0 %vm12747_vm0, %v15714_v0  ;;  %9946 = vmatprep.mubr.msk.f32.mxu1 %vm12747_vm0, %v15714_v0 }
 0x13a   : > { %10035 = vmatpush3.msra.mxu0 %v1659_v17  ;;  %10160 = vmatpush3.msra.mxu1 %v1957_v18  ;;  %v13492_v18 = vld [vmem:[%s12979_s28 + $0x9a] sm:$0xff] }
 0x13b   : > { %10036 = vmatprep.subr.mxu0 %v15714_v0  ;;  %10161 = vmatprep.subr.mxu1 %v15714_v0 }
 0x13c   : > { %9822 = vmatmul.mubr.f32.gmra.mxu0 %v13316_v46  ;;  %9947 = vmatmul.mubr.f32.gmra.mxu1 %v13034_v54  ;;  %v13338_v54 = vld [vmem:[%s12979_s28 + $0x2a] sm:$0xff] }
 0x13d   : > { %9824 = vmatprep.mubr.msk.f32.mxu0 %vm12747_vm0, %v15714_v0  ;;  %9949 = vmatprep.mubr.msk.f32.mxu1 %vm12747_vm0, %v15714_v0 }
 0x13e   : > { %10037 = vmatpush3.msra.mxu0 %v1658_v20  ;;  %10162 = vmatpush3.msra.mxu1 %v1956_v21 }
 0x13f   : > { %10038 = vmatprep.subr.mxu0 %v15714_v0  ;;  %10163 = vmatprep.subr.mxu1 %v15714_v0 }
 0x140   : > { %9825 = vmatmul.mubr.f32.gmra.mxu0 %v13327_v50  ;;  %9950 = vmatmul.mubr.f32.gmra.mxu1 %v13045_v58  ;;  %v13349_v58 = vld [vmem:[%s12979_s28 + $0x32] sm:$0xff] }
 0x141   : > { %9827 = vmatprep.mubr.msk.f32.mxu0 %vm12747_vm0, %v15714_v0  ;;  %9952 = vmatprep.mubr.msk.f32.mxu1 %vm12747_vm0, %v15714_v0 }
 0x142   : > { %10039 = vmatpush3.msra.mxu0 %v1657_v22  ;;  %10164 = vmatpush3.msra.mxu1 %v1955_v24 }
 0x143   : > { %10040 = vmatprep.subr.mxu0 %v15714_v0  ;;  %10165 = vmatprep.subr.mxu1 %v15714_v0 }
 0x144   : > { %9828 = vmatmul.mubr.f32.gmra.mxu0 %v13338_v54  ;;  %9953 = vmatmul.mubr.f32.gmra.mxu1 %v13056_v62  ;;  %v13360_v62 = vld [vmem:[%s12979_s28 + $0x3a] sm:$0xff] }
 0x145   : > { %9830 = vmatprep.mubr.msk.f32.mxu0 %vm12747_vm0, %v15714_v0  ;;  %9955 = vmatprep.mubr.msk.f32.mxu1 %vm12747_vm0, %v15714_v0 }
 0x146   : > { %10041 = vmatpush3.msra.mxu0 %v1656_v25  ;;  %10166 = vmatpush3.msra.mxu1 %v1954_v26  ;;  %v13503_v25 = vld [vmem:[%s12979_s28 + $0xa2] sm:$0xff] }
 0x147   : > { %10042 = vmatprep.subr.mxu0 %v15714_v0  ;;  %10167 = vmatprep.subr.mxu1 %v15714_v0 }
 0x148   : > { %9831 = vmatmul.mubr.f32.gmra.mxu0 %v13349_v58  ;;  %9956 = vmatmul.mubr.f32.gmra.mxu1 %v13067_v3  ;;  %v13371_v3 = vld [vmem:[%s12979_s28 + $0x42] sm:$0xff] }
 0x149   : > { %9833 = vmatprep.mubr.msk.f32.mxu0 %vm12747_vm0, %v15714_v0  ;;  %9958 = vmatprep.mubr.msk.f32.mxu1 %vm12747_vm0, %v15714_v0 }
 0x14a   : > { %10043 = vmatpush3.msra.mxu0 %v1655_v28  ;;  %10168 = vmatpush3.msra.mxu1 %v1953_v29 }
 0x14b   : > { %10044 = vmatprep.subr.mxu0 %v15714_v0  ;;  %10169 = vmatprep.subr.mxu1 %v15714_v0 }
 0x14c   : > { %9834 = vmatmul.mubr.f32.gmra.mxu0 %v13360_v62  ;;  %9959 = vmatmul.mubr.f32.gmra.mxu1 %v13078_v7  ;;  %v13382_v7 = vld [vmem:[%s12979_s28 + $0x4a] sm:$0xff] }
 0x14d   : > { %9836 = vmatprep.mubr.msk.f32.mxu0 %vm12747_vm0, %v15714_v0  ;;  %9961 = vmatprep.mubr.msk.f32.mxu1 %vm12747_vm0, %v15714_v0 }
 0x14e   : > { %10045 = vmatpush3.msra.mxu0 %v1654_v30  ;;  %10170 = vmatpush3.msra.mxu1 %v1952_v32  ;;  %v13514_v32 = vld [vmem:[%s12979_s28 + $0xaa] sm:$0xff] }
 0x14f   : > { %10046 = vmatprep.subr.mxu0 %v15714_v0  ;;  %10171 = vmatprep.subr.mxu1 %v15714_v0 }
 0x150   : > { %9837 = vmatmul.mubr.f32.gmra.mxu0 %v13371_v3  ;;  %9962 = vmatmul.mubr.f32.gmra.mxu1 %v13089_v11  ;;  %v13393_v11 = vld [vmem:[%s12979_s28 + $0x52] sm:$0xff] }
 0x151   : > { %9839 = vmatprep.mubr.msk.f32.mxu0 %vm12747_vm0, %v15714_v0  ;;  %9964 = vmatprep.mubr.msk.f32.mxu1 %vm12747_vm0, %v15714_v0 }
 0x152   : > { %10047 = vmatpush3.msra.mxu0 %v1653_v33  ;;  %10172 = vmatpush3.msra.mxu1 %v1951_v34 }
 0x153   : > { %10048 = vmatprep.subr.mxu0 %v15714_v0  ;;  %10173 = vmatprep.subr.mxu1 %v15714_v0 }
 0x154   : > { %9840 = vmatmul.mubr.f32.gmra.mxu0 %v13382_v7  ;;  %9965 = vmatmul.mubr.f32.gmra.mxu1 %v13100_v15  ;;  %v13404_v15 = vld [vmem:[%s12979_s28 + $0x5a] sm:$0xff] }
 0x155   : > { %9842 = vmatprep.mubr.msk.f32.mxu0 %vm12747_vm0, %v15714_v0  ;;  %9967 = vmatprep.mubr.msk.f32.mxu1 %vm12747_vm0, %v15714_v0 }
 0x156   : > { %10049 = vmatpush3.msra.mxu0 %v1652_v36  ;;  %10174 = vmatpush3.msra.mxu1 %v1950_v38 }
 0x157   : > { %10050 = vmatprep.subr.mxu0 %v15714_v0  ;;  %10175 = vmatprep.subr.mxu1 %v15714_v0 }
 0x158   : > { %9843 = vmatmul.mubr.f32.gmra.mxu0 %v13393_v11  ;;  %9968 = vmatmul.mubr.f32.gmra.mxu1 %v13111_v19  ;;  %v13415_v19 = vld [vmem:[%s12979_s28 + $0x62] sm:$0xff] }
 0x159   : > { %9845 = vmatprep.mubr.msk.f32.mxu0 %vm12747_vm0, %v15714_v0  ;;  %9970 = vmatprep.mubr.msk.f32.mxu1 %vm12747_vm0, %v15714_v0 }
 0x15a   : > { %10051 = vmatpush3.msra.mxu0 %v1651_v40  ;;  %10176 = vmatpush3.msra.mxu1 %v1949_v43  ;;  %v13525_v40 = vld [vmem:[%s12979_s28 + $0xb2] sm:$0xff] }
 0x15b   : > { %10052 = vmatprep.subr.mxu0 %v15714_v0  ;;  %10177 = vmatprep.subr.mxu1 %v15714_v0 }
 0x15c   : > { %9846 = vmatmul.mubr.f32.gmra.mxu0 %v13404_v15  ;;  %9971 = vmatmul.mubr.f32.gmra.mxu1 %v13122_v23  ;;  %v13426_v23 = vld [vmem:[%s12979_s28 + $0x6a] sm:$0xff] }
 0x15d   : > { %9848 = vmatprep.mubr.msk.f32.mxu0 %vm12747_vm0, %v15714_v0  ;;  %9973 = vmatprep.mubr.msk.f32.mxu1 %vm12747_vm0, %v15714_v0 }
 0x15e   : > { %10053 = vmatpush3.msra.mxu0 %v1650_v45  ;;  %10178 = vmatpush3.msra.mxu1 %v1948_v48 }
 0x15f   : > { %10054 = vmatprep.subr.mxu0 %v15714_v0  ;;  %10179 = vmatprep.subr.mxu1 %v15714_v0 }
 0x160   : > { %9849 = vmatmul.mubr.f32.gmra.mxu0 %v13415_v19  ;;  %9974 = vmatmul.mubr.f32.gmra.mxu1 %v13133_v27  ;;  %v13437_v27 = vld [vmem:[%s12979_s28 + $0x72] sm:$0xff] }
 0x161   : > { %9851 = vmatprep.mubr.msk.f32.mxu0 %vm12747_vm0, %v15714_v0  ;;  %9976 = vmatprep.mubr.msk.f32.mxu1 %vm12747_vm0, %v15714_v0 }
 0x162   : > { %10055 = vmatpush3.msra.mxu0 %v1649_v51  ;;  %10180 = vmatpush3.msra.mxu1 %v1947_v53  ;;  %v13536_v53 = vld [vmem:[%s12979_s28 + $0xba] sm:$0xff] }
 0x163   : > { %10056 = vmatprep.subr.mxu0 %v15714_v0  ;;  %10181 = vmatprep.subr.mxu1 %v15714_v0 }
 0x164   : > { %9852 = vmatmul.mubr.f32.gmra.mxu0 %v13426_v23  ;;  %9977 = vmatmul.mubr.f32.gmra.mxu1 %v13144_v31  ;;  %v13448_v31 = vld [vmem:[%s12979_s28 + $0x7a] sm:$0xff] }
 0x165   : > { %9854 = vmatprep.mubr.msk.f32.mxu0 %vm12747_vm0, %v15714_v0  ;;  %9979 = vmatprep.mubr.msk.f32.mxu1 %vm12747_vm0, %v15714_v0 }
 0x166   : > { %10057 = vmatpush3.msra.mxu0 %v1648_v56  ;;  %10182 = vmatpush3.msra.mxu1 %v1946_v59 }
 0x167   : > { %10058 = vmatprep.subr.mxu0 %v15714_v0  ;;  %10183 = vmatprep.subr.mxu1 %v15714_v0 }
 0x168   : > { %9855 = vmatmul.mubr.f32.gmra.mxu0 %v13437_v27  ;;  %9980 = vmatmul.mubr.f32.gmra.mxu1 %v13155_v35  ;;  %v13459_v35 = vld [vmem:[%s12979_s28 + $0x82] sm:$0xff] }
 0x169   : > { %9857 = vmatprep.mubr.msk.f32.mxu0 %vm12747_vm0, %v15714_v0  ;;  %9982 = vmatprep.mubr.msk.f32.mxu1 %vm12747_vm0, %v15714_v0 }
 0x16a   : > { %10059 = vmatpush3.msra.mxu0 %v1647_v61  ;;  %10184 = vmatpush3.msra.mxu1 %v1945_v1 }
 0x16b   : > { %10060 = vmatprep.subr.mxu0 %v15714_v0  ;;  %10185 = vmatprep.subr.mxu1 %v15714_v0 }
 0x16c   : > { %9858 = vmatmul.mubr.f32.gmra.mxu0 %v13448_v31  ;;  %9983 = vmatmul.mubr.f32.gmra.mxu1 %v13166_v37  ;;  %v13470_v37 = vld [vmem:[%s12979_s28 + $0x8a] sm:$0xff] }
 0x16d   : > { %9860 = vmatprep.mubr.msk.f32.mxu0 %vm12747_vm0, %v15714_v0  ;;  %9985 = vmatprep.mubr.msk.f32.mxu1 %vm12747_vm0, %v15714_v0 }
 0x16e   : > { %10061 = vmatpush3.msra.mxu0 %v1646_v4  ;;  %10186 = vmatpush3.msra.mxu1 %v1944_v6  ;;  %v13547_v4 = vld [vmem:[%s12979_s28 + $0xc2] sm:$0xff] }
 0x16f   : > { %10280 = vmatprep.subr.mxu0 %v15714_v0  ;;  %10405 = vmatprep.subr.mxu1 %v15714_v0 }
 0x170   : > { %9861 = vmatmul.mubr.f32.gmra.mxu0 %v13459_v35  ;;  %9986 = vmatmul.mubr.f32.gmra.mxu1 %v13177_v39  ;;  %v13481_v39 = vld [vmem:[%s12979_s28 + $0x92] sm:$0xff] }
 0x171   : > { %9863 = vmatprep.mubr.msk.f32.mxu0 %vm12747_vm0, %v15714_v0  ;;  %9988 = vmatprep.mubr.msk.f32.mxu1 %vm12747_vm0, %v15714_v0 }
 0x174   : > { %v645_v9 = vpop.f32.mrf.mxu0  ;;  %v865_v10 = vpop.f32.mrf.mxu1  ;;  %9864 = vmatmul.mubr.f32.gmra.mxu0 %v13470_v37  ;;  %9989 = vmatmul.mubr.f32.gmra.mxu1 %v13186_v41 }
 0x175   : > { %v13476_v12 = vadd.f32 %v865_v10, %v645_v9  ;;  %9866 = vmatprep.mubr.msk.f32.mxu0 %vm12747_vm0, %v15714_v0  ;;  %9991 = vmatprep.mubr.msk.f32.mxu1 %vm12747_vm0, %v15714_v0 }
 0x176   : > { %v9564_v13 = vpop.f32.mrf.mxu0  ;;  %v9689_v14 = vpop.f32.mrf.mxu1 }
 0x177   : > { %v13558_v14 = vld [vmem:[%s12979_s28 + $0xca] sm:$0xff] }
 0x178   : > { %v650_v16 = vpop.f32.mrf.mxu0  ;;  %v870_v17 = vpop.f32.mrf.mxu1  ;;  %9867 = vmatmul.mubr.f32.gmra.mxu0 %v13481_v39  ;;  %9992 = vmatmul.mubr.f32.gmra.mxu1 %v13195_v44 }
 0x179   : > { %v13487_v41 = vadd.f32 %v870_v17, %v650_v16  ;;  %9869 = vmatprep.mubr.msk.f32.mxu0 %vm12747_vm0, %v15714_v0  ;;  %9994 = vmatprep.mubr.msk.f32.mxu1 %vm12747_vm0, %v15714_v0 }
 0x17a   : > { %v9567_v20 = vpop.f32.mrf.mxu0  ;;  %v9692_v21 = vpop.f32.mrf.mxu1 }
 0x17c   : > { %v655_v22 = vpop.f32.mrf.mxu0  ;;  %v875_v24 = vpop.f32.mrf.mxu1  ;;  %9870 = vmatmul.mubr.f32.gmra.mxu0 %v13492_v18  ;;  %9995 = vmatmul.mubr.f32.gmra.mxu1 %v13204_v47 }
 0x17d   : > { %v13498_v44 = vadd.f32 %v875_v24, %v655_v22  ;;  %9872 = vmatprep.mubr.msk.f32.mxu0 %vm12747_vm0, %v15714_v0  ;;  %9997 = vmatprep.mubr.msk.f32.mxu1 %vm12747_vm0, %v15714_v0  ;;  %v13569_v22 = vld [vmem:[%s12979_s28 + $0xd2] sm:$0xff] }
 0x17e   : > { %v9570_v26 = vpop.f32.mrf.mxu0  ;;  %v9695_v28 = vpop.f32.mrf.mxu1 }
 0x180   : > { %v660_v29 = vpop.f32.mrf.mxu0  ;;  %v880_v30 = vpop.f32.mrf.mxu1  ;;  %9873 = vmatmul.mubr.f32.gmra.mxu0 %v13503_v25  ;;  %9998 = vmatmul.mubr.f32.gmra.mxu1 %v13213_v49 }
 0x181   : > { %v13509_v47 = vadd.f32 %v880_v30, %v660_v29  ;;  %9875 = vmatprep.mubr.msk.f32.mxu0 %vm12747_vm0, %v15714_v0  ;;  %10000 = vmatprep.mubr.msk.f32.mxu1 %vm12747_vm0, %v15714_v0  ;;  %v13580_v30 = vld [vmem:[%s12979_s28 + $0xda] sm:$0xff] }
 0x182   : > { %v9573_v33 = vpop.f32.mrf.mxu0  ;;  %v9698_v34 = vpop.f32.mrf.mxu1 }
 0x184   : > { %v665_v36 = vpop.f32.mrf.mxu0  ;;  %v885_v38 = vpop.f32.mrf.mxu1  ;;  %9876 = vmatmul.mubr.f32.gmra.mxu0 %v13514_v32  ;;  %10001 = vmatmul.mubr.f32.gmra.mxu1 %v13222_v52 }
 0x185   : > { %v13520_v49 = vadd.f32 %v885_v38, %v665_v36  ;;  %9878 = vmatprep.mubr.msk.f32.mxu0 %vm12747_vm0, %v15714_v0  ;;  %10003 = vmatprep.mubr.msk.f32.mxu1 %vm12747_vm0, %v15714_v0 }
 0x186   : > { %v9576_v43 = vpop.f32.mrf.mxu0  ;;  %v9701_v45 = vpop.f32.mrf.mxu1 }
 0x187   : > { %v13591_v43 = vld [vmem:[%s12979_s28 + $0xe2] sm:$0xff] }
 0x188   : > { %v670_v48 = vpop.f32.mrf.mxu0  ;;  %v890_v51 = vpop.f32.mrf.mxu1  ;;  %9879 = vmatmul.mubr.f32.gmra.mxu0 %v13525_v40  ;;  %10004 = vmatmul.mubr.f32.gmra.mxu1 %v13231_v55 }
 0x189   : > { %v13531_v52 = vadd.f32 %v890_v51, %v670_v48  ;;  %9881 = vmatprep.mubr.msk.f32.mxu0 %vm12747_vm0, %v15714_v0  ;;  %10006 = vmatprep.mubr.msk.f32.mxu1 %vm12747_vm0, %v15714_v0 }
 0x18a   : > { %v9579_v56 = vpop.f32.mrf.mxu0  ;;  %v9704_v59 = vpop.f32.mrf.mxu1 }
 0x18b   : > { %v13602_v59 = vld [vmem:[%s12979_s28 + $0xea] sm:$0xff] }
 0x18c   : > { %v675_v61 = vpop.f32.mrf.mxu0  ;;  %v895_v1 = vpop.f32.mrf.mxu1  ;;  %9882 = vmatmul.mubr.f32.gmra.mxu0 %v13536_v53  ;;  %10007 = vmatmul.mubr.f32.gmra.mxu1 %v13240_v57 }
 0x18d   : > { %v13542_v55 = vadd.f32 %v895_v1, %v675_v61  ;;  %9884 = vmatprep.mubr.msk.f32.mxu0 %vm12747_vm0, %v15714_v0  ;;  %10009 = vmatprep.mubr.msk.f32.mxu1 %vm12747_vm0, %v15714_v0  ;;  %v1346_v61 = vld [vmem:[%s12979_s28 + $0xf8] sm:$0xff] }
 0x18e   : > { %v9582_v6 = vpop.f32.mrf.mxu0  ;;  %v9707_v9 = vpop.f32.mrf.mxu1 }
 0x190   : > { %v680_v10 = vpop.f32.mrf.mxu0  ;;  %v900_v13 = vpop.f32.mrf.mxu1  ;;  %9885 = vmatmul.mubr.f32.gmra.mxu0 %v13547_v4  ;;  %10010 = vmatmul.mubr.f32.gmra.mxu1 %v13249_v60 }
 0x191   : > { %v13553_v57 = vadd.f32 %v900_v13, %v680_v10  ;;  %9887 = vmatprep.mubr.msk.f32.mxu0 %vm12747_vm0, %v15714_v0  ;;  %10012 = vmatprep.mubr.msk.f32.mxu1 %vm12747_vm0, %v15714_v0  ;;  %v13613_v13 = vld [vmem:[%s12979_s28 + $0xf2] sm:$0xff] }
 0x192   : > { %v9585_v16 = vpop.f32.mrf.mxu0  ;;  %v9710_v17 = vpop.f32.mrf.mxu1 }
 0x193   : > { %v1347_v16 = vld [vmem:[%s12979_s28 + $0x100] sm:$0xff] }
 0x194   : > { %v685_v20 = vpop.f32.mrf.mxu0  ;;  %v905_v21 = vpop.f32.mrf.mxu1  ;;  %9888 = vmatmul.mubr.f32.gmra.mxu0 %v13558_v14  ;;  %10013 = vmatmul.mubr.f32.gmra.mxu1 %v13258_v63 }
 0x195   : > { %v13564_v60 = vadd.f32 %v905_v21, %v685_v20  ;;  %9890 = vmatprep.mubr.msk.f32.mxu0 %vm12747_vm0, %v15714_v0  ;;  %10015 = vmatprep.mubr.msk.f32.mxu1 %vm12747_vm0, %v15714_v0 }
 0x196   : > { %v9588_v24 = vpop.f32.mrf.mxu0  ;;  %v9713_v26 = vpop.f32.mrf.mxu1 }
 0x198   : > { %v690_v28 = vpop.f32.mrf.mxu0  ;;  %v910_v29 = vpop.f32.mrf.mxu1  ;;  %9891 = vmatmul.mubr.f32.gmra.mxu0 %v13569_v22  ;;  %10016 = vmatmul.mubr.f32.gmra.mxu1 %v13267_v2 }
 0x199   : > { %v13575_v63 = vadd.f32 %v910_v29, %v690_v28  ;;  %9893 = vmatprep.mubr.msk.f32.mxu0 %vm12747_vm0, %v15714_v0  ;;  %10018 = vmatprep.mubr.msk.f32.mxu1 %vm12747_vm0, %v15714_v0  ;;  %v1615_v28 = vld [vmem:[%s12979_s28 + $0x11] sm:$0xff] }
 0x19a   : > { %v9591_v33 = vpop.f32.mrf.mxu0  ;;  %v9716_v34 = vpop.f32.mrf.mxu1 }
 0x19b   : > { %v2257_v34 = vld [vmem:[#allocation5 + $0x378] sm:$0xff] }
 0x19c   : > { %v695_v36 = vpop.f32.mrf.mxu0  ;;  %v915_v38 = vpop.f32.mrf.mxu1  ;;  %9894 = vmatmul.mubr.f32.gmra.mxu0 %v13580_v30  ;;  %10019 = vmatmul.mubr.f32.gmra.mxu1 %v13276_v5 }
 0x19d   : > { %v13586_v2 = vadd.f32 %v915_v38, %v695_v36  ;;  %9896 = vmatprep.mubr.msk.f32.mxu0 %vm12747_vm0, %v15714_v0  ;;  %10021 = vmatprep.mubr.msk.f32.mxu1 %vm12747_vm0, %v15714_v0  ;;  %v2555_v36 = vld [vmem:[#allocation5 + $0x3f8] sm:$0xff] }
 0x19e   : > { %v9594_v45 = vpop.f32.mrf.mxu0  ;;  %v9719_v48 = vpop.f32.mrf.mxu1 }
 0x1a0   : > { %v700_v51 = vpop.f32.mrf.mxu0  ;;  %v920_v56 = vpop.f32.mrf.mxu1  ;;  %9897 = vmatmul.mubr.f32.gmra.mxu0 %v13591_v43  ;;  %10022 = vmatmul.mubr.f32.gmra.mxu1 %v13285_v8 }
 0x1a1   : > { %v13597_v5 = vadd.f32 %v920_v56, %v700_v51  ;;  %9899 = vmatprep.mubr.msk.f32.mxu0 %vm12747_vm0, %v15714_v0  ;;  %10024 = vmatprep.mubr.msk.f32.mxu1 %vm12747_vm0, %v15714_v0  ;;  %v1616_v51 = vld [vmem:[%s12979_s28 + $0x19] sm:$0xff] }
 0x1a2   : > { %v9597_v1 = vpop.f32.mrf.mxu0  ;;  %v9722_v6 = vpop.f32.mrf.mxu1 }
 0x1a3   : > { %v2256_v1 = vld [vmem:[#allocation5 + $0x370] sm:$0xff] }
 0x1a4   : > { %v705_v9 = vpop.f32.mrf.mxu0  ;;  %v925_v10 = vpop.f32.mrf.mxu1  ;;  %9900 = vmatmul.mubr.f32.gmra.mxu0 %v13602_v59  ;;  %10025 = vmatmul.mubr.f32.gmra.mxu1 %v1346_v61 }
 0x1a5   : > { %v13608_v8 = vadd.f32 %v925_v10, %v705_v9  ;;  %9902 = vmatprep.mubr.msk.f32.mxu0 %vm12747_vm0, %v15714_v0  ;;  %10027 = vmatprep.mubr.msk.f32.mxu1 %vm12747_vm0, %v15714_v0 }
 0x1a6   : > { %v9600_v17 = vpop.f32.mrf.mxu0  ;;  %v9725_v20 = vpop.f32.mrf.mxu1 }
 0x1a8   : > { %v710_v21 = vpop.f32.mrf.mxu0  ;;  %v930_v24 = vpop.f32.mrf.mxu1  ;;  %9903 = vmatmul.mubr.f32.gmra.mxu0 %v13613_v13  ;;  %10028 = vmatmul.mubr.f32.gmra.mxu1 %v1347_v16  ;;  %v13642_v16 = vld [vmem:[%s12979_s28 + $0x21] sm:$0xff] }
 0x1a9   : > { %v13619_v26 = vadd.f32 %v930_v24, %v710_v21  ;;  %10062 = vmatprep.mubr.msk.f32.mxu0 %vm12747_vm0, %v15714_v0  ;;  %10187 = vmatprep.mubr.msk.f32.mxu1 %vm12747_vm0, %v15714_v0  ;;  %v2255_v21 = vld [vmem:[#allocation5 + $0x368] sm:$0xff] }
 0x1aa   : > { %v9603_v29 = vpop.f32.mrf.mxu0  ;;  %v9728_v33 = vpop.f32.mrf.mxu1 }
 0x1ab   : > { %v13655_v33 = vld [vmem:[%s12979_s28 + $0x29] sm:$0xff] }
 0x1ac   : > { %v715_v38 = vpop.f32.mrf.mxu0  ;;  %v935_v45 = vpop.f32.mrf.mxu1  ;;  %10063 = vmatmul.mubr.f32.vlgmr.msra.gmra.mxu0 %v1615_v28  ;;  %10188 = vmatmul.mubr.f32.vlgmr.msra.gmra.mxu1 %v13305_v42  ;;  %v2554_v42 = vld [vmem:[#allocation5 + $0x3f0] sm:$0xff] }
 0x1ad   : > { %v13627_v48 = vadd.f32 %v935_v45, %v715_v38  ;;  %10065 = vmatprep.mubr.msk.f32.mxu0 %vm12747_vm0, %v15714_v0  ;;  %10190 = vmatprep.mubr.msk.f32.mxu1 %vm12747_vm0, %v15714_v0  ;;  %v2254_v38 = vld [vmem:[#allocation5 + $0x360] sm:$0xff] }
 0x1ae   : > { %v9606_v56 = vpop.f32.mrf.mxu0  ;;  %v9731_v61 = vpop.f32.mrf.mxu1  ;;  %10281 = vmatpush3.msra.mxu0 %v2257_v34  ;;  %10406 = vmatpush3.msra.mxu1 %v2555_v36 }
 0x1af   : > { %10282 = vmatprep.subr.mxu0 %v15714_v0  ;;  %10407 = vmatprep.subr.mxu1 %v15714_v0  ;;  %v13668_v61 = vld [vmem:[%s12979_s28 + $0x31] sm:$0xff] }
 0x1b0   : > { %v720_v6 = vpop.f32.mrf.mxu0  ;;  %v940_v9 = vpop.f32.mrf.mxu1  ;;  %10066 = vmatmul.mubr.f32.gmra.mxu0 %v1616_v51  ;;  %10191 = vmatmul.mubr.f32.gmra.mxu1 %v13316_v46  ;;  %v2553_v46 = vld [vmem:[#allocation5 + $0x3e8] sm:$0xff] }
 0x1b1   : > { %v13637_v10 = vadd.f32 %v940_v9, %v720_v6  ;;  %10068 = vmatprep.mubr.msk.f32.mxu0 %vm12747_vm0, %v15714_v0  ;;  %10193 = vmatprep.mubr.msk.f32.mxu1 %vm12747_vm0, %v15714_v0  ;;  %v2253_v6 = vld [vmem:[#allocation5 + $0x358] sm:$0xff] }
 0x1b2   : > { %v9609_v17 = vpop.f32.mrf.mxu0  ;;  %v9734_v20 = vpop.f32.mrf.mxu1  ;;  %10283 = vmatpush3.msra.mxu0 %v2256_v1  ;;  %10408 = vmatpush3.msra.mxu1 %v2554_v42 }
 0x1b3   : > { %10284 = vmatprep.subr.mxu0 %v15714_v0  ;;  %10409 = vmatprep.subr.mxu1 %v15714_v0 }
 0x1b4   : > { %v725_v24 = vpop.f32.mrf.mxu0  ;;  %v945_v28 = vpop.f32.mrf.mxu1  ;;  %10069 = vmatmul.mubr.f32.gmra.mxu0 %v13642_v16  ;;  %10194 = vmatmul.mubr.f32.gmra.mxu1 %v13327_v50  ;;  %v2552_v50 = vld [vmem:[#allocation5 + $0x3e0] sm:$0xff] }
 0x1b5   : > { %v13650_v29 = vadd.f32 %v945_v28, %v725_v24  ;;  %10071 = vmatprep.mubr.msk.f32.mxu0 %vm12747_vm0, %v15714_v0  ;;  %10196 = vmatprep.mubr.msk.f32.mxu1 %vm12747_vm0, %v15714_v0  ;;  %v2252_v28 = vld [vmem:[#allocation5 + $0x350] sm:$0xff] }
 0x1b6   : > { %v9612_v34 = vpop.f32.mrf.mxu0  ;;  %v9737_v36 = vpop.f32.mrf.mxu1  ;;  %10285 = vmatpush3.msra.mxu0 %v2255_v21  ;;  %10410 = vmatpush3.msra.mxu1 %v2553_v46  ;;  %v13681_v21 = vld [vmem:[%s12979_s28 + $0x39] sm:$0xff] }
 0x1b7   : > { %10286 = vmatprep.subr.mxu0 %v15714_v0  ;;  %10411 = vmatprep.subr.mxu1 %v15714_v0 }
 0x1b8   : > { %v730_v45 = vpop.f32.mrf.mxu0  ;;  %v950_v51 = vpop.f32.mrf.mxu1  ;;  %10072 = vmatmul.mubr.f32.gmra.mxu0 %v13655_v33  ;;  %10197 = vmatmul.mubr.f32.gmra.mxu1 %v13338_v54  ;;  %v2551_v54 = vld [vmem:[#allocation5 + $0x3d8] sm:$0xff] }
 0x1b9   : > { %v13663_v56 = vadd.f32 %v950_v51, %v730_v45  ;;  %10074 = vmatprep.mubr.msk.f32.mxu0 %vm12747_vm0, %v15714_v0  ;;  %10199 = vmatprep.mubr.msk.f32.mxu1 %vm12747_vm0, %v15714_v0 }
 0x1ba   : > { %v9615_v1 = vpop.f32.mrf.mxu0  ;;  %v9740_v42 = vpop.f32.mrf.mxu1  ;;  %10287 = vmatpush3.msra.mxu0 %v2254_v38  ;;  %10412 = vmatpush3.msra.mxu1 %v2552_v50  ;;  %v13694_v50 = vld [vmem:[%s12979_s28 + $0x41] sm:$0xff] }
 0x1bb   : > { %10288 = vmatprep.subr.mxu0 %v15714_v0  ;;  %10413 = vmatprep.subr.mxu1 %v15714_v0  ;;  %v2251_v1 = vld [vmem:[#allocation5 + $0x348] sm:$0xff] }
 0x1bc   : > { %v735_v9 = vpop.f32.mrf.mxu0  ;;  %v955_v17 = vpop.f32.mrf.mxu1  ;;  %10075 = vmatmul.mubr.f32.gmra.mxu0 %v13668_v61  ;;  %10200 = vmatmul.mubr.f32.gmra.mxu1 %v13349_v58  ;;  %v2550_v58 = vld [vmem:[#allocation5 + $0x3d0] sm:$0xff] }
 0x1bd   : > { %v13676_v20 = vadd.f32 %v955_v17, %v735_v9  ;;  %10077 = vmatprep.mubr.msk.f32.mxu0 %vm12747_vm0, %v15714_v0  ;;  %10202 = vmatprep.mubr.msk.f32.mxu1 %vm12747_vm0, %v15714_v0  ;;  %v13707_v9 = vld [vmem:[%s12979_s28 + $0x49] sm:$0xff] }
 0x1be   : > { %v9618_v46 = vpop.f32.mrf.mxu0  ;;  %v9743_v24 = vpop.f32.mrf.mxu1  ;;  %10289 = vmatpush3.msra.mxu0 %v2253_v6  ;;  %10414 = vmatpush3.msra.mxu1 %v2551_v54 }
 0x1bf   : > { %10290 = vmatprep.subr.mxu0 %v15714_v0  ;;  %10415 = vmatprep.subr.mxu1 %v15714_v0  ;;  %v2250_v24 = vld [vmem:[#allocation5 + $0x340] sm:$0xff] }
 0x1c0   : > { %v740_v34 = vpop.f32.mrf.mxu0  ;;  %v960_v36 = vpop.f32.mrf.mxu1  ;;  %10078 = vmatmul.mubr.f32.gmra.mxu0 %v13681_v21  ;;  %10203 = vmatmul.mubr.f32.gmra.mxu1 %v13360_v62  ;;  %v2549_v62 = vld [vmem:[#allocation5 + $0x3c8] sm:$0xff] }
 0x1c1   : > { %v13689_v38 = vadd.f32 %v960_v36, %v740_v34  ;;  %10080 = vmatprep.mubr.msk.f32.mxu0 %vm12747_vm0, %v15714_v0  ;;  %10205 = vmatprep.mubr.msk.f32.mxu1 %vm12747_vm0, %v15714_v0  ;;  %v13720_v36 = vld [vmem:[%s12979_s28 + $0x51] sm:$0xff] }
 0x1c2   : > { %v9621_v45 = vpop.f32.mrf.mxu0  ;;  %v9746_v51 = vpop.f32.mrf.mxu1  ;;  %10291 = vmatpush3.msra.mxu0 %v2252_v28  ;;  %10416 = vmatpush3.msra.mxu1 %v2550_v58 }
 0x1c3   : > { %10292 = vmatprep.subr.mxu0 %v15714_v0  ;;  %10417 = vmatprep.subr.mxu1 %v15714_v0 }
 0x1c4   : > { %v745_v42 = vpop.f32.mrf.mxu0  ;;  %v965_v6 = vpop.f32.mrf.mxu1  ;;  %10081 = vmatmul.mubr.f32.gmra.mxu0 %v13694_v50  ;;  %10206 = vmatmul.mubr.f32.gmra.mxu1 %v13371_v3  ;;  %v2548_v3 = vld [vmem:[#allocation5 + $0x3c0] sm:$0xff] }
 0x1c5   : > { %v13702_v54 = vadd.f32 %v965_v6, %v745_v42  ;;  %10083 = vmatprep.mubr.msk.f32.mxu0 %vm12747_vm0, %v15714_v0  ;;  %10208 = vmatprep.mubr.msk.f32.mxu1 %vm12747_vm0, %v15714_v0 }
 0x1c6   : > { %v9624_v17 = vpop.f32.mrf.mxu0  ;;  %v9749_v46 = vpop.f32.mrf.mxu1  ;;  %10293 = vmatpush3.msra.mxu0 %v2251_v1  ;;  %10418 = vmatpush3.msra.mxu1 %v2549_v62  ;;  %v2249_v1 = vld [vmem:[#allocation5 + $0x338] sm:$0xff] }
 0x1c7   : > { %10294 = vmatprep.subr.mxu0 %v15714_v0  ;;  %10419 = vmatprep.subr.mxu1 %v15714_v0  ;;  %v13733_v17 = vld [vmem:[%s12979_s28 + $0x59] sm:$0xff] }
 0x1c8   : > { %v750_v28 = vpop.f32.mrf.mxu0  ;;  %v970_v58 = vpop.f32.mrf.mxu1  ;;  %10084 = vmatmul.mubr.f32.gmra.mxu0 %v13707_v9  ;;  %10209 = vmatmul.mubr.f32.gmra.mxu1 %v13382_v7  ;;  %v2547_v7 = vld [vmem:[#allocation5 + $0x3b8] sm:$0xff] }
 0x1c9   : > { %v13715_v34 = vadd.f32 %v970_v58, %v750_v28  ;;  %10086 = vmatprep.mubr.msk.f32.mxu0 %vm12747_vm0, %v15714_v0  ;;  %10211 = vmatprep.mubr.msk.f32.mxu1 %vm12747_vm0, %v15714_v0 }
 0x1ca   : > { %v9627_v45 = vpop.f32.mrf.mxu0  ;;  %v9752_v51 = vpop.f32.mrf.mxu1  ;;  %10295 = vmatpush3.msra.mxu0 %v2250_v24  ;;  %10420 = vmatpush3.msra.mxu1 %v2548_v3  ;;  %v2248_v3 = vld [vmem:[#allocation5 + $0x330] sm:$0xff] }
 0x1cb   : > { %10296 = vmatprep.subr.mxu0 %v15714_v0  ;;  %10421 = vmatprep.subr.mxu1 %v15714_v0  ;;  %v13746_v51 = vld [vmem:[%s12979_s28 + $0x61] sm:$0xff] }
 0x1cc   : > { %v755_v62 = vpop.f32.mrf.mxu0  ;;  %v975_v42 = vpop.f32.mrf.mxu1  ;;  %10087 = vmatmul.mubr.f32.gmra.mxu0 %v13720_v36  ;;  %10212 = vmatmul.mubr.f32.gmra.mxu1 %v13393_v11  ;;  %v2546_v11 = vld [vmem:[#allocation5 + $0x3b0] sm:$0xff] }
 0x1cd   : > { %v13728_v6 = vadd.f32 %v975_v42, %v755_v62  ;;  %10089 = vmatprep.mubr.msk.f32.mxu0 %vm12747_vm0, %v15714_v0  ;;  %10214 = vmatprep.mubr.msk.f32.mxu1 %vm12747_vm0, %v15714_v0  ;;  %v2247_v62 = vld [vmem:[#allocation5 + $0x328] sm:$0xff] }
 0x1ce   : > { %v9630_v46 = vpop.f32.mrf.mxu0  ;;  %v9755_v24 = vpop.f32.mrf.mxu1  ;;  %10297 = vmatpush3.msra.mxu0 %v2249_v1  ;;  %10422 = vmatpush3.msra.mxu1 %v2547_v7 }
 0x1cf   : > { %10298 = vmatprep.subr.mxu0 %v15714_v0  ;;  %10423 = vmatprep.subr.mxu1 %v15714_v0 }
 0x1d0   : > { %v760_v28 = vpop.f32.mrf.mxu0  ;;  %v980_v58 = vpop.f32.mrf.mxu1  ;;  %10090 = vmatmul.mubr.f32.gmra.mxu0 %v13733_v17  ;;  %10215 = vmatmul.mubr.f32.gmra.mxu1 %v13404_v15  ;;  %v2545_v15 = vld [vmem:[#allocation5 + $0x3a8] sm:$0xff] }
 0x1d1   : > { %v13741_v45 = vadd.f32 %v980_v58, %v760_v28  ;;  %10092 = vmatprep.mubr.msk.f32.mxu0 %vm12747_vm0, %v15714_v0  ;;  %10217 = vmatprep.mubr.msk.f32.mxu1 %vm12747_vm0, %v15714_v0  ;;  %v13759_v28 = vld [vmem:[%s12979_s28 + $0x69] sm:$0xff] }
 0x1d2   : > { %v9633_v1 = vpop.f32.mrf.mxu0  ;;  %v9758_v7 = vpop.f32.mrf.mxu1  ;;  %10299 = vmatpush3.msra.mxu0 %v2248_v3  ;;  %10424 = vmatpush3.msra.mxu1 %v2546_v11  ;;  %v2246_v58 = vld [vmem:[#allocation5 + $0x320] sm:$0xff] }
 0x1d3   : > { %10300 = vmatprep.subr.mxu0 %v15714_v0  ;;  %10425 = vmatprep.subr.mxu1 %v15714_v0 }
 0x1d4   : > { %v765_v42 = vpop.f32.mrf.mxu0  ;;  %v985_v46 = vpop.f32.mrf.mxu1  ;;  %10093 = vmatmul.mubr.f32.gmra.mxu0 %v13746_v51  ;;  %10218 = vmatmul.mubr.f32.gmra.mxu1 %v13415_v19  ;;  %v2544_v19 = vld [vmem:[#allocation5 + $0x3a0] sm:$0xff] }
 0x1d5   : > { %v13754_v24 = vadd.f32 %v985_v46, %v765_v42  ;;  %10095 = vmatprep.mubr.msk.f32.mxu0 %vm12747_vm0, %v15714_v0  ;;  %10220 = vmatprep.mubr.msk.f32.mxu1 %vm12747_vm0, %v15714_v0  ;;  %v13772_v46 = vld [vmem:[%s12979_s28 + $0x71] sm:$0xff] }
 0x1d6   : > { %v9636_v3 = vpop.f32.mrf.mxu0  ;;  %v9761_v11 = vpop.f32.mrf.mxu1  ;;  %10301 = vmatpush3.msra.mxu0 %v2247_v62  ;;  %10426 = vmatpush3.msra.mxu1 %v2545_v15 }
 0x1d7   : > { %10302 = vmatprep.subr.mxu0 %v15714_v0  ;;  %10427 = vmatprep.subr.mxu1 %v15714_v0  ;;  %v2245_v3 = vld [vmem:[#allocation5 + $0x318] sm:$0xff] }
 0x1d8   : > { %v770_v1 = vpop.f32.mrf.mxu0  ;;  %v990_v7 = vpop.f32.mrf.mxu1  ;;  %10096 = vmatmul.mubr.f32.gmra.mxu0 %v13759_v28  ;;  %10221 = vmatmul.mubr.f32.gmra.mxu1 %v13426_v23  ;;  %v2543_v23 = vld [vmem:[#allocation5 + $0x398] sm:$0xff] }
 0x1d9   : > { %v13767_v42 = vadd.f32 %v990_v7, %v770_v1  ;;  %10098 = vmatprep.mubr.msk.f32.mxu0 %vm12747_vm0, %v15714_v0  ;;  %10223 = vmatprep.mubr.msk.f32.mxu1 %vm12747_vm0, %v15714_v0 }
 0x1da   : > { %v9639_v62 = vpop.f32.mrf.mxu0  ;;  %v9764_v15 = vpop.f32.mrf.mxu1  ;;  %10303 = vmatpush3.msra.mxu0 %v2246_v58  ;;  %10428 = vmatpush3.msra.mxu1 %v2544_v19 }
 0x1db   : > { %10304 = vmatprep.subr.mxu0 %v15714_v0  ;;  %10429 = vmatprep.subr.mxu1 %v15714_v0  ;;  %v13785_v62 = vld [vmem:[%s12979_s28 + $0x79] sm:$0xff] }
 0x1dc   : > { %v775_v11 = vpop.f32.mrf.mxu0  ;;  %v995_v1 = vpop.f32.mrf.mxu1  ;;  %10099 = vmatmul.mubr.f32.gmra.mxu0 %v13772_v46  ;;  %10224 = vmatmul.mubr.f32.gmra.mxu1 %v13437_v27  ;;  %v2244_v15 = vld [vmem:[#allocation5 + $0x310] sm:$0xff] }
 0x1dd   : > { %v13780_v7 = vadd.f32 %v995_v1, %v775_v11  ;;  %10101 = vmatprep.mubr.msk.f32.mxu0 %vm12747_vm0, %v15714_v0  ;;  %10226 = vmatprep.mubr.msk.f32.mxu1 %vm12747_vm0, %v15714_v0  ;;  %v2542_v27 = vld [vmem:[#allocation5 + $0x390] sm:$0xff] }
 0x1de   : > { %v9642_v58 = vpop.f32.mrf.mxu0  ;;  %v9767_v19 = vpop.f32.mrf.mxu1  ;;  %10305 = vmatpush3.msra.mxu0 %v2245_v3  ;;  %10430 = vmatpush3.msra.mxu1 %v2543_v23 }
 0x1df   : > { %15730 = vst [vmem:[#allocation24_spill] sm:$0xff] %v13780_v7  ;;  %10306 = vmatprep.subr.mxu0 %v15714_v0  ;;  %10431 = vmatprep.subr.mxu1 %v15714_v0  ;;  %v13798_v58 = vld [vmem:[%s12979_s28 + $0x81] sm:$0xff]  ;;  %v2243_v19 = vld [vmem:[#allocation5 + $0x308] sm:$0xff] }
 0x1e0   : > { %v780_v11 = vpop.f32.mrf.mxu0  ;;  %v1000_v1 = vpop.f32.mrf.mxu1  ;;  %10102 = vmatmul.mubr.f32.gmra.mxu0 %v13785_v62  ;;  %10227 = vmatmul.mubr.f32.gmra.mxu1 %v13448_v31  ;;  %v2541_v31 = vld [vmem:[#allocation5 + $0x388] sm:$0xff] }
 0x1e1   : > { %v13793_v7 = vadd.f32 %v1000_v1, %v780_v11  ;;  %10104 = vmatprep.mubr.msk.f32.mxu0 %vm12747_vm0, %v15714_v0  ;;  %10229 = vmatprep.mubr.msk.f32.mxu1 %vm12747_vm0, %v15714_v0 }
 0x1e2   : > { %v9645_v3 = vpop.f32.mrf.mxu0  ;;  %v9770_v23 = vpop.f32.mrf.mxu1  ;;  %10307 = vmatpush3.msra.mxu0 %v2244_v15  ;;  %10432 = vmatpush3.msra.mxu1 %v2542_v27 }
 0x1e3   : > { %15731 = vst [vmem:[#allocation25_spill] sm:$0xff] %v13793_v7  ;;  %10308 = vmatprep.subr.mxu0 %v15714_v0  ;;  %10433 = vmatprep.subr.mxu1 %v15714_v0  ;;  %v13811_v3 = vld [vmem:[%s12979_s28 + $0x89] sm:$0xff] }
 0x1e4   : > { %v785_v11 = vpop.f32.mrf.mxu0  ;;  %v1005_v1 = vpop.f32.mrf.mxu1  ;;  %10105 = vmatmul.mubr.f32.gmra.mxu0 %v13798_v58  ;;  %10230 = vmatmul.mubr.f32.gmra.mxu1 %v13459_v35  ;;  %v2242_v23 = vld [vmem:[#allocation5 + $0x300] sm:$0xff] }
 0x1e5   : > { %v13806_v7 = vadd.f32 %v1005_v1, %v785_v11  ;;  %10107 = vmatprep.mubr.msk.f32.mxu0 %vm12747_vm0, %v15714_v0  ;;  %10232 = vmatprep.mubr.msk.f32.mxu1 %vm12747_vm0, %v15714_v0  ;;  %v2540_v35 = vld [vmem:[#allocation5 + $0x380] sm:$0xff] }
 0x1e6   : > { %v9648_v15 = vpop.f32.mrf.mxu0  ;;  %v9773_v27 = vpop.f32.mrf.mxu1  ;;  %10309 = vmatpush3.msra.mxu0 %v2243_v19  ;;  %10434 = vmatpush3.msra.mxu1 %v2541_v31  ;;  %v13824_v19 = vld [vmem:[%s12979_s28 + $0x91] sm:$0xff] }
 0x1e7   : > { %15732 = vst [vmem:[#allocation26_spill] sm:$0xff] %v13806_v7  ;;  %10310 = vmatprep.subr.mxu0 %v15714_v0  ;;  %10435 = vmatprep.subr.mxu1 %v15714_v0 }
 0x1e8   : > { %v790_v11 = vpop.f32.mrf.mxu0  ;;  %v1010_v1 = vpop.f32.mrf.mxu1  ;;  %10108 = vmatmul.mubr.f32.gmra.mxu0 %v13811_v3  ;;  %10233 = vmatmul.mubr.f32.gmra.mxu1 %v13470_v37 }
 0x1e9   : > { %v13819_v7 = vadd.f32 %v1010_v1, %v790_v11  ;;  %10110 = vmatprep.mubr.msk.f32.mxu0 %vm12747_vm0, %v15714_v0  ;;  %10235 = vmatprep.mubr.msk.f32.mxu1 %vm12747_vm0, %v15714_v0  ;;  %v13836_v1 = vld [vmem:[%s12979_s28 + $0x99] sm:$0xff] }
 0x1ea   : > { %v9651_v31 = vpop.f32.mrf.mxu0  ;;  %v9776_v15 = vpop.f32.mrf.mxu1  ;;  %10311 = vmatpush3.msra.mxu0 %v2242_v23  ;;  %10436 = vmatpush3.msra.mxu1 %v2540_v35 }
 0x1eb   : > { %15733 = vst [vmem:[#allocation27_spill] sm:$0xff] %v13819_v7  ;;  %10530 = vmatprep.subr.mxu0 %v15714_v0 }
 0x1ec   : > { %v795_v27 = vpop.f32.mrf.mxu0  ;;  %v1015_v37 = vpop.f32.mrf.mxu1  ;;  %10111 = vmatmul.mubr.f32.gmra.mxu0 %v13824_v19  ;;  %10236 = vmatmul.mubr.f32.gmra.mxu1 %v13481_v39 }
 0x1ed   : > { %v13831_v11 = vadd.f32 %v1015_v37, %v795_v27  ;;  %10113 = vmatprep.mubr.msk.f32.mxu0 %vm12747_vm0, %v15714_v0  ;;  %10238 = vmatprep.mubr.msk.f32.mxu1 %vm12747_vm0, %v15714_v0  ;;  %v13846_v27 = vld [vmem:[%s12979_s28 + $0xa1] sm:$0xff] }
 0x1ee   : > { %v9654_v23 = vpop.f32.mrf.mxu0  ;;  %v9779_v35 = vpop.f32.mrf.mxu1 }
 0x1ef   : > { %15734 = vst [vmem:[#allocation28_spill] sm:$0xff] %v13831_v11 }
 0x1f0   : > { %v1132_v31 = vpop.f32.mrf.mxu0  ;;  %10114 = vmatmul.mubr.f32.gmra.mxu0 %v13836_v1  ;;  %v1430_v15 = vpop.f32.mrf.mxu1  ;;  %10239 = vmatmul.mubr.f32.gmra.mxu1 %v13492_v18  ;;  %v13858_v18 = vld [vmem:[%s12979_s28 + $0xa9] sm:$0xff] }
 0x1f1   : > { %v1286_v39 = vadd.f32 %v1132_v31, %v13476_v12  ;;  %10116 = vmatprep.mubr.msk.f32.mxu0 %vm12747_vm0, %v15714_v0  ;;  %10241 = vmatprep.mubr.msk.f32.mxu1 %vm12747_vm0, %v15714_v0 }
 0x1f2   : > { %v9814_v37 = vpop.f32.mrf.mxu0  ;;  %v9939_v23 = vpop.f32.mrf.mxu1 }
 0x1f3   : > { %v13850_v35 = vadd.f32 %v1430_v15, %v1286_v39 }
 0x1f4   : > { %v1137_v11 = vpop.f32.mrf.mxu0  ;;  %10117 = vmatmul.mubr.f32.gmra.mxu0 %v13846_v27  ;;  %v1435_v7 = vpop.f32.mrf.mxu1  ;;  %10242 = vmatmul.mubr.f32.gmra.mxu1 %v13503_v25  ;;  %v13870_v25 = vld [vmem:[%s12979_s28 + $0xb1] sm:$0xff] }
 0x1f5   : > { %v1287_v12 = vadd.f32 %v1137_v11, %v13487_v41  ;;  %10119 = vmatprep.mubr.msk.f32.mxu0 %vm12747_vm0, %v15714_v0  ;;  %10244 = vmatprep.mubr.msk.f32.mxu1 %vm12747_vm0, %v15714_v0 }
 0x1f6   : > { %v9817_v31 = vpop.f32.mrf.mxu0  ;;  %v9942_v15 = vpop.f32.mrf.mxu1 }
 0x1f7   : > { %v13862_v39 = vadd.f32 %v1435_v7, %v1287_v12 }
 0x1f8   : > { %v1142_v37 = vpop.f32.mrf.mxu0  ;;  %10120 = vmatmul.mubr.f32.gmra.mxu0 %v13858_v18  ;;  %v1440_v23 = vpop.f32.mrf.mxu1  ;;  %10245 = vmatmul.mubr.f32.gmra.mxu1 %v13514_v32  ;;  %v13882_v32 = vld [vmem:[%s12979_s28 + $0xb9] sm:$0xff] }
 0x1f9   : > { %v1288_v41 = vadd.f32 %v1142_v37, %v13498_v44  ;;  %10122 = vmatprep.mubr.msk.f32.mxu0 %vm12747_vm0, %v15714_v0  ;;  %10247 = vmatprep.mubr.msk.f32.mxu1 %vm12747_vm0, %v15714_v0 }
 0x1fa   : > { %v9820_v11 = vpop.f32.mrf.mxu0  ;;  %v9945_v7 = vpop.f32.mrf.mxu1 }
 0x1fb   : > { %v13874_v12 = vadd.f32 %v1440_v23, %v1288_v41 }
 0x1fc   : > { %v1147_v31 = vpop.f32.mrf.mxu0  ;;  %10123 = vmatmul.mubr.f32.gmra.mxu0 %v13870_v25  ;;  %v1445_v15 = vpop.f32.mrf.mxu1  ;;  %10248 = vmatmul.mubr.f32.gmra.mxu1 %v13525_v40  ;;  %v13894_v40 = vld [vmem:[%s12979_s28 + $0xc1] sm:$0xff] }
 0x1fd   : > { %v1289_v44 = vadd.f32 %v1147_v31, %v13509_v47  ;;  %10125 = vmatprep.mubr.msk.f32.mxu0 %vm12747_vm0, %v15714_v0  ;;  %10250 = vmatprep.mubr.msk.f32.mxu1 %vm12747_vm0, %v15714_v0 }
 0x1fe   : > { %v9823_v37 = vpop.f32.mrf.mxu0  ;;  %v9948_v23 = vpop.f32.mrf.mxu1 }
 0x1ff   : > { %v13886_v41 = vadd.f32 %v1445_v15, %v1289_v44 }
 0x200   : > { %v1152_v11 = vpop.f32.mrf.mxu0  ;;  %10126 = vmatmul.mubr.f32.gmra.mxu0 %v13882_v32  ;;  %v1450_v7 = vpop.f32.mrf.mxu1  ;;  %10251 = vmatmul.mubr.f32.gmra.mxu1 %v13536_v53  ;;  %v13906_v53 = vld [vmem:[%s12979_s28 + $0xc9] sm:$0xff] }
 0x201   : > { %v1290_v47 = vadd.f32 %v1152_v11, %v13520_v49  ;;  %10128 = vmatprep.mubr.msk.f32.mxu0 %vm12747_vm0, %v15714_v0  ;;  %10253 = vmatprep.mubr.msk.f32.mxu1 %vm12747_vm0, %v15714_v0 }
 0x202   : > { %v9826_v31 = vpop.f32.mrf.mxu0  ;;  %v9951_v15 = vpop.f32.mrf.mxu1 }
 0x203   : > { %v13898_v44 = vadd.f32 %v1450_v7, %v1290_v47 }
 0x204   : > { %v1157_v37 = vpop.f32.mrf.mxu0  ;;  %10129 = vmatmul.mubr.f32.gmra.mxu0 %v13894_v40  ;;  %v1455_v23 = vpop.f32.mrf.mxu1  ;;  %10254 = vmatmul.mubr.f32.gmra.mxu1 %v13547_v4  ;;  %v13918_v4 = vld [vmem:[%s12979_s28 + $0xd1] sm:$0xff] }
 0x205   : > { %v1291_v49 = vadd.f32 %v1157_v37, %v13531_v52  ;;  %10131 = vmatprep.mubr.msk.f32.mxu0 %vm12747_vm0, %v15714_v0  ;;  %10256 = vmatprep.mubr.msk.f32.mxu1 %vm12747_vm0, %v15714_v0 }
 0x206   : > { %v9829_v11 = vpop.f32.mrf.mxu0  ;;  %v9954_v7 = vpop.f32.mrf.mxu1 }
 0x207   : > { %v13910_v47 = vadd.f32 %v1455_v23, %v1291_v49 }
 0x208   : > { %v1162_v31 = vpop.f32.mrf.mxu0  ;;  %10132 = vmatmul.mubr.f32.gmra.mxu0 %v13906_v53  ;;  %v1460_v15 = vpop.f32.mrf.mxu1  ;;  %10257 = vmatmul.mubr.f32.gmra.mxu1 %v13558_v14  ;;  %v13930_v14 = vld [vmem:[%s12979_s28 + $0xd9] sm:$0xff] }
 0x209   : > { %v1292_v52 = vadd.f32 %v1162_v31, %v13542_v55  ;;  %10134 = vmatprep.mubr.msk.f32.mxu0 %vm12747_vm0, %v15714_v0  ;;  %10259 = vmatprep.mubr.msk.f32.mxu1 %vm12747_vm0, %v15714_v0 }
 0x20a   : > { %v9832_v37 = vpop.f32.mrf.mxu0  ;;  %v9957_v23 = vpop.f32.mrf.mxu1 }
 0x20b   : > { %v13922_v49 = vadd.f32 %v1460_v15, %v1292_v52 }
 0x20c   : > { %v1167_v11 = vpop.f32.mrf.mxu0  ;;  %10135 = vmatmul.mubr.f32.gmra.mxu0 %v13918_v4  ;;  %v1465_v7 = vpop.f32.mrf.mxu1  ;;  %10260 = vmatmul.mubr.f32.gmra.mxu1 %v13569_v22  ;;  %v13942_v22 = vld [vmem:[%s12979_s28 + $0xe1] sm:$0xff] }
 0x20d   : > { %v1293_v55 = vadd.f32 %v1167_v11, %v13553_v57  ;;  %10137 = vmatprep.mubr.msk.f32.mxu0 %vm12747_vm0, %v15714_v0  ;;  %10262 = vmatprep.mubr.msk.f32.mxu1 %vm12747_vm0, %v15714_v0 }
 0x20e   : > { %v9835_v31 = vpop.f32.mrf.mxu0  ;;  %v9960_v15 = vpop.f32.mrf.mxu1 }
 0x20f   : > { %v13934_v52 = vadd.f32 %v1465_v7, %v1293_v55 }
 0x210   : > { %v1172_v37 = vpop.f32.mrf.mxu0  ;;  %10138 = vmatmul.mubr.f32.gmra.mxu0 %v13930_v14  ;;  %v1470_v23 = vpop.f32.mrf.mxu1  ;;  %10263 = vmatmul.mubr.f32.gmra.mxu1 %v13580_v30  ;;  %v13954_v30 = vld [vmem:[%s12979_s28 + $0xe9] sm:$0xff] }
 0x211   : > { %v1294_v57 = vadd.f32 %v1172_v37, %v13564_v60  ;;  %10140 = vmatprep.mubr.msk.f32.mxu0 %vm12747_vm0, %v15714_v0  ;;  %10265 = vmatprep.mubr.msk.f32.mxu1 %vm12747_vm0, %v15714_v0 }
 0x212   : > { %v9838_v11 = vpop.f32.mrf.mxu0  ;;  %v9963_v7 = vpop.f32.mrf.mxu1 }
 0x213   : > { %v13946_v55 = vadd.f32 %v1470_v23, %v1294_v57 }
 0x214   : > { %v1177_v31 = vpop.f32.mrf.mxu0  ;;  %10141 = vmatmul.mubr.f32.gmra.mxu0 %v13942_v22  ;;  %v1475_v15 = vpop.f32.mrf.mxu1  ;;  %10266 = vmatmul.mubr.f32.gmra.mxu1 %v13591_v43  ;;  %v13966_v43 = vld [vmem:[%s12979_s28 + $0xf1] sm:$0xff] }
 0x215   : > { %v1295_v60 = vadd.f32 %v1177_v31, %v13575_v63  ;;  %10143 = vmatprep.mubr.msk.f32.mxu0 %vm12747_vm0, %v15714_v0  ;;  %10268 = vmatprep.mubr.msk.f32.mxu1 %vm12747_vm0, %v15714_v0 }
 0x216   : > { %v9841_v37 = vpop.f32.mrf.mxu0  ;;  %v9966_v23 = vpop.f32.mrf.mxu1 }
 0x217   : > { %v13958_v57 = vadd.f32 %v1475_v15, %v1295_v60 }
 0x218   : > { %v1182_v11 = vpop.f32.mrf.mxu0  ;;  %10144 = vmatmul.mubr.f32.gmra.mxu0 %v13954_v30  ;;  %v1480_v7 = vpop.f32.mrf.mxu1  ;;  %10269 = vmatmul.mubr.f32.gmra.mxu1 %v13602_v59  ;;  %v13978_v59 = vld [vmem:[%s12979_s28 + $0xf9] sm:$0xff] }
 0x219   : > { %v1296_v63 = vadd.f32 %v1182_v11, %v13586_v2  ;;  %10146 = vmatprep.mubr.msk.f32.mxu0 %vm12747_vm0, %v15714_v0  ;;  %10271 = vmatprep.mubr.msk.f32.mxu1 %vm12747_vm0, %v15714_v0  ;;  %v1942_v11 = vld [vmem:[%s12979_s28 + $0xfa] sm:$0xff] }
 0x21a   : > { %v9844_v31 = vpop.f32.mrf.mxu0  ;;  %v9969_v15 = vpop.f32.mrf.mxu1 }
 0x21b   : > { %v13970_v60 = vadd.f32 %v1480_v7, %v1296_v63 }
 0x21c   : > { %v1187_v37 = vpop.f32.mrf.mxu0  ;;  %10147 = vmatmul.mubr.f32.gmra.mxu0 %v13966_v43  ;;  %v1485_v23 = vpop.f32.mrf.mxu1  ;;  %10272 = vmatmul.mubr.f32.gmra.mxu1 %v13613_v13 }
 0x21d   : > { %15735 = vst [vmem:[#allocation29_spill] sm:$0xff] %v13970_v60  ;;  %v1297_v2 = vadd.f32 %v1187_v37, %v13597_v5  ;;  %10149 = vmatprep.mubr.msk.f32.mxu0 %vm12747_vm0, %v15714_v0  ;;  %10274 = vmatprep.mubr.msk.f32.mxu1 %vm12747_vm0, %v15714_v0  ;;  %v13990_v37 = vld [vmem:[%s12979_s28 + $0x101] sm:$0xff] }
 0x21e   : > { %v9847_v7 = vpop.f32.mrf.mxu0  ;;  %v9972_v63 = vpop.f32.mrf.mxu1 }
 0x21f   : > { %v13983_v31 = vadd.f32 %v1485_v23, %v1297_v2  ;;  %v1943_v7 = vld [vmem:[%s12979_s28 + $0x102] sm:$0xff] }
 0x220   : > { %v1192_v15 = vpop.f32.mrf.mxu0  ;;  %10150 = vmatmul.mubr.f32.gmra.mxu0 %v13978_v59  ;;  %v1490_v13 = vpop.f32.mrf.mxu1  ;;  %10275 = vmatmul.mubr.f32.gmra.mxu1 %v1942_v11  ;;  %v2211_v11 = vld [vmem:[%s12979_s28 + $0x20] sm:$0xff] }
 0x221   : > { %15736 = vst [vmem:[#allocation30_spill] sm:$0xff] %v13983_v31  ;;  %v1298_v5 = vadd.f32 %v1192_v15, %v13608_v8  ;;  %10152 = vmatprep.mubr.msk.f32.mxu0 %vm12747_vm0, %v15714_v0  ;;  %10277 = vmatprep.mubr.msk.f32.mxu1 %vm12747_vm0, %v15714_v0 }
 0x222   : > { %v9850_v63 = vpop.f32.mrf.mxu0  ;;  %v9975_v23 = vpop.f32.mrf.mxu1 }
 0x223   : > { %v13995_v2 = vadd.f32 %v1490_v13, %v1298_v5  ;;  %v2853_v13 = vld [vmem:[#allocation5 + $0x478] sm:$0xff] }
 0x224   : > { %v1197_v31 = vpop.f32.mrf.mxu0  ;;  %10153 = vmatmul.mubr.f32.gmra.mxu0 %v13990_v37  ;;  %v1495_v60 = vpop.f32.mrf.mxu1  ;;  %10278 = vmatmul.mubr.f32.gmra.mxu1 %v1943_v7 }
 0x225   : > { %15737 = vst [vmem:[#allocation31_spill] sm:$0xff] %v13995_v2  ;;  %v1299_v8 = vadd.f32 %v1197_v31, %v13619_v26  ;;  %10312 = vmatprep.mubr.msk.f32.mxu0 %vm12747_vm0, %v15714_v0  ;;  %10437 = vmatprep.mubr.msk.f32.mxu1 %vm12747_vm0, %v15714_v0  ;;  %v2212_v26 = vld [vmem:[%s12979_s28 + $0x28] sm:$0xff] }
 0x226   : > { %v9853_v15 = vpop.f32.mrf.mxu0  ;;  %v9978_v63 = vpop.f32.mrf.mxu1 }
 0x227   : > { %v14004_v23 = vadd.f32 %v1495_v60, %v1299_v8  ;;  %v2852_v8 = vld [vmem:[#allocation5 + $0x470] sm:$0xff]  ;;  %v2213_v63 = vld [vmem:[%s12979_s28 + $0x30] sm:$0xff] }
 0x228   : > { %v1202_v5 = vpop.f32.mrf.mxu0  ;;  %10313 = vmatmul.mubr.f32.vlgmr.msra.gmra.mxu0 %v2211_v11  ;;  %v1500_v2 = vpop.f32.mrf.mxu1  ;;  %10438 = vmatmul.mubr.f32.vlgmr.msra.gmra.mxu1 %v13642_v16 }
 0x229   : > { %v1300_v7 = vadd.f32 %v1202_v5, %v13627_v48  ;;  %10315 = vmatprep.mubr.msk.f32.mxu0 %vm12747_vm0, %v15714_v0  ;;  %10440 = vmatprep.mubr.msk.f32.mxu1 %vm12747_vm0, %v15714_v0 }
 0x22a   : > { %v9856_v31 = vpop.f32.mrf.mxu0  ;;  %v9981_v15 = vpop.f32.mrf.mxu1  ;;  %10531 = vmatpush3.msra.mxu0 %v2853_v13 }
 0x22b   : > { %v14013_v60 = vadd.f32 %v1500_v2, %v1300_v7  ;;  %10532 = vmatprep.subr.mxu0 %v15714_v0  ;;  %v2851_v7 = vld [vmem:[#allocation5 + $0x468] sm:$0xff]  ;;  %v2214_v31 = vld [vmem:[%s12979_s28 + $0x38] sm:$0xff] }
 0x22c   : > { %v1207_v11 = vpop.f32.mrf.mxu0  ;;  %10316 = vmatmul.mubr.f32.gmra.mxu0 %v2212_v26  ;;  %v1505_v16 = vpop.f32.mrf.mxu1  ;;  %10441 = vmatmul.mubr.f32.gmra.mxu1 %v13655_v33 }
 0x22d   : > { %v1301_v48 = vadd.f32 %v1207_v11, %v13637_v10  ;;  %10318 = vmatprep.mubr.msk.f32.mxu0 %vm12747_vm0, %v15714_v0  ;;  %10443 = vmatprep.mubr.msk.f32.mxu1 %vm12747_vm0, %v15714_v0 }
 0x22e   : > { %v9859_v2 = vpop.f32.mrf.mxu0  ;;  %v9984_v13 = vpop.f32.mrf.mxu1  ;;  %10533 = vmatpush3.msra.mxu0 %v2852_v8 }
 0x22f   : > { %v14023_v5 = vadd.f32 %v1505_v16, %v1301_v48  ;;  %10534 = vmatprep.subr.mxu0 %v15714_v0  ;;  %v2850_v16 = vld [vmem:[#allocation5 + $0x460] sm:$0xff] }
 0x230   : > { %v1212_v26 = vpop.f32.mrf.mxu0  ;;  %10319 = vmatmul.mubr.f32.gmra.mxu0 %v2213_v63  ;;  %v1510_v33 = vpop.f32.mrf.mxu1  ;;  %10444 = vmatmul.mubr.f32.gmra.mxu1 %v13668_v61  ;;  %v2215_v63 = vld [vmem:[%s12979_s28 + $0x40] sm:$0xff] }
 0x231   : > { %v1302_v10 = vadd.f32 %v1212_v26, %v13650_v29  ;;  %10321 = vmatprep.mubr.msk.f32.mxu0 %vm12747_vm0, %v15714_v0  ;;  %10446 = vmatprep.mubr.msk.f32.mxu1 %vm12747_vm0, %v15714_v0  ;;  %v2849_v26 = vld [vmem:[#allocation5 + $0x458] sm:$0xff] }
 0x232   : > { %v9862_v15 = vpop.f32.mrf.mxu0  ;;  %v9987_v8 = vpop.f32.mrf.mxu1  ;;  %10535 = vmatpush3.msra.mxu0 %v2851_v7 }
 0x233   : > { %v14033_v11 = vadd.f32 %v1510_v33, %v1302_v10  ;;  %10536 = vmatprep.subr.mxu0 %v15714_v0  ;;  %v2216_v10 = vld [vmem:[%s12979_s28 + $0x48] sm:$0xff] }
 0x234   : > { %v1217_v48 = vpop.f32.mrf.mxu0  ;;  %10322 = vmatmul.mubr.f32.gmra.mxu0 %v2214_v31  ;;  %v1515_v61 = vpop.f32.mrf.mxu1  ;;  %10447 = vmatmul.mubr.f32.gmra.mxu1 %v13681_v21 }
 0x235   : > { %v1303_v29 = vadd.f32 %v1217_v48, %v13663_v56  ;;  %10324 = vmatprep.mubr.msk.f32.mxu0 %vm12747_vm0, %v15714_v0  ;;  %10449 = vmatprep.mubr.msk.f32.mxu1 %vm12747_vm0, %v15714_v0 }
 0x236   : > { %v9865_v2 = vpop.f32.mrf.mxu0  ;;  %v9990_v13 = vpop.f32.mrf.mxu1  ;;  %10537 = vmatpush3.msra.mxu0 %v2850_v16  ;;  %v2848_v16 = vld [vmem:[#allocation5 + $0x450] sm:$0xff] }
 0x237   : > { %v14043_v7 = vadd.f32 %v1515_v61, %v1303_v29  ;;  %10538 = vmatprep.subr.mxu0 %v15714_v0  ;;  %v2217_v61 = vld [vmem:[%s12979_s28 + $0x50] sm:$0xff] }
 0x238   : > { %v1222_v33 = vpop.f32.mrf.mxu0  ;;  %10325 = vmatmul.mubr.f32.gmra.mxu0 %v2215_v63  ;;  %v1520_v21 = vpop.f32.mrf.mxu1  ;;  %10450 = vmatmul.mubr.f32.gmra.mxu1 %v13694_v50  ;;  %v2847_v13 = vld [vmem:[#allocation5 + $0x448] sm:$0xff] }
 0x239   : > { %v1304_v56 = vadd.f32 %v1222_v33, %v13676_v20  ;;  %10327 = vmatprep.mubr.msk.f32.mxu0 %vm12747_vm0, %v15714_v0  ;;  %10452 = vmatprep.mubr.msk.f32.mxu1 %vm12747_vm0, %v15714_v0  ;;  %v2218_v33 = vld [vmem:[%s12979_s28 + $0x58] sm:$0xff] }
 0x23a   : > { %v9868_v31 = vpop.f32.mrf.mxu0  ;;  %v9993_v15 = vpop.f32.mrf.mxu1  ;;  %10539 = vmatpush3.msra.mxu0 %v2849_v26 }
 0x23b   : > { %v14053_v8 = vadd.f32 %v1520_v21, %v1304_v56  ;;  %10540 = vmatprep.subr.mxu0 %v15714_v0  ;;  %v2846_v31 = vld [vmem:[#allocation5 + $0x440] sm:$0xff] }
 0x23c   : > { %v1227_v48 = vpop.f32.mrf.mxu0  ;;  %10328 = vmatmul.mubr.f32.gmra.mxu0 %v2216_v10  ;;  %v1525_v50 = vpop.f32.mrf.mxu1  ;;  %10453 = vmatmul.mubr.f32.gmra.mxu1 %v13707_v9 }
 0x23d   : > { %v1305_v20 = vadd.f32 %v1227_v48, %v13689_v38  ;;  %10330 = vmatprep.mubr.msk.f32.mxu0 %vm12747_vm0, %v15714_v0  ;;  %10455 = vmatprep.mubr.msk.f32.mxu1 %vm12747_vm0, %v15714_v0 }
 0x23e   : > { %v9871_v29 = vpop.f32.mrf.mxu0  ;;  %v9996_v63 = vpop.f32.mrf.mxu1  ;;  %10541 = vmatpush3.msra.mxu0 %v2848_v16  ;;  %v2219_v16 = vld [vmem:[%s12979_s28 + $0x60] sm:$0xff] }
 0x23f   : > { %v14063_v2 = vadd.f32 %v1525_v50, %v1305_v20  ;;  %10542 = vmatprep.subr.mxu0 %v15714_v0  ;;  %v2220_v63 = vld [vmem:[%s12979_s28 + $0x68] sm:$0xff] }
 0x240   : > { %v1232_v26 = vpop.f32.mrf.mxu0  ;;  %10331 = vmatmul.mubr.f32.gmra.mxu0 %v2217_v61  ;;  %v1530_v9 = vpop.f32.mrf.mxu1  ;;  %10456 = vmatmul.mubr.f32.gmra.mxu1 %v13720_v36  ;;  %v2845_v61 = vld [vmem:[#allocation5 + $0x438] sm:$0xff] }
 0x241   : > { %v1306_v38 = vadd.f32 %v1232_v26, %v13702_v54  ;;  %10333 = vmatprep.mubr.msk.f32.mxu0 %vm12747_vm0, %v15714_v0  ;;  %10458 = vmatprep.mubr.msk.f32.mxu1 %vm12747_vm0, %v15714_v0 }
 0x242   : > { %v9874_v21 = vpop.f32.mrf.mxu0  ;;  %v9999_v56 = vpop.f32.mrf.mxu1  ;;  %10543 = vmatpush3.msra.mxu0 %v2847_v13 }
 0x243   : > { %v14073_v10 = vadd.f32 %v1530_v9, %v1306_v38  ;;  %10544 = vmatprep.subr.mxu0 %v15714_v0  ;;  %v2844_v38 = vld [vmem:[#allocation5 + $0x430] sm:$0xff]  ;;  %v2221_v21 = vld [vmem:[%s12979_s28 + $0x70] sm:$0xff] }
 0x244   : > { %v1237_v15 = vpop.f32.mrf.mxu0  ;;  %10334 = vmatmul.mubr.f32.gmra.mxu0 %v2218_v33  ;;  %v1535_v36 = vpop.f32.mrf.mxu1  ;;  %10459 = vmatmul.mubr.f32.gmra.mxu1 %v13733_v17 }
 0x245   : > { %v1307_v54 = vadd.f32 %v1237_v15, %v13715_v34  ;;  %10336 = vmatprep.mubr.msk.f32.mxu0 %vm12747_vm0, %v15714_v0  ;;  %10461 = vmatprep.mubr.msk.f32.mxu1 %vm12747_vm0, %v15714_v0 }
 0x246   : > { %v9877_v48 = vpop.f32.mrf.mxu0  ;;  %v10002_v50 = vpop.f32.mrf.mxu1  ;;  %10545 = vmatpush3.msra.mxu0 %v2846_v31 }
 0x247   : > { %v14083_v20 = vadd.f32 %v1535_v36, %v1307_v54  ;;  %10546 = vmatprep.subr.mxu0 %v15714_v0  ;;  %v2843_v36 = vld [vmem:[#allocation5 + $0x428] sm:$0xff] }
 0x248   : > { %v1242_v29 = vpop.f32.mrf.mxu0  ;;  %10337 = vmatmul.mubr.f32.gmra.mxu0 %v2219_v16  ;;  %v1540_v17 = vpop.f32.mrf.mxu1  ;;  %10462 = vmatmul.mubr.f32.gmra.mxu1 %v13746_v51  ;;  %v2222_v16 = vld [vmem:[%s12979_s28 + $0x78] sm:$0xff] }
 0x249   : > { %v1308_v34 = vadd.f32 %v1242_v29, %v13728_v6  ;;  %10339 = vmatprep.mubr.msk.f32.mxu0 %vm12747_vm0, %v15714_v0  ;;  %10464 = vmatprep.mubr.msk.f32.mxu1 %vm12747_vm0, %v15714_v0  ;;  %v2842_v29 = vld [vmem:[#allocation5 + $0x420] sm:$0xff] }
 0x24a   : > { %v9880_v13 = vpop.f32.mrf.mxu0  ;;  %v10005_v26 = vpop.f32.mrf.mxu1  ;;  %10547 = vmatpush3.msra.mxu0 %v2845_v61 }
 0x24b   : > { %v14093_v9 = vadd.f32 %v1540_v17, %v1308_v34  ;;  %10548 = vmatprep.subr.mxu0 %v15714_v0  ;;  %v2223_v34 = vld [vmem:[%s12979_s28 + $0x80] sm:$0xff] }
 0x24c   : > { %v1247_v33 = vpop.f32.mrf.mxu0  ;;  %10340 = vmatmul.mubr.f32.gmra.mxu0 %v2220_v63  ;;  %v1545_v51 = vpop.f32.mrf.mxu1  ;;  %10465 = vmatmul.mubr.f32.gmra.mxu1 %v13759_v28 }
 0x24d   : > { %v1309_v6 = vadd.f32 %v1247_v33, %v13741_v45  ;;  %10342 = vmatprep.mubr.msk.f32.mxu0 %vm12747_vm0, %v15714_v0  ;;  %10467 = vmatprep.mubr.msk.f32.mxu1 %vm12747_vm0, %v15714_v0 }
 0x24e   : > { %v9883_v56 = vpop.f32.mrf.mxu0  ;;  %v10008_v31 = vpop.f32.mrf.mxu1  ;;  %10549 = vmatpush3.msra.mxu0 %v2844_v38  ;;  %v2841_v38 = vld [vmem:[#allocation5 + $0x418] sm:$0xff] }
 0x24f   : > { %v14103_v15 = vadd.f32 %v1545_v51, %v1309_v6  ;;  %10550 = vmatprep.subr.mxu0 %v15714_v0  ;;  %v2224_v6 = vld [vmem:[%s12979_s28 + $0x88] sm:$0xff] }
 0x250   : > { %v1252_v54 = vpop.f32.mrf.mxu0  ;;  %10343 = vmatmul.mubr.f32.gmra.mxu0 %v2221_v21  ;;  %v1550_v28 = vpop.f32.mrf.mxu1  ;;  %10468 = vmatmul.mubr.f32.gmra.mxu1 %v13772_v46 }
 0x251   : > { %v1310_v45 = vadd.f32 %v1252_v54, %v13754_v24  ;;  %10345 = vmatprep.mubr.msk.f32.mxu0 %vm12747_vm0, %v15714_v0  ;;  %10470 = vmatprep.mubr.msk.f32.mxu1 %vm12747_vm0, %v15714_v0 }
 0x252   : > { %v9886_v48 = vpop.f32.mrf.mxu0  ;;  %v10011_v50 = vpop.f32.mrf.mxu1  ;;  %10551 = vmatpush3.msra.mxu0 %v2843_v36  ;;  %v2840_v36 = vld [vmem:[#allocation5 + $0x410] sm:$0xff] }
 0x253   : > { %v14113_v61 = vadd.f32 %v1550_v28, %v1310_v45  ;;  %10552 = vmatprep.subr.mxu0 %v15714_v0  ;;  %v15739_v28 = vld [vmem:[#allocation25_spill] sm:$0xff] }
 0x254   : > { %v1257_v17 = vpop.f32.mrf.mxu0  ;;  %10346 = vmatmul.mubr.f32.gmra.mxu0 %v2222_v16  ;;  %v1555_v46 = vpop.f32.mrf.mxu1  ;;  %10471 = vmatmul.mubr.f32.gmra.mxu1 %v13785_v62  ;;  %v2225_v16 = vld [vmem:[%s12979_s28 + $0x90] sm:$0xff] }
 0x255   : > { %v1311_v24 = vadd.f32 %v1257_v17, %v13767_v42  ;;  %10348 = vmatprep.mubr.msk.f32.mxu0 %vm12747_vm0, %v15714_v0  ;;  %10473 = vmatprep.mubr.msk.f32.mxu1 %vm12747_vm0, %v15714_v0  ;;  %v15738_v42 = vld [vmem:[#allocation24_spill] sm:$0xff] }
 0x256   : > { %v9889_v63 = vpop.f32.mrf.mxu0  ;;  %v10014_v13 = vpop.f32.mrf.mxu1  ;;  %10553 = vmatpush3.msra.mxu0 %v2842_v29  ;;  %v2839_v17 = vld [vmem:[#allocation5 + $0x408] sm:$0xff] }
 0x257   : > { %v14123_v26 = vadd.f32 %v1555_v46, %v1311_v24  ;;  %10554 = vmatprep.subr.mxu0 %v15714_v0  ;;  %v15740_v24 = vld [vmem:[#allocation26_spill] sm:$0xff] }
 0x258   : > { %v1262_v33 = vpop.f32.mrf.mxu0  ;;  %10349 = vmatmul.mubr.f32.gmra.mxu0 %v2223_v34  ;;  %v1560_v62 = vpop.f32.mrf.mxu1  ;;  %10474 = vmatmul.mubr.f32.gmra.mxu1 %v13798_v58  ;;  %v2226_v63 = vld [vmem:[%s12979_s28 + $0x98] sm:$0xff] }
 0x259   : > { %v1312_v51 = vadd.f32 %v1262_v33, %v15738_v42  ;;  %10351 = vmatprep.mubr.msk.f32.mxu0 %vm12747_vm0, %v15714_v0  ;;  %10476 = vmatprep.mubr.msk.f32.mxu1 %vm12747_vm0, %v15714_v0 }
 0x25a   : > { %v9892_v21 = vpop.f32.mrf.mxu0  ;;  %v10017_v56 = vpop.f32.mrf.mxu1  ;;  %10555 = vmatpush3.msra.mxu0 %v2841_v38 }
 0x25b   : > { %v14133_v31 = vadd.f32 %v1560_v62, %v1312_v51  ;;  %10556 = vmatprep.subr.mxu0 %v15714_v0  ;;  %v2838_v62 = vld [vmem:[#allocation5 + $0x400] sm:$0xff]  ;;  %v2227_v21 = vld [vmem:[%s12979_s28 + $0xa0] sm:$0xff] }
 0x25c   : > { %v1267_v54 = vpop.f32.mrf.mxu0  ;;  %10352 = vmatmul.mubr.f32.gmra.mxu0 %v2224_v6  ;;  %v1565_v58 = vpop.f32.mrf.mxu1  ;;  %10477 = vmatmul.mubr.f32.gmra.mxu1 %v13811_v3  ;;  %v15741_v51 = vld [vmem:[#allocation27_spill] sm:$0xff] }
 0x25d   : > { %v1313_v45 = vadd.f32 %v1267_v54, %v15739_v28  ;;  %10354 = vmatprep.mubr.msk.f32.mxu0 %vm12747_vm0, %v15714_v0  ;;  %10479 = vmatprep.mubr.msk.f32.mxu1 %vm12747_vm0, %v15714_v0 }
 0x25e   : > { %v9895_v48 = vpop.f32.mrf.mxu0  ;;  %v10020_v50 = vpop.f32.mrf.mxu1  ;;  %10557 = vmatpush3.msra.mxu0 %v2840_v36 }
 0x25f   : > { %v14143_v29 = vadd.f32 %v1565_v58, %v1313_v45  ;;  %10558 = vmatprep.subr.mxu0 %v15714_v0 }
 0x260   : > { %v1272_v46 = vpop.f32.mrf.mxu0  ;;  %10355 = vmatmul.mubr.f32.gmra.mxu0 %v2225_v16  ;;  %v1570_v3 = vpop.f32.mrf.mxu1  ;;  %10480 = vmatmul.mubr.f32.gmra.mxu1 %v13824_v19  ;;  %v2228_v16 = vld [vmem:[%s12979_s28 + $0xa8] sm:$0xff] }
 0x261   : > { %v1314_v34 = vadd.f32 %v1272_v46, %v15740_v24  ;;  %10357 = vmatprep.mubr.msk.f32.mxu0 %vm12747_vm0, %v15714_v0  ;;  %10482 = vmatprep.mubr.msk.f32.mxu1 %vm12747_vm0, %v15714_v0  ;;  %v2229_v24 = vld [vmem:[%s12979_s28 + $0xb0] sm:$0xff] }
 0x262   : > { %v9898_v13 = vpop.f32.mrf.mxu0  ;;  %v10023_v38 = vpop.f32.mrf.mxu1  ;;  %10559 = vmatpush3.msra.mxu0 %v2839_v17 }
 0x263   : > { %v14153_v33 = vadd.f32 %v1570_v3, %v1314_v34  ;;  %10560 = vmatprep.subr.mxu0 %v15714_v0 }
 0x264   : > { %v1277_v42 = vpop.f32.mrf.mxu0  ;;  %10358 = vmatmul.mubr.f32.gmra.mxu0 %v2226_v63  ;;  %v1575_v19 = vpop.f32.mrf.mxu1  ;;  %10483 = vmatmul.mubr.f32.gmra.mxu1 %v13836_v1  ;;  %v15742_v1 = vld [vmem:[#allocation28_spill] sm:$0xff] }
 0x265   : > { %v1315_v6 = vadd.f32 %v1277_v42, %v15741_v51  ;;  %10360 = vmatprep.mubr.msk.f32.mxu0 %vm12747_vm0, %v15714_v0  ;;  %10485 = vmatprep.mubr.msk.f32.mxu1 %vm12747_vm0, %v15714_v0 }
 0x266   : > { %v9901_v56 = vpop.f32.mrf.mxu0  ;;  %v10026_v36 = vpop.f32.mrf.mxu1  ;;  %10561 = vmatpush3.msra.mxu0 %v2838_v62 }
 0x267   : > { %v14163_v54 = vadd.f32 %v1575_v19, %v1315_v6 }
 0x268   : > { %v1282_v58 = vpop.f32.mrf.mxu0  ;;  %10361 = vmatmul.mubr.f32.gmra.mxu0 %v2227_v21  ;;  %v1580_v28 = vpop.f32.mrf.mxu1  ;;  %10486 = vmatmul.mubr.f32.gmra.mxu1 %v13846_v27 }
 0x269   : > { %v1316_v45 = vadd.f32 %v1282_v58, %v15742_v1  ;;  %10363 = vmatprep.mubr.msk.f32.mxu0 %vm12747_vm0, %v15714_v0  ;;  %10488 = vmatprep.mubr.msk.f32.mxu1 %vm12747_vm0, %v15714_v0 }
 0x26a   : > { %v9904_v48 = vpop.f32.mrf.mxu0  ;;  %v10029_v50 = vpop.f32.mrf.mxu1 }
 0x26b   : > { %v14172_v17 = vadd.f32 %v1580_v28, %v1316_v45 }
 0x26c   : > { %v1728_v46 = vpop.f32.mrf.mxu0  ;;  %10364 = vmatmul.mubr.f32.gmra.mxu0 %v2228_v16  ;;  %v2026_v3 = vpop.f32.mrf.mxu1  ;;  %10489 = vmatmul.mubr.f32.gmra.mxu1 %v13858_v18 }
 0x26d   : > { %v1882_v27 = vadd.f32 %v1728_v46, %v13850_v35  ;;  %10366 = vmatprep.mubr.msk.f32.mxu0 %vm12747_vm0, %v15714_v0  ;;  %10491 = vmatprep.mubr.msk.f32.mxu1 %vm12747_vm0, %v15714_v0  ;;  %v2230_v35 = vld [vmem:[%s12979_s28 + $0xb8] sm:$0xff] }
 0x26e   : > { %v10064_v34 = vpop.f32.mrf.mxu0  ;;  %v10189_v63 = vpop.f32.mrf.mxu1 }
 0x26f   : > { %v14181_v13 = vadd.f32 %v2026_v3, %v1882_v27 }
 0x270   : > { %v1733_v38 = vpop.f32.mrf.mxu0  ;;  %10367 = vmatmul.mubr.f32.gmra.mxu0 %v2229_v24  ;;  %v2031_v62 = vpop.f32.mrf.mxu1  ;;  %10492 = vmatmul.mubr.f32.gmra.mxu1 %v13870_v25 }
 0x271   : > { %v1883_v18 = vadd.f32 %v1733_v38, %v13862_v39  ;;  %10369 = vmatprep.mubr.msk.f32.mxu0 %vm12747_vm0, %v15714_v0  ;;  %10494 = vmatprep.mubr.msk.f32.mxu1 %vm12747_vm0, %v15714_v0  ;;  %v2231_v39 = vld [vmem:[%s12979_s28 + $0xc0] sm:$0xff] }
 0x272   : > { %v10067_v42 = vpop.f32.mrf.mxu0  ;;  %v10192_v19 = vpop.f32.mrf.mxu1 }
 0x273   : > { %v14190_v51 = vadd.f32 %v2031_v62, %v1883_v18 }
 0x274   : > { %v1738_v6 = vpop.f32.mrf.mxu0  ;;  %10370 = vmatmul.mubr.f32.gmra.mxu0 %v2230_v35  ;;  %v2036_v21 = vpop.f32.mrf.mxu1  ;;  %10495 = vmatmul.mubr.f32.gmra.mxu1 %v13882_v32 }
 0x275   : > { %v1884_v25 = vadd.f32 %v1738_v6, %v13874_v12  ;;  %10372 = vmatprep.mubr.msk.f32.mxu0 %vm12747_vm0, %v15714_v0  ;;  %10497 = vmatprep.mubr.msk.f32.mxu1 %vm12747_vm0, %v15714_v0  ;;  %v2232_v12 = vld [vmem:[%s12979_s28 + $0xc8] sm:$0xff] }
 0x276   : > { %v10070_v56 = vpop.f32.mrf.mxu0  ;;  %v10195_v36 = vpop.f32.mrf.mxu1 }
 0x277   : > { %v14199_v58 = vadd.f32 %v2036_v21, %v1884_v25 }
 0x278   : > { %v1743_v28 = vpop.f32.mrf.mxu0  ;;  %10373 = vmatmul.mubr.f32.gmra.mxu0 %v2231_v39  ;;  %v2041_v1 = vpop.f32.mrf.mxu1  ;;  %10498 = vmatmul.mubr.f32.gmra.mxu1 %v13894_v40 }
 0x279   : > { %v1885_v32 = vadd.f32 %v1743_v28, %v13886_v41  ;;  %10375 = vmatprep.mubr.msk.f32.mxu0 %vm12747_vm0, %v15714_v0  ;;  %10500 = vmatprep.mubr.msk.f32.mxu1 %vm12747_vm0, %v15714_v0  ;;  %v2233_v41 = vld [vmem:[%s12979_s28 + $0xd0] sm:$0xff] }
 0x27a   : > { %v10073_v45 = vpop.f32.mrf.mxu0  ;;  %v10198_v16 = vpop.f32.mrf.mxu1 }
 0x27b   : > { %v14208_v48 = vadd.f32 %v2041_v1, %v1885_v32 }
 0x27c   : > { %v1748_v50 = vpop.f32.mrf.mxu0  ;;  %10376 = vmatmul.mubr.f32.gmra.mxu0 %v2232_v12  ;;  %v2046_v46 = vpop.f32.mrf.mxu1  ;;  %10501 = vmatmul.mubr.f32.gmra.mxu1 %v13906_v53 }
 0x27d   : > { %v1886_v40 = vadd.f32 %v1748_v50, %v13898_v44  ;;  %10378 = vmatprep.mubr.msk.f32.mxu0 %vm12747_vm0, %v15714_v0  ;;  %10503 = vmatprep.mubr.msk.f32.mxu1 %vm12747_vm0, %v15714_v0  ;;  %v2234_v44 = vld [vmem:[%s12979_s28 + $0xd8] sm:$0xff] }
 0x27e   : > { %v10076_v3 = vpop.f32.mrf.mxu0  ;;  %v10201_v27 = vpop.f32.mrf.mxu1 }
 0x27f   : > { %v14217_v24 = vadd.f32 %v2046_v46, %v1886_v40 }
 0x280   : > { %v1753_v34 = vpop.f32.mrf.mxu0  ;;  %10379 = vmatmul.mubr.f32.gmra.mxu0 %v2233_v41  ;;  %v2051_v63 = vpop.f32.mrf.mxu1  ;;  %10504 = vmatmul.mubr.f32.gmra.mxu1 %v13918_v4 }
 0x281   : > { %v1887_v53 = vadd.f32 %v1753_v34, %v13910_v47  ;;  %10381 = vmatprep.mubr.msk.f32.mxu0 %vm12747_vm0, %v15714_v0  ;;  %10506 = vmatprep.mubr.msk.f32.mxu1 %vm12747_vm0, %v15714_v0  ;;  %v2235_v47 = vld [vmem:[%s12979_s28 + $0xe0] sm:$0xff] }
 0x282   : > { %v10079_v38 = vpop.f32.mrf.mxu0  ;;  %v10204_v62 = vpop.f32.mrf.mxu1 }
 0x283   : > { %v14226_v18 = vadd.f32 %v2051_v63, %v1887_v53  ;;  %v2239_v63 = vld [vmem:[%s12979_s28 + $0x100] sm:$0xff] }
 0x284   : > { %v1758_v35 = vpop.f32.mrf.mxu0  ;;  %10382 = vmatmul.mubr.f32.gmra.mxu0 %v2234_v44  ;;  %v2056_v42 = vpop.f32.mrf.mxu1  ;;  %10507 = vmatmul.mubr.f32.gmra.mxu1 %v13930_v14 }
 0x285   : > { %v1888_v4 = vadd.f32 %v1758_v35, %v13922_v49  ;;  %10384 = vmatprep.mubr.msk.f32.mxu0 %vm12747_vm0, %v15714_v0  ;;  %10509 = vmatprep.mubr.msk.f32.mxu1 %vm12747_vm0, %v15714_v0  ;;  %v2236_v49 = vld [vmem:[%s12979_s28 + $0xe8] sm:$0xff] }
 0x286   : > { %v10082_v19 = vpop.f32.mrf.mxu0  ;;  %v10207_v6 = vpop.f32.mrf.mxu1 }
 0x287   : > { %v14235_v21 = vadd.f32 %v2056_v42, %v1888_v4  ;;  %v2240_v4 = vld [vmem:[%s12979_s28 + $0x108] sm:$0xff] }
 0x288   : > { %v1763_v25 = vpop.f32.mrf.mxu0  ;;  %10385 = vmatmul.mubr.f32.gmra.mxu0 %v2235_v47  ;;  %v2061_v39 = vpop.f32.mrf.mxu1  ;;  %10510 = vmatmul.mubr.f32.gmra.mxu1 %v13942_v22  ;;  %v2538_v47 = vld [vmem:[%s12979_s28 + $0x109] sm:$0xff] }
 0x289   : > { %v1889_v14 = vadd.f32 %v1763_v25, %v13934_v52  ;;  %10387 = vmatprep.mubr.msk.f32.mxu0 %vm12747_vm0, %v15714_v0  ;;  %10512 = vmatprep.mubr.msk.f32.mxu1 %vm12747_vm0, %v15714_v0  ;;  %v2237_v52 = vld [vmem:[%s12979_s28 + $0xf0] sm:$0xff] }
 0x28a   : > { %v10085_v56 = vpop.f32.mrf.mxu0  ;;  %v10210_v36 = vpop.f32.mrf.mxu1 }
 0x28b   : > { %v14244_v28 = vadd.f32 %v2061_v39, %v1889_v14  ;;  %v2241_v56 = vld [vmem:[%s12979_s28 + $0x110] sm:$0xff] }
 0x28c   : > { %v1768_v1 = vpop.f32.mrf.mxu0  ;;  %10388 = vmatmul.mubr.f32.gmra.mxu0 %v2236_v49  ;;  %v2066_v32 = vpop.f32.mrf.mxu1  ;;  %10513 = vmatmul.mubr.f32.gmra.mxu1 %v13954_v30  ;;  %v2539_v36 = vld [vmem:[%s12979_s28 + $0x111] sm:$0xff] }
 0x28d   : > { %v1890_v22 = vadd.f32 %v1768_v1, %v13946_v55  ;;  %10390 = vmatprep.mubr.msk.f32.mxu0 %vm12747_vm0, %v15714_v0  ;;  %10515 = vmatprep.mubr.msk.f32.mxu1 %vm12747_vm0, %v15714_v0  ;;  %v2238_v55 = vld [vmem:[%s12979_s28 + $0xf8] sm:$0xff] }
 0x28e   : > { %v10088_v12 = vpop.f32.mrf.mxu0  ;;  %v10213_v45 = vpop.f32.mrf.mxu1 }
 0x28f   : > { %v14253_v16 = vadd.f32 %v2066_v32, %v1890_v22 }
 0x290   : > { %v1773_v50 = vpop.f32.mrf.mxu0  ;;  %10391 = vmatmul.mubr.f32.gmra.mxu0 %v2237_v52  ;;  %v2071_v46 = vpop.f32.mrf.mxu1  ;;  %10516 = vmatmul.mubr.f32.gmra.mxu1 %v13966_v43  ;;  %v15743_v43 = vld [vmem:[#allocation29_spill] sm:$0xff] }
 0x291   : > { %v1891_v30 = vadd.f32 %v1773_v50, %v13958_v57  ;;  %10393 = vmatprep.mubr.msk.f32.mxu0 %vm12747_vm0, %v15714_v0  ;;  %10518 = vmatprep.mubr.msk.f32.mxu1 %vm12747_vm0, %v15714_v0  ;;  %v2807_v50 = vld [vmem:[%s12979_s28 + $0x22] sm:$0xff] }
 0x292   : > { %v10091_v40 = vpop.f32.mrf.mxu0  ;;  %v10216_v41 = vpop.f32.mrf.mxu1 }
 0x293   : > { %v14262_v3 = vadd.f32 %v2071_v46, %v1891_v30 }
 0x294   : > { %v1778_v27 = vpop.f32.mrf.mxu0  ;;  %10394 = vmatmul.mubr.f32.gmra.mxu0 %v2238_v55  ;;  %v2076_v34 = vpop.f32.mrf.mxu1  ;;  %10519 = vmatmul.mubr.f32.gmra.mxu1 %v13978_v59  ;;  %v15744_v59 = vld [vmem:[#allocation30_spill] sm:$0xff] }
 0x295   : > { %v1892_v57 = vadd.f32 %v1778_v27, %v15743_v43  ;;  %10396 = vmatprep.mubr.msk.f32.mxu0 %vm12747_vm0, %v15714_v0  ;;  %10521 = vmatprep.mubr.msk.f32.mxu1 %vm12747_vm0, %v15714_v0 }
 0x296   : > { %v10094_v53 = vpop.f32.mrf.mxu0  ;;  %v10219_v44 = vpop.f32.mrf.mxu1 }
 0x297   : > { %v14271_v38 = vadd.f32 %v2076_v34, %v1892_v57  ;;  %v2808_v34 = vld [vmem:[%s12979_s28 + $0x2a] sm:$0xff] }
 0x298   : > { %v1783_v62 = vpop.f32.mrf.mxu0  ;;  %10397 = vmatmul.mubr.f32.gmra.mxu0 %v2239_v63  ;;  %v2081_v35 = vpop.f32.mrf.mxu1  ;;  %10522 = vmatmul.mubr.f32.gmra.mxu1 %v13990_v37  ;;  %v15745_v37 = vld [vmem:[#allocation31_spill] sm:$0xff] }
 0x299   : > { %v1893_v42 = vadd.f32 %v1783_v62, %v15744_v59  ;;  %10399 = vmatprep.mubr.msk.f32.mxu0 %vm12747_vm0, %v15714_v0  ;;  %10524 = vmatprep.mubr.msk.f32.mxu1 %vm12747_vm0, %v15714_v0  ;;  %v2809_v62 = vld [vmem:[%s12979_s28 + $0x32] sm:$0xff] }
 0x29a   : > { %v10097_v19 = vpop.f32.mrf.mxu0  ;;  %v10222_v6 = vpop.f32.mrf.mxu1 }
 0x29b   : > { %v14281_v25 = vadd.f32 %v2081_v35, %v1893_v42  ;;  %v2810_v19 = vld [vmem:[%s12979_s28 + $0x3a] sm:$0xff] }
 0x29c   : > { %v1788_v39 = vpop.f32.mrf.mxu0  ;;  %10400 = vmatmul.mubr.f32.gmra.mxu0 %v2240_v4  ;;  %v2086_v14 = vpop.f32.mrf.mxu1  ;;  %10525 = vmatmul.mubr.f32.gmra.mxu1 %v2538_v47 }
 0x29d   : > { %v1894_v49 = vadd.f32 %v1788_v39, %v15745_v37  ;;  %10402 = vmatprep.mubr.msk.f32.mxu0 %vm12747_vm0, %v15714_v0  ;;  %10527 = vmatprep.mubr.msk.f32.mxu1 %vm12747_vm0, %v15714_v0 }
 0x29e   : > { %v10100_v1 = vpop.f32.mrf.mxu0  ;;  %v10225_v32 = vpop.f32.mrf.mxu1 }
 0x29f   : > { %v14290_v22 = vadd.f32 %v2086_v14, %v1894_v49 }
 0x2a0   : > { %v1793_v52 = vpop.f32.mrf.mxu0  ;;  %10403 = vmatmul.mubr.f32.gmra.mxu0 %v2241_v56  ;;  %v2091_v12 = vpop.f32.mrf.mxu1  ;;  %10528 = vmatmul.mubr.f32.gmra.mxu1 %v2539_v36  ;;  %v2811_v56 = vld [vmem:[%s12979_s28 + $0x42] sm:$0xff] }
 0x2a1   : > { %v1895_v45 = vadd.f32 %v1793_v52, %v14004_v23  ;;  %10562 = vmatprep.mubr.msk.f32.mxu0 %vm12747_vm0, %v15714_v0 }
 0x2a2   : > { %v10103_v46 = vpop.f32.mrf.mxu0  ;;  %v10228_v30 = vpop.f32.mrf.mxu1 }
 0x2a3   : > { %v14296_v55 = vadd.f32 %v2091_v12, %v1895_v45  ;;  %v2812_v45 = vld [vmem:[%s12979_s28 + $0x4a] sm:$0xff] }
 0x2a4   : > { %v1798_v40 = vpop.f32.mrf.mxu0  ;;  %10563 = vmatmul.mubr.f32.vlgmr.msra.gmra.mxu0 %v2807_v50  ;;  %v2096_v41 = vpop.f32.mrf.mxu1 }
 0x2a5   : > { %v1896_v27 = vadd.f32 %v1798_v40, %v14013_v60  ;;  %10565 = vmatprep.mubr.msk.f32.mxu0 %vm12747_vm0, %v15714_v0 }
 0x2a6   : > { %v10106_v43 = vpop.f32.mrf.mxu0  ;;  %v10231_v23 = vpop.f32.mrf.mxu1 }
 0x2a7   : > { %v14302_v57 = vadd.f32 %v2096_v41, %v1896_v27  ;;  %v2813_v27 = vld [vmem:[%s12979_s28 + $0x52] sm:$0xff] }
 0x2a8   : > { %v1803_v63 = vpop.f32.mrf.mxu0  ;;  %10566 = vmatmul.mubr.f32.gmra.mxu0 %v2808_v34  ;;  %v2101_v53 = vpop.f32.mrf.mxu1 }
 0x2a9   : > { %v1897_v44 = vadd.f32 %v1803_v63, %v14023_v5  ;;  %10568 = vmatprep.mubr.msk.f32.mxu0 %vm12747_vm0, %v15714_v0 }
 0x2aa   : > { %v10109_v35 = vpop.f32.mrf.mxu0  ;;  %v10234_v60 = vpop.f32.mrf.mxu1 }
 0x2ab   : > { %v14308_v59 = vadd.f32 %v2101_v53, %v1897_v44  ;;  %v2814_v44 = vld [vmem:[%s12979_s28 + $0x5a] sm:$0xff] }
 0x2ac   : > { %v1808_v42 = vpop.f32.mrf.mxu0  ;;  %10569 = vmatmul.mubr.f32.gmra.mxu0 %v2809_v62  ;;  %v2106_v4 = vpop.f32.mrf.mxu1 }
 0x2ad   : > { %v1898_v47 = vadd.f32 %v1808_v42, %v14033_v11  ;;  %10571 = vmatprep.mubr.msk.f32.mxu0 %vm12747_vm0, %v15714_v0 }
 0x2ae   : > { %v10112_v6 = vpop.f32.mrf.mxu0  ;;  %v10237_v5 = vpop.f32.mrf.mxu1 }
 0x2af   : > { %v14314_v39 = vadd.f32 %v2106_v4, %v1898_v47  ;;  %v2815_v47 = vld [vmem:[%s12979_s28 + $0x62] sm:$0xff] }
 0x2b0   : > { %v1813_v14 = vpop.f32.mrf.mxu0  ;;  %10572 = vmatmul.mubr.f32.gmra.mxu0 %v2810_v19  ;;  %v2111_v37 = vpop.f32.mrf.mxu1 }
 0x2b1   : > { %v1899_v49 = vadd.f32 %v1813_v14, %v14043_v7  ;;  %10574 = vmatprep.mubr.msk.f32.mxu0 %vm12747_vm0, %v15714_v0 }
 0x2b2   : > { %v10115_v36 = vpop.f32.mrf.mxu0  ;;  %v10240_v11 = vpop.f32.mrf.mxu1 }
 0x2b3   : > { %v14320_v1 = vadd.f32 %v2111_v37, %v1899_v49  ;;  %v2816_v49 = vld [vmem:[%s12979_s28 + $0x6a] sm:$0xff] }
 0x2b4   : > { %v1818_v32 = vpop.f32.mrf.mxu0  ;;  %10575 = vmatmul.mubr.f32.gmra.mxu0 %v2811_v56  ;;  %v2116_v52 = vpop.f32.mrf.mxu1 }
 0x2b5   : > { %v1900_v12 = vadd.f32 %v1818_v32, %v14053_v8  ;;  %10577 = vmatprep.mubr.msk.f32.mxu0 %vm12747_vm0, %v15714_v0 }
 0x2b6   : > { %v10118_v50 = vpop.f32.mrf.mxu0  ;;  %v10243_v7 = vpop.f32.mrf.mxu1 }
 0x2b7   : > { %v14326_v46 = vadd.f32 %v2116_v52, %v1900_v12  ;;  %v2817_v12 = vld [vmem:[%s12979_s28 + $0x72] sm:$0xff] }
 0x2b8   : > { %v1823_v30 = vpop.f32.mrf.mxu0  ;;  %10578 = vmatmul.mubr.f32.gmra.mxu0 %v2812_v45  ;;  %v2121_v40 = vpop.f32.mrf.mxu1 }
 0x2b9   : > { %v1901_v41 = vadd.f32 %v1823_v30, %v14063_v2  ;;  %10580 = vmatprep.mubr.msk.f32.mxu0 %vm12747_vm0, %v15714_v0 }
 0x2ba   : > { %v10121_v34 = vpop.f32.mrf.mxu0  ;;  %v10246_v8 = vpop.f32.mrf.mxu1 }
 0x2bb   : > { %v14332_v43 = vadd.f32 %v2121_v40, %v1901_v41  ;;  %v2818_v41 = vld [vmem:[%s12979_s28 + $0x7a] sm:$0xff] }
 0x2bc   : > { %v1828_v23 = vpop.f32.mrf.mxu0  ;;  %10581 = vmatmul.mubr.f32.gmra.mxu0 %v2813_v27  ;;  %v2126_v63 = vpop.f32.mrf.mxu1 }
 0x2bd   : > { %v1902_v53 = vadd.f32 %v1828_v23, %v14073_v10  ;;  %10583 = vmatprep.mubr.msk.f32.mxu0 %vm12747_vm0, %v15714_v0 }
 0x2be   : > { %v10124_v62 = vpop.f32.mrf.mxu0  ;;  %v10249_v2 = vpop.f32.mrf.mxu1 }
 0x2bf   : > { %v14338_v35 = vadd.f32 %v2126_v63, %v1902_v53  ;;  %v2819_v53 = vld [vmem:[%s12979_s28 + $0x82] sm:$0xff] }
 0x2c0   : > { %v1833_v60 = vpop.f32.mrf.mxu0  ;;  %10584 = vmatmul.mubr.f32.gmra.mxu0 %v2814_v44  ;;  %v2131_v42 = vpop.f32.mrf.mxu1 }
 0x2c1   : > { %v1903_v4 = vadd.f32 %v1833_v60, %v14083_v20  ;;  %10586 = vmatprep.mubr.msk.f32.mxu0 %vm12747_vm0, %v15714_v0 }
 0x2c2   : > { %v10127_v19 = vpop.f32.mrf.mxu0  ;;  %v10252_v10 = vpop.f32.mrf.mxu1 }
 0x2c3   : > { %v14344_v6 = vadd.f32 %v2131_v42, %v1903_v4  ;;  %v2820_v4 = vld [vmem:[%s12979_s28 + $0x8a] sm:$0xff] }
 0x2c4   : > { %v1838_v5 = vpop.f32.mrf.mxu0  ;;  %10587 = vmatmul.mubr.f32.gmra.mxu0 %v2815_v47  ;;  %v2136_v14 = vpop.f32.mrf.mxu1 }
 0x2c5   : > { %v1904_v37 = vadd.f32 %v1838_v5, %v14093_v9  ;;  %10589 = vmatprep.mubr.msk.f32.mxu0 %vm12747_vm0, %v15714_v0 }
 0x2c6   : > { %v10130_v56 = vpop.f32.mrf.mxu0  ;;  %v10255_v20 = vpop.f32.mrf.mxu1 }
 0x2c7   : > { %v14350_v36 = vadd.f32 %v2136_v14, %v1904_v37  ;;  %v3261_v14 = vld [vmem:[#allocation9 + $0xf8] sm:$0xff]  ;;  %v3260_v20 = vld [vmem:[#allocation9 + $0xf0] sm:$0xff] }
 0x2c8   : > { %v1843_v11 = vpop.f32.mrf.mxu0  ;;  %10590 = vmatmul.mubr.f32.gmra.mxu0 %v2816_v49  ;;  %v2141_v32 = vpop.f32.mrf.mxu1  ;;  %v2821_v49 = vld [vmem:[%s12979_s28 + $0x92] sm:$0xff]  ;;  %10655 = vmatprep.subr.mxu1 %v3261_v14 }
 0x2c9   : > { %v1905_v52 = vadd.f32 %v1843_v11, %v14103_v15  ;;  %10592 = vmatprep.mubr.msk.f32.mxu0 %vm12747_vm0, %v15714_v0  ;;  %10656 = vmatpush3.msra.mxu1 %v3261_v14  ;;  %v3254_v14 = vld [vmem:[#allocation9 + $0xc0] sm:$0xff] }
 0x2ca   : > { %v10133_v45 = vpop.f32.mrf.mxu0  ;;  %v10258_v9 = vpop.f32.mrf.mxu1  ;;  %10657 = vmatprep.subr.mxu1 %v3260_v20 }
 0x2cb   : > { %v14356_v50 = vadd.f32 %v2141_v32, %v1905_v52  ;;  %10658 = vmatpush3.msra.mxu1 %v3260_v20  ;;  %v2822_v45 = vld [vmem:[%s12979_s28 + $0x9a] sm:$0xff] }
 0x2cc   : > { %v1848_v7 = vpop.f32.mrf.mxu0  ;;  %10593 = vmatmul.mubr.f32.gmra.mxu0 %v2817_v12  ;;  %v2146_v30 = vpop.f32.mrf.mxu1  ;;  %v3259_v12 = vld [vmem:[#allocation9 + $0xe8] sm:$0xff] }
 0x2cd   : > { %v1906_v40 = vadd.f32 %v1848_v7, %v14113_v61  ;;  %10595 = vmatprep.mubr.msk.f32.mxu0 %vm12747_vm0, %v15714_v0  ;;  %10659 = vmatprep.subr.mxu1 %v3259_v12 }
 0x2ce   : > { %v10136_v27 = vpop.f32.mrf.mxu0  ;;  %v10261_v15 = vpop.f32.mrf.mxu1  ;;  %10660 = vmatpush3.msra.mxu1 %v3259_v12 }
 0x2cf   : > { %v14362_v34 = vadd.f32 %v2146_v30, %v1906_v40  ;;  %v3258_v30 = vld [vmem:[#allocation9 + $0xe0] sm:$0xff]  ;;  %v3257_v15 = vld [vmem:[#allocation9 + $0xd8] sm:$0xff] }
 0x2d0   : > { %v1853_v8 = vpop.f32.mrf.mxu0  ;;  %10596 = vmatmul.mubr.f32.gmra.mxu0 %v2818_v41  ;;  %v2151_v23 = vpop.f32.mrf.mxu1  ;;  %10661 = vmatprep.subr.mxu1 %v3258_v30 }
 0x2d1   : > { %v1907_v63 = vadd.f32 %v1853_v8, %v14123_v26  ;;  %10598 = vmatprep.mubr.msk.f32.mxu0 %vm12747_vm0, %v15714_v0  ;;  %10662 = vmatpush3.msra.mxu1 %v3258_v30  ;;  %v3992_v8 = vld [vmem:[#allocation9 + $0x1f8] sm:$0xff] }
 0x2d2   : > { %v10139_v44 = vpop.f32.mrf.mxu0  ;;  %v10264_v61 = vpop.f32.mrf.mxu1  ;;  %10663 = vmatprep.subr.mxu1 %v3257_v15  ;;  %10877 = vmatprep.subr.mxu0 %v3992_v8 }
 0x2d3   : > { %v14368_v62 = vadd.f32 %v2151_v23, %v1907_v63  ;;  %v2823_v23 = vld [vmem:[%s12979_s28 + $0xa2] sm:$0xff]  ;;  %10664 = vmatpush3.msra.mxu1 %v3257_v15  ;;  %v3256_v44 = vld [vmem:[#allocation9 + $0xd0] sm:$0xff]  ;;  %10878 = vmatpush3.msra.mxu0 %v3992_v8  ;;  %v3251_v15 = vld [vmem:[#allocation9 + $0xa8] sm:$0xff] }
 0x2d4   : > { %v1858_v2 = vpop.f32.mrf.mxu0  ;;  %10599 = vmatmul.mubr.f32.gmra.mxu0 %v2819_v53  ;;  %v2156_v60 = vpop.f32.mrf.mxu1  ;;  %v3991_v61 = vld [vmem:[#allocation9 + $0x1f0] sm:$0xff]  ;;  %10665 = vmatprep.subr.mxu1 %v3256_v44 }
 0x2d5   : > { %v1908_v42 = vadd.f32 %v1858_v2, %v14133_v31  ;;  %10601 = vmatprep.mubr.msk.f32.mxu0 %vm12747_vm0, %v15714_v0  ;;  %10879 = vmatprep.subr.mxu0 %v3991_v61 }
 0x2d6   : > { %v10142_v47 = vpop.f32.mrf.mxu0  ;;  %v10267_v26 = vpop.f32.mrf.mxu1  ;;  %10666 = vmatpush3.msra.mxu1 %v3256_v44  ;;  %10880 = vmatpush3.msra.mxu0 %v3991_v61 }
 0x2d7   : > { %v14374_v19 = vadd.f32 %v2156_v60, %v1908_v42  ;;  %v2824_v26 = vld [vmem:[%s12979_s28 + $0xaa] sm:$0xff] }
 0x2d8   : > { %v1863_v10 = vpop.f32.mrf.mxu0  ;;  %10602 = vmatmul.mubr.f32.gmra.mxu0 %v2820_v4  ;;  %v2161_v5 = vpop.f32.mrf.mxu1  ;;  %v3990_v4 = vld [vmem:[#allocation9 + $0x1e8] sm:$0xff] }
 0x2d9   : > { %v1909_v37 = vadd.f32 %v1863_v10, %v14143_v29  ;;  %10604 = vmatprep.mubr.msk.f32.mxu0 %vm12747_vm0, %v15714_v0  ;;  %10881 = vmatprep.subr.mxu0 %v3990_v4 }
 0x2da   : > { %v10145_v31 = vpop.f32.mrf.mxu0  ;;  %v10270_v56 = vpop.f32.mrf.mxu1  ;;  %10882 = vmatpush3.msra.mxu0 %v3990_v4 }
 0x2db   : > { %v14380_v11 = vadd.f32 %v2161_v5, %v1909_v37 }
 0x2dc   : > { %v1868_v32 = vpop.f32.mrf.mxu0  ;;  %10605 = vmatmul.mubr.f32.gmra.mxu0 %v2821_v49  ;;  %v2166_v52 = vpop.f32.mrf.mxu1  ;;  %v3989_v49 = vld [vmem:[#allocation9 + $0x1e0] sm:$0xff] }
 0x2dd   : > { %v1910_v29 = vadd.f32 %v1868_v32, %v14153_v33  ;;  %10607 = vmatprep.mubr.msk.f32.mxu0 %vm12747_vm0, %v15714_v0  ;;  %v2825_v32 = vld [vmem:[%s12979_s28 + $0xb2] sm:$0xff]  ;;  %10883 = vmatprep.subr.mxu0 %v3989_v49 }
 0x2de   : > { %v10148_v9 = vpop.f32.mrf.mxu0  ;;  %v10273_v7 = vpop.f32.mrf.mxu1  ;;  %10884 = vmatpush3.msra.mxu0 %v3989_v49  ;;  %v2828_v49 = vld [vmem:[%s12979_s28 + $0xca] sm:$0xff] }
 0x2df   : > { %v14386_v40 = vadd.f32 %v2166_v52, %v1910_v29  ;;  %v3988_v52 = vld [vmem:[#allocation9 + $0x1d8] sm:$0xff]  ;;  %v3252_v9 = vld [vmem:[#allocation9 + $0xb0] sm:$0xff] }
 0x2e0   : > { %v1873_v41 = vpop.f32.mrf.mxu0  ;;  %10608 = vmatmul.mubr.f32.gmra.mxu0 %v2822_v45  ;;  %v2171_v27 = vpop.f32.mrf.mxu1  ;;  %10885 = vmatprep.subr.mxu0 %v3988_v52 }
 0x2e1   : > { %v1911_v33 = vadd.f32 %v1873_v41, %v14163_v54  ;;  %10610 = vmatprep.mubr.msk.f32.mxu0 %vm12747_vm0, %v15714_v0  ;;  %v3255_v54 = vld [vmem:[#allocation9 + $0xc8] sm:$0xff]  ;;  %10886 = vmatpush3.msra.mxu0 %v3988_v52 }
 0x2e2   : > { %v10151_v63 = vpop.f32.mrf.mxu0  ;;  %v10276_v53 = vpop.f32.mrf.mxu1  ;;  %10667 = vmatprep.subr.mxu1 %v3255_v54 }
 0x2e3   : > { %v14392_v2 = vadd.f32 %v2171_v27, %v1911_v33  ;;  %10668 = vmatpush3.msra.mxu1 %v3255_v54  ;;  %v2826_v27 = vld [vmem:[%s12979_s28 + $0xba] sm:$0xff]  ;;  %v3986_v63 = vld [vmem:[#allocation9 + $0x1c8] sm:$0xff] }
 0x2e4   : > { %v1878_v60 = vpop.f32.mrf.mxu0  ;;  %10611 = vmatmul.mubr.f32.gmra.mxu0 %v2823_v23  ;;  %v2176_v42 = vpop.f32.mrf.mxu1  ;;  %10669 = vmatprep.subr.mxu1 %v3254_v14 }
 0x2e5   : > { %v1912_v47 = vadd.f32 %v1878_v60, %v14172_v17  ;;  %10613 = vmatprep.mubr.msk.f32.mxu0 %vm12747_vm0, %v15714_v0  ;;  %v3253_v17 = vld [vmem:[#allocation9 + $0xb8] sm:$0xff]  ;;  %10670 = vmatpush3.msra.mxu1 %v3254_v14 }
 0x2e6   : > { %v10154_v10 = vpop.f32.mrf.mxu0  ;;  %v10279_v5 = vpop.f32.mrf.mxu1  ;;  %10671 = vmatprep.subr.mxu1 %v3253_v17  ;;  %v2827_v60 = vld [vmem:[%s12979_s28 + $0xc2] sm:$0xff] }
 0x2e7   : > { %v14398_v37 = vadd.f32 %v2176_v42, %v1912_v47  ;;  %10672 = vmatpush3.msra.mxu1 %v3253_v17  ;;  %v3985_v42 = vld [vmem:[#allocation9 + $0x1c0] sm:$0xff] }
 0x2e8   : > { %v2324_v31 = vpop.f32.mrf.mxu0  ;;  %10614 = vmatmul.mubr.f32.gmra.mxu0 %v2824_v26  ;;  %v2622_v56 = vpop.f32.mrf.mxu1  ;;  %10673 = vmatprep.subr.mxu1 %v3252_v9  ;;  %v3249_v26 = vld [vmem:[#allocation9 + $0x98] sm:$0xff] }
 0x2e9   : > { %v2478_v20 = vadd.f32 %v2324_v31, %v14181_v13  ;;  %10616 = vmatprep.mubr.msk.f32.mxu0 %vm12747_vm0, %v15714_v0  ;;  %v3987_v13 = vld [vmem:[#allocation9 + $0x1d0] sm:$0xff]  ;;  %10674 = vmatpush3.msra.mxu1 %v3252_v9  ;;  %v2829_v9 = vld [vmem:[%s12979_s28 + $0xd2] sm:$0xff] }
 0x2ea   : > { %v10314_v12 = vpop.f32.mrf.mxu0  ;;  %v10439_v29 = vpop.f32.mrf.mxu1  ;;  %10887 = vmatprep.subr.mxu0 %v3987_v13  ;;  %10675 = vmatprep.subr.mxu1 %v3251_v15  ;;  %v3248_v31 = vld [vmem:[#allocation9 + $0x90] sm:$0xff] }
 0x2eb   : > { %v14404_v45 = vadd.f32 %v2622_v56, %v2478_v20  ;;  %10888 = vmatpush3.msra.mxu0 %v3987_v13  ;;  %10676 = vmatpush3.msra.mxu1 %v3251_v15 }
 0x2ec   : > { %v2329_v7 = vpop.f32.mrf.mxu0  ;;  %10617 = vmatmul.mubr.f32.gmra.mxu0 %v2825_v32  ;;  %v2627_v30 = vpop.f32.mrf.mxu1  ;;  %10889 = vmatprep.subr.mxu0 %v3986_v63  ;;  %v3983_v32 = vld [vmem:[#allocation9 + $0x1b0] sm:$0xff] }
 0x2ed   : > { %v2479_v41 = vadd.f32 %v2329_v7, %v14190_v51  ;;  %10619 = vmatprep.mubr.msk.f32.mxu0 %vm12747_vm0, %v15714_v0  ;;  %v3250_v51 = vld [vmem:[#allocation9 + $0xa0] sm:$0xff]  ;;  %10890 = vmatpush3.msra.mxu0 %v3986_v63  ;;  %v3982_v7 = vld [vmem:[#allocation9 + $0x1a8] sm:$0xff]  ;;  %v2830_v63 = vld [vmem:[%s12979_s28 + $0xda] sm:$0xff] }
 0x2ee   : > { %v10317_v8 = vpop.f32.mrf.mxu0  ;;  %v10442_v33 = vpop.f32.mrf.mxu1  ;;  %10677 = vmatprep.subr.mxu1 %v3250_v51  ;;  %10891 = vmatprep.subr.mxu0 %v3985_v42 }
 0x2ef   : > { %v14410_v23 = vadd.f32 %v2627_v30, %v2479_v41  ;;  %10678 = vmatpush3.msra.mxu1 %v3250_v51  ;;  %10892 = vmatpush3.msra.mxu0 %v3985_v42 }
 0x2f0   : > { %v2334_v53 = vpop.f32.mrf.mxu0  ;;  %10620 = vmatmul.mubr.f32.gmra.mxu0 %v2826_v27  ;;  %v2632_v44 = vpop.f32.mrf.mxu1  ;;  %10679 = vmatprep.subr.mxu1 %v3249_v26  ;;  %v3246_v27 = vld [vmem:[#allocation9 + $0x80] sm:$0xff] }
 0x2f1   : > { %v2480_v61 = vadd.f32 %v2334_v53, %v14199_v58  ;;  %10622 = vmatprep.mubr.msk.f32.mxu0 %vm12747_vm0, %v15714_v0  ;;  %v3984_v58 = vld [vmem:[#allocation9 + $0x1b8] sm:$0xff]  ;;  %10680 = vmatpush3.msra.mxu1 %v3249_v26 }
 0x2f2   : > { %v10320_v54 = vpop.f32.mrf.mxu0  ;;  %v10445_v4 = vpop.f32.mrf.mxu1  ;;  %10893 = vmatprep.subr.mxu0 %v3984_v58  ;;  %10681 = vmatprep.subr.mxu1 %v3248_v31 }
 0x2f3   : > { %v14416_v47 = vadd.f32 %v2632_v44, %v2480_v61  ;;  %10894 = vmatpush3.msra.mxu0 %v3984_v58  ;;  %10682 = vmatpush3.msra.mxu1 %v3248_v31  ;;  %v3980_v61 = vld [vmem:[#allocation9 + $0x198] sm:$0xff]  ;;  %v3979_v4 = vld [vmem:[#allocation9 + $0x190] sm:$0xff]  ;;  %v3978_v58 = vld [vmem:[#allocation9 + $0x188] sm:$0xff] }
 0x2f4   : > { %v2339_v10 = vpop.f32.mrf.mxu0  ;;  %10623 = vmatmul.mubr.f32.gmra.mxu0 %v2827_v60  ;;  %v2637_v5 = vpop.f32.mrf.mxu1  ;;  %10895 = vmatprep.subr.mxu0 %v3983_v32  ;;  %v2831_v54 = vld [vmem:[%s12979_s28 + $0xe2] sm:$0xff]  ;;  %v2832_v31 = vld [vmem:[%s12979_s28 + $0xea] sm:$0xff] }
 0x2f5   : > { %v2481_v14 = vadd.f32 %v2339_v10, %v14208_v48  ;;  %10625 = vmatprep.mubr.msk.f32.mxu0 %vm12747_vm0, %v15714_v0  ;;  %v3247_v48 = vld [vmem:[#allocation9 + $0x88] sm:$0xff]  ;;  %10896 = vmatpush3.msra.mxu0 %v3983_v32 }
 0x2f6   : > { %v10323_v56 = vpop.f32.mrf.mxu0  ;;  %v10448_v17 = vpop.f32.mrf.mxu1  ;;  %10683 = vmatprep.subr.mxu1 %v3247_v48  ;;  %10897 = vmatprep.subr.mxu0 %v3982_v7 }
 0x2f7   : > { %v14422_v20 = vadd.f32 %v2637_v5, %v2481_v14  ;;  %10684 = vmatpush3.msra.mxu1 %v3247_v48  ;;  %10898 = vmatpush3.msra.mxu0 %v3982_v7  ;;  %v3977_v56 = vld [vmem:[#allocation9 + $0x180] sm:$0xff] }
 0x2f8   : > { %v2344_v52 = vpop.f32.mrf.mxu0  ;;  %10626 = vmatmul.mubr.f32.gmra.mxu0 %v2828_v49  ;;  %v2642_v12 = vpop.f32.mrf.mxu1  ;;  %10685 = vmatprep.subr.mxu1 %v3246_v27 }
 0x2f9   : > { %v2482_v29 = vadd.f32 %v2344_v52, %v14217_v24  ;;  %10628 = vmatprep.mubr.msk.f32.mxu0 %vm12747_vm0, %v15714_v0  ;;  %v3981_v24 = vld [vmem:[#allocation9 + $0x1a0] sm:$0xff]  ;;  %10686 = vmatpush3.msra.mxu1 %v3246_v27 }
 0x2fa   : > { %v10326_v30 = vpop.f32.mrf.mxu0  ;;  %v10451_v13 = vpop.f32.mrf.mxu1  ;;  %10899 = vmatprep.subr.mxu0 %v3981_v24 }
 0x2fb   : > { %v14428_v41 = vadd.f32 %v2642_v12, %v2482_v29  ;;  %10900 = vmatpush3.msra.mxu0 %v3981_v24  ;;  %v2833_v29 = vld [vmem:[%s12979_s28 + $0xf2] sm:$0xff] }
 0x2fc   : > { %v2349_v15 = vpop.f32.mrf.mxu0  ;;  %10629 = vmatmul.mubr.f32.gmra.mxu0 %v2829_v9  ;;  %v2647_v8 = vpop.f32.mrf.mxu1  ;;  %10901 = vmatprep.subr.mxu0 %v3980_v61 }
 0x2fd   : > { %v2483_v33 = vadd.f32 %v2349_v15, %v14226_v18  ;;  %10631 = vmatprep.mubr.msk.f32.mxu0 %vm12747_vm0, %v15714_v0  ;;  %10902 = vmatpush3.msra.mxu0 %v3980_v61  ;;  %v2835_v61 = vld [vmem:[%s12979_s28 + $0x102] sm:$0xff] }
 0x2fe   : > { %v10329_v53 = vpop.f32.mrf.mxu0  ;;  %v10454_v44 = vpop.f32.mrf.mxu1  ;;  %10903 = vmatprep.subr.mxu0 %v3979_v4 }
 0x2ff   : > { %v14434_v51 = vadd.f32 %v2647_v8, %v2483_v33  ;;  %10904 = vmatpush3.msra.mxu0 %v3979_v4 }
 0x300   : > { %v2354_v60 = vpop.f32.mrf.mxu0  ;;  %10632 = vmatmul.mubr.f32.gmra.mxu0 %v2830_v63  ;;  %v2652_v42 = vpop.f32.mrf.mxu1  ;;  %10905 = vmatprep.subr.mxu0 %v3978_v58 }
 0x301   : > { %v2484_v18 = vadd.f32 %v2354_v60, %v14235_v21  ;;  %10634 = vmatprep.mubr.msk.f32.mxu0 %vm12747_vm0, %v15714_v0  ;;  %10906 = vmatpush3.msra.mxu0 %v3978_v58 }
 0x302   : > { %v10332_v26 = vpop.f32.mrf.mxu0  ;;  %v10457_v10 = vpop.f32.mrf.mxu1  ;;  %10907 = vmatprep.subr.mxu0 %v3977_v56 }
 0x303   : > { %v14440_v5 = vadd.f32 %v2652_v42, %v2484_v18  ;;  %10908 = vmatpush3.msra.mxu0 %v3977_v56  ;;  %v2836_v26 = vld [vmem:[%s12979_s28 + $0x10a] sm:$0xff] }
 0x304   : > { %v2359_v14 = vpop.f32.mrf.mxu0  ;;  %10635 = vmatmul.mubr.f32.gmra.mxu0 %v2831_v54  ;;  %v2657_v49 = vpop.f32.mrf.mxu1  ;;  %11058 = vmatprep.subr.mxu0 %v15714_v0 }
 0x305   : > { %v2485_v21 = vadd.f32 %v2359_v14, %v14244_v28  ;;  %10637 = vmatprep.mubr.msk.f32.mxu0 %vm12747_vm0, %v15714_v0 }
 0x306   : > { %v10335_v17 = vpop.f32.mrf.mxu0  ;;  %v10460_v32 = vpop.f32.mrf.mxu1 }
 0x307   : > { %v14446_v52 = vadd.f32 %v2657_v49, %v2485_v21 }
 0x308   : > { %v2364_v12 = vpop.f32.mrf.mxu0  ;;  %10638 = vmatmul.mubr.f32.gmra.mxu0 %v2832_v31  ;;  %v2662_v48 = vpop.f32.mrf.mxu1  ;;  %v2837_v31 = vld [vmem:[%s12979_s28 + $0x112] sm:$0xff] }
 0x309   : > { %v2486_v28 = vadd.f32 %v2364_v12, %v14253_v16  ;;  %10640 = vmatprep.mubr.msk.f32.mxu0 %vm12747_vm0, %v15714_v0  ;;  %v2834_v16 = vld [vmem:[%s12979_s28 + $0xfa] sm:$0xff] }
 0x30a   : > { %v10338_v9 = vpop.f32.mrf.mxu0  ;;  %v10463_v7 = vpop.f32.mrf.mxu1 }
 0x30b   : > { %v14453_v30 = vadd.f32 %v2662_v48, %v2486_v28 }
 0x30c   : > { %v2369_v13 = vpop.f32.mrf.mxu0  ;;  %10641 = vmatmul.mubr.f32.gmra.mxu0 %v2833_v29  ;;  %v2667_v27 = vpop.f32.mrf.mxu1 }
 0x30d   : > { %v2487_v15 = vadd.f32 %v2369_v13, %v14262_v3  ;;  %10643 = vmatprep.mubr.msk.f32.mxu0 %vm12747_vm0, %v15714_v0 }
 0x30e   : > { %v10341_v8 = vpop.f32.mrf.mxu0  ;;  %v10466_v24 = vpop.f32.mrf.mxu1 }
 0x30f   : > { %v14459_v33 = vadd.f32 %v2667_v27, %v2487_v15 }
 0x310   : > { %v2374_v63 = vpop.f32.mrf.mxu0  ;;  %10644 = vmatmul.mubr.f32.gmra.mxu0 %v2834_v16  ;;  %v2672_v53 = vpop.f32.mrf.mxu1 }
 0x311   : > { %v2488_v44 = vadd.f32 %v2374_v63, %v14271_v38  ;;  %10646 = vmatprep.mubr.msk.f32.mxu0 %vm12747_vm0, %v15714_v0 }
 0x312   : > { %v10344_v60 = vpop.f32.mrf.mxu0  ;;  %v10469_v3 = vpop.f32.mrf.mxu1 }
 0x313   : > { %v14465_v42 = vadd.f32 %v2672_v53, %v2488_v44 }
 0x314   : > { %v2379_v18 = vpop.f32.mrf.mxu0  ;;  %10647 = vmatmul.mubr.f32.gmra.mxu0 %v2835_v61  ;;  %v2677_v54 = vpop.f32.mrf.mxu1 }
 0x315   : > { %v2489_v4 = vadd.f32 %v2379_v18, %v14281_v25  ;;  %10649 = vmatprep.mubr.msk.f32.mxu0 %vm12747_vm0, %v15714_v0 }
 0x316   : > { %v10347_v10 = vpop.f32.mrf.mxu0  ;;  %v10472_v38 = vpop.f32.mrf.mxu1 }
 0x317   : > { %v14471_v58 = vadd.f32 %v2677_v54, %v2489_v4 }
 0x318   : > { %v2384_v14 = vpop.f32.mrf.mxu0  ;;  %10650 = vmatmul.mubr.f32.gmra.mxu0 %v2836_v26  ;;  %v2682_v49 = vpop.f32.mrf.mxu1 }
 0x319   : > { %v2490_v21 = vadd.f32 %v2384_v14, %v14290_v22  ;;  %10652 = vmatprep.mubr.msk.f32.mxu0 %vm12747_vm0, %v15714_v0 }
 0x31a   : > { %v10350_v56 = vpop.f32.mrf.mxu0  ;;  %v10475_v17 = vpop.f32.mrf.mxu1 }
 0x31b   : > { %v14477_v25 = vadd.f32 %v2682_v49, %v2490_v21 }
 0x31c   : > { %v2389_v32 = vpop.f32.mrf.mxu0  ;;  %10653 = vmatmul.mubr.f32.gmra.mxu0 %v2837_v31  ;;  %v2687_v12 = vpop.f32.mrf.mxu1 }
 0x31d   : > { %v2491_v48 = vadd.f32 %v2389_v32, %v14296_v55 }
 0x31e   : > { %v10353_v28 = vpop.f32.mrf.mxu0  ;;  %v10478_v29 = vpop.f32.mrf.mxu1 }
 0x31f   : > { %v14480_v9 = vadd.f32 %v2687_v12, %v2491_v48 }
 0x320   : > { %v2394_v7 = vpop.f32.mrf.mxu0  ;;  %v2692_v13 = vpop.f32.mrf.mxu1 }
 0x321   : > { %v2492_v22 = vadd.f32 %v2394_v7, %v14302_v57 }
 0x322   : > { %v10356_v27 = vpop.f32.mrf.mxu0  ;;  %v10481_v15 = vpop.f32.mrf.mxu1 }
 0x323   : > { %v14483_v16 = vadd.f32 %v2692_v13, %v2492_v22 }
 0x324   : > { %v2399_v8 = vpop.f32.mrf.mxu0  ;;  %v2697_v24 = vpop.f32.mrf.mxu1 }
 0x325   : > { %v2493_v63 = vadd.f32 %v2399_v8, %v14308_v59 }
 0x326   : > { %v10359_v53 = vpop.f32.mrf.mxu0  ;;  %v10484_v44 = vpop.f32.mrf.mxu1 }
 0x327   : > { %v14486_v61 = vadd.f32 %v2697_v24, %v2493_v63 }
 0x328   : > { %v2404_v55 = vpop.f32.mrf.mxu0  ;;  %v2702_v60 = vpop.f32.mrf.mxu1 }
 0x329   : > { %v2494_v3 = vadd.f32 %v2404_v55, %v14314_v39 }
 0x32a   : > { %v10362_v18 = vpop.f32.mrf.mxu0  ;;  %v10487_v54 = vpop.f32.mrf.mxu1 }
 0x32b   : > { %v14489_v4 = vadd.f32 %v2702_v60, %v2494_v3 }
 0x32c   : > { %v2409_v57 = vpop.f32.mrf.mxu0  ;;  %v2707_v26 = vpop.f32.mrf.mxu1 }
 0x32d   : > { %v2495_v10 = vadd.f32 %v2409_v57, %v14320_v1 }
 0x32e   : > { %v10365_v38 = vpop.f32.mrf.mxu0  ;;  %v10490_v14 = vpop.f32.mrf.mxu1 }
 0x32f   : > { %v14492_v49 = vadd.f32 %v2707_v26, %v2495_v10  ;;  %v14509_v10 = vld [vmem:[#allocation9 + $0x78] sm:$0xff] }
 0x330   : > { %v2414_v59 = vpop.f32.mrf.mxu0  ;;  %v2712_v21 = vpop.f32.mrf.mxu1  ;;  %10729 = vmatprep.subr.mxu1 %v14509_v10 }
 0x331   : > { %v2496_v31 = vadd.f32 %v2414_v59, %v14326_v46 }
 0x332   : > { %v10368_v56 = vpop.f32.mrf.mxu0  ;;  %v10493_v17 = vpop.f32.mrf.mxu1 }
 0x333   : > { %v14495_v32 = vadd.f32 %v2712_v21, %v2496_v31 }
 0x334   : > { %v2419_v39 = vpop.f32.mrf.mxu0  ;;  %v2717_v12 = vpop.f32.mrf.mxu1 }
 0x335   : > { %v2497_v48 = vadd.f32 %v2419_v39, %v14332_v43 }
 0x336   : > { %v10371_v28 = vpop.f32.mrf.mxu0  ;;  %v10496_v29 = vpop.f32.mrf.mxu1 }
 0x337   : > { %v14498_v7 = vadd.f32 %v2717_v12, %v2497_v48 }
 0x338   : > { %v2424_v1 = vpop.f32.mrf.mxu0  ;;  %v2722_v13 = vpop.f32.mrf.mxu1 }
 0x339   : > { %v2498_v22 = vadd.f32 %v2424_v1, %v14338_v35 }
 0x33a   : > { %v10374_v27 = vpop.f32.mrf.mxu0  ;;  %v10499_v15 = vpop.f32.mrf.mxu1 }
 0x33b   : > { %v14501_v8 = vadd.f32 %v2722_v13, %v2498_v22 }
 0x33c   : > { %v2429_v46 = vpop.f32.mrf.mxu0  ;;  %v2727_v24 = vpop.f32.mrf.mxu1 }
 0x33d   : > { %v2499_v63 = vadd.f32 %v2429_v46, %v14344_v6 }
 0x33e   : > { %v10377_v53 = vpop.f32.mrf.mxu0  ;;  %v10502_v44 = vpop.f32.mrf.mxu1 }
 0x33f   : > { %v14504_v55 = vadd.f32 %v2727_v24, %v2499_v63 }
 0x340   : > { %v2434_v43 = vpop.f32.mrf.mxu0  ;;  %v2732_v60 = vpop.f32.mrf.mxu1 }
 0x341   : > { %v2500_v3 = vadd.f32 %v2434_v43, %v14350_v36 }
 0x342   : > { %v10380_v18 = vpop.f32.mrf.mxu0  ;;  %v10505_v54 = vpop.f32.mrf.mxu1 }
 0x343   : > { %v14507_v57 = vadd.f32 %v2732_v60, %v2500_v3 }
 0x344   : > { %v2439_v35 = vpop.f32.mrf.mxu0  ;;  %v2737_v26 = vpop.f32.mrf.mxu1 }
 0x345   : > { %v2501_v38 = vadd.f32 %v2439_v35, %v14356_v50 }
 0x346   : > { %v10383_v6 = vpop.f32.mrf.mxu0  ;;  %v10508_v14 = vpop.f32.mrf.mxu1 }
 0x347   : > { %v14513_v59 = vadd.f32 %v2737_v26, %v2501_v38 }
 0x348   : > { %v2444_v21 = vpop.f32.mrf.mxu0  ;;  %v2742_v31 = vpop.f32.mrf.mxu1 }
 0x349   : > { %v2502_v36 = vadd.f32 %v2444_v21, %v14362_v34 }
 0x34a   : > { %v10386_v56 = vpop.f32.mrf.mxu0  ;;  %v10511_v17 = vpop.f32.mrf.mxu1 }
 0x34b   : > { %v14516_v39 = vadd.f32 %v2742_v31, %v2502_v36 }
 0x34c   : > { %v2449_v12 = vpop.f32.mrf.mxu0  ;;  %v2747_v48 = vpop.f32.mrf.mxu1 }
 0x34d   : > { %v2503_v28 = vadd.f32 %v2449_v12, %v14368_v62 }
 0x34e   : > { %v10389_v29 = vpop.f32.mrf.mxu0  ;;  %v10514_v50 = vpop.f32.mrf.mxu1 }
 0x34f   : > { %v14519_v1 = vadd.f32 %v2747_v48, %v2503_v28  ;;  %v14536_v28 = vld [vmem:[#allocation7] ss:$0 sm:$0xff] }
 0x350   : > { %v2454_v13 = vpop.f32.mrf.mxu0  ;;  %v2752_v22 = vpop.f32.mrf.mxu1 }
 0x351   : > { %v2504_v27 = vadd.f32 %v2454_v13, %v14374_v19 }
 0x352   : > { %v10392_v15 = vpop.f32.mrf.mxu0  ;;  %v10517_v46 = vpop.f32.mrf.mxu1 }
 0x353   : > { %v14522_v24 = vadd.f32 %v2752_v22, %v2504_v27 }
 0x354   : > { %v2459_v34 = vpop.f32.mrf.mxu0  ;;  %v2757_v63 = vpop.f32.mrf.mxu1 }
 0x355   : > { %v2505_v53 = vadd.f32 %v2459_v34, %v14380_v11 }
 0x356   : > { %v10395_v44 = vpop.f32.mrf.mxu0  ;;  %v10520_v43 = vpop.f32.mrf.mxu1 }
 0x357   : > { %v14525_v60 = vadd.f32 %v2757_v63, %v2505_v53 }
 0x358   : > { %v2464_v62 = vpop.f32.mrf.mxu0  ;;  %v2762_v3 = vpop.f32.mrf.mxu1 }
 0x359   : > { %v2506_v18 = vadd.f32 %v2464_v62, %v14386_v40 }
 0x35a   : > { %v10398_v54 = vpop.f32.mrf.mxu0  ;;  %v10523_v35 = vpop.f32.mrf.mxu1 }
 0x35b   : > { %v14528_v26 = vadd.f32 %v2762_v3, %v2506_v18 }
 0x35c   : > { %v2469_v19 = vpop.f32.mrf.mxu0  ;;  %v2767_v38 = vpop.f32.mrf.mxu1 }
 0x35d   : > { %v2507_v6 = vadd.f32 %v2469_v19, %v14392_v2  ;;  %v3216_v19 = vld [vmem:[#allocation9 + $0x70] sm:$0xff] }
 0x35e   : > { %v10401_v14 = vpop.f32.mrf.mxu0  ;;  %v10526_v21 = vpop.f32.mrf.mxu1 }
 0x35f   : > { %v14531_v31 = vadd.f32 %v2767_v38, %v2507_v6 }
 0x360   : > { %v2474_v11 = vpop.f32.mrf.mxu0  ;;  %v2772_v36 = vpop.f32.mrf.mxu1 }
 0x361   : > { %v2508_v56 = vadd.f32 %v2474_v11, %v14398_v37 }
 0x362   : > { %v10404_v17 = vpop.f32.mrf.mxu0  ;;  %v10529_v12 = vpop.f32.mrf.mxu1 }
 0x363   : > { %v14534_v48 = vadd.f32 %v2772_v36, %v2508_v56  ;;  %v3214_v36 = vld [vmem:[#allocation9 + $0x60] sm:$0xff]  ;;  %v3213_v12 = vld [vmem:[#allocation9 + $0x58] sm:$0xff] }
 0x364   : > { %v2920_v40 = vpop.f32.mrf.mxu0 }
 0x365   : > { %v3074_v29 = vadd.f32 %v2920_v40, %v14404_v45 }
 0x366   : > { %v10564_v50 = vpop.f32.mrf.mxu0 }
 0x367   : > { %v14540_v2 = vadd.f32 %v14536_v28, %v3074_v29  ;;  %v3212_v50 = vld [vmem:[#allocation9 + $0x50] sm:$0xff] }
 0x368   : > { %v2925_v13 = vpop.f32.mrf.mxu0 }
 0x369   : > { %3143 = vst [vmem:[#allocation2] sm:$0xff] %v14540_v2  ;;  %v3075_v22 = vadd.f32 %v2925_v13, %v14410_v23 }
 0x36a   : > { %v10567_v27 = vpop.f32.mrf.mxu0 }
 0x36b   : > { %v14545_v37 = vadd.f32 %v14536_v28, %v3075_v22 }
 0x36c   : > { %v2930_v15 = vpop.f32.mrf.mxu0 }
 0x36d   : > { %3144 = vst [vmem:[#allocation2 + $0x8] sm:$0xff] %v14545_v37  ;;  %v3076_v46 = vadd.f32 %v2930_v15, %v14416_v47  ;;  %v3211_v15 = vld [vmem:[#allocation9 + $0x48] sm:$0xff] }
 0x36e   : > { %v10570_v34 = vpop.f32.mrf.mxu0 }
 0x36f   : > { %v14550_v45 = vadd.f32 %v14536_v28, %v3076_v46 }
 0x370   : > { %v2935_v63 = vpop.f32.mrf.mxu0 }
 0x371   : > { %3145 = vst [vmem:[#allocation2 + $0x10] sm:$0xff] %v14550_v45  ;;  %v3077_v53 = vadd.f32 %v2935_v63, %v14422_v20 }
 0x372   : > { %v10573_v44 = vpop.f32.mrf.mxu0 }
 0x373   : > { %v14555_v23 = vadd.f32 %v14536_v28, %v3077_v53  ;;  %v3210_v53 = vld [vmem:[#allocation9 + $0x40] sm:$0xff] }
 0x374   : > { %v2940_v43 = vpop.f32.mrf.mxu0  ;;  %v3218_v62 = vld [vmem:[#allocation2 + $0x1] sm:$0xff] }
 0x375   : > { %3146 = vst [vmem:[#allocation2 + $0x18] sm:$0xff] %v14555_v23  ;;  %v3078_v3 = vadd.f32 %v2940_v43, %v14428_v41  ;;  %10687 = vmatprep.mubr.f32.mxu1 %v3218_v62  ;;  %v3215_v41 = vld [vmem:[#allocation9 + $0x68] sm:$0xff]  ;;  %v3209_v62 = vld [vmem:[#allocation9 + $0x38] sm:$0xff] }
 0x376   : > { %v10576_v47 = vpop.f32.mrf.mxu0 }
 0x377   : > { %v14560_v18 = vadd.f32 %v14536_v28, %v3078_v3 }
 0x378   : > { %v2945_v54 = vpop.f32.mrf.mxu0  ;;  %v3219_v35 = vld [vmem:[#allocation2 + $0x9] sm:$0xff] }
 0x379   : > { %3147 = vst [vmem:[#allocation2 + $0x20] sm:$0xff] %v14560_v18  ;;  %v3079_v20 = vadd.f32 %v2945_v54, %v14434_v51  ;;  %10688 = vmatmul.mubr.f32.vlgmr.msra.gmra.mxu1 %v3219_v35  ;;  %v3208_v35 = vld [vmem:[#allocation9 + $0x30] sm:$0xff] }
 0x37a   : > { %v10579_v38 = vpop.f32.mrf.mxu0  ;;  %10730 = vmatpush3.msra.mxu1 %v14509_v10 }
 0x37b   : > { %v14566_v6 = vadd.f32 %v14536_v28, %v3079_v20  ;;  %10731 = vmatprep.subr.mxu1 %v3216_v19 }
 0x37c   : > { %v2950_v14 = vpop.f32.mrf.mxu0  ;;  %v3220_v21 = vld [vmem:[#allocation2 + $0x11] sm:$0xff]  ;;  %10732 = vmatpush3.msra.mxu1 %v3216_v19 }
 0x37d   : > { %3148 = vst [vmem:[#allocation2 + $0x28] sm:$0xff] %v14566_v6  ;;  %v3080_v11 = vadd.f32 %v2950_v14, %v14440_v5  ;;  %10690 = vmatprep.mubr.f32.mxu1 %v3220_v21  ;;  %10909 = vmatprep.mubr.f32.mxu0 %v3220_v21 }
 0x37e   : > { %v10582_v51 = vpop.f32.mrf.mxu0  ;;  %10733 = vmatprep.subr.mxu1 %v3215_v41 }
 0x37f   : > { %v14571_v56 = vadd.f32 %v14536_v28, %v3080_v11  ;;  %10734 = vmatpush3.msra.mxu1 %v3215_v41  ;;  %v3207_v41 = vld [vmem:[#allocation9 + $0x28] sm:$0xff]  ;;  %v3206_v11 = vld [vmem:[#allocation9 + $0x20] sm:$0xff] }
 0x380   : > { %v2955_v10 = vpop.f32.mrf.mxu0  ;;  %v3221_v17 = vld [vmem:[#allocation2 + $0x19] sm:$0xff]  ;;  %10735 = vmatprep.subr.mxu1 %v3214_v36 }
 0x381   : > { %3149 = vst [vmem:[#allocation2 + $0x30] sm:$0xff] %v14571_v56  ;;  %v3081_v40 = vadd.f32 %v2955_v10, %v14446_v52  ;;  %10691 = vmatmul.mubr.f32.gmra.mxu1 %v3221_v17  ;;  %10910 = vmatmul.mubr.f32.vlgmr.msra.gmra.mxu0 %v3221_v17  ;;  %v3205_v17 = vld [vmem:[#allocation9 + $0x18] sm:$0xff] }
 0x382   : > { %v10585_v5 = vpop.f32.mrf.mxu0  ;;  %10736 = vmatpush3.msra.mxu1 %v3214_v36 }
 0x383   : > { %v14576_v29 = vadd.f32 %v14536_v28, %v3081_v40  ;;  %10737 = vmatprep.subr.mxu1 %v3213_v12 }
 0x384   : > { %v2960_v13 = vpop.f32.mrf.mxu0  ;;  %v3222_v22 = vld [vmem:[#allocation2 + $0x21] sm:$0xff]  ;;  %10738 = vmatpush3.msra.mxu1 %v3213_v12 }
 0x385   : > { %3150 = vst [vmem:[#allocation2 + $0x38] sm:$0xff] %v14576_v29  ;;  %v3082_v27 = vadd.f32 %v2960_v13, %v14453_v30  ;;  %10693 = vmatprep.mubr.f32.mxu1 %v3222_v22  ;;  %10912 = vmatprep.mubr.f32.mxu0 %v3222_v22 }
 0x386   : > { %v10588_v52 = vpop.f32.mrf.mxu0  ;;  %10739 = vmatprep.subr.mxu1 %v3212_v50 }
 0x387   : > { %v14581_v46 = vadd.f32 %v14536_v28, %v3082_v27  ;;  %10740 = vmatpush3.msra.mxu1 %v3212_v50  ;;  %v3204_v50 = vld [vmem:[#allocation9 + $0x10] sm:$0xff]  ;;  %v3203_v27 = vld [vmem:[#allocation9 + $0x8] sm:$0xff] }
 0x388   : > { %v2965_v34 = vpop.f32.mrf.mxu0  ;;  %v3223_v63 = vld [vmem:[#allocation2 + $0x29] sm:$0xff]  ;;  %10741 = vmatprep.subr.mxu1 %v3211_v15 }
 0x389   : > { %3151 = vst [vmem:[#allocation2 + $0x40] sm:$0xff] %v14581_v46  ;;  %v3083_v44 = vadd.f32 %v2965_v34, %v14459_v33  ;;  %10694 = vmatmul.mubr.f32.gmra.mxu1 %v3223_v63  ;;  %10913 = vmatmul.mubr.f32.gmra.mxu0 %v3223_v63  ;;  %v3202_v63 = vld [vmem:[#allocation9] sm:$0xff] }
 0x38a   : > { %v10591_v30 = vpop.f32.mrf.mxu0  ;;  %10742 = vmatpush3.msra.mxu1 %v3211_v15 }
 0x38b   : > { %v14586_v43 = vadd.f32 %v14536_v28, %v3083_v44  ;;  %10743 = vmatprep.subr.mxu1 %v3210_v53 }
 0x38c   : > { %v2970_v3 = vpop.f32.mrf.mxu0  ;;  %v3224_v47 = vld [vmem:[#allocation2 + $0x31] sm:$0xff]  ;;  %10744 = vmatpush3.msra.mxu1 %v3210_v53 }
 0x38d   : > { %3152 = vst [vmem:[#allocation2 + $0x48] sm:$0xff] %v14586_v43  ;;  %v3084_v54 = vadd.f32 %v2970_v3, %v14465_v42  ;;  %10696 = vmatprep.mubr.f32.mxu1 %v3224_v47  ;;  %10915 = vmatprep.mubr.f32.mxu0 %v3224_v47 }
 0x38e   : > { %v10594_v33 = vpop.f32.mrf.mxu0  ;;  %10745 = vmatprep.subr.mxu1 %v3209_v62 }
 0x38f   : > { %v14591_v19 = vadd.f32 %v14536_v28, %v3084_v54  ;;  %10746 = vmatpush3.msra.mxu1 %v3209_v62  ;;  %v14613_v62 = vld [vmem:[#allocation9 + $0x178] sm:$0xff] }
 0x390   : > { %v2975_v20 = vpop.f32.mrf.mxu0  ;;  %v3225_v38 = vld [vmem:[#allocation2 + $0x39] sm:$0xff]  ;;  %10747 = vmatprep.subr.mxu1 %v3208_v35 }
 0x391   : > { %3153 = vst [vmem:[#allocation2 + $0x50] sm:$0xff] %v14591_v19  ;;  %v3085_v14 = vadd.f32 %v2975_v20, %v14471_v58  ;;  %10697 = vmatmul.mubr.f32.gmra.mxu1 %v3225_v38  ;;  %10916 = vmatmul.mubr.f32.gmra.mxu0 %v3225_v38 }
 0x392   : > { %v10597_v42 = vpop.f32.mrf.mxu0  ;;  %10748 = vmatpush3.msra.mxu1 %v3208_v35 }
 0x393   : > { %v14596_v21 = vadd.f32 %v14536_v28, %v3085_v14  ;;  %10749 = vmatprep.subr.mxu1 %v3207_v41 }
 0x394   : > { %v2980_v36 = vpop.f32.mrf.mxu0  ;;  %v3226_v51 = vld [vmem:[#allocation2 + $0x41] sm:$0xff]  ;;  %10750 = vmatpush3.msra.mxu1 %v3207_v41 }
 0x395   : > { %3154 = vst [vmem:[#allocation2 + $0x58] sm:$0xff] %v14596_v21  ;;  %v3086_v10 = vadd.f32 %v2980_v36, %v14477_v25  ;;  %10699 = vmatprep.mubr.f32.mxu1 %v3226_v51  ;;  %10918 = vmatprep.mubr.f32.mxu0 %v3226_v51 }
 0x396   : > { %v10600_v58 = vpop.f32.mrf.mxu0  ;;  %10751 = vmatprep.subr.mxu1 %v3206_v11 }
 0x397   : > { %v14601_v12 = vadd.f32 %v14536_v28, %v3086_v10  ;;  %10752 = vmatpush3.msra.mxu1 %v3206_v11 }
 0x398   : > { %v2985_v40 = vpop.f32.mrf.mxu0  ;;  %v3227_v5 = vld [vmem:[#allocation2 + $0x49] sm:$0xff]  ;;  %10753 = vmatprep.subr.mxu1 %v3205_v17 }
 0x399   : > { %3155 = vst [vmem:[#allocation2 + $0x60] sm:$0xff] %v14601_v12  ;;  %v3087_v13 = vadd.f32 %v2985_v40, %v14480_v9  ;;  %10700 = vmatmul.mubr.f32.gmra.mxu1 %v3227_v5  ;;  %10919 = vmatmul.mubr.f32.gmra.mxu0 %v3227_v5 }
 0x39a   : > { %v10603_v25 = vpop.f32.mrf.mxu0  ;;  %10754 = vmatpush3.msra.mxu1 %v3205_v17 }
 0x39b   : > { %v14606_v22 = vadd.f32 %v14536_v28, %v3087_v13  ;;  %10755 = vmatprep.subr.mxu1 %v3204_v50 }
 0x39c   : > { %v2990_v15 = vpop.f32.mrf.mxu0  ;;  %v3228_v52 = vld [vmem:[#allocation2 + $0x51] sm:$0xff]  ;;  %10756 = vmatpush3.msra.mxu1 %v3204_v50 }
 0x39d   : > { %3156 = vst [vmem:[#allocation2 + $0x68] sm:$0xff] %v14606_v22  ;;  %v3088_v34 = vadd.f32 %v2990_v15, %v14483_v16  ;;  %10702 = vmatprep.mubr.f32.mxu1 %v3228_v52  ;;  %10921 = vmatprep.mubr.f32.mxu0 %v3228_v52 }
 0x39e   : > { %v10606_v9 = vpop.f32.mrf.mxu0  ;;  %10757 = vmatprep.subr.mxu1 %v3203_v27 }
 0x39f   : > { %v14611_v53 = vadd.f32 %v14536_v28, %v3088_v34  ;;  %10758 = vmatpush3.msra.mxu1 %v3203_v27 }
 0x3a0   : > { %v2995_v44 = vpop.f32.mrf.mxu0  ;;  %v3229_v30 = vld [vmem:[#allocation2 + $0x59] sm:$0xff]  ;;  %10759 = vmatprep.subr.mxu1 %v3202_v63 }
 0x3a1   : > { %3157 = vst [vmem:[#allocation2 + $0x70] sm:$0xff] %v14611_v53  ;;  %v3089_v3 = vadd.f32 %v2995_v44, %v14486_v61  ;;  %10703 = vmatmul.mubr.f32.gmra.mxu1 %v3229_v30  ;;  %10922 = vmatmul.mubr.f32.gmra.mxu0 %v3229_v30 }
 0x3a2   : > { %v10609_v16 = vpop.f32.mrf.mxu0  ;;  %10760 = vmatpush3.msra.mxu1 %v3202_v63 }
 0x3a3   : > { %v14618_v47 = vadd.f32 %v14536_v28, %v3089_v3  ;;  %10803 = vmatprep.subr.mxu1 %v14613_v62 }
 0x3a4   : > { %v3000_v54 = vpop.f32.mrf.mxu0  ;;  %v3230_v35 = vld [vmem:[#allocation2 + $0x61] sm:$0xff] }
 0x3a5   : > { %3158 = vst [vmem:[#allocation2 + $0x78] sm:$0xff] %v14618_v47  ;;  %v3090_v33 = vadd.f32 %v3000_v54, %v14489_v4  ;;  %10705 = vmatprep.mubr.f32.mxu1 %v3230_v35  ;;  %10924 = vmatprep.mubr.f32.mxu0 %v3230_v35 }
 0x3a6   : > { %v10612_v20 = vpop.f32.mrf.mxu0 }
 0x3a7   : > { %v14624_v61 = vadd.f32 %v14536_v28, %v3090_v33 }
 0x3a8   : > { %v3005_v38 = vpop.f32.mrf.mxu0  ;;  %v3231_v41 = vld [vmem:[#allocation2 + $0x69] sm:$0xff] }
 0x3a9   : > { %3159 = vst [vmem:[#allocation2 + $0x80] sm:$0xff] %v14624_v61  ;;  %v3091_v14 = vadd.f32 %v3005_v38, %v14492_v49  ;;  %10706 = vmatmul.mubr.f32.gmra.mxu1 %v3231_v41  ;;  %10925 = vmatmul.mubr.f32.gmra.mxu0 %v3231_v41 }
 0x3aa   : > { %v10615_v42 = vpop.f32.mrf.mxu0 }
 0x3ab   : > { %v14629_v11 = vadd.f32 %v14536_v28, %v3091_v14 }
 0x3ac   : > { %v3010_v36 = vpop.f32.mrf.mxu0  ;;  %v3232_v4 = vld [vmem:[#allocation2 + $0x71] sm:$0xff] }
 0x3ad   : > { %3160 = vst [vmem:[#allocation2 + $0x88] sm:$0xff] %v14629_v11  ;;  %v3092_v51 = vadd.f32 %v3010_v36, %v14495_v32  ;;  %10708 = vmatprep.mubr.f32.mxu1 %v3232_v4  ;;  %10927 = vmatprep.mubr.f32.mxu0 %v3232_v4 }
 0x3ae   : > { %v10618_v10 = vpop.f32.mrf.mxu0 }
 0x3af   : > { %v14634_v17 = vadd.f32 %v14536_v28, %v3092_v51 }
 0x3b0   : > { %v3015_v58 = vpop.f32.mrf.mxu0  ;;  %v3233_v49 = vld [vmem:[#allocation2 + $0x79] sm:$0xff] }
 0x3b1   : > { %3161 = vst [vmem:[#allocation2 + $0x90] sm:$0xff] %v14634_v17  ;;  %v3093_v40 = vadd.f32 %v3015_v58, %v14498_v7  ;;  %10709 = vmatmul.mubr.f32.gmra.mxu1 %v3233_v49  ;;  %10928 = vmatmul.mubr.f32.gmra.mxu0 %v3233_v49 }
 0x3b2   : > { %v10621_v5 = vpop.f32.mrf.mxu0 }
 0x3b3   : > { %v14639_v50 = vadd.f32 %v14536_v28, %v3093_v40 }
 0x3b4   : > { %v3020_v13 = vpop.f32.mrf.mxu0  ;;  %v3234_v32 = vld [vmem:[#allocation2 + $0x81] sm:$0xff] }
 0x3b5   : > { %3162 = vst [vmem:[#allocation2 + $0x98] sm:$0xff] %v14639_v50  ;;  %v3094_v25 = vadd.f32 %v3020_v13, %v14501_v8  ;;  %10711 = vmatprep.mubr.f32.mxu1 %v3234_v32  ;;  %10930 = vmatprep.mubr.f32.mxu0 %v3234_v32 }
 0x3b6   : > { %v10624_v27 = vpop.f32.mrf.mxu0 }
 0x3b7   : > { %v14644_v15 = vadd.f32 %v14536_v28, %v3094_v25 }
 0x3b8   : > { %v3025_v52 = vpop.f32.mrf.mxu0  ;;  %v3235_v7 = vld [vmem:[#allocation2 + $0x89] sm:$0xff] }
 0x3b9   : > { %3163 = vst [vmem:[#allocation2 + $0xa0] sm:$0xff] %v14644_v15  ;;  %v3095_v34 = vadd.f32 %v3025_v52, %v14504_v55  ;;  %10712 = vmatmul.mubr.f32.gmra.mxu1 %v3235_v7  ;;  %10931 = vmatmul.mubr.f32.gmra.mxu0 %v3235_v7 }
 0x3ba   : > { %v10627_v63 = vpop.f32.mrf.mxu0 }
 0x3bb   : > { %v14649_v9 = vadd.f32 %v14536_v28, %v3095_v34 }
 0x3bc   : > { %v3030_v44 = vpop.f32.mrf.mxu0  ;;  %v3236_v8 = vld [vmem:[#allocation2 + $0x91] sm:$0xff] }
 0x3bd   : > { %3164 = vst [vmem:[#allocation2 + $0xa8] sm:$0xff] %v14649_v9  ;;  %v3096_v30 = vadd.f32 %v3030_v44, %v14507_v57  ;;  %10714 = vmatprep.mubr.f32.mxu1 %v3236_v8  ;;  %10933 = vmatprep.mubr.f32.mxu0 %v3236_v8 }
 0x3be   : > { %v10630_v3 = vpop.f32.mrf.mxu0 }
 0x3bf   : > { %v14654_v16 = vadd.f32 %v14536_v28, %v3096_v30 }
 0x3c0   : > { %v3035_v54 = vpop.f32.mrf.mxu0  ;;  %v3237_v55 = vld [vmem:[#allocation2 + $0x99] sm:$0xff] }
 0x3c1   : > { %3165 = vst [vmem:[#allocation2 + $0xb0] sm:$0xff] %v14654_v16  ;;  %v3097_v35 = vadd.f32 %v3035_v54, %v14513_v59  ;;  %10715 = vmatmul.mubr.f32.gmra.mxu1 %v3237_v55  ;;  %10934 = vmatmul.mubr.f32.gmra.mxu0 %v3237_v55 }
 0x3c2   : > { %v10633_v33 = vpop.f32.mrf.mxu0 }
 0x3c3   : > { %v14659_v20 = vadd.f32 %v14536_v28, %v3097_v35 }
 0x3c4   : > { %v3040_v38 = vpop.f32.mrf.mxu0  ;;  %v3238_v57 = vld [vmem:[#allocation2 + $0xa1] sm:$0xff] }
 0x3c5   : > { %3166 = vst [vmem:[#allocation2 + $0xb8] sm:$0xff] %v14659_v20  ;;  %v3098_v41 = vadd.f32 %v3040_v38, %v14516_v39  ;;  %10717 = vmatprep.mubr.f32.mxu1 %v3238_v57  ;;  %10936 = vmatprep.mubr.f32.mxu0 %v3238_v57  ;;  %v3714_v57 = vld [vmem:[#allocation9 + $0x170] sm:$0xff] }
 0x3c6   : > { %v10636_v14 = vpop.f32.mrf.mxu0 }
 0x3c7   : > { %v14664_v42 = vadd.f32 %v14536_v28, %v3098_v41  ;;  %v3708_v14 = vld [vmem:[#allocation9 + $0x140] sm:$0xff] }
 0x3c8   : > { %v3045_v36 = vpop.f32.mrf.mxu0  ;;  %v3239_v59 = vld [vmem:[#allocation2 + $0xa9] sm:$0xff] }
 0x3c9   : > { %3167 = vst [vmem:[#allocation2 + $0xc0] sm:$0xff] %v14664_v42  ;;  %v3099_v4 = vadd.f32 %v3045_v36, %v14519_v1  ;;  %10718 = vmatmul.mubr.f32.gmra.mxu1 %v3239_v59  ;;  %10937 = vmatmul.mubr.f32.gmra.mxu0 %v3239_v59  ;;  %v3707_v36 = vld [vmem:[#allocation9 + $0x138] sm:$0xff]  ;;  %v3706_v59 = vld [vmem:[#allocation9 + $0x130] sm:$0xff] }
 0x3ca   : > { %v10639_v51 = vpop.f32.mrf.mxu0 }
 0x3cb   : > { %v14669_v10 = vadd.f32 %v14536_v28, %v3099_v4  ;;  %v3705_v4 = vld [vmem:[#allocation9 + $0x128] sm:$0xff]  ;;  %v3704_v51 = vld [vmem:[#allocation9 + $0x120] sm:$0xff] }
 0x3cc   : > { %v3050_v58 = vpop.f32.mrf.mxu0  ;;  %v3240_v39 = vld [vmem:[#allocation2 + $0xb1] sm:$0xff] }
 0x3cd   : > { %3168 = vst [vmem:[#allocation2 + $0xc8] sm:$0xff] %v14669_v10  ;;  %v3100_v49 = vadd.f32 %v3050_v58, %v14522_v24  ;;  %10720 = vmatprep.mubr.f32.mxu1 %v3240_v39  ;;  %10939 = vmatprep.mubr.f32.mxu0 %v3240_v39  ;;  %v3703_v58 = vld [vmem:[#allocation9 + $0x118] sm:$0xff]  ;;  %v3702_v39 = vld [vmem:[#allocation9 + $0x110] sm:$0xff] }
 0x3ce   : > { %v10642_v40 = vpop.f32.mrf.mxu0 }
 0x3cf   : > { %v14674_v5 = vadd.f32 %v14536_v28, %v3100_v49  ;;  %v3701_v49 = vld [vmem:[#allocation9 + $0x108] sm:$0xff]  ;;  %v3700_v40 = vld [vmem:[#allocation9 + $0x100] sm:$0xff] }
 0x3d0   : > { %v3055_v13 = vpop.f32.mrf.mxu0  ;;  %v3241_v1 = vld [vmem:[#allocation2 + $0xb9] sm:$0xff] }
 0x3d1   : > { %3169 = vst [vmem:[#allocation2 + $0xd0] sm:$0xff] %v14674_v5  ;;  %v3101_v32 = vadd.f32 %v3055_v13, %v14525_v60  ;;  %10721 = vmatmul.mubr.f32.gmra.mxu1 %v3241_v1  ;;  %10940 = vmatmul.mubr.f32.gmra.mxu0 %v3241_v1  ;;  %v4317_v13 = vld [vmem:[#allocation12 + $0x18] sm:$0xff] }
 0x3d2   : > { %v10645_v25 = vpop.f32.mrf.mxu0 }
 0x3d3   : > { %v14679_v27 = vadd.f32 %v14536_v28, %v3101_v32  ;;  %v4361_v32 = vld [vmem:[#allocation12 + $0xb0] sm:$0xff] }
 0x3d4   : > { %v3060_v52 = vpop.f32.mrf.mxu0  ;;  %v3242_v24 = vld [vmem:[#allocation2 + $0xc1] sm:$0xff] }
 0x3d5   : > { %3170 = vst [vmem:[#allocation2 + $0xd8] sm:$0xff] %v14679_v27  ;;  %v3102_v7 = vadd.f32 %v3060_v52, %v14528_v26  ;;  %10723 = vmatprep.mubr.f32.mxu1 %v3242_v24  ;;  %10942 = vmatprep.mubr.f32.mxu0 %v3242_v24  ;;  %v4316_v25 = vld [vmem:[#allocation12 + $0x10] sm:$0xff]  ;;  %v4315_v52 = vld [vmem:[#allocation12 + $0x8] sm:$0xff] }
 0x3d6   : > { %v10648_v34 = vpop.f32.mrf.mxu0 }
 0x3d7   : > { %v14684_v63 = vadd.f32 %v14536_v28, %v3102_v7  ;;  %v4359_v7 = vld [vmem:[#allocation12 + $0xa0] sm:$0xff] }
 0x3d8   : > { %v3065_v44 = vpop.f32.mrf.mxu0  ;;  %v3243_v60 = vld [vmem:[#allocation2 + $0xc9] sm:$0xff] }
 0x3d9   : > { %3171 = vst [vmem:[#allocation2 + $0xe0] sm:$0xff] %v14684_v63  ;;  %v3103_v8 = vadd.f32 %v3065_v44, %v14531_v31  ;;  %10724 = vmatmul.mubr.f32.gmra.mxu1 %v3243_v60  ;;  %10943 = vmatmul.mubr.f32.gmra.mxu0 %v3243_v60  ;;  %v4314_v34 = vld [vmem:[#allocation12] sm:$0xff]  ;;  %v4358_v44 = vld [vmem:[#allocation12 + $0x98] sm:$0xff]  ;;  %v4357_v60 = vld [vmem:[#allocation12 + $0x90] sm:$0xff] }
 0x3da   : > { %v10651_v30 = vpop.f32.mrf.mxu0 }
 0x3db   : > { %v14689_v3 = vadd.f32 %v14536_v28, %v3103_v8  ;;  %v4356_v30 = vld [vmem:[#allocation12 + $0x88] sm:$0xff] }
 0x3dc   : > { %v3070_v54 = vpop.f32.mrf.mxu0  ;;  %v3244_v26 = vld [vmem:[#allocation2 + $0xd1] sm:$0xff] }
 0x3dd   : > { %3172 = vst [vmem:[#allocation2 + $0xe8] sm:$0xff] %v14689_v3  ;;  %v3104_v55 = vadd.f32 %v3070_v54, %v14534_v48  ;;  %10726 = vmatprep.mubr.f32.mxu1 %v3244_v26  ;;  %10945 = vmatprep.mubr.f32.mxu0 %v3244_v26  ;;  %v3713_v48 = vld [vmem:[#allocation9 + $0x168] sm:$0xff] }
 0x3de   : > { %v10654_v35 = vpop.f32.mrf.mxu0  ;;  %v4355_v54 = vld [vmem:[#allocation12 + $0x80] sm:$0xff] }
 0x3df   : > { %v3142_v33 = vadd.f32 %v14536_v28, %v3104_v55  ;;  %v3712_v28 = vld [vmem:[#allocation9 + $0x160] sm:$0xff] }
 0x3e0   : > { %v3245_v38 = vld [vmem:[#allocation2 + $0xd9] sm:$0xff] }
 0x3e1   : > { %3173 = vst [vmem:[#allocation2 + $0xf0] sm:$0xff] %v3142_v33  ;;  %10727 = vmatmul.mubr.f32.gmra.mxu1 %v3245_v38  ;;  %10946 = vmatmul.mubr.f32.gmra.mxu0 %v3245_v38 }
 0x3e2   : > { %10761 = vmatprep.mubr.f32.mxu1 %v14540_v2  ;;  %v3711_v2 = vld [vmem:[#allocation9 + $0x158] sm:$0xff] }
 0x3e4   : > { %v3975_v31 = vld [vmem:[#allocation2 + $0xe1] sm:$0xff] }
 0x3e5   : > { %10762 = vmatmul.mubr.f32.vlgmr.msra.gmra.mxu1 %v14545_v37  ;;  %10948 = vmatprep.mubr.f32.mxu0 %v3975_v31  ;;  %v3710_v37 = vld [vmem:[#allocation9 + $0x150] sm:$0xff] }
 0x3e6   : > { %10764 = vmatprep.mubr.f32.mxu1 %v14550_v45  ;;  %10804 = vmatpush3.msra.mxu1 %v14613_v62  ;;  %v3709_v62 = vld [vmem:[#allocation9 + $0x148] sm:$0xff] }
 0x3e7   : > { %10805 = vmatprep.subr.mxu1 %v3714_v57 }
 0x3e8   : > { %v3976_v41 = vld [vmem:[#allocation2 + $0xe9] sm:$0xff]  ;;  %10806 = vmatpush3.msra.mxu1 %v3714_v57 }
 0x3e9   : > { %10765 = vmatmul.mubr.f32.gmra.mxu1 %v14555_v23  ;;  %10949 = vmatmul.mubr.f32.gmra.mxu0 %v3976_v41 }
 0x3ea   : > { %10767 = vmatprep.mubr.f32.mxu1 %v14560_v18  ;;  %10807 = vmatprep.subr.mxu1 %v3713_v48 }
 0x3eb   : > { %10808 = vmatpush3.msra.mxu1 %v3713_v48  ;;  %11090 = vmatprep.mubr.msk.f32.mxu0 %vm12747_vm0, %v15714_v0 }
 0x3ec   : > { %10809 = vmatprep.subr.mxu1 %v3712_v28 }
 0x3ed   : > { %10768 = vmatmul.mubr.f32.gmra.mxu1 %v14566_v6 }
 0x3ee   : > { %10770 = vmatprep.mubr.f32.mxu1 %v14571_v56  ;;  %10810 = vmatpush3.msra.mxu1 %v3712_v28 }
 0x3ef   : > { %10811 = vmatprep.subr.mxu1 %v3711_v2 }
 0x3f0   : > { %10812 = vmatpush3.msra.mxu1 %v3711_v2 }
 0x3f1   : > { %10771 = vmatmul.mubr.f32.gmra.mxu1 %v14576_v29  ;;  %10813 = vmatprep.subr.mxu1 %v3710_v37 }
 0x3f2   : > { %10773 = vmatprep.mubr.f32.mxu1 %v14581_v46  ;;  %10814 = vmatpush3.msra.mxu1 %v3710_v37 }
 0x3f3   : > { %10815 = vmatprep.subr.mxu1 %v3709_v62 }
 0x3f4   : > { %10816 = vmatpush3.msra.mxu1 %v3709_v62 }
 0x3f5   : > { %10774 = vmatmul.mubr.f32.gmra.mxu1 %v14586_v43  ;;  %10817 = vmatprep.subr.mxu1 %v3708_v14 }
 0x3f6   : > { %10776 = vmatprep.mubr.f32.mxu1 %v14591_v19  ;;  %10818 = vmatpush3.msra.mxu1 %v3708_v14 }
 0x3f7   : > { %10819 = vmatprep.subr.mxu1 %v3707_v36 }
 0x3f8   : > { %10820 = vmatpush3.msra.mxu1 %v3707_v36 }
 0x3f9   : > { %10777 = vmatmul.mubr.f32.gmra.mxu1 %v14596_v21  ;;  %10821 = vmatprep.subr.mxu1 %v3706_v59 }
 0x3fa   : > { %10779 = vmatprep.mubr.f32.mxu1 %v14601_v12  ;;  %10822 = vmatpush3.msra.mxu1 %v3706_v59 }
 0x3fb   : > { %10823 = vmatprep.subr.mxu1 %v3705_v4 }
 0x3fc   : > { %10824 = vmatpush3.msra.mxu1 %v3705_v4 }
 0x3fd   : > { %10780 = vmatmul.mubr.f32.gmra.mxu1 %v14606_v22  ;;  %10825 = vmatprep.subr.mxu1 %v3704_v51 }
 0x3fe   : > { %10782 = vmatprep.mubr.f32.mxu1 %v14611_v53  ;;  %10826 = vmatpush3.msra.mxu1 %v3704_v51 }
 0x3ff   : > { %10827 = vmatprep.subr.mxu1 %v3703_v58 }
 0x400   : > { %10828 = vmatpush3.msra.mxu1 %v3703_v58 }
 0x401   : > { %10783 = vmatmul.mubr.f32.gmra.mxu1 %v14618_v47  ;;  %10829 = vmatprep.subr.mxu1 %v3702_v39 }
 0x402   : > { %10785 = vmatprep.mubr.f32.mxu1 %v14624_v61  ;;  %10830 = vmatpush3.msra.mxu1 %v3702_v39 }
 0x403   : > { %10831 = vmatprep.subr.mxu1 %v3701_v49 }
 0x404   : > { %10832 = vmatpush3.msra.mxu1 %v3701_v49 }
 0x405   : > { %10786 = vmatmul.mubr.f32.gmra.mxu1 %v14629_v11  ;;  %10833 = vmatprep.subr.mxu1 %v3700_v40 }
 0x406   : > { %10788 = vmatprep.mubr.f32.mxu1 %v14634_v17  ;;  %10834 = vmatpush3.msra.mxu1 %v3700_v40 }
 0x407   : > { %10951 = vmatprep.subr.mxu1 %v15714_v0 }
 0x409   : > { %10789 = vmatmul.mubr.f32.gmra.mxu1 %v14639_v50 }
 0x40a   : > { %10791 = vmatprep.mubr.f32.mxu1 %v14644_v15 }
 0x40d   : > { %10792 = vmatmul.mubr.f32.gmra.mxu1 %v14649_v9 }
 0x40e   : > { %10794 = vmatprep.mubr.f32.mxu1 %v14654_v16 }
 0x411   : > { %10795 = vmatmul.mubr.f32.gmra.mxu1 %v14659_v20 }
 0x412   : > { %10797 = vmatprep.mubr.f32.mxu1 %v14664_v42 }
 0x415   : > { %10798 = vmatmul.mubr.f32.gmra.mxu1 %v14669_v10 }
 0x416   : > { %10800 = vmatprep.mubr.f32.mxu1 %v14674_v5 }
 0x419   : > { %10801 = vmatmul.mubr.f32.gmra.mxu1 %v14679_v27 }
 0x41a   : > { %10835 = vmatprep.mubr.f32.mxu1 %v14550_v45  ;;  %v4329_v45 = vld [vmem:[#allocation12 + $0x78] sm:$0xff] }
 0x41b   : > { %11059 = vmatpush3.msra.mxu0 %v4329_v45 }
 0x41c   : > { %11060 = vmatprep.subr.mxu0 %v15714_v0 }
 0x41d   : > { %10836 = vmatmul.mubr.f32.vlgmr.msra.gmra.mxu1 %v14555_v23  ;;  %v4328_v23 = vld [vmem:[#allocation12 + $0x70] sm:$0xff] }
 0x41e   : > { %10838 = vmatprep.mubr.f32.mxu1 %v14560_v18  ;;  %11061 = vmatpush3.msra.mxu0 %v4328_v23  ;;  %v4327_v18 = vld [vmem:[#allocation12 + $0x68] sm:$0xff] }
 0x41f   : > { %11062 = vmatprep.subr.mxu0 %v15714_v0 }
 0x420   : > { %11063 = vmatpush3.msra.mxu0 %v4327_v18 }
 0x421   : > { %10839 = vmatmul.mubr.f32.gmra.mxu1 %v14566_v6  ;;  %11064 = vmatprep.subr.mxu0 %v15714_v0  ;;  %v4326_v6 = vld [vmem:[#allocation12 + $0x60] sm:$0xff] }
 0x422   : > { %10841 = vmatprep.mubr.f32.mxu1 %v14571_v56  ;;  %11065 = vmatpush3.msra.mxu0 %v4326_v6  ;;  %v4370_v56 = vld [vmem:[#allocation12 + $0xf8] sm:$0xff] }
 0x423   : > { %11066 = vmatprep.subr.mxu0 %v15714_v0  ;;  %10952 = vmatpush3.msra.mxu1 %v4370_v56 }
 0x424   : > { %10953 = vmatprep.subr.mxu1 %v15714_v0 }
 0x425   : > { %10842 = vmatmul.mubr.f32.gmra.mxu1 %v14576_v29  ;;  %v4325_v29 = vld [vmem:[#allocation12 + $0x58] sm:$0xff] }
 0x426   : > { %10844 = vmatprep.mubr.f32.mxu1 %v14581_v46  ;;  %11067 = vmatpush3.msra.mxu0 %v4325_v29  ;;  %v4369_v46 = vld [vmem:[#allocation12 + $0xf0] sm:$0xff] }
 0x427   : > { %11068 = vmatprep.subr.mxu0 %v15714_v0  ;;  %10954 = vmatpush3.msra.mxu1 %v4369_v46 }
 0x428   : > { %10955 = vmatprep.subr.mxu1 %v15714_v0 }
 0x429   : > { %10845 = vmatmul.mubr.f32.gmra.mxu1 %v14586_v43  ;;  %v4324_v43 = vld [vmem:[#allocation12 + $0x50] sm:$0xff] }
 0x42a   : > { %10847 = vmatprep.mubr.f32.mxu1 %v14591_v19  ;;  %11069 = vmatpush3.msra.mxu0 %v4324_v43  ;;  %v4368_v19 = vld [vmem:[#allocation12 + $0xe8] sm:$0xff] }
 0x42b   : > { %11070 = vmatprep.subr.mxu0 %v15714_v0  ;;  %10956 = vmatpush3.msra.mxu1 %v4368_v19 }
 0x42c   : > { %10957 = vmatprep.subr.mxu1 %v15714_v0 }
 0x42d   : > { %10848 = vmatmul.mubr.f32.gmra.mxu1 %v14596_v21  ;;  %v4323_v21 = vld [vmem:[#allocation12 + $0x48] sm:$0xff] }
 0x42e   : > { %10850 = vmatprep.mubr.f32.mxu1 %v14601_v12  ;;  %11071 = vmatpush3.msra.mxu0 %v4323_v21 }
 0x42f   : > { %11072 = vmatprep.subr.mxu0 %v15714_v0 }
 0x431   : > { %10851 = vmatmul.mubr.f32.gmra.mxu1 %v14606_v22  ;;  %v4367_v22 = vld [vmem:[#allocation12 + $0xe0] sm:$0xff] }
 0x432   : > { %10853 = vmatprep.mubr.f32.mxu1 %v14611_v53  ;;  %v4322_v53 = vld [vmem:[#allocation12 + $0x40] sm:$0xff]  ;;  %10958 = vmatpush3.msra.mxu1 %v4367_v22 }
 0x433   : > { %11073 = vmatpush3.msra.mxu0 %v4322_v53  ;;  %10959 = vmatprep.subr.mxu1 %v15714_v0 }
 0x434   : > { %11074 = vmatprep.subr.mxu0 %v15714_v0 }
 0x435   : > { %10854 = vmatmul.mubr.f32.gmra.mxu1 %v14618_v47  ;;  %v4366_v47 = vld [vmem:[#allocation12 + $0xd8] sm:$0xff] }
 0x436   : > { %10856 = vmatprep.mubr.f32.mxu1 %v14624_v61  ;;  %v4321_v61 = vld [vmem:[#allocation12 + $0x38] sm:$0xff]  ;;  %10960 = vmatpush3.msra.mxu1 %v4366_v47 }
 0x437   : > { %11075 = vmatpush3.msra.mxu0 %v4321_v61  ;;  %10961 = vmatprep.subr.mxu1 %v15714_v0 }
 0x438   : > { %11076 = vmatprep.subr.mxu0 %v15714_v0 }
 0x439   : > { %10857 = vmatmul.mubr.f32.gmra.mxu1 %v14629_v11  ;;  %v14761_v12 = vpop.f32.mrf.mxu1 }
 0x43a   : > { %10859 = vmatprep.mubr.f32.mxu1 %v14634_v17  ;;  %v4365_v17 = vld [vmem:[#allocation12 + $0xd0] sm:$0xff] }
 0x43b   : > { %v14767_v11 = vpop.f32.mrf.mxu1  ;;  %10962 = vmatpush3.msra.mxu1 %v4365_v17 }
 0x43c   : > { %10963 = vmatprep.subr.mxu1 %v15714_v0 }
 0x43d   : > { %10860 = vmatmul.mubr.f32.gmra.mxu1 %v14639_v50  ;;  %v4320_v50 = vld [vmem:[#allocation12 + $0x30] sm:$0xff] }
 0x43e   : > { %10862 = vmatprep.mubr.f32.mxu1 %v14644_v15  ;;  %11077 = vmatpush3.msra.mxu0 %v4320_v50 }
 0x43f   : > { %11078 = vmatprep.subr.mxu0 %v15714_v0 }
 0x441   : > { %10863 = vmatmul.mubr.f32.gmra.mxu1 %v14649_v9  ;;  %v14771_v15 = vpop.f32.mrf.mxu1  ;;  %v4364_v9 = vld [vmem:[#allocation12 + $0xc8] sm:$0xff]  ;;  %v10911_v47 = vpop.f32.mrf.mxu0 }
 0x442   : > { %10865 = vmatprep.mubr.f32.mxu1 %v14654_v16  ;;  %v4319_v16 = vld [vmem:[#allocation12 + $0x28] sm:$0xff]  ;;  %10964 = vmatpush3.msra.mxu1 %v4364_v9 }
 0x443   : > { %11079 = vmatpush3.msra.mxu0 %v4319_v16  ;;  %10965 = vmatprep.subr.mxu1 %v15714_v0  ;;  %v4059_v50 = vpop.f32.mrf.mxu0 }
 0x444   : > { %11080 = vmatprep.subr.mxu0 %v15714_v0 }
 0x445   : > { %10866 = vmatmul.mubr.f32.gmra.mxu1 %v14659_v20  ;;  %v4363_v20 = vld [vmem:[#allocation12 + $0xc0] sm:$0xff] }
 0x446   : > { %10868 = vmatprep.mubr.f32.mxu1 %v14664_v42  ;;  %v4318_v42 = vld [vmem:[#allocation12 + $0x20] sm:$0xff]  ;;  %10966 = vmatpush3.msra.mxu1 %v4363_v20 }
 0x447   : > { %11081 = vmatpush3.msra.mxu0 %v4318_v42  ;;  %10967 = vmatprep.subr.mxu1 %v15714_v0 }
 0x448   : > { %11082 = vmatprep.subr.mxu0 %v15714_v0 }
 0x449   : > { %10869 = vmatmul.mubr.f32.gmra.mxu1 %v14669_v10  ;;  %v14777_v10 = vpop.f32.mrf.mxu1  ;;  %11083 = vmatpush3.msra.mxu0 %v4317_v13  ;;  %v10914_v16 = vpop.f32.mrf.mxu0 }
 0x44a   : > { %10871 = vmatprep.mubr.f32.mxu1 %v14674_v5  ;;  %v4362_v5 = vld [vmem:[#allocation12 + $0xb8] sm:$0xff]  ;;  %11084 = vmatprep.subr.mxu0 %v15714_v0 }
 0x44b   : > { %v14781_v1 = vpop.f32.mrf.mxu1  ;;  %10968 = vmatpush3.msra.mxu1 %v4362_v5  ;;  %11085 = vmatpush3.msra.mxu0 %v4316_v25  ;;  %v4069_v5 = vpop.f32.mrf.mxu0 }
 0x44c   : > { %10969 = vmatprep.subr.mxu1 %v15714_v0  ;;  %11086 = vmatprep.subr.mxu0 %v15714_v0 }
 0x44d   : > { %10872 = vmatmul.mubr.f32.gmra.mxu1 %v14679_v27  ;;  %v4360_v27 = vld [vmem:[#allocation12 + $0xa8] sm:$0xff]  ;;  %v14787_v24 = vpop.f32.mrf.mxu1  ;;  %11087 = vmatpush3.msra.mxu0 %v4315_v52 }
 0x44e   : > { %10874 = vmatprep.mubr.f32.mxu1 %v14684_v63  ;;  %10970 = vmatpush3.msra.mxu1 %v4361_v32 }
 0x44f   : > { %10971 = vmatprep.subr.mxu1 %v15714_v0  ;;  %11088 = vmatprep.subr.mxu0 %v15714_v0 }
 0x450   : > { %10972 = vmatpush3.msra.mxu1 %v4360_v27  ;;  %11089 = vmatpush3.msra.mxu0 %v4314_v34 }
 0x451   : > { %10875 = vmatmul.mubr.f32.gmra.mxu1 %v14689_v3  ;;  %v14791_v63 = vpop.f32.mrf.mxu1  ;;  %10973 = vmatprep.subr.mxu1 %v15714_v0  ;;  %v10917_v32 = vpop.f32.mrf.mxu0 }
 0x452   : > { %10983 = vmatprep.mubr.msk.f32.mxu1 %vm12747_vm0, %v15714_v0  ;;  %10974 = vmatpush3.msra.mxu1 %v4359_v7 }
 0x453   : > { %10975 = vmatprep.subr.mxu1 %v15714_v0  ;;  %11272 = vmatprep.subr.mxu0 %v15714_v0  ;;  %v14798_v8 = vpop.f32.mrf.mxu1  ;;  %v4079_v52 = vpop.f32.mrf.mxu0 }
 0x454   : > { %10976 = vmatpush3.msra.mxu1 %v4358_v44 }
 0x455   : > { %10977 = vmatprep.subr.mxu1 %v15714_v0 }
 0x456   : > { %10978 = vmatpush3.msra.mxu1 %v4357_v60 }
 0x457   : > { %10979 = vmatprep.subr.mxu1 %v15714_v0 }
 0x458   : > { %10980 = vmatpush3.msra.mxu1 %v4356_v30 }
 0x459   : > { %v14801_v3 = vpop.f32.mrf.mxu1  ;;  %10981 = vmatprep.subr.mxu1 %v15714_v0  ;;  %v14880_v34 = vpop.f32.mrf.mxu0 }
 0x45a   : > { %10982 = vmatpush3.msra.mxu1 %v4355_v54 }
 0x45b   : > { %v14805_v26 = vpop.f32.mrf.mxu1  ;;  %11165 = vmatprep.subr.mxu1 %v15714_v0  ;;  %v14886_v30 = vpop.f32.mrf.mxu0 }
 0x461   : > { %v14808_v55 = vpop.f32.mrf.mxu1  ;;  %v14890_v0 = vpop.f32.mrf.mxu0 }
 0x463   : > { %v14810_v35 = vpop.f32.mrf.mxu1 }
 0x469   : > { %v14812_v33 = vpop.f32.mrf.mxu1 }
 0x46b   : > { %v14814_v38 = vpop.f32.mrf.mxu1 }
 0x471   : > { %v14816_v31 = vpop.f32.mrf.mxu1 }
 0x473   : > { %v14818_v57 = vpop.f32.mrf.mxu1 }
 0x479   : > { %v14820_v48 = vpop.f32.mrf.mxu1 }
 0x47b   : > { %v14822_v41 = vpop.f32.mrf.mxu1 }
 0x481   : > { %v14824_v28 = vpop.f32.mrf.mxu1 }
 0x483   : > { %v14826_v2 = vpop.f32.mrf.mxu1 }
 0x489   : > { %v14828_v37 = vpop.f32.mrf.mxu1 }
 0x48a   : > { %15746 = vst [vmem:[#allocation24_spill] sm:$0xff] %v14828_v37 }
 0x48b   : > { %v14830_v62 = vpop.f32.mrf.mxu1 }
 0x48c   : > { %15747 = vst [vmem:[#allocation25_spill] sm:$0xff] %v14830_v62 }
 0x491   : > { %v14832_v14 = vpop.f32.mrf.mxu1 }
 0x492   : > { %15748 = vst [vmem:[#allocation26_spill] sm:$0xff] %v14832_v14 }
 0x493   : > { %v14834_v36 = vpop.f32.mrf.mxu1 }
 0x494   : > { %15749 = vst [vmem:[#allocation27_spill] sm:$0xff] %v14834_v36  ;;  %v14896_v36 = vpop.f32.mrf.mxu0 }
 0x499   : > { %v14836_v59 = vpop.f32.mrf.mxu1 }
 0x49a   : > { %15750 = vst [vmem:[#allocation28_spill] sm:$0xff] %v14836_v59 }
 0x49b   : > { %v14838_v4 = vpop.f32.mrf.mxu1 }
 0x49c   : > { %15751 = vst [vmem:[#allocation29_spill] sm:$0xff] %v14838_v4 }
 0x4a1   : > { %v14840_v51 = vpop.f32.mrf.mxu1 }
 0x4a2   : > { %15752 = vst [vmem:[#allocation30_spill] sm:$0xff] %v14840_v51 }
 0x4a3   : > { %v14842_v58 = vpop.f32.mrf.mxu1 }
 0x4a4   : > { %15753 = vst [vmem:[#allocation31_spill] sm:$0xff] %v14842_v58 }
 0x4a5   : > { %v10763_v39 = vpop.f32.mrf.mxu1 }
 0x4a6   : > { %v3539_v51 = vadd.f32 %v10763_v39, %v14761_v12 }
 0x4a7   : > { %v3533_v49 = vpop.f32.mrf.mxu1 }
 0x4a8   : > { %v3534_v59 = vadd.f32 %v3533_v49, %v14767_v11 }
 0x4a9   : > { %v10766_v40 = vpop.f32.mrf.mxu1 }
 0x4ab   : > { %v3543_v45 = vpop.f32.mrf.mxu1 }
 0x4ad   : > { %v10769_v23 = vpop.f32.mrf.mxu1 }
 0x4af   : > { %v3553_v18 = vpop.f32.mrf.mxu1 }
 0x4b1   : > { %v14844_v6 = vpop.f32.mrf.mxu1 }
 0x4b3   : > { %v14846_v56 = vpop.f32.mrf.mxu1 }
 0x4b5   : > { %v14848_v29 = vpop.f32.mrf.mxu1 }
 0x4b7   : > { %v14850_v46 = vpop.f32.mrf.mxu1 }
 0x4b9   : > { %v14852_v43 = vpop.f32.mrf.mxu1 }
 0x4bb   : > { %v14854_v19 = vpop.f32.mrf.mxu1 }
 0x4bd   : > { %v14856_v21 = vpop.f32.mrf.mxu1 }
 0x4bf   : > { %v14858_v22 = vpop.f32.mrf.mxu1 }
 0x4c1   : > { %v14860_v53 = vpop.f32.mrf.mxu1 }
 0x4c3   : > { %v14862_v61 = vpop.f32.mrf.mxu1 }
 0x4c5   : > { %v14864_v17 = vpop.f32.mrf.mxu1 }
 0x4c7   : > { %v14866_v9 = vpop.f32.mrf.mxu1 }
 0x4c9   : > { %v14868_v20 = vpop.f32.mrf.mxu1 }
 0x4cb   : > { %v14870_v42 = vpop.f32.mrf.mxu1 }
 0x4cd   : > { %v14872_v13 = vpop.f32.mrf.mxu1 }
 0x4ce   : > { %15754 = vst [vmem:[#allocation32_spill] sm:$0xff] %v14872_v13 }
 0x4cf   : > { %v14874_v25 = vpop.f32.mrf.mxu1 }
 0x4d0   : > { %15755 = vst [vmem:[#allocation33_spill] sm:$0xff] %v14874_v25 }
 0x4d1   : > { %v14876_v27 = vpop.f32.mrf.mxu1 }
 0x4d2   : > { %15756 = vst [vmem:[#allocation34_spill] sm:$0xff] %v14876_v27  ;;  %v14898_v27 = vld [vmem:[#allocation10] ss:$0 sm:$0xff] }
 0x4d3   : > { %v14878_v7 = vpop.f32.mrf.mxu1 }
 0x4d4   : > { %15757 = vst [vmem:[#allocation35_spill] sm:$0xff] %v14878_v7 }
 0x4d5   : > { %v14882_v44 = vpop.f32.mrf.mxu1 }
 0x4d6   : > { %15758 = vst [vmem:[#allocation36_spill] sm:$0xff] %v14882_v44 }
 0x4d7   : > { %v14884_v60 = vpop.f32.mrf.mxu1 }
 0x4d8   : > { %15759 = vst [vmem:[#allocation37_spill] sm:$0xff] %v14884_v60  ;;  %v3549_v60 = vadd.f32 %v10766_v40, %v14771_v15  ;;  %v5047_v15 = vld [vmem:[#allocation12 + $0x1f8] sm:$0xff] }
 0x4d9   : > { %v14888_v54 = vpop.f32.mrf.mxu1 }
 0x4da   : > { %15760 = vst [vmem:[#allocation38_spill] sm:$0xff] %v14888_v54  ;;  %v14901_v54 = vpop.f32.mrf.mxu0 }
 0x4db   : > { %v14892_v58 = vpop.f32.mrf.mxu1 }
 0x4dc   : > { %15761 = vst [vmem:[#allocation39_spill] sm:$0xff] %v14892_v58  ;;  %v3544_v58 = vadd.f32 %v3543_v45, %v14777_v10  ;;  %v14907_v40 = vpop.f32.mrf.mxu0  ;;  %v5046_v45 = vld [vmem:[#allocation12 + $0x1f0] sm:$0xff] }
 0x4dd   : > { %v10837_v4 = vpop.f32.mrf.mxu1 }
 0x4de   : > { %v3922_v7 = vadd.f32 %v10837_v4, %v3539_v51  ;;  %v3559_v4 = vadd.f32 %v10769_v23, %v14781_v1  ;;  %v14913_v1 = vpop.f32.mrf.mxu0 }
 0x4df   : > { %v3782_v44 = vpop.f32.mrf.mxu1 }
 0x4e0   : > { %v4199_v14 = vadd.f32 %v10911_v47, %v3922_v7  ;;  %v3921_v25 = vadd.f32 %v3782_v44, %v3534_v59  ;;  %v3554_v47 = vadd.f32 %v3553_v18, %v14787_v24  ;;  %v14931_v7 = vpop.f32.mrf.mxu0 }
 0x4e1   : > { %v10840_v62 = vpop.f32.mrf.mxu1 }
 0x4e2   : > { %v4234_v12 = vadd.f32 %v14898_v27, %v4199_v14  ;;  %v4198_v39 = vadd.f32 %v4059_v50, %v3921_v25  ;;  %v3924_v13 = vadd.f32 %v10840_v62, %v3549_v60  ;;  %v15762_v50 = vmov 0.0  }
 0x4e3   : > { %v3792_v11 = vpop.f32.mrf.mxu1 }
 0x4e4   : > { %4262 = vst [vmem:[#allocation3 + $0x8] sm:$0xff] %v4234_v12  ;;  %v4233_v51 = vadd.f32 %v14898_v27, %v4198_v39  ;;  %v4201_v49 = vadd.f32 %v10914_v16, %v3924_v13  ;;  %v3923_v37 = vadd.f32 %v3792_v11, %v3544_v58  ;;  %v3569_v58 = vadd.f32 %v14844_v6, %v14791_v63  ;;  %v5045_v16 = vld [vmem:[#allocation12 + $0x1e8] sm:$0xff] }
 0x4e5   : > { %v10843_v59 = vpop.f32.mrf.mxu1  ;;  %v3574_v39 = vadd.f32 %v14850_v46, %v14805_v26 }
 0x4e6   : > { %4261 = vst [vmem:[#allocation3] sm:$0xff] %v4233_v51  ;;  %v14911_v10 = vadd.f32 %v14898_v27, %v4201_v49  ;;  %v4200_v14 = vadd.f32 %v4069_v5, %v3923_v37  ;;  %v3926_v62 = vadd.f32 %v10843_v59, %v3559_v4  ;;  %11091 = vmatmul.mubr.f32.vlgmr.msra.gmra.mxu0 %v4233_v51  ;;  %v4791_v51 = vld [vmem:[#allocation12 + $0x178] sm:$0xff] }
 0x4e7   : > { %v3802_v23 = vpop.f32.mrf.mxu1  ;;  %11093 = vmatprep.mubr.msk.f32.mxu0 %vm12747_vm0, %v15762_v50  ;;  %11273 = vmatpush3.msra.mxu0 %v5047_v15  ;;  %v3564_v5 = vadd.f32 %v14846_v56, %v14798_v8  ;;  %v3579_v8 = vadd.f32 %v14848_v29, %v14801_v3  ;;  %v5043_v49 = vld [vmem:[#allocation12 + $0x1d8] sm:$0xff]  ;;  %v3589_v15 = vadd.f32 %v14852_v43, %v14808_v55 }
 0x4e8   : > { %4264 = vst [vmem:[#allocation3 + $0x18] sm:$0xff] %v14911_v10  ;;  %v14921_v24 = vadd.f32 %v14898_v27, %v4200_v14  ;;  %v4203_v18 = vadd.f32 %v10917_v32, %v3926_v62  ;;  %v3925_v37 = vadd.f32 %v3802_v23, %v3554_v47  ;;  %11274 = vmatprep.subr.mxu0 %v15762_v50  ;;  %v5044_v32 = vld [vmem:[#allocation12 + $0x1e0] sm:$0xff]  ;;  %v4790_v62 = vld [vmem:[#allocation12 + $0x170] sm:$0xff] }
 0x4e9   : > { %v10846_v13 = vpop.f32.mrf.mxu1  ;;  %11275 = vmatpush3.msra.mxu0 %v5046_v45  ;;  %v3584_v55 = vadd.f32 %v14854_v19, %v14810_v35  ;;  %v3599_v35 = vadd.f32 %v14856_v21, %v14812_v33  ;;  %v3594_v33 = vadd.f32 %v14858_v22, %v14814_v38  ;;  %v5041_v38 = vld [vmem:[#allocation12 + $0x1c8] sm:$0xff] }
 0x4ea   : > { %4263 = vst [vmem:[#allocation3 + $0x10] sm:$0xff] %v14921_v24  ;;  %v14928_v25 = vadd.f32 %v14898_v27, %v4203_v18  ;;  %v4202_v63 = vadd.f32 %v4079_v52, %v3925_v37  ;;  %v3928_v6 = vadd.f32 %v10846_v13, %v3569_v58  ;;  %11094 = vmatmul.mubr.f32.gmra.mxu0 %v4234_v12  ;;  %v14943_v12 = vpop.f32.mrf.mxu0  ;;  %v5042_v58 = vld [vmem:[#allocation12 + $0x1d0] sm:$0xff]  ;;  %v4789_v13 = vld [vmem:[#allocation12 + $0x168] sm:$0xff] }
 0x4eb   : > { %11276 = vmatprep.subr.mxu0 %v15762_v50  ;;  %v3812_v44 = vpop.f32.mrf.mxu1  ;;  %11096 = vmatprep.mubr.msk.f32.mxu0 %vm12747_vm0, %v15762_v50 }
 0x4ec   : > { %11277 = vmatpush3.msra.mxu0 %v5045_v16  ;;  %4266 = vst [vmem:[#allocation3 + $0x28] sm:$0xff] %v14928_v25  ;;  %v14939_v56 = vadd.f32 %v14898_v27, %v4202_v63  ;;  %v4205_v52 = vadd.f32 %v14880_v34, %v3928_v6  ;;  %v3927_v60 = vadd.f32 %v3812_v44, %v3564_v5  ;;  %v14965_v47 = vpop.f32.mrf.mxu0 }
 0x4ed   : > { %11278 = vmatprep.subr.mxu0 %v15762_v50  ;;  %v10849_v11 = vpop.f32.mrf.mxu1  ;;  %v4330_v4 = vld [vmem:[#allocation3 + $0x1] sm:$0xff] }
 0x4ee   : > { %11279 = vmatpush3.msra.mxu0 %v5044_v32  ;;  %4265 = vst [vmem:[#allocation3 + $0x20] sm:$0xff] %v14939_v56  ;;  %v14949_v3 = vadd.f32 %v14898_v27, %v4205_v52  ;;  %v4204_v29 = vadd.f32 %v14886_v30, %v3927_v60  ;;  %v3930_v34 = vadd.f32 %v10849_v11, %v3579_v8  ;;  %v14976_v18 = vpop.f32.mrf.mxu0  ;;  %v4788_v11 = vld [vmem:[#allocation12 + $0x160] sm:$0xff] }
 0x4ef   : > { %10984 = vmatmul.mubr.f32.vlgmr.msra.gmra.mxu1 %v4330_v4  ;;  %11097 = vmatmul.mubr.f32.gmra.mxu0 %v14921_v24  ;;  %v3822_v26 = vpop.f32.mrf.mxu1  ;;  %v3609_v32 = vadd.f32 %v14860_v53, %v14816_v31  ;;  %v3604_v31 = vadd.f32 %v14862_v61, %v14818_v57  ;;  %v5040_v57 = vld [vmem:[#allocation12 + $0x1c0] sm:$0xff]  ;;  %v3619_v61 = vadd.f32 %v14864_v17, %v14820_v48 }
 0x4f0   : > { %10986 = vmatprep.mubr.msk.f32.mxu1 %vm12747_vm0, %v15762_v50  ;;  %11099 = vmatprep.mubr.msk.f32.mxu0 %vm12747_vm0, %v15762_v50  ;;  %4268 = vst [vmem:[#allocation3 + $0x38] sm:$0xff] %v14949_v3  ;;  %v14961_v46 = vadd.f32 %v14898_v27, %v4204_v29  ;;  %v4207_v30 = vadd.f32 %v14890_v0, %v3930_v34  ;;  %v15002_v22 = vpop.f32.mrf.mxu0 }
 0x4f1   : > { %v3929_v59 = vadd.f32 %v3822_v26, %v3574_v39  ;;  %11166 = vmatpush3.msra.mxu1 %v4791_v51  ;;  %11280 = vmatprep.subr.mxu0 %v15762_v50  ;;  %v10852_v43 = vpop.f32.mrf.mxu1  ;;  %v4331_v14 = vld [vmem:[#allocation3 + $0x9] sm:$0xff]  ;;  %v14992_v5 = vld [vmem:[#allocation3 + $0x11] sm:$0xff]  ;;  %v3614_v48 = vadd.f32 %v14866_v9, %v14822_v41 }
 0x4f2   : > { %11167 = vmatprep.subr.mxu1 %v15762_v50  ;;  %11281 = vmatpush3.msra.mxu0 %v5043_v49  ;;  %4267 = vst [vmem:[#allocation3 + $0x30] sm:$0xff] %v14961_v46  ;;  %v14972_v45 = vadd.f32 %v14898_v27, %v4207_v30  ;;  %v3932_v23 = vadd.f32 %v10852_v43, %v3589_v15  ;;  %v15016_v60 = vpop.f32.mrf.mxu0  ;;  %v4787_v30 = vld [vmem:[#allocation12 + $0x158] sm:$0xff] }
 0x4f3   : > { %v4206_v0 = vadd.f32 %v14896_v36, %v3929_v59  ;;  %10987 = vmatmul.mubr.f32.gmra.mxu1 %v4331_v14  ;;  %11100 = vmatmul.mubr.f32.gmra.mxu0 %v14911_v10  ;;  %v3832_v19 = vpop.f32.mrf.mxu1  ;;  %v5039_v41 = vld [vmem:[#allocation12 + $0x1b8] sm:$0xff]  ;;  %v3629_v43 = vadd.f32 %v14868_v20, %v14824_v28  ;;  %v3624_v28 = vadd.f32 %v14870_v42, %v14826_v2  ;;  %v5038_v2 = vld [vmem:[#allocation12 + $0x1b0] sm:$0xff] }
 0x4f4   : > { %10989 = vmatprep.mubr.msk.f32.mxu1 %vm12747_vm0, %v15762_v50  ;;  %11102 = vmatprep.mubr.msk.f32.mxu0 %vm12747_vm0, %v15762_v50  ;;  %4270 = vst [vmem:[#allocation3 + $0x48] sm:$0xff] %v14972_v45  ;;  %v4209_v37 = vadd.f32 %v14901_v54, %v3932_v23  ;;  %v3931_v16 = vadd.f32 %v3832_v19, %v3584_v55  ;;  %v4149_v15 = vpop.f32.mrf.mxu0 }
 0x4f5   : > { %v14986_v36 = vadd.f32 %v14898_v27, %v4206_v0  ;;  %11168 = vmatpush3.msra.mxu1 %v4790_v62  ;;  %11282 = vmatprep.subr.mxu0 %v15762_v50  ;;  %v10855_v21 = vpop.f32.mrf.mxu1  ;;  %v15020_v39 = vld [vmem:[#allocation3 + $0x19] sm:$0xff]  ;;  %v15044_v26 = vld [vmem:[#allocation3 + $0x21] sm:$0xff] }
 0x4f6   : > { %11169 = vmatprep.subr.mxu1 %v15762_v50  ;;  %11283 = vmatpush3.msra.mxu0 %v5042_v58  ;;  %v14997_v63 = vadd.f32 %v14898_v27, %v4209_v37  ;;  %v4208_v54 = vadd.f32 %v14907_v40, %v3931_v16  ;;  %v3934_v6 = vadd.f32 %v10855_v21, %v3599_v35  ;;  %v10941_v9 = vpop.f32.mrf.mxu0  ;;  %v4786_v58 = vld [vmem:[#allocation12 + $0x150] sm:$0xff]  ;;  %v15763_v37 = vld [vmem:[#allocation24_spill] sm:$0xff] }
 0x4f7   : > { %4269 = vst [vmem:[#allocation3 + $0x40] sm:$0xff] %v14986_v36  ;;  %10990 = vmatmul.mubr.f32.gmra.mxu1 %v14992_v5  ;;  %11103 = vmatmul.mubr.f32.gmra.mxu0 %v14939_v56  ;;  %v3842_v44 = vpop.f32.mrf.mxu1  ;;  %v15764_v16 = vld [vmem:[#allocation32_spill] sm:$0xff] }
 0x4f8   : > { %10992 = vmatprep.mubr.msk.f32.mxu1 %vm12747_vm0, %v15762_v50  ;;  %11105 = vmatprep.mubr.msk.f32.mxu0 %vm12747_vm0, %v15762_v50  ;;  %4272 = vst [vmem:[#allocation3 + $0x58] sm:$0xff] %v14997_v63  ;;  %v15012_v40 = vadd.f32 %v14898_v27, %v4208_v54  ;;  %v4211_v8 = vadd.f32 %v14913_v1, %v3934_v6  ;;  %v4159_v42 = vpop.f32.mrf.mxu0 }
 0x4f9   : > { %v3933_v52 = vadd.f32 %v3842_v44, %v3594_v33  ;;  %11170 = vmatpush3.msra.mxu1 %v4789_v13  ;;  %11284 = vmatprep.subr.mxu0 %v15762_v50  ;;  %v10858_v53 = vpop.f32.mrf.mxu1  ;;  %v15068_v23 = vld [vmem:[#allocation3 + $0x29] sm:$0xff]  ;;  %v3639_v33 = vadd.f32 %v15764_v16, %v15763_v37  ;;  %v15773_v16 = vld [vmem:[#allocation29_spill] sm:$0xff] }
 0x4fa   : > { %11171 = vmatprep.subr.mxu1 %v15762_v50  ;;  %11285 = vmatpush3.msra.mxu0 %v5041_v38  ;;  %4271 = vst [vmem:[#allocation3 + $0x50] sm:$0xff] %v15012_v40  ;;  %v15025_v1 = vadd.f32 %v14898_v27, %v4211_v8  ;;  %v3936_v51 = vadd.f32 %v10858_v53, %v3609_v32  ;;  %v10944_v38 = vpop.f32.mrf.mxu0  ;;  %v15766_v32 = vld [vmem:[#allocation33_spill] sm:$0xff] }
 0x4fb   : > { %v4210_v4 = vadd.f32 %v14931_v7, %v3933_v52  ;;  %10993 = vmatmul.mubr.f32.gmra.mxu1 %v15020_v39  ;;  %11106 = vmatmul.mubr.f32.gmra.mxu0 %v14928_v25  ;;  %v3852_v29 = vpop.f32.mrf.mxu1  ;;  %v15092_v52 = vld [vmem:[#allocation3 + $0x31] sm:$0xff] }
 0x4fc   : > { %10995 = vmatprep.mubr.msk.f32.mxu1 %vm12747_vm0, %v15762_v50  ;;  %11108 = vmatprep.mubr.msk.f32.mxu0 %vm12747_vm0, %v15762_v50  ;;  %4274 = vst [vmem:[#allocation3 + $0x68] sm:$0xff] %v15025_v1  ;;  %v4213_v34 = vadd.f32 %v14943_v12, %v3936_v51  ;;  %v3935_v49 = vadd.f32 %v3852_v29, %v3604_v31  ;;  %v4785_v31 = vld [vmem:[#allocation12 + $0x148] sm:$0xff]  ;;  %v15767_v51 = vld [vmem:[#allocation26_spill] sm:$0xff] }
 0x4fd   : > { %v15038_v7 = vadd.f32 %v14898_v27, %v4210_v4  ;;  %11172 = vmatpush3.msra.mxu1 %v4788_v11  ;;  %11286 = vmatprep.subr.mxu0 %v15762_v50  ;;  %v10861_v17 = vpop.f32.mrf.mxu1  ;;  %v5037_v4 = vld [vmem:[#allocation12 + $0x1a8] sm:$0xff] }
 0x4fe   : > { %11173 = vmatprep.subr.mxu1 %v15762_v50  ;;  %11287 = vmatpush3.msra.mxu0 %v5040_v57  ;;  %v15049_v59 = vadd.f32 %v14898_v27, %v4213_v34  ;;  %v4212_v12 = vadd.f32 %v14965_v47, %v3935_v49  ;;  %v3938_v55 = vadd.f32 %v10861_v17, %v3619_v61  ;;  %v15768_v57 = vld [vmem:[#allocation34_spill] sm:$0xff]  ;;  %v15769_v17 = vld [vmem:[#allocation27_spill] sm:$0xff] }
 0x4ff   : > { %4273 = vst [vmem:[#allocation3 + $0x60] sm:$0xff] %v15038_v7  ;;  %10996 = vmatmul.mubr.f32.gmra.mxu1 %v15044_v26  ;;  %11109 = vmatmul.mubr.f32.gmra.mxu0 %v14961_v46  ;;  %v3862_v14 = vpop.f32.mrf.mxu1  ;;  %v3649_v61 = vadd.f32 %v15768_v57, %v15767_v51 }
 0x500   : > { %10998 = vmatprep.mubr.msk.f32.mxu1 %vm12747_vm0, %v15762_v50  ;;  %11111 = vmatprep.mubr.msk.f32.mxu0 %vm12747_vm0, %v15762_v50  ;;  %4276 = vst [vmem:[#allocation3 + $0x78] sm:$0xff] %v15049_v59  ;;  %v15062_v47 = vadd.f32 %v14898_v27, %v4212_v12  ;;  %v4215_v62 = vadd.f32 %v14976_v18, %v3938_v55 }
 0x501   : > { %v3937_v0 = vadd.f32 %v3862_v14, %v3614_v48  ;;  %11174 = vmatpush3.msra.mxu1 %v4787_v30  ;;  %11288 = vmatprep.subr.mxu0 %v15762_v50  ;;  %v10864_v20 = vpop.f32.mrf.mxu1  ;;  %v4169_v48 = vpop.f32.mrf.mxu0  ;;  %v15770_v30 = vld [vmem:[#allocation35_spill] sm:$0xff] }
 0x502   : > { %11175 = vmatprep.subr.mxu1 %v15762_v50  ;;  %11289 = vmatpush3.msra.mxu0 %v5039_v41  ;;  %4275 = vst [vmem:[#allocation3 + $0x70] sm:$0xff] %v15062_v47  ;;  %v15073_v35 = vadd.f32 %v14898_v27, %v4215_v62  ;;  %v3940_v19 = vadd.f32 %v10864_v20, %v3629_v43  ;;  %v15114_v41 = vld [vmem:[#allocation3 + $0x39] sm:$0xff] }
 0x503   : > { %v4214_v18 = vadd.f32 %v15002_v22, %v3937_v0  ;;  %10999 = vmatmul.mubr.f32.gmra.mxu1 %v15068_v23  ;;  %11112 = vmatmul.mubr.f32.gmra.mxu0 %v14949_v3  ;;  %v3872_v21 = vpop.f32.mrf.mxu1  ;;  %v15765_v22 = vld [vmem:[#allocation25_spill] sm:$0xff]  ;;  %v3644_v12 = vadd.f32 %v15770_v30, %v15769_v17  ;;  %v4784_v43 = vld [vmem:[#allocation12 + $0x140] sm:$0xff] }
 0x504   : > { %11001 = vmatprep.mubr.msk.f32.mxu1 %vm12747_vm0, %v15762_v50  ;;  %11114 = vmatprep.mubr.msk.f32.mxu0 %vm12747_vm0, %v15762_v50  ;;  %4278 = vst [vmem:[#allocation3 + $0x88] sm:$0xff] %v15073_v35  ;;  %v4217_v54 = vadd.f32 %v15016_v60, %v3940_v19  ;;  %v3939_v6 = vadd.f32 %v3872_v21, %v3624_v28  ;;  %v5036_v0 = vld [vmem:[#allocation12 + $0x1a0] sm:$0xff]  ;;  %v10947_v28 = vpop.f32.mrf.mxu0 }
 0x505   : > { %v15086_v13 = vadd.f32 %v14898_v27, %v4214_v18  ;;  %11176 = vmatpush3.msra.mxu1 %v4786_v58  ;;  %11290 = vmatprep.subr.mxu0 %v15762_v50  ;;  %v3634_v44 = vadd.f32 %v15766_v32, %v15765_v22  ;;  %v10867_v8 = vpop.f32.mrf.mxu1  ;;  %v15771_v20 = vld [vmem:[#allocation28_spill] sm:$0xff]  ;;  %v4783_v22 = vld [vmem:[#allocation12 + $0x138] sm:$0xff] }
 0x506   : > { %11177 = vmatprep.subr.mxu1 %v15762_v50  ;;  %11291 = vmatpush3.msra.mxu0 %v5038_v2  ;;  %v15097_v53 = vadd.f32 %v14898_v27, %v4217_v54  ;;  %v4216_v60 = vadd.f32 %v4149_v15, %v3939_v6  ;;  %v3942_v11 = vadd.f32 %v10867_v8, %v3639_v33  ;;  %v15772_v58 = vld [vmem:[#allocation36_spill] sm:$0xff]  ;;  %v15774_v33 = vld [vmem:[#allocation37_spill] sm:$0xff]  ;;  %v5035_v8 = vld [vmem:[#allocation12 + $0x198] sm:$0xff] }
 0x507   : > { %4277 = vst [vmem:[#allocation3 + $0x80] sm:$0xff] %v15086_v13  ;;  %11002 = vmatmul.mubr.f32.gmra.mxu1 %v15092_v52  ;;  %11115 = vmatmul.mubr.f32.gmra.mxu0 %v14986_v36  ;;  %v3882_v29 = vpop.f32.mrf.mxu1  ;;  %v3659_v18 = vadd.f32 %v15772_v58, %v15771_v20  ;;  %v3654_v21 = vadd.f32 %v15774_v33, %v15773_v16  ;;  %v15136_v6 = vld [vmem:[#allocation3 + $0x41] sm:$0xff] }
 0x508   : > { %11004 = vmatprep.mubr.msk.f32.mxu1 %vm12747_vm0, %v15762_v50  ;;  %11117 = vmatprep.mubr.msk.f32.mxu0 %vm12747_vm0, %v15762_v50  ;;  %4280 = vst [vmem:[#allocation3 + $0x98] sm:$0xff] %v15097_v53  ;;  %v15109_v34 = vadd.f32 %v14898_v27, %v4216_v60  ;;  %v4219_v49 = vadd.f32 %v10941_v9, %v3942_v11  ;;  %v15775_v60 = vld [vmem:[#allocation30_spill] sm:$0xff] }
 0x509   : > { %v3941_v15 = vadd.f32 %v3882_v29, %v3634_v44  ;;  %11178 = vmatpush3.msra.mxu1 %v4785_v31  ;;  %11292 = vmatprep.subr.mxu0 %v15762_v50  ;;  %v10870_v55 = vpop.f32.mrf.mxu1  ;;  %v4179_v31 = vpop.f32.mrf.mxu0  ;;  %v15776_v11 = vld [vmem:[#allocation38_spill] sm:$0xff] }
 0x50a   : > { %11179 = vmatprep.subr.mxu1 %v15762_v50  ;;  %11293 = vmatpush3.msra.mxu0 %v5037_v4  ;;  %4279 = vst [vmem:[#allocation3 + $0x90] sm:$0xff] %v15109_v34  ;;  %v15119_v14 = vadd.f32 %v14898_v27, %v4219_v49  ;;  %v3944_v62 = vadd.f32 %v10870_v55, %v3649_v61  ;;  %v4782_v55 = vld [vmem:[#allocation12 + $0x130] sm:$0xff] }
 0x50b   : > { %v4218_v9 = vadd.f32 %v4159_v42, %v3941_v15  ;;  %11005 = vmatmul.mubr.f32.gmra.mxu1 %v15114_v41  ;;  %11118 = vmatmul.mubr.f32.gmra.mxu0 %v14972_v45  ;;  %v3892_v19 = vpop.f32.mrf.mxu1  ;;  %v3669_v4 = vadd.f32 %v15776_v11, %v15775_v60  ;;  %v10950_v49 = vpop.f32.mrf.mxu0  ;;  %v15777_v15 = vld [vmem:[#allocation31_spill] sm:$0xff]  ;;  %v4778_v60 = vld [vmem:[#allocation12 + $0x110] sm:$0xff] }
 0x50c   : > { %11007 = vmatprep.mubr.msk.f32.mxu1 %vm12747_vm0, %v15762_v50  ;;  %11120 = vmatprep.mubr.msk.f32.mxu0 %vm12747_vm0, %v15762_v50  ;;  %4282 = vst [vmem:[#allocation3 + $0xa8] sm:$0xff] %v15119_v14  ;;  %v4221_v42 = vadd.f32 %v10944_v38, %v3944_v62  ;;  %v3943_v37 = vadd.f32 %v3892_v19, %v3644_v12  ;;  %v15158_v12 = vld [vmem:[#allocation3 + $0x49] sm:$0xff]  ;;  %v15220_v11 = vld [vmem:[#allocation3 + $0x71] sm:$0xff] }
 0x50d   : > { %v15131_v2 = vadd.f32 %v14898_v27, %v4218_v9  ;;  %11180 = vmatpush3.msra.mxu1 %v4784_v43  ;;  %11294 = vmatprep.subr.mxu0 %v15762_v50  ;;  %v10873_v54 = vpop.f32.mrf.mxu1  ;;  %v4189_v19 = vpop.f32.mrf.mxu0 }
 0x50e   : > { %11181 = vmatprep.subr.mxu1 %v15762_v50  ;;  %11295 = vmatpush3.msra.mxu0 %v5036_v0  ;;  %v15141_v32 = vadd.f32 %v14898_v27, %v4221_v42  ;;  %v4220_v38 = vadd.f32 %v4169_v48, %v3943_v37  ;;  %v3946_v44 = vadd.f32 %v10873_v54, %v3659_v18  ;;  %v15778_v48 = vld [vmem:[#allocation39_spill] sm:$0xff]  ;;  %v5034_v0 = vld [vmem:[#allocation12 + $0x190] sm:$0xff]  ;;  %v4781_v37 = vld [vmem:[#allocation12 + $0x128] sm:$0xff] }
 0x50f   : > { %4281 = vst [vmem:[#allocation3 + $0xa0] sm:$0xff] %v15131_v2  ;;  %11008 = vmatmul.mubr.f32.gmra.mxu1 %v15136_v6  ;;  %11121 = vmatmul.mubr.f32.gmra.mxu0 %v15012_v40  ;;  %v3902_v51 = vpop.f32.mrf.mxu1  ;;  %v3664_v17 = vadd.f32 %v15778_v48, %v15777_v15  ;;  %v15176_v42 = vld [vmem:[#allocation3 + $0x51] sm:$0xff] }
 0x510   : > { %11010 = vmatprep.mubr.msk.f32.mxu1 %vm12747_vm0, %v15762_v50  ;;  %11123 = vmatprep.mubr.msk.f32.mxu0 %vm12747_vm0, %v15762_v50  ;;  %4284 = vst [vmem:[#allocation3 + $0xb8] sm:$0xff] %v15141_v32  ;;  %v15153_v57 = vadd.f32 %v14898_v27, %v4220_v38  ;;  %v4223_v61 = vadd.f32 %v10947_v28, %v3946_v44  ;;  %v4780_v38 = vld [vmem:[#allocation12 + $0x120] sm:$0xff] }
 0x511   : > { %v3945_v29 = vadd.f32 %v3902_v51, %v3654_v21  ;;  %11182 = vmatpush3.msra.mxu1 %v4783_v22  ;;  %11296 = vmatprep.subr.mxu0 %v15762_v50  ;;  %v10876_v30 = vpop.f32.mrf.mxu1  ;;  %v5033_v21 = vld [vmem:[#allocation12 + $0x188] sm:$0xff]  ;;  %v5032_v44 = vld [vmem:[#allocation12 + $0x180] sm:$0xff] }
 0x512   : > { %11183 = vmatprep.subr.mxu1 %v15762_v50  ;;  %11297 = vmatpush3.msra.mxu0 %v5035_v8  ;;  %4283 = vst [vmem:[#allocation3 + $0xb0] sm:$0xff] %v15153_v57  ;;  %v15163_v43 = vadd.f32 %v14898_v27, %v4223_v61  ;;  %v3948_v62 = vadd.f32 %v10876_v30, %v3669_v4  ;;  %v15191_v22 = vld [vmem:[#allocation3 + $0x59] sm:$0xff]  ;;  %v4779_v8 = vld [vmem:[#allocation12 + $0x118] sm:$0xff] }
 0x513   : > { %v4222_v9 = vadd.f32 %v4179_v31, %v3945_v29  ;;  %11011 = vmatmul.mubr.f32.gmra.mxu1 %v15158_v12  ;;  %11124 = vmatmul.mubr.f32.gmra.mxu0 %v14997_v63  ;;  %v3912_v28 = vpop.f32.mrf.mxu1  ;;  %v15211_v31 = vld [vmem:[#allocation3 + $0x69] sm:$0xff]  ;;  %v4777_v4 = vld [vmem:[#allocation12 + $0x108] sm:$0xff]  ;;  %v4776_v61 = vld [vmem:[#allocation12 + $0x100] sm:$0xff] }
 0x514   : > { %11013 = vmatprep.mubr.msk.f32.mxu1 %vm12747_vm0, %v15762_v50  ;;  %11126 = vmatprep.mubr.msk.f32.mxu0 %vm12747_vm0, %v15762_v50  ;;  %4286 = vst [vmem:[#allocation3 + $0xc8] sm:$0xff] %v15163_v43  ;;  %v4225_v58 = vadd.f32 %v10950_v49, %v3948_v62  ;;  %v3947_v18 = vadd.f32 %v3912_v28, %v3664_v17  ;;  %v15229_v51 = vld [vmem:[#allocation3 + $0x79] sm:$0xff]  ;;  %v15238_v29 = vld [vmem:[#allocation3 + $0x81] sm:$0xff]  ;;  %v15247_v49 = vld [vmem:[#allocation3 + $0x89] sm:$0xff] }
 0x515   : > { %v15173_v20 = vadd.f32 %v14898_v27, %v4222_v9  ;;  %11184 = vmatpush3.msra.mxu1 %v4782_v55  ;;  %11298 = vmatprep.subr.mxu0 %v15762_v50  ;;  %v15255_v15 = vld [vmem:[#allocation3 + $0x91] sm:$0xff] }
 0x516   : > { %11185 = vmatprep.subr.mxu1 %v15762_v50  ;;  %11299 = vmatpush3.msra.mxu0 %v5034_v0  ;;  %v4260_v16 = vadd.f32 %v14898_v27, %v4225_v58  ;;  %v4224_v33 = vadd.f32 %v4189_v19, %v3947_v18  ;;  %v15263_v48 = vld [vmem:[#allocation3 + $0x99] sm:$0xff]  ;;  %v15271_v17 = vld [vmem:[#allocation3 + $0xa1] sm:$0xff] }
 0x517   : > { %4285 = vst [vmem:[#allocation3 + $0xc0] sm:$0xff] %v15173_v20  ;;  %11014 = vmatmul.mubr.f32.gmra.mxu1 %v15176_v42  ;;  %11127 = vmatmul.mubr.f32.gmra.mxu0 %v15038_v7 }
 0x518   : > { %11016 = vmatprep.mubr.msk.f32.mxu1 %vm12747_vm0, %v15762_v50  ;;  %11129 = vmatprep.mubr.msk.f32.mxu0 %vm12747_vm0, %v15762_v50  ;;  %4288 = vst [vmem:[#allocation3 + $0xd8] sm:$0xff] %v4260_v16  ;;  %v15188_v54 = vadd.f32 %v14898_v27, %v4224_v33  ;;  %v15202_v27 = vld [vmem:[#allocation3 + $0x61] sm:$0xff] }
 0x519   : > { %11186 = vmatpush3.msra.mxu1 %v4781_v37  ;;  %11300 = vmatprep.subr.mxu0 %v15762_v50  ;;  %v15279_v30 = vld [vmem:[#allocation3 + $0xa9] sm:$0xff]  ;;  %v15287_v55 = vld [vmem:[#allocation3 + $0xb1] sm:$0xff] }
 0x51a   : > { %11187 = vmatprep.subr.mxu1 %v15762_v50  ;;  %11301 = vmatpush3.msra.mxu0 %v5033_v21  ;;  %4287 = vst [vmem:[#allocation3 + $0xd0] sm:$0xff] %v15188_v54 }
 0x51b   : > { %11017 = vmatmul.mubr.f32.gmra.mxu1 %v15191_v22  ;;  %11130 = vmatmul.mubr.f32.gmra.mxu0 %v15025_v1 }
 0x51c   : > { %11019 = vmatprep.mubr.msk.f32.mxu1 %vm12747_vm0, %v15762_v50  ;;  %11132 = vmatprep.mubr.msk.f32.mxu0 %vm12747_vm0, %v15762_v50 }
 0x51d   : > { %11188 = vmatpush3.msra.mxu1 %v4780_v38  ;;  %11302 = vmatprep.subr.mxu0 %v15762_v50 }
 0x51e   : > { %11189 = vmatprep.subr.mxu1 %v15762_v50  ;;  %11303 = vmatpush3.msra.mxu0 %v5032_v44  ;;  %v15295_v9 = vld [vmem:[#allocation3 + $0xb9] sm:$0xff]  ;;  %v15303_v62 = vld [vmem:[#allocation3 + $0xc1] sm:$0xff] }
 0x51f   : > { %11020 = vmatmul.mubr.f32.gmra.mxu1 %v15202_v27  ;;  %11133 = vmatmul.mubr.f32.gmra.mxu0 %v15062_v47 }
 0x520   : > { %11022 = vmatprep.mubr.msk.f32.mxu1 %vm12747_vm0, %v15762_v50  ;;  %11135 = vmatprep.mubr.msk.f32.mxu0 %vm12747_vm0, %v15762_v50 }
 0x521   : > { %11190 = vmatpush3.msra.mxu1 %v4779_v8 }
 0x522   : > { %11191 = vmatprep.subr.mxu1 %v15762_v50 }
 0x523   : > { %11023 = vmatmul.mubr.f32.gmra.mxu1 %v15211_v31  ;;  %11136 = vmatmul.mubr.f32.gmra.mxu0 %v15049_v59 }
 0x524   : > { %11025 = vmatprep.mubr.msk.f32.mxu1 %vm12747_vm0, %v15762_v50  ;;  %11138 = vmatprep.mubr.msk.f32.mxu0 %vm12747_vm0, %v15762_v50 }
 0x525   : > { %11192 = vmatpush3.msra.mxu1 %v4778_v60 }
 0x526   : > { %11193 = vmatprep.subr.mxu1 %v15762_v50 }
 0x527   : > { %11026 = vmatmul.mubr.f32.gmra.mxu1 %v15220_v11  ;;  %11139 = vmatmul.mubr.f32.gmra.mxu0 %v15086_v13 }
 0x528   : > { %11028 = vmatprep.mubr.msk.f32.mxu1 %vm12747_vm0, %v15762_v50  ;;  %11141 = vmatprep.mubr.msk.f32.mxu0 %vm12747_vm0, %v15762_v50 }
 0x529   : > { %11194 = vmatpush3.msra.mxu1 %v4777_v4 }
 0x52a   : > { %11195 = vmatprep.subr.mxu1 %v15762_v50 }
 0x52b   : > { %11029 = vmatmul.mubr.f32.gmra.mxu1 %v15229_v51  ;;  %11142 = vmatmul.mubr.f32.gmra.mxu0 %v15073_v35 }
 0x52c   : > { %11031 = vmatprep.mubr.msk.f32.mxu1 %vm12747_vm0, %v15762_v50  ;;  %11144 = vmatprep.mubr.msk.f32.mxu0 %vm12747_vm0, %v15762_v50 }
 0x52d   : > { %11196 = vmatpush3.msra.mxu1 %v4776_v61 }
 0x52e   : > { %5294 = vmatprep.subr.mxu1 %v15762_v50 }
 0x52f   : > { %11032 = vmatmul.mubr.f32.gmra.mxu1 %v15238_v29  ;;  %11145 = vmatmul.mubr.f32.gmra.mxu0 %v15109_v34 }
 0x530   : > { %11034 = vmatprep.mubr.msk.f32.mxu1 %vm12747_vm0, %v15762_v50  ;;  %11147 = vmatprep.mubr.msk.f32.mxu0 %vm12747_vm0, %v15762_v50 }
 0x533   : > { %11035 = vmatmul.mubr.f32.gmra.mxu1 %v15247_v49  ;;  %11148 = vmatmul.mubr.f32.gmra.mxu0 %v15097_v53 }
 0x534   : > { %11037 = vmatprep.mubr.msk.f32.mxu1 %vm12747_vm0, %v15762_v50  ;;  %11150 = vmatprep.mubr.msk.f32.mxu0 %vm12747_vm0, %v15762_v50 }
 0x537   : > { %11038 = vmatmul.mubr.f32.gmra.mxu1 %v15255_v15  ;;  %11151 = vmatmul.mubr.f32.gmra.mxu0 %v15131_v2 }
 0x538   : > { %11040 = vmatprep.mubr.msk.f32.mxu1 %vm12747_vm0, %v15762_v50  ;;  %11153 = vmatprep.mubr.msk.f32.mxu0 %vm12747_vm0, %v15762_v50 }
 0x53b   : > { %11041 = vmatmul.mubr.f32.gmra.mxu1 %v15263_v48  ;;  %11154 = vmatmul.mubr.f32.gmra.mxu0 %v15119_v14 }
 0x53c   : > { %11043 = vmatprep.mubr.msk.f32.mxu1 %vm12747_vm0, %v15762_v50  ;;  %11156 = vmatprep.mubr.msk.f32.mxu0 %vm12747_vm0, %v15762_v50 }
 0x53f   : > { %11044 = vmatmul.mubr.f32.gmra.mxu1 %v15271_v17  ;;  %11157 = vmatmul.mubr.f32.gmra.mxu0 %v15153_v57 }
 0x540   : > { %11046 = vmatprep.mubr.msk.f32.mxu1 %vm12747_vm0, %v15762_v50  ;;  %11159 = vmatprep.mubr.msk.f32.mxu0 %vm12747_vm0, %v15762_v50 }
 0x543   : > { %11047 = vmatmul.mubr.f32.gmra.mxu1 %v15279_v30  ;;  %11160 = vmatmul.mubr.f32.gmra.mxu0 %v15141_v32 }
 0x544   : > { %11049 = vmatprep.mubr.msk.f32.mxu1 %vm12747_vm0, %v15762_v50  ;;  %11162 = vmatprep.mubr.msk.f32.mxu0 %vm12747_vm0, %v15762_v50 }
 0x547   : > { %11050 = vmatmul.mubr.f32.gmra.mxu1 %v15287_v55  ;;  %11163 = vmatmul.mubr.f32.gmra.mxu0 %v15173_v20 }
 0x548   : > { %11052 = vmatprep.mubr.msk.f32.mxu1 %vm12747_vm0, %v15762_v50  ;;  %11304 = vmatprep.mubr.msk.f32.mxu0 %vm12747_vm0, %v15762_v50 }
 0x54b   : > { %11053 = vmatmul.mubr.f32.gmra.mxu1 %v15295_v9  ;;  %11305 = vmatmul.mubr.f32.vlgmr.msra.gmra.mxu0 %v14992_v5 }
 0x54c   : > { %11055 = vmatprep.mubr.msk.f32.mxu1 %vm12747_vm0, %v15762_v50  ;;  %11307 = vmatprep.mubr.msk.f32.mxu0 %vm12747_vm0, %v15762_v50 }
 0x54f   : > { %11056 = vmatmul.mubr.f32.gmra.mxu1 %v15303_v62  ;;  %11308 = vmatmul.mubr.f32.gmra.mxu0 %v15020_v39 }
 0x550   : > { %11197 = vmatprep.mubr.msk.f32.mxu1 %vm12747_vm0, %v15762_v50  ;;  %11310 = vmatprep.mubr.msk.f32.mxu0 %vm12747_vm0, %v15762_v50 }
 0x553   : > { %11198 = vmatmul.mubr.f32.vlgmr.msra.gmra.mxu1 %v14921_v24  ;;  %11311 = vmatmul.mubr.f32.gmra.mxu0 %v15044_v26 }
 0x554   : > { %11200 = vmatprep.mubr.msk.f32.mxu1 %vm12747_vm0, %v15762_v50  ;;  %11313 = vmatprep.mubr.msk.f32.mxu0 %vm12747_vm0, %v15762_v50 }
 0x557   : > { %11201 = vmatmul.mubr.f32.gmra.mxu1 %v14911_v10  ;;  %11314 = vmatmul.mubr.f32.gmra.mxu0 %v15068_v23  ;;  %v5030_v10 = vld [vmem:[#allocation3 + $0xc9] sm:$0xff] }
 0x558   : > { %11203 = vmatprep.mubr.msk.f32.mxu1 %vm12747_vm0, %v15762_v50  ;;  %11316 = vmatprep.mubr.msk.f32.mxu0 %vm12747_vm0, %v15762_v50 }
 0x55b   : > { %11204 = vmatmul.mubr.f32.gmra.mxu1 %v14939_v56  ;;  %11317 = vmatmul.mubr.f32.gmra.mxu0 %v15092_v52  ;;  %v5031_v56 = vld [vmem:[#allocation3 + $0xd1] sm:$0xff] }
 0x55c   : > { %11206 = vmatprep.mubr.msk.f32.mxu1 %vm12747_vm0, %v15762_v50  ;;  %11319 = vmatprep.mubr.msk.f32.mxu0 %vm12747_vm0, %v15762_v50 }
 0x55f   : > { %11207 = vmatmul.mubr.f32.gmra.mxu1 %v14928_v25  ;;  %11320 = vmatmul.mubr.f32.gmra.mxu0 %v15114_v41 }
 0x560   : > { %11209 = vmatprep.mubr.msk.f32.mxu1 %vm12747_vm0, %v15762_v50  ;;  %11322 = vmatprep.mubr.msk.f32.mxu0 %vm12747_vm0, %v15762_v50 }
 0x563   : > { %11210 = vmatmul.mubr.f32.gmra.mxu1 %v14961_v46  ;;  %11323 = vmatmul.mubr.f32.gmra.mxu0 %v15136_v6 }
 0x564   : > { %11212 = vmatprep.mubr.msk.f32.mxu1 %vm12747_vm0, %v15762_v50  ;;  %11325 = vmatprep.mubr.msk.f32.mxu0 %vm12747_vm0, %v15762_v50 }
 0x567   : > { %11213 = vmatmul.mubr.f32.gmra.mxu1 %v14949_v3  ;;  %11326 = vmatmul.mubr.f32.gmra.mxu0 %v15158_v12 }
 0x568   : > { %11215 = vmatprep.mubr.msk.f32.mxu1 %vm12747_vm0, %v15762_v50  ;;  %11328 = vmatprep.mubr.msk.f32.mxu0 %vm12747_vm0, %v15762_v50 }
 0x56b   : > { %11216 = vmatmul.mubr.f32.gmra.mxu1 %v14986_v36  ;;  %11329 = vmatmul.mubr.f32.gmra.mxu0 %v15176_v42 }
 0x56c   : > { %11218 = vmatprep.mubr.msk.f32.mxu1 %vm12747_vm0, %v15762_v50  ;;  %11331 = vmatprep.mubr.msk.f32.mxu0 %vm12747_vm0, %v15762_v50 }
 0x56f   : > { %11219 = vmatmul.mubr.f32.gmra.mxu1 %v14972_v45  ;;  %11332 = vmatmul.mubr.f32.gmra.mxu0 %v15191_v22 }
 0x570   : > { %11221 = vmatprep.mubr.msk.f32.mxu1 %vm12747_vm0, %v15762_v50  ;;  %11334 = vmatprep.mubr.msk.f32.mxu0 %vm12747_vm0, %v15762_v50 }
 0x573   : > { %11222 = vmatmul.mubr.f32.gmra.mxu1 %v15012_v40  ;;  %11335 = vmatmul.mubr.f32.gmra.mxu0 %v15202_v27 }
 0x574   : > { %11224 = vmatprep.mubr.msk.f32.mxu1 %vm12747_vm0, %v15762_v50  ;;  %11337 = vmatprep.mubr.msk.f32.mxu0 %vm12747_vm0, %v15762_v50 }
 0x577   : > { %11225 = vmatmul.mubr.f32.gmra.mxu1 %v14997_v63  ;;  %11338 = vmatmul.mubr.f32.gmra.mxu0 %v15211_v31 }
 0x578   : > { %11227 = vmatprep.mubr.msk.f32.mxu1 %vm12747_vm0, %v15762_v50  ;;  %11340 = vmatprep.mubr.msk.f32.mxu0 %vm12747_vm0, %v15762_v50 }
 0x57b   : > { %11228 = vmatmul.mubr.f32.gmra.mxu1 %v15038_v7  ;;  %11341 = vmatmul.mubr.f32.gmra.mxu0 %v15220_v11 }
 0x57c   : > { %11230 = vmatprep.mubr.msk.f32.mxu1 %vm12747_vm0, %v15762_v50  ;;  %11343 = vmatprep.mubr.msk.f32.mxu0 %vm12747_vm0, %v15762_v50 }
 0x57f   : > { %11231 = vmatmul.mubr.f32.gmra.mxu1 %v15025_v1  ;;  %11344 = vmatmul.mubr.f32.gmra.mxu0 %v15229_v51 }
 0x580   : > { %11233 = vmatprep.mubr.msk.f32.mxu1 %vm12747_vm0, %v15762_v50  ;;  %11346 = vmatprep.mubr.msk.f32.mxu0 %vm12747_vm0, %v15762_v50 }
 0x583   : > { %11234 = vmatmul.mubr.f32.gmra.mxu1 %v15062_v47  ;;  %11347 = vmatmul.mubr.f32.gmra.mxu0 %v15238_v29 }
 0x584   : > { %11236 = vmatprep.mubr.msk.f32.mxu1 %vm12747_vm0, %v15762_v50  ;;  %11349 = vmatprep.mubr.msk.f32.mxu0 %vm12747_vm0, %v15762_v50 }
 0x587   : > { %11237 = vmatmul.mubr.f32.gmra.mxu1 %v15049_v59  ;;  %11350 = vmatmul.mubr.f32.gmra.mxu0 %v15247_v49 }
 0x588   : > { %11239 = vmatprep.mubr.msk.f32.mxu1 %vm12747_vm0, %v15762_v50  ;;  %11352 = vmatprep.mubr.msk.f32.mxu0 %vm12747_vm0, %v15762_v50 }
 0x58b   : > { %11240 = vmatmul.mubr.f32.gmra.mxu1 %v15086_v13  ;;  %11353 = vmatmul.mubr.f32.gmra.mxu0 %v15255_v15 }
 0x58c   : > { %11242 = vmatprep.mubr.msk.f32.mxu1 %vm12747_vm0, %v15762_v50  ;;  %11355 = vmatprep.mubr.msk.f32.mxu0 %vm12747_vm0, %v15762_v50 }
 0x58f   : > { %11243 = vmatmul.mubr.f32.gmra.mxu1 %v15073_v35  ;;  %11356 = vmatmul.mubr.f32.gmra.mxu0 %v15263_v48 }
 0x590   : > { %11245 = vmatprep.mubr.msk.f32.mxu1 %vm12747_vm0, %v15762_v50  ;;  %11358 = vmatprep.mubr.msk.f32.mxu0 %vm12747_vm0, %v15762_v50 }
 0x593   : > { %11246 = vmatmul.mubr.f32.gmra.mxu1 %v15109_v34  ;;  %11359 = vmatmul.mubr.f32.gmra.mxu0 %v15271_v17 }
 0x594   : > { %11248 = vmatprep.mubr.msk.f32.mxu1 %vm12747_vm0, %v15762_v50  ;;  %11361 = vmatprep.mubr.msk.f32.mxu0 %vm12747_vm0, %v15762_v50 }
 0x597   : > { %11249 = vmatmul.mubr.f32.gmra.mxu1 %v15097_v53  ;;  %11362 = vmatmul.mubr.f32.gmra.mxu0 %v15279_v30 }
 0x598   : > { %11251 = vmatprep.mubr.msk.f32.mxu1 %vm12747_vm0, %v15762_v50  ;;  %11364 = vmatprep.mubr.msk.f32.mxu0 %vm12747_vm0, %v15762_v50 }
 0x59b   : > { %11252 = vmatmul.mubr.f32.gmra.mxu1 %v15131_v2  ;;  %11365 = vmatmul.mubr.f32.gmra.mxu0 %v15287_v55 }
 0x59c   : > { %11254 = vmatprep.mubr.msk.f32.mxu1 %vm12747_vm0, %v15762_v50  ;;  %11367 = vmatprep.mubr.msk.f32.mxu0 %vm12747_vm0, %v15762_v50 }
 0x59f   : > { %11255 = vmatmul.mubr.f32.gmra.mxu1 %v15119_v14  ;;  %11368 = vmatmul.mubr.f32.gmra.mxu0 %v15295_v9 }
 0x5a0   : > { %11257 = vmatprep.mubr.msk.f32.mxu1 %vm12747_vm0, %v15762_v50  ;;  %11370 = vmatprep.mubr.msk.f32.mxu0 %vm12747_vm0, %v15762_v50 }
 0x5a3   : > { %11258 = vmatmul.mubr.f32.gmra.mxu1 %v15153_v57  ;;  %11371 = vmatmul.mubr.f32.gmra.mxu0 %v15303_v62 }
 0x5a4   : > { %11260 = vmatprep.mubr.msk.f32.mxu1 %vm12747_vm0, %v15762_v50  ;;  %11373 = vmatprep.mubr.msk.f32.mxu0 %vm12747_vm0, %v15762_v50 }
 0x5a6   : > { %v4627_v24 = vpop.f32.mrf.mxu0 }
 0x5a7   : > { %11261 = vmatmul.mubr.f32.gmra.mxu1 %v15141_v32  ;;  %11374 = vmatmul.mubr.f32.gmra.mxu0 %v5030_v10 }
 0x5a8   : > { %11263 = vmatprep.mubr.msk.f32.mxu1 %vm12747_vm0, %v15762_v50  ;;  %11376 = vmatprep.mubr.msk.f32.mxu0 %vm12747_vm0, %v15762_v50  ;;  %v11092_v25 = vpop.f32.mrf.mxu0 }
 0x5aa   : > { %v4632_v3 = vpop.f32.mrf.mxu0 }
 0x5ab   : > { %11264 = vmatmul.mubr.f32.gmra.mxu1 %v15173_v20  ;;  %11377 = vmatmul.mubr.f32.gmra.mxu0 %v5031_v56 }
 0x5ac   : > { %11266 = vmatprep.mubr.msk.f32.mxu1 %vm12747_vm0, %v15762_v50  ;;  %v11095_v46 = vpop.f32.mrf.mxu0 }
 0x5af   : > { %v4437_v45 = vpop.f32.mrf.mxu1  ;;  %11267 = vmatmul.mubr.f32.gmra.mxu1 %v15163_v43  ;;  %v4637_v36 = vpop.f32.mrf.mxu0 }
 0x5b0   : > { %v15446_v5 = vadd.f32 %v4627_v24, %v4437_v45  ;;  %11269 = vmatprep.mubr.msk.f32.mxu1 %vm12747_vm0, %v15762_v50 }
 0x5b1   : > { %v10985_v63 = vpop.f32.mrf.mxu1  ;;  %v11098_v40 = vpop.f32.mrf.mxu0 }
 0x5b3   : > { %v4442_v39 = vpop.f32.mrf.mxu1  ;;  %11270 = vmatmul.mubr.f32.gmra.mxu1 %v15188_v54  ;;  %v4642_v1 = vpop.f32.mrf.mxu0 }
 0x5b4   : > { %v15451_v7 = vadd.f32 %v4632_v3, %v4442_v39 }
 0x5b5   : > { %v10988_v26 = vpop.f32.mrf.mxu1  ;;  %v11101_v59 = vpop.f32.mrf.mxu0 }
 0x5b7   : > { %v4447_v47 = vpop.f32.mrf.mxu1  ;;  %v4647_v23 = vpop.f32.mrf.mxu0 }
 0x5b8   : > { %v15453_v35 = vadd.f32 %v4637_v36, %v4447_v47 }
 0x5b9   : > { %v10991_v13 = vpop.f32.mrf.mxu1  ;;  %v11104_v52 = vpop.f32.mrf.mxu0 }
 0x5bb   : > { %v4452_v53 = vpop.f32.mrf.mxu1  ;;  %v4652_v34 = vpop.f32.mrf.mxu0 }
 0x5bc   : > { %v15455_v41 = vadd.f32 %v4642_v1, %v4452_v53 }
 0x5bd   : > { %v10994_v14 = vpop.f32.mrf.mxu1  ;;  %v11107_v2 = vpop.f32.mrf.mxu0 }
 0x5bf   : > { %v4457_v6 = vpop.f32.mrf.mxu1  ;;  %v4657_v32 = vpop.f32.mrf.mxu0 }
 0x5c0   : > { %v15457_v57 = vadd.f32 %v4647_v23, %v4457_v6 }
 0x5c1   : > { %v10997_v12 = vpop.f32.mrf.mxu1  ;;  %v11110_v43 = vpop.f32.mrf.mxu0 }
 0x5c3   : > { %v4462_v0 = vpop.f32.mrf.mxu1  ;;  %v4662_v28 = vpop.f32.mrf.mxu0 }
 0x5c4   : > { %v15459_v20 = vadd.f32 %v4652_v34, %v4462_v0 }
 0x5c5   : > { %v11000_v58 = vpop.f32.mrf.mxu1  ;;  %v11113_v18 = vpop.f32.mrf.mxu0 }
 0x5c7   : > { %v4467_v19 = vpop.f32.mrf.mxu1  ;;  %v4667_v42 = vpop.f32.mrf.mxu0 }
 0x5c8   : > { %v15461_v37 = vadd.f32 %v4657_v32, %v4467_v19 }
 0x5c9   : > { %v11003_v16 = vpop.f32.mrf.mxu1  ;;  %v11116_v33 = vpop.f32.mrf.mxu0 }
 0x5cb   : > { %v4472_v21 = vpop.f32.mrf.mxu1  ;;  %v4672_v54 = vpop.f32.mrf.mxu0 }
 0x5cc   : > { %v15463_v22 = vadd.f32 %v4662_v28, %v4472_v21 }
 0x5cd   : > { %v11006_v38 = vpop.f32.mrf.mxu1  ;;  %v11119_v44 = vpop.f32.mrf.mxu0 }
 0x5cf   : > { %v4477_v27 = vpop.f32.mrf.mxu1  ;;  %v4677_v8 = vpop.f32.mrf.mxu0 }
 0x5d0   : > { %v15465_v31 = vadd.f32 %v4667_v42, %v4477_v27 }
 0x5d1   : > { %v11009_v60 = vpop.f32.mrf.mxu1  ;;  %v11122_v11 = vpop.f32.mrf.mxu0 }
 0x5d3   : > { %v4482_v4 = vpop.f32.mrf.mxu1  ;;  %v4682_v51 = vpop.f32.mrf.mxu0 }
 0x5d4   : > { %v15467_v61 = vadd.f32 %v4672_v54, %v4482_v4 }
 0x5d5   : > { %v11012_v29 = vpop.f32.mrf.mxu1  ;;  %v11125_v49 = vpop.f32.mrf.mxu0 }
 0x5d7   : > { %v4487_v15 = vpop.f32.mrf.mxu1  ;;  %v4687_v48 = vpop.f32.mrf.mxu0 }
 0x5d8   : > { %v15469_v17 = vadd.f32 %v4677_v8, %v4487_v15 }
 0x5d9   : > { %v11015_v30 = vpop.f32.mrf.mxu1  ;;  %v11128_v55 = vpop.f32.mrf.mxu0 }
 0x5db   : > { %v4492_v9 = vpop.f32.mrf.mxu1  ;;  %v4692_v62 = vpop.f32.mrf.mxu0 }
 0x5dc   : > { %v15471_v10 = vadd.f32 %v4682_v51, %v4492_v9 }
 0x5dd   : > { %v11018_v24 = vpop.f32.mrf.mxu1  ;;  %v11131_v25 = vpop.f32.mrf.mxu0 }
 0x5df   : > { %v4497_v56 = vpop.f32.mrf.mxu1  ;;  %v4697_v3 = vpop.f32.mrf.mxu0 }
 0x5e0   : > { %v15473_v46 = vadd.f32 %v4687_v48, %v4497_v56 }
 0x5e1   : > { %v11021_v45 = vpop.f32.mrf.mxu1  ;;  %v11134_v36 = vpop.f32.mrf.mxu0 }
 0x5e3   : > { %v4502_v63 = vpop.f32.mrf.mxu1  ;;  %v4702_v40 = vpop.f32.mrf.mxu0 }
 0x5e4   : > { %v15475_v39 = vadd.f32 %v4692_v62, %v4502_v63 }
 0x5e5   : > { %v11024_v1 = vpop.f32.mrf.mxu1  ;;  %v11137_v26 = vpop.f32.mrf.mxu0 }
 0x5e7   : > { %v4507_v59 = vpop.f32.mrf.mxu1  ;;  %v4707_v47 = vpop.f32.mrf.mxu0 }
 0x5e8   : > { %v15477_v23 = vadd.f32 %v4697_v3, %v4507_v59  ;;  %v5264_v3 = vld [vmem:[#allocation13 + $0x8] sm:$0xff] }
 0x5e9   : > { %v11027_v13 = vpop.f32.mrf.mxu1  ;;  %v11140_v52 = vpop.f32.mrf.mxu0  ;;  %8249 = vmatprep.mubr.msk.f32.mxu1 %vm5275_vm1, %v5264_v3  ;;  %v5400_v3 = vld [vmem:[#allocation15 + $0x58] sm:$0xff] }
 0x5eb   : > { %v4512_v53 = vpop.f32.mrf.mxu1  ;;  %v4712_v34 = vpop.f32.mrf.mxu0 }
 0x5ec   : > { %v15479_v14 = vadd.f32 %v4702_v40, %v4512_v53 }
 0x5ed   : > { %v11030_v2 = vpop.f32.mrf.mxu1  ;;  %v11143_v6 = vpop.f32.mrf.mxu0 }
 0x5ef   : > { %v4517_v32 = vpop.f32.mrf.mxu1  ;;  %v4717_v12 = vpop.f32.mrf.mxu0 }
 0x5f0   : > { %v15481_v43 = vadd.f32 %v4707_v47, %v4517_v32 }
 0x5f1   : > { %v11033_v0 = vpop.f32.mrf.mxu1  ;;  %v11146_v28 = vpop.f32.mrf.mxu0 }
 0x5f3   : > { %v4522_v58 = vpop.f32.mrf.mxu1  ;;  %v4722_v18 = vpop.f32.mrf.mxu0 }
 0x5f4   : > { %v15483_v19 = vadd.f32 %v4712_v34, %v4522_v58 }
 0x5f5   : > { %v11036_v42 = vpop.f32.mrf.mxu1  ;;  %v11149_v16 = vpop.f32.mrf.mxu0 }
 0x5f7   : > { %v4527_v33 = vpop.f32.mrf.mxu1  ;;  %v4727_v21 = vpop.f32.mrf.mxu0 }
 0x5f8   : > { %v15485_v54 = vadd.f32 %v4717_v12, %v4527_v33 }
 0x5f9   : > { %v11039_v38 = vpop.f32.mrf.mxu1  ;;  %v11152_v44 = vpop.f32.mrf.mxu0 }
 0x5fb   : > { %v4532_v27 = vpop.f32.mrf.mxu1  ;;  %v4732_v8 = vpop.f32.mrf.mxu0 }
 0x5fc   : > { %v15487_v60 = vadd.f32 %v4722_v18, %v4532_v27 }
 0x5fd   : > { %v11042_v11 = vpop.f32.mrf.mxu1  ;;  %v11155_v4 = vpop.f32.mrf.mxu0 }
 0x5ff   : > { %v4537_v51 = vpop.f32.mrf.mxu1  ;;  %v4737_v29 = vpop.f32.mrf.mxu0 }
 0x600   : > { %v15489_v49 = vadd.f32 %v4727_v21, %v4537_v51  ;;  %v5404_v51 = vld [vmem:[#allocation15 + $0x78] sm:$0xff] }
 0x601   : > { %v11045_v15 = vpop.f32.mrf.mxu1  ;;  %v11158_v48 = vpop.f32.mrf.mxu0  ;;  %11379 = vmatprep.subr.mxu0 %v5404_v51 }
 0x602   : > { %11380 = vmatpush3.msra.mxu0 %v5404_v51  ;;  %v5392_v51 = vld [vmem:[#allocation15 + $0x18] sm:$0xff] }
 0x603   : > { %v4542_v30 = vpop.f32.mrf.mxu1  ;;  %v4742_v55 = vpop.f32.mrf.mxu0 }
 0x604   : > { %v15491_v9 = vadd.f32 %v4732_v8, %v4542_v30  ;;  %v5402_v30 = vld [vmem:[#allocation15 + $0x68] sm:$0xff] }
 0x605   : > { %v11048_v62 = vpop.f32.mrf.mxu1  ;;  %v11161_v24 = vpop.f32.mrf.mxu0 }
 0x606   : > { %v5401_v24 = vld [vmem:[#allocation15 + $0x60] sm:$0xff] }
 0x607   : > { %v4547_v25 = vpop.f32.mrf.mxu1  ;;  %v4747_v56 = vpop.f32.mrf.mxu0 }
 0x608   : > { %v15493_v45 = vadd.f32 %v4737_v29, %v4547_v25 }
 0x609   : > { %v11051_v36 = vpop.f32.mrf.mxu1  ;;  %v11164_v63 = vpop.f32.mrf.mxu0 }
 0x60b   : > { %v4552_v40 = vpop.f32.mrf.mxu1  ;;  %v5114_v1 = vpop.f32.mrf.mxu0 }
 0x60c   : > { %v15496_v26 = vadd.f32 %v4742_v55, %v4552_v40 }
 0x60d   : > { %v11054_v59 = vpop.f32.mrf.mxu1  ;;  %v11306_v47 = vpop.f32.mrf.mxu0 }
 0x60f   : > { %v4557_v13 = vpop.f32.mrf.mxu1  ;;  %v5119_v52 = vpop.f32.mrf.mxu0 }
 0x610   : > { %v15498_v53 = vadd.f32 %v4747_v56, %v4557_v13  ;;  %v5398_v13 = vld [vmem:[#allocation15 + $0x48] sm:$0xff] }
 0x611   : > { %v11057_v34 = vpop.f32.mrf.mxu1  ;;  %v11309_v2 = vpop.f32.mrf.mxu0 }
 0x613   : > { %v4858_v6 = vpop.f32.mrf.mxu1  ;;  %v5124_v32 = vpop.f32.mrf.mxu0 }
 0x614   : > { %v4982_v12 = vadd.f32 %v4858_v6, %v15446_v5  ;;  %v5403_v5 = vld [vmem:[#allocation15 + $0x70] sm:$0xff] }
 0x615   : > { %v11199_v0 = vpop.f32.mrf.mxu1  ;;  %v11312_v28 = vpop.f32.mrf.mxu0  ;;  %11381 = vmatprep.subr.mxu0 %v5403_v5 }
 0x616   : > { %v15501_v58 = vadd.f32 %v5114_v1, %v4982_v12  ;;  %11382 = vmatpush3.msra.mxu0 %v5403_v5  ;;  %v5399_v1 = vld [vmem:[#allocation15 + $0x50] sm:$0xff]  ;;  %v5396_v0 = vld [vmem:[#allocation15 + $0x38] sm:$0xff] }
 0x617   : > { %v4863_v18 = vpop.f32.mrf.mxu1  ;;  %v5129_v42 = vpop.f32.mrf.mxu0  ;;  %11383 = vmatprep.subr.mxu0 %v5402_v30 }
 0x618   : > { %v4983_v16 = vadd.f32 %v4863_v18, %v15451_v7  ;;  %11384 = vmatpush3.msra.mxu0 %v5402_v30 }
 0x619   : > { %v11202_v33 = vpop.f32.mrf.mxu1  ;;  %v11315_v21 = vpop.f32.mrf.mxu0  ;;  %11385 = vmatprep.subr.mxu0 %v5401_v24 }
 0x61a   : > { %v15504_v38 = vadd.f32 %v5119_v52, %v4983_v16  ;;  %11386 = vmatpush3.msra.mxu0 %v5401_v24 }
 0x61b   : > { %v4868_v44 = vpop.f32.mrf.mxu1  ;;  %v5134_v27 = vpop.f32.mrf.mxu0  ;;  %11387 = vmatprep.subr.mxu0 %v5400_v3 }
 0x61c   : > { %v4984_v8 = vadd.f32 %v4868_v44, %v15453_v35  ;;  %11388 = vmatpush3.msra.mxu0 %v5400_v3  ;;  %v5394_v44 = vld [vmem:[#allocation15 + $0x28] sm:$0xff] }
 0x61d   : > { %v11205_v11 = vpop.f32.mrf.mxu1  ;;  %v11318_v4 = vpop.f32.mrf.mxu0  ;;  %11389 = vmatprep.subr.mxu0 %v5399_v1 }
 0x61e   : > { %v15507_v29 = vadd.f32 %v5124_v32, %v4984_v8  ;;  %11390 = vmatpush3.msra.mxu0 %v5399_v1  ;;  %v5393_v11 = vld [vmem:[#allocation15 + $0x20] sm:$0xff] }
 0x61f   : > { %v4873_v15 = vpop.f32.mrf.mxu1  ;;  %v5139_v48 = vpop.f32.mrf.mxu0  ;;  %11391 = vmatprep.subr.mxu0 %v5398_v13 }
 0x620   : > { %v4985_v7 = vadd.f32 %v4873_v15, %v15455_v41  ;;  %11392 = vmatpush3.msra.mxu0 %v5398_v13 }
 0x621   : > { %v11208_v55 = vpop.f32.mrf.mxu1  ;;  %v11321_v62 = vpop.f32.mrf.mxu0 }
 0x622   : > { %v15510_v25 = vadd.f32 %v5129_v42, %v4985_v7 }
 0x623   : > { %v4878_v35 = vpop.f32.mrf.mxu1  ;;  %v5144_v56 = vpop.f32.mrf.mxu0 }
 0x624   : > { %v4986_v36 = vadd.f32 %v4878_v35, %v15457_v57  ;;  %v5397_v57 = vld [vmem:[#allocation15 + $0x40] sm:$0xff] }
 0x625   : > { %v11211_v63 = vpop.f32.mrf.mxu1  ;;  %v11324_v40 = vpop.f32.mrf.mxu0  ;;  %11393 = vmatprep.subr.mxu0 %v5397_v57 }
 0x626   : > { %v15513_v41 = vadd.f32 %v5134_v27, %v4986_v36  ;;  %11394 = vmatpush3.msra.mxu0 %v5397_v57 }
 0x627   : > { %v4883_v59 = vpop.f32.mrf.mxu1  ;;  %v15515_v47 = vpop.f32.mrf.mxu0  ;;  %11395 = vmatprep.subr.mxu0 %v5396_v0 }
 0x628   : > { %v4987_v52 = vadd.f32 %v4883_v59, %v15459_v20  ;;  %v5395_v20 = vld [vmem:[#allocation15 + $0x30] sm:$0xff]  ;;  %11396 = vmatpush3.msra.mxu0 %v5396_v0 }
 0x629   : > { %v11214_v34 = vpop.f32.mrf.mxu1  ;;  %v11327_v2 = vpop.f32.mrf.mxu0  ;;  %11397 = vmatprep.subr.mxu0 %v5395_v20 }
 0x62a   : > { %v15518_v6 = vadd.f32 %v5139_v48, %v4987_v52  ;;  %11398 = vmatpush3.msra.mxu0 %v5395_v20  ;;  %v5391_v48 = vld [vmem:[#allocation15 + $0x10] sm:$0xff] }
 0x62b   : > { %v4888_v32 = vpop.f32.mrf.mxu1  ;;  %v15520_v12 = vpop.f32.mrf.mxu0  ;;  %11399 = vmatprep.subr.mxu0 %v5394_v44 }
 0x62c   : > { %v4988_v28 = vadd.f32 %v4888_v32, %v15461_v37  ;;  %11400 = vmatpush3.msra.mxu0 %v5394_v44 }
 0x62d   : > { %v11217_v18 = vpop.f32.mrf.mxu1  ;;  %v11330_v42 = vpop.f32.mrf.mxu0  ;;  %11401 = vmatprep.subr.mxu0 %v5393_v11 }
 0x62e   : > { %v15523_v16 = vadd.f32 %v5144_v56, %v4988_v28  ;;  %11402 = vmatpush3.msra.mxu0 %v5393_v11 }
 0x62f   : > { %v15525_v33 = vpop.f32.mrf.mxu1  ;;  %v15527_v21 = vpop.f32.mrf.mxu0  ;;  %11403 = vmatprep.subr.mxu0 %v5392_v51 }
 0x630   : > { %11404 = vmatpush3.msra.mxu0 %v5392_v51 }
 0x631   : > { %v11220_v27 = vpop.f32.mrf.mxu1  ;;  %v11333_v8 = vpop.f32.mrf.mxu0  ;;  %11405 = vmatprep.subr.mxu0 %v5391_v48 }
 0x632   : > { %11406 = vmatpush3.msra.mxu0 %v5391_v48 }
 0x633   : > { %v15529_v37 = vpop.f32.mrf.mxu1  ;;  %v15531_v4 = vpop.f32.mrf.mxu0 }
 0x635   : > { %v11223_v5 = vpop.f32.mrf.mxu1  ;;  %v11336_v15 = vpop.f32.mrf.mxu0 }
 0x637   : > { %v4903_v30 = vpop.f32.mrf.mxu1  ;;  %v5169_v7 = vpop.f32.mrf.mxu0 }
 0x639   : > { %v11226_v55 = vpop.f32.mrf.mxu1  ;;  %v11339_v62 = vpop.f32.mrf.mxu0 }
 0x63b   : > { %v4908_v24 = vpop.f32.mrf.mxu1  ;;  %v5174_v35 = vpop.f32.mrf.mxu0 }
 0x63d   : > { %v11229_v56 = vpop.f32.mrf.mxu1  ;;  %v11342_v3 = vpop.f32.mrf.mxu0 }
 0x63f   : > { %v4913_v36 = vpop.f32.mrf.mxu1  ;;  %v5179_v63 = vpop.f32.mrf.mxu0 }
 0x641   : > { %v11232_v40 = vpop.f32.mrf.mxu1  ;;  %v11345_v1 = vpop.f32.mrf.mxu0 }
 0x643   : > { %v4918_v59 = vpop.f32.mrf.mxu1  ;;  %v5184_v13 = vpop.f32.mrf.mxu0 }
 0x644   : > { %v4994_v56 = vadd.f32 %v4918_v59, %v15473_v46 }
 0x645   : > { %v11235_v52 = vpop.f32.mrf.mxu1  ;;  %v11348_v34 = vpop.f32.mrf.mxu0 }
 0x646   : > { %v4992_v34 = vadd.f32 %v4908_v24, %v15469_v17 }
 0x647   : > { %v4923_v2 = vpop.f32.mrf.mxu1  ;;  %v5189_v57 = vpop.f32.mrf.mxu0 }
 0x648   : > { %v4995_v15 = vadd.f32 %v4923_v2, %v15475_v39  ;;  %v5250_v2 = vadd.f32 %v5174_v35, %v4994_v56  ;;  %v5248_v17 = vadd.f32 %v15531_v4, %v4992_v34  ;;  %v5273_v34 = vld [vmem:[#allocation13 + $0x50] sm:$0xff] }
 0x649   : > { %v11238_v32 = vpop.f32.mrf.mxu1  ;;  %v11351_v0 = vpop.f32.mrf.mxu0 }
 0x64b   : > { %v4928_v28 = vpop.f32.mrf.mxu1  ;;  %v15533_v18 = vpop.f32.mrf.mxu0 }
 0x64c   : > { %v4996_v8 = vadd.f32 %v4928_v28, %v15477_v23  ;;  %v4993_v23 = vadd.f32 %v4913_v36, %v15471_v10 }
 0x64d   : > { %v11241_v42 = vpop.f32.mrf.mxu1  ;;  %v11354_v20 = vpop.f32.mrf.mxu0 }
 0x64e   : > { %v5252_v3 = vadd.f32 %v5184_v13, %v4996_v8  ;;  %v4991_v13 = vadd.f32 %v4903_v30, %v15467_v61  ;;  %v4989_v61 = vadd.f32 %v15525_v33, %v15463_v22 }
 0x64f   : > { %v4933_v44 = vpop.f32.mrf.mxu1  ;;  %v15535_v27 = vpop.f32.mrf.mxu0 }
 0x650   : > { %v4997_v11 = vadd.f32 %v4933_v44, %v15479_v14  ;;  %v5251_v14 = vadd.f32 %v5179_v63, %v4995_v15  ;;  %v4990_v63 = vadd.f32 %v15529_v37, %v15465_v31  ;;  %v5247_v30 = vadd.f32 %v15527_v21, %v4991_v13  ;;  %v5541_v13 = vld [vmem:[#allocation16 + $0xf8] sm:$0xff] }
 0x651   : > { %v11244_v51 = vpop.f32.mrf.mxu1  ;;  %v11357_v5 = vpop.f32.mrf.mxu0  ;;  %v5245_v4 = vadd.f32 %v15515_v47, %v4989_v61 }
 0x652   : > { %v5253_v48 = vadd.f32 %v5189_v57, %v4997_v11  ;;  %v5249_v57 = vadd.f32 %v5169_v7, %v4993_v23  ;;  %v5246_v0 = vadd.f32 %v15520_v12, %v4990_v63  ;;  %v5263_v23 = vld [vmem:[#allocation13] sm:$0xff]  ;;  %v5537_v63 = vld [vmem:[#allocation16 + $0xd8] sm:$0xff] }
 0x653   : > { %v15540_v55 = vpop.f32.mrf.mxu1  ;;  %v15542_v62 = vpop.f32.mrf.mxu0 }
 0x654   : > { %5295 = vmatpush1.msra.mxu1 %v5253_v48 }
 0x655   : > { %v11247_v40 = vpop.f32.mrf.mxu1  ;;  %5296 = vmatprep.subr.mxu1 %v15762_v50  ;;  %v11360_v1 = vpop.f32.mrf.mxu0 }
 0x656   : > { %5297 = vmatpush1.msra.mxu1 %v5252_v3 }
 0x657   : > { %v15547_v52 = vpop.f32.mrf.mxu1  ;;  %5298 = vmatprep.subr.mxu1 %v15762_v50  ;;  %v15550_v39 = vpop.f32.mrf.mxu0 }
 0x658   : > { %5299 = vmatpush1.msra.mxu1 %v5251_v14  ;;  %v5266_v14 = vld [vmem:[#allocation13 + $0x18] sm:$0xff] }
 0x659   : > { %v11250_v46 = vpop.f32.mrf.mxu1  ;;  %5300 = vmatprep.subr.mxu1 %v15762_v50  ;;  %v11363_v59 = vpop.f32.mrf.mxu0 }
 0x65a   : > { %5301 = vmatpush1.msra.mxu1 %v5250_v2  ;;  %v5390_v2 = vld [vmem:[#allocation15 + $0x8] sm:$0xff]  ;;  %v5389_v46 = vld [vmem:[#allocation15] sm:$0xff]  ;;  %v5523_v59 = vld [vmem:[#allocation16 + $0x78] sm:$0xff] }
 0x65b   : > { %v15555_v10 = vpop.f32.mrf.mxu1  ;;  %5302 = vmatprep.subr.mxu1 %v15762_v50  ;;  %v15558_v36 = vpop.f32.mrf.mxu0  ;;  %11407 = vmatprep.subr.mxu0 %v5390_v2 }
 0x65c   : > { %5303 = vmatpush1.msra.mxu1 %v5249_v57  ;;  %11408 = vmatpush3.msra.mxu0 %v5390_v2  ;;  %v5540_v57 = vld [vmem:[#allocation16 + $0xf0] sm:$0xff] }
 0x65d   : > { %v11253_v24 = vpop.f32.mrf.mxu1  ;;  %5304 = vmatprep.subr.mxu1 %v15762_v50  ;;  %v11366_v35 = vpop.f32.mrf.mxu0  ;;  %11409 = vmatprep.subr.mxu0 %v5389_v46  ;;  %v5708_v2 = vld [vmem:[#allocation16 + $0x170] sm:$0xff] }
 0x65e   : > { %5305 = vmatpush1.msra.mxu1 %v5248_v17  ;;  %11410 = vmatpush3.msra.mxu0 %v5389_v46  ;;  %v5536_v17 = vld [vmem:[#allocation16 + $0xd0] sm:$0xff]  ;;  %v5535_v24 = vld [vmem:[#allocation16 + $0xc8] sm:$0xff] }
 0x65f   : > { %v4953_v7 = vpop.f32.mrf.mxu1  ;;  %5306 = vmatprep.subr.mxu1 %v15762_v50  ;;  %v5219_v32 = vpop.f32.mrf.mxu0  ;;  %11455 = vmatprep.subr.mxu0 %v5523_v59 }
 0x660   : > { %5307 = vmatpush1.msra.mxu1 %v5247_v30 }
 0x661   : > { %v11256_v31 = vpop.f32.mrf.mxu1  ;;  %5308 = vmatprep.subr.mxu1 %v15762_v50  ;;  %v11369_v37 = vpop.f32.mrf.mxu0 }
 0x662   : > { %5309 = vmatpush1.msra.mxu1 %v5246_v0  ;;  %v5521_v0 = vld [vmem:[#allocation16 + $0x68] sm:$0xff]  ;;  %v5520_v37 = vld [vmem:[#allocation16 + $0x60] sm:$0xff] }
 0x663   : > { %v4958_v28 = vpop.f32.mrf.mxu1  ;;  %5310 = vmatprep.subr.mxu1 %v15762_v50  ;;  %v5224_v22 = vpop.f32.mrf.mxu0 }
 0x664   : > { %5311 = vmatpush1.msra.mxu1 %v5245_v4 }
 0x665   : > { %v11259_v33 = vpop.f32.mrf.mxu1  ;;  %5312 = vmatprep.subr.mxu1 %v15762_v50  ;;  %v11372_v21 = vpop.f32.mrf.mxu0 }
 0x666   : > { %5313 = vmatpush1.msra.mxu1 %v15523_v16  ;;  %v5518_v33 = vld [vmem:[#allocation16 + $0x50] sm:$0xff] }
 0x667   : > { %v4963_v12 = vpop.f32.mrf.mxu1  ;;  %5314 = vmatprep.subr.mxu1 %v15762_v50  ;;  %v5229_v42 = vpop.f32.mrf.mxu0 }
 0x668   : > { %5315 = vmatpush1.msra.mxu1 %v15518_v6  ;;  %v5003_v56 = vadd.f32 %v4963_v12, %v15491_v9  ;;  %v5517_v12 = vld [vmem:[#allocation16 + $0x48] sm:$0xff] }
 0x669   : > { %v11262_v20 = vpop.f32.mrf.mxu1  ;;  %5316 = vmatprep.subr.mxu1 %v15762_v50  ;;  %v11375_v47 = vpop.f32.mrf.mxu0 }
 0x66a   : > { %5317 = vmatpush1.msra.mxu1 %v15513_v41  ;;  %v5259_v40 = vadd.f32 %v5219_v32, %v5003_v56  ;;  %v5516_v20 = vld [vmem:[#allocation16 + $0x40] sm:$0xff]  ;;  %v5804_v56 = vld [vmem:[#allocation16 + $0x1f8] sm:$0xff] }
 0x66b   : > { %v4968_v44 = vpop.f32.mrf.mxu1  ;;  %5318 = vmatprep.subr.mxu1 %v15762_v50  ;;  %v5234_v8 = vpop.f32.mrf.mxu0 }
 0x66c   : > { %5319 = vmatpush1.msra.mxu1 %v15510_v25 }
 0x66d   : > { %v11265_v11 = vpop.f32.mrf.mxu1  ;;  %5320 = vmatprep.subr.mxu1 %v15762_v50  ;;  %v11378_v16 = vpop.f32.mrf.mxu0 }
 0x66e   : > { %5321 = vmatpush1.msra.mxu1 %v15507_v29  ;;  %v5004_v29 = vadd.f32 %v4968_v44, %v15493_v45  ;;  %v5000_v45 = vadd.f32 %v15555_v10, %v15485_v54  ;;  %v5539_v10 = vld [vmem:[#allocation16 + $0xe8] sm:$0xff]  ;;  %v5515_v44 = vld [vmem:[#allocation16 + $0x38] sm:$0xff]  ;;  %v5514_v11 = vld [vmem:[#allocation16 + $0x30] sm:$0xff] }
 0x66f   : > { %v4973_v51 = vpop.f32.mrf.mxu1  ;;  %5322 = vmatprep.subr.mxu1 %v15762_v50  ;;  %v5513_v16 = vld [vmem:[#allocation16 + $0x28] sm:$0xff] }
 0x670   : > { %5323 = vmatpush1.msra.mxu1 %v15504_v38  ;;  %v5005_v25 = vadd.f32 %v4973_v51, %v15496_v26  ;;  %v5002_v38 = vadd.f32 %v4958_v28, %v15489_v49  ;;  %v5001_v26 = vadd.f32 %v4953_v7, %v15487_v60  ;;  %v4999_v49 = vadd.f32 %v15547_v52, %v15483_v19  ;;  %v5272_v52 = vld [vmem:[#allocation13 + $0x48] sm:$0xff]  ;;  %v5522_v7 = vld [vmem:[#allocation16 + $0x70] sm:$0xff]  ;;  %v5519_v28 = vld [vmem:[#allocation16 + $0x58] sm:$0xff] }
 0x671   : > { %v11268_v6 = vpop.f32.mrf.mxu1  ;;  %5324 = vmatprep.subr.mxu1 %v15762_v50  ;;  %v4998_v60 = vadd.f32 %v15540_v55, %v15481_v43  ;;  %v5256_v1 = vadd.f32 %v15542_v62, %v5000_v45  ;;  %v5265_v43 = vld [vmem:[#allocation13 + $0x10] sm:$0xff]  ;;  %v5268_v55 = vld [vmem:[#allocation13 + $0x28] sm:$0xff]  ;;  %v5270_v62 = vld [vmem:[#allocation13 + $0x38] sm:$0xff] }
 0x672   : > { %5325 = vmatpush1.msra.mxu1 %v15501_v58  ;;  %v5261_v3 = vadd.f32 %v5229_v42, %v5005_v25  ;;  %v5260_v58 = vadd.f32 %v5224_v22, %v5004_v29  ;;  %v5258_v9 = vadd.f32 %v15558_v36, %v5002_v38  ;;  %v5255_v54 = vadd.f32 %v15535_v27, %v4999_v49  ;;  %v5267_v27 = vld [vmem:[#allocation13 + $0x20] sm:$0xff]  ;;  %v5510_v25 = vld [vmem:[#allocation16 + $0x10] sm:$0xff]  ;;  %v5531_v38 = vld [vmem:[#allocation16 + $0xa8] sm:$0xff] }
 0x673   : > { %v4978_v41 = vpop.f32.mrf.mxu1  ;;  %5340 = vmatprep.subr.mxu1 %v15762_v50  ;;  %v5254_v19 = vadd.f32 %v15533_v18, %v4998_v60  ;;  %v5269_v18 = vld [vmem:[#allocation13 + $0x30] sm:$0xff]  ;;  %v5538_v36 = vld [vmem:[#allocation16 + $0xe0] sm:$0xff]  ;;  %v5527_v45 = vld [vmem:[#allocation16 + $0x88] sm:$0xff] }
 0x674   : > { %v5006_v5 = vadd.f32 %v4978_v41, %v15498_v53  ;;  %v5257_v53 = vadd.f32 %v15550_v39, %v5001_v26  ;;  %v5274_v39 = vld [vmem:[#allocation13 + $0x58] sm:$0xff]  ;;  %v5512_v6 = vld [vmem:[#allocation16 + $0x20] sm:$0xff] }
 0x675   : > { %v11271_v15 = vpop.f32.mrf.mxu1  ;;  %v5511_v41 = vld [vmem:[#allocation16 + $0x18] sm:$0xff]  ;;  %v5508_v29 = vld [vmem:[#allocation16] sm:$0xff] }
 0x676   : > { %v5262_v48 = vadd.f32 %v5234_v8, %v5006_v5  ;;  %v5509_v5 = vld [vmem:[#allocation16 + $0x8] sm:$0xff]  ;;  %v5534_v15 = vld [vmem:[#allocation16 + $0xc0] sm:$0xff]  ;;  %v5529_v26 = vld [vmem:[#allocation16 + $0x98] sm:$0xff] }
 0x677   : > { %v5709_v49 = vld [vmem:[#allocation16 + $0x178] sm:$0xff] }
 0x678   : > { %5341 = vmatpush2.msra.mxu1 %v5262_v48  ;;  %v5533_v48 = vld [vmem:[#allocation16 + $0xb8] sm:$0xff] }
 0x679   : > { %5342 = vmatprep.subr.mxu1 %v15762_v50 }
 0x67a   : > { %5343 = vmatpush2.msra.mxu1 %v5261_v3  ;;  %v5532_v3 = vld [vmem:[#allocation16 + $0xb0] sm:$0xff] }
 0x67b   : > { %5344 = vmatprep.subr.mxu1 %v15762_v50 }
 0x67c   : > { %5345 = vmatpush2.msra.mxu1 %v5260_v58  ;;  %v5530_v58 = vld [vmem:[#allocation16 + $0xa0] sm:$0xff] }
 0x67d   : > { %5346 = vmatprep.subr.mxu1 %v15762_v50 }
 0x67e   : > { %5347 = vmatpush2.msra.mxu1 %v5259_v40  ;;  %v5528_v40 = vld [vmem:[#allocation16 + $0x90] sm:$0xff] }
 0x67f   : > { %5348 = vmatprep.subr.mxu1 %v15762_v50 }
 0x680   : > { %5349 = vmatpush2.msra.mxu1 %v5258_v9  ;;  %v5526_v9 = vld [vmem:[#allocation16 + $0x80] sm:$0xff] }
 0x681   : > { %5350 = vmatprep.subr.mxu1 %v15762_v50 }
 0x682   : > { %5351 = vmatpush2.msra.mxu1 %v5257_v53 }
 0x683   : > { %5352 = vmatprep.subr.mxu1 %v15762_v50 }
 0x684   : > { %5353 = vmatpush2.msra.mxu1 %v5256_v1  ;;  %v5803_v1 = vld [vmem:[#allocation16 + $0x1f0] sm:$0xff] }
 0x685   : > { %5354 = vmatprep.subr.mxu1 %v15762_v50 }
 0x686   : > { %5355 = vmatpush2.msra.mxu1 %v5255_v54  ;;  %v5802_v54 = vld [vmem:[#allocation16 + $0x1e8] sm:$0xff] }
 0x687   : > { %5356 = vmatprep.subr.mxu1 %v15762_v50  ;;  %v5271_v50 = vld [vmem:[#allocation13 + $0x40] sm:$0xff] }
 0x688   : > { %5357 = vmatpush2.msra.mxu1 %v5254_v19  ;;  %v5801_v19 = vld [vmem:[#allocation16 + $0x1e0] sm:$0xff] }
 0x689   : > { %5359 = vmatmul.mubr.f32.vlgmr.msra.gmra.mxu1 %v5263_v23  ;;  %11420 = vmatprep.subr.mxu1 %v5541_v13 }
 0x68a   : > { %8250 = vmatprep.mubr.msk.f32.mxu1 %vm5275_vm1, %v5266_v14  ;;  %11421 = vmatpush3.msra.mxu1 %v5541_v13  ;;  %v5800_v14 = vld [vmem:[#allocation16 + $0x1d8] sm:$0xff]  ;;  %v5707_v13 = vld [vmem:[#allocation16 + $0x168] sm:$0xff] }
 0x68b   : > { %11422 = vmatprep.subr.mxu1 %v5540_v57 }
 0x68c   : > { %11423 = vmatpush3.msra.mxu1 %v5540_v57  ;;  %v5794_v57 = vld [vmem:[#allocation16 + $0x1a8] sm:$0xff] }
 0x68d   : > { %5364 = vmatmul.mubr.f32.gmra.mxu1 %v5265_v43  ;;  %11424 = vmatprep.subr.mxu1 %v5539_v10 }
 0x68e   : > { %8251 = vmatprep.mubr.msk.f32.mxu1 %vm5275_vm1, %v5268_v55  ;;  %11425 = vmatpush3.msra.mxu1 %v5539_v10  ;;  %v5706_v10 = vld [vmem:[#allocation16 + $0x160] sm:$0xff] }
 0x68f   : > { %11426 = vmatprep.subr.mxu1 %v5538_v36 }
 0x690   : > { %11427 = vmatpush3.msra.mxu1 %v5538_v36  ;;  %v5793_v36 = vld [vmem:[#allocation16 + $0x1a0] sm:$0xff] }
 0x691   : > { %5369 = vmatmul.mubr.f32.gmra.mxu1 %v5267_v27  ;;  %11428 = vmatprep.subr.mxu1 %v5537_v63 }
 0x692   : > { %8252 = vmatprep.mubr.msk.f32.mxu1 %vm5275_vm1, %v5270_v62  ;;  %11429 = vmatpush3.msra.mxu1 %v5537_v63  ;;  %v5799_v62 = vld [vmem:[#allocation16 + $0x1d0] sm:$0xff]  ;;  %v5705_v63 = vld [vmem:[#allocation16 + $0x158] sm:$0xff] }
 0x693   : > { %11430 = vmatprep.subr.mxu1 %v5536_v17 }
 0x694   : > { %11431 = vmatpush3.msra.mxu1 %v5536_v17  ;;  %v5792_v17 = vld [vmem:[#allocation16 + $0x198] sm:$0xff] }
 0x695   : > { %5374 = vmatmul.mubr.f32.gmra.mxu1 %v5269_v18  ;;  %11432 = vmatprep.subr.mxu1 %v5535_v24  ;;  %v5798_v18 = vld [vmem:[#allocation16 + $0x1c8] sm:$0xff] }
 0x696   : > { %8253 = vmatprep.mubr.msk.f32.mxu1 %vm5275_vm1, %v5272_v52  ;;  %11433 = vmatpush3.msra.mxu1 %v5535_v24  ;;  %v5797_v52 = vld [vmem:[#allocation16 + $0x1c0] sm:$0xff]  ;;  %v5704_v24 = vld [vmem:[#allocation16 + $0x150] sm:$0xff] }
 0x697   : > { %11434 = vmatprep.subr.mxu1 %v5534_v15 }
 0x698   : > { %11435 = vmatpush3.msra.mxu1 %v5534_v15  ;;  %v5897_v15 = vld [vmem:[#allocation16 + $0x268] sm:$0xff] }
 0x699   : > { %5379 = vmatmul.mubr.f32.gmra.mxu1 %v5271_v50  ;;  %11436 = vmatprep.subr.mxu1 %v5533_v48 }
 0x69a   : > { %8254 = vmatprep.mubr.msk.f32.mxu1 %vm5275_vm1, %v5274_v39  ;;  %11437 = vmatpush3.msra.mxu1 %v5533_v48  ;;  %v5796_v39 = vld [vmem:[#allocation16 + $0x1b8] sm:$0xff] }
 0x69b   : > { %11438 = vmatprep.subr.mxu1 %v5532_v3 }
 0x69c   : > { %11439 = vmatpush3.msra.mxu1 %v5532_v3  ;;  %v5986_v3 = vld [vmem:[#allocation16 + $0x2b8] sm:$0xff] }
 0x69d   : > { %5384 = vmatmul.mubr.f32.gmra.mxu1 %v5273_v34  ;;  %11440 = vmatprep.subr.mxu1 %v5531_v38 }
 0x69e   : > { %11441 = vmatpush3.msra.mxu1 %v5531_v38  ;;  %v5895_v38 = vld [vmem:[#allocation16 + $0x258] sm:$0xff] }
 0x69f   : > { %11442 = vmatprep.subr.mxu1 %v5530_v58 }
 0x6a0   : > { %11443 = vmatpush3.msra.mxu1 %v5530_v58  ;;  %v5985_v58 = vld [vmem:[#allocation16 + $0x2b0] sm:$0xff] }
 0x6a1   : > { %11444 = vmatprep.subr.mxu1 %v5529_v26 }
 0x6a2   : > { %11445 = vmatpush3.msra.mxu1 %v5529_v26  ;;  %v5894_v26 = vld [vmem:[#allocation16 + $0x250] sm:$0xff] }
 0x6a3   : > { %11446 = vmatprep.subr.mxu1 %v5528_v40 }
 0x6a4   : > { %11447 = vmatpush3.msra.mxu1 %v5528_v40  ;;  %v5984_v40 = vld [vmem:[#allocation16 + $0x2a8] sm:$0xff] }
 0x6a5   : > { %11448 = vmatprep.subr.mxu1 %v5527_v45 }
 0x6a6   : > { %11449 = vmatpush3.msra.mxu1 %v5527_v45  ;;  %v5893_v45 = vld [vmem:[#allocation16 + $0x248] sm:$0xff] }
 0x6a7   : > { %11450 = vmatprep.subr.mxu1 %v5526_v9 }
 0x6a8   : > { %11451 = vmatpush3.msra.mxu1 %v5526_v9  ;;  %v5983_v9 = vld [vmem:[#allocation16 + $0x2a0] sm:$0xff] }
 0x6a9   : > { %11490 = vmatprep.subr.mxu1 %v5709_v49 }
 0x749   : > { %v5360_v35 = vpop.f32.mrf.mxu1 }
 0x74a   : > { %11411 = vmatprep.mubr.f32.mxu0 %v5360_v35  ;;  %v5791_v35 = vld [vmem:[#allocation16 + $0x190] sm:$0xff] }
 0x74b   : > { %v5362_v61 = vpop.f32.mrf.mxu1 }
 0x74c   : > { %v5703_v61 = vld [vmem:[#allocation16 + $0x148] sm:$0xff] }
 0x74d   : > { %v5365_v30 = vpop.f32.mrf.mxu1 }
 0x74e   : > { %11412 = vmatmul.mubr.f32.vlgmr.msra.gmra.mxu0 %v5365_v30  ;;  %v5790_v30 = vld [vmem:[#allocation16 + $0x188] sm:$0xff] }
 0x74f   : > { %v5367_v32 = vpop.f32.mrf.mxu1  ;;  %11456 = vmatpush3.msra.mxu0 %v5523_v59  ;;  %v5795_v59 = vld [vmem:[#allocation16 + $0x1b0] sm:$0xff] }
 0x750   : > { %11457 = vmatprep.subr.mxu0 %v5522_v7  ;;  %v5789_v32 = vld [vmem:[#allocation16 + $0x180] sm:$0xff] }
 0x751   : > { %v5370_v31 = vpop.f32.mrf.mxu1  ;;  %11458 = vmatpush3.msra.mxu0 %v5522_v7  ;;  %v5702_v7 = vld [vmem:[#allocation16 + $0x140] sm:$0xff] }
 0x752   : > { %11414 = vmatprep.mubr.f32.mxu0 %v5370_v31  ;;  %11459 = vmatprep.subr.mxu0 %v5521_v0  ;;  %v5994_v31 = vld [vmem:[#allocation16 + $0x2f8] sm:$0xff] }
 0x753   : > { %v5372_v4 = vpop.f32.mrf.mxu1  ;;  %11460 = vmatpush3.msra.mxu0 %v5521_v0  ;;  %v5701_v0 = vld [vmem:[#allocation16 + $0x138] sm:$0xff] }
 0x754   : > { %11461 = vmatprep.subr.mxu0 %v5520_v37  ;;  %v5699_v4 = vld [vmem:[#allocation16 + $0x128] sm:$0xff] }
 0x755   : > { %v5375_v22 = vpop.f32.mrf.mxu1  ;;  %11462 = vmatpush3.msra.mxu0 %v5520_v37  ;;  %v5700_v37 = vld [vmem:[#allocation16 + $0x130] sm:$0xff] }
 0x756   : > { %11415 = vmatmul.mubr.f32.gmra.mxu0 %v5375_v22  ;;  %11463 = vmatprep.subr.mxu0 %v5519_v28  ;;  %v5993_v22 = vld [vmem:[#allocation16 + $0x2f0] sm:$0xff] }
 0x757   : > { %v5377_v21 = vpop.f32.mrf.mxu1  ;;  %11464 = vmatpush3.msra.mxu0 %v5519_v28 }
 0x758   : > { %11465 = vmatprep.subr.mxu0 %v5518_v33  ;;  %v5992_v21 = vld [vmem:[#allocation16 + $0x2e8] sm:$0xff] }
 0x759   : > { %v5380_v42 = vpop.f32.mrf.mxu1  ;;  %11466 = vmatpush3.msra.mxu0 %v5518_v33  ;;  %v5698_v33 = vld [vmem:[#allocation16 + $0x120] sm:$0xff] }
 0x75a   : > { %11417 = vmatprep.mubr.f32.mxu0 %v5380_v42  ;;  %11467 = vmatprep.subr.mxu0 %v5517_v12  ;;  %v5991_v42 = vld [vmem:[#allocation16 + $0x2e0] sm:$0xff] }
 0x75b   : > { %v5382_v47 = vpop.f32.mrf.mxu1  ;;  %11468 = vmatpush3.msra.mxu0 %v5517_v12  ;;  %v5697_v12 = vld [vmem:[#allocation16 + $0x118] sm:$0xff] }
 0x75c   : > { %11469 = vmatprep.subr.mxu0 %v5516_v20 }
 0x75d   : > { %v5385_v8 = vpop.f32.mrf.mxu1  ;;  %11470 = vmatpush3.msra.mxu0 %v5516_v20  ;;  %v5696_v20 = vld [vmem:[#allocation16 + $0x110] sm:$0xff] }
 0x75e   : > { %11418 = vmatmul.mubr.f32.gmra.mxu0 %v5385_v8  ;;  %11471 = vmatprep.subr.mxu0 %v5515_v44  ;;  %v5695_v8 = vld [vmem:[#allocation16 + $0x108] sm:$0xff] }
 0x75f   : > { %11472 = vmatpush3.msra.mxu0 %v5515_v44  ;;  %v5387_v51 = vpop.f32.mrf.mxu1  ;;  %v5990_v44 = vld [vmem:[#allocation16 + $0x2d8] sm:$0xff] }
 0x760   : > { %11473 = vmatprep.subr.mxu0 %v5514_v11  ;;  %v5988_v51 = vld [vmem:[#allocation16 + $0x2c8] sm:$0xff] }
 0x761   : > { %11474 = vmatpush3.msra.mxu0 %v5514_v11  ;;  %v5989_v11 = vld [vmem:[#allocation16 + $0x2d0] sm:$0xff] }
 0x762   : > { %11475 = vmatprep.subr.mxu0 %v5513_v16 }
 0x763   : > { %11476 = vmatpush3.msra.mxu0 %v5513_v16  ;;  %v5694_v16 = vld [vmem:[#allocation16 + $0x100] sm:$0xff] }
 0x764   : > { %11477 = vmatprep.subr.mxu0 %v5512_v6 }
 0x765   : > { %11478 = vmatpush3.msra.mxu0 %v5512_v6  ;;  %v5899_v6 = vld [vmem:[#allocation16 + $0x278] sm:$0xff] }
 0x766   : > { %11479 = vmatprep.subr.mxu0 %v5511_v41 }
 0x767   : > { %11480 = vmatpush3.msra.mxu0 %v5511_v41 }
 0x768   : > { %11481 = vmatprep.subr.mxu0 %v5510_v25 }
 0x769   : > { %11482 = vmatpush3.msra.mxu0 %v5510_v25  ;;  %v5898_v25 = vld [vmem:[#allocation16 + $0x270] sm:$0xff] }
 0x76a   : > { %11483 = vmatprep.subr.mxu0 %v5509_v5 }
 0x76b   : > { %11484 = vmatpush3.msra.mxu0 %v5509_v5 }
 0x76c   : > { %11485 = vmatprep.subr.mxu0 %v5508_v29 }
 0x76d   : > { %11486 = vmatpush3.msra.mxu0 %v5508_v29  ;;  %v5987_v29 = vld [vmem:[#allocation16 + $0x2c0] sm:$0xff] }
 0x76e   : > { %11525 = vmatprep.subr.mxu0 %v5804_v56 }
 0x80e   : > { %v15617_v53 = vpop.f32.mrf.mxu0 }
 0x80f   : > { %5501 = vst [vmem:[#allocation4 + $0x8] sm:$0xff] %v15617_v53 }
 0x810   : > { %v5471_v60 = vpop.f32.mrf.mxu0 }
 0x811   : > { %5500 = vst [vmem:[#allocation4] sm:$0xff] %v5471_v60  ;;  %11487 = vmatprep.mubr.f32.mxu0 %v5471_v60  ;;  %v5982_v60 = vld [vmem:[#allocation16 + $0x298] sm:$0xff] }
 0x812   : > { %11488 = vmatmul.mubr.f32.vlgmr.msra.gmra.mxu0 %v15617_v53 }
 0x813   : > { %11526 = vmatpush3.msra.mxu0 %v5804_v56  ;;  %v5896_v56 = vld [vmem:[#allocation16 + $0x260] sm:$0xff] }
 0x814   : > { %11527 = vmatprep.subr.mxu0 %v5803_v1 }
 0x815   : > { %11528 = vmatpush3.msra.mxu0 %v5803_v1  ;;  %v5891_v1 = vld [vmem:[#allocation16 + $0x238] sm:$0xff] }
 0x816   : > { %v11416_v23 = vpop.f32.mrf.mxu0  ;;  %11529 = vmatprep.subr.mxu0 %v5802_v54 }
 0x817   : > { %5503 = vst [vmem:[#allocation4 + $0x18] sm:$0xff] %v11416_v23  ;;  %11530 = vmatpush3.msra.mxu0 %v5802_v54  ;;  %v5981_v54 = vld [vmem:[#allocation16 + $0x290] sm:$0xff]  ;;  %v5980_v23 = vld [vmem:[#allocation16 + $0x288] sm:$0xff] }
 0x818   : > { %v15621_v43 = vpop.f32.mrf.mxu0  ;;  %11531 = vmatprep.subr.mxu0 %v5801_v19  ;;  %v5524_v55 = vld [vmem:[#allocation4 + $0x1] sm:$0xff] }
 0x819   : > { %v5787_v27 = vld [vmem:[#allocation4 + $0x3] sm:$0xff]  ;;  %5502 = vst [vmem:[#allocation4 + $0x10] sm:$0xff] %v15621_v43  ;;  %11452 = vmatprep.mubr.f32.mxu1 %v5524_v55  ;;  %11532 = vmatpush3.msra.mxu0 %v5801_v19  ;;  %v5979_v55 = vld [vmem:[#allocation16 + $0x280] sm:$0xff] }
 0x81a   : > { %11533 = vmatprep.subr.mxu0 %v5800_v14  ;;  %11557 = vmatprep.mubr.f32.mxu0 %v5787_v27  ;;  %v5692_v47 = vld [vmem:[#allocation4 + $0x2] sm:$0xff]  ;;  %v5888_v27 = vld [vmem:[#allocation16 + $0x220] sm:$0xff] }
 0x81b   : > { %11534 = vmatpush3.msra.mxu0 %v5800_v14  ;;  %v5882_v5 = vld [vmem:[#allocation4 + $0x4] sm:$0xff]  ;;  %v5889_v14 = vld [vmem:[#allocation16 + $0x228] sm:$0xff] }
 0x81c   : > { %11535 = vmatprep.subr.mxu0 %v5799_v62  ;;  %v5977_v48 = vld [vmem:[#allocation4 + $0x5] sm:$0xff] }
 0x81d   : > { %11536 = vmatpush3.msra.mxu0 %v5799_v62  ;;  %v5890_v19 = vld [vmem:[#allocation16 + $0x230] sm:$0xff]  ;;  %v6184_v62 = vld [vmem:[#allocation16 + $0x3f8] sm:$0xff] }
 0x81e   : > { %11537 = vmatprep.subr.mxu0 %v5798_v18  ;;  %v11419_v50 = vpop.f32.mrf.mxu0 }
 0x81f   : > { %11538 = vmatpush3.msra.mxu0 %v5798_v18  ;;  %5505 = vst [vmem:[#allocation4 + $0x28] sm:$0xff] %v11419_v50  ;;  %v5887_v18 = vld [vmem:[#allocation16 + $0x218] sm:$0xff]  ;;  %v5886_v50 = vld [vmem:[#allocation16 + $0x210] sm:$0xff] }
 0x820   : > { %v15624_v34 = vld [vmem:[#allocation4 + $0x9] sm:$0xff]  ;;  %11539 = vmatprep.subr.mxu0 %v5797_v52  ;;  %v5491_v46 = vpop.f32.mrf.mxu0 }
 0x821   : > { %11453 = vmatmul.mubr.f32.vlgmr.msra.gmra.mxu1 %v15624_v34  ;;  %11540 = vmatpush3.msra.mxu0 %v5797_v52  ;;  %5504 = vst [vmem:[#allocation4 + $0x20] sm:$0xff] %v5491_v46  ;;  %v15627_v28 = vld [vmem:[#allocation4 + $0xb] sm:$0xff]  ;;  %v5885_v46 = vld [vmem:[#allocation16 + $0x208] sm:$0xff] }
 0x822   : > { %11491 = vmatpush3.msra.mxu1 %v5709_v49  ;;  %11541 = vmatprep.subr.mxu0 %v5796_v39  ;;  %v15630_v41 = vld [vmem:[#allocation4 + $0xa] sm:$0xff]  ;;  %v5892_v49 = vld [vmem:[#allocation16 + $0x240] sm:$0xff] }
 0x823   : > { %11492 = vmatprep.subr.mxu1 %v5708_v2  ;;  %11542 = vmatpush3.msra.mxu0 %v5796_v39  ;;  %v15633_v52 = vld [vmem:[#allocation4 + $0xd] sm:$0xff]  ;;  %v6183_v39 = vld [vmem:[#allocation16 + $0x3f0] sm:$0xff] }
 0x824   : > { %11493 = vmatpush3.msra.mxu1 %v5708_v2  ;;  %11543 = vmatprep.subr.mxu0 %v5795_v59  ;;  %v6167_v2 = vld [vmem:[#allocation4 + $0x7] sm:$0xff] }
 0x825   : > { %11494 = vmatprep.subr.mxu1 %v5707_v13  ;;  %11544 = vmatpush3.msra.mxu0 %v5795_v59  ;;  %v6182_v59 = vld [vmem:[#allocation16 + $0x3e8] sm:$0xff] }
 0x826   : > { %11495 = vmatpush3.msra.mxu1 %v5707_v13  ;;  %11545 = vmatprep.subr.mxu0 %v5794_v57  ;;  %v5884_v13 = vld [vmem:[#allocation16 + $0x200] sm:$0xff] }
 0x827   : > { %11496 = vmatprep.subr.mxu1 %v5706_v10  ;;  %11546 = vmatpush3.msra.mxu0 %v5794_v57  ;;  %v6181_v57 = vld [vmem:[#allocation16 + $0x3e0] sm:$0xff] }
 0x828   : > { %11497 = vmatpush3.msra.mxu1 %v5706_v10  ;;  %11547 = vmatprep.subr.mxu0 %v5793_v36  ;;  %v6089_v10 = vld [vmem:[#allocation16 + $0x378] sm:$0xff] }
 0x829   : > { %11498 = vmatprep.subr.mxu1 %v5705_v63  ;;  %11548 = vmatpush3.msra.mxu0 %v5793_v36  ;;  %v15636_v36 = vld [vmem:[#allocation4 + $0xc] sm:$0xff] }
 0x82a   : > { %11499 = vmatpush3.msra.mxu1 %v5705_v63  ;;  %11549 = vmatprep.subr.mxu0 %v5792_v17  ;;  %v6180_v63 = vld [vmem:[#allocation16 + $0x3d8] sm:$0xff] }
 0x82b   : > { %11500 = vmatprep.subr.mxu1 %v5704_v24  ;;  %11550 = vmatpush3.msra.mxu0 %v5792_v17  ;;  %v6088_v17 = vld [vmem:[#allocation16 + $0x370] sm:$0xff] }
 0x82c   : > { %11501 = vmatpush3.msra.mxu1 %v5704_v24  ;;  %11551 = vmatprep.subr.mxu0 %v5791_v35  ;;  %v6072_v24 = vld [vmem:[#allocation4 + $0x6] sm:$0xff] }
 0x82d   : > { %11502 = vmatprep.subr.mxu1 %v5703_v61  ;;  %11552 = vmatpush3.msra.mxu0 %v5791_v35  ;;  %v6179_v35 = vld [vmem:[#allocation16 + $0x3d0] sm:$0xff] }
 0x82e   : > { %11503 = vmatpush3.msra.mxu1 %v5703_v61  ;;  %11553 = vmatprep.subr.mxu0 %v5790_v30  ;;  %v6087_v61 = vld [vmem:[#allocation16 + $0x368] sm:$0xff] }
 0x82f   : > { %11504 = vmatprep.subr.mxu1 %v5702_v7  ;;  %11554 = vmatpush3.msra.mxu0 %v5790_v30  ;;  %v6178_v30 = vld [vmem:[#allocation16 + $0x3c8] sm:$0xff] }
 0x830   : > { %11505 = vmatpush3.msra.mxu1 %v5702_v7  ;;  %11555 = vmatprep.subr.mxu0 %v5789_v32  ;;  %v6086_v7 = vld [vmem:[#allocation16 + $0x360] sm:$0xff] }
 0x831   : > { %11506 = vmatprep.subr.mxu1 %v5701_v0  ;;  %11556 = vmatpush3.msra.mxu0 %v5789_v32  ;;  %v6177_v32 = vld [vmem:[#allocation16 + $0x3c0] sm:$0xff] }
 0x832   : > { %11507 = vmatpush3.msra.mxu1 %v5701_v0  ;;  %11595 = vmatprep.subr.mxu0 %v5994_v31  ;;  %v6085_v0 = vld [vmem:[#allocation16 + $0x358] sm:$0xff] }
 0x833   : > { %11508 = vmatprep.subr.mxu1 %v5700_v37  ;;  %11558 = vmatmul.mubr.f32.vlgmr.msra.gmra.mxu0 %v15627_v28 }
 0x834   : > { %11509 = vmatpush3.msra.mxu1 %v5700_v37  ;;  %11596 = vmatpush3.msra.mxu0 %v5994_v31  ;;  %v6176_v31 = vld [vmem:[#allocation16 + $0x3b8] sm:$0xff]  ;;  %v6084_v37 = vld [vmem:[#allocation16 + $0x350] sm:$0xff] }
 0x835   : > { %11510 = vmatprep.subr.mxu1 %v5699_v4  ;;  %11597 = vmatprep.subr.mxu0 %v5993_v22 }
 0x836   : > { %11511 = vmatpush3.msra.mxu1 %v5699_v4  ;;  %11598 = vmatpush3.msra.mxu0 %v5993_v22  ;;  %v6175_v4 = vld [vmem:[#allocation16 + $0x3b0] sm:$0xff]  ;;  %v6083_v22 = vld [vmem:[#allocation16 + $0x348] sm:$0xff] }
 0x837   : > { %11512 = vmatprep.subr.mxu1 %v5698_v33  ;;  %11599 = vmatprep.subr.mxu0 %v5992_v21 }
 0x838   : > { %11513 = vmatpush3.msra.mxu1 %v5698_v33  ;;  %11600 = vmatpush3.msra.mxu0 %v5992_v21  ;;  %v6174_v33 = vld [vmem:[#allocation16 + $0x3a8] sm:$0xff]  ;;  %v6082_v21 = vld [vmem:[#allocation16 + $0x340] sm:$0xff] }
 0x839   : > { %11514 = vmatprep.subr.mxu1 %v5697_v12  ;;  %11601 = vmatprep.subr.mxu0 %v5991_v42 }
 0x83a   : > { %11515 = vmatpush3.msra.mxu1 %v5697_v12  ;;  %11522 = vmatprep.mubr.f32.mxu1 %v5692_v47  ;;  %v6173_v12 = vld [vmem:[#allocation16 + $0x3a0] sm:$0xff]  ;;  %v6080_v47 = vld [vmem:[#allocation16 + $0x330] sm:$0xff] }
 0x83b   : > { %11516 = vmatprep.subr.mxu1 %v5696_v20  ;;  %11602 = vmatpush3.msra.mxu0 %v5991_v42  ;;  %v6081_v42 = vld [vmem:[#allocation16 + $0x338] sm:$0xff] }
 0x83c   : > { %11517 = vmatpush3.msra.mxu1 %v5696_v20  ;;  %11603 = vmatprep.subr.mxu0 %v5990_v44  ;;  %v6172_v20 = vld [vmem:[#allocation16 + $0x398] sm:$0xff] }
 0x83d   : > { %11518 = vmatprep.subr.mxu1 %v5695_v8  ;;  %11604 = vmatpush3.msra.mxu0 %v5990_v44  ;;  %v6171_v44 = vld [vmem:[#allocation16 + $0x390] sm:$0xff] }
 0x83e   : > { %11519 = vmatpush3.msra.mxu1 %v5695_v8  ;;  %11605 = vmatprep.subr.mxu0 %v5989_v11  ;;  %v6079_v8 = vld [vmem:[#allocation16 + $0x328] sm:$0xff] }
 0x83f   : > { %11520 = vmatprep.subr.mxu1 %v5694_v16  ;;  %11606 = vmatpush3.msra.mxu0 %v5989_v11  ;;  %v6170_v11 = vld [vmem:[#allocation16 + $0x388] sm:$0xff] }
 0x840   : > { %11521 = vmatpush3.msra.mxu1 %v5694_v16  ;;  %11607 = vmatprep.subr.mxu0 %v5988_v51  ;;  %v6078_v16 = vld [vmem:[#allocation16 + $0x320] sm:$0xff] }
 0x841   : > { %11560 = vmatprep.subr.mxu1 %v5899_v6  ;;  %11523 = vmatmul.mubr.f32.vlgmr.msra.gmra.mxu1 %v15630_v41 }
 0x842   : > { %11561 = vmatpush3.msra.mxu1 %v5899_v6  ;;  %11592 = vmatprep.mubr.f32.mxu1 %v5882_v5  ;;  %v6077_v6 = vld [vmem:[#allocation16 + $0x318] sm:$0xff]  ;;  %v6076_v5 = vld [vmem:[#allocation16 + $0x310] sm:$0xff] }
 0x843   : > { %11562 = vmatprep.subr.mxu1 %v5898_v25  ;;  %11608 = vmatpush3.msra.mxu0 %v5988_v51  ;;  %v6169_v51 = vld [vmem:[#allocation16 + $0x380] sm:$0xff] }
 0x844   : > { %11563 = vmatpush3.msra.mxu1 %v5898_v25  ;;  %11627 = vmatprep.mubr.f32.mxu0 %v5977_v48  ;;  %v6374_v25 = vld [vmem:[#allocation16 + $0x4f8] sm:$0xff]  ;;  %v6075_v48 = vld [vmem:[#allocation16 + $0x308] sm:$0xff] }
 0x845   : > { %11564 = vmatprep.subr.mxu1 %v5897_v15  ;;  %11609 = vmatprep.subr.mxu0 %v5987_v29 }
 0x846   : > { %11565 = vmatpush3.msra.mxu1 %v5897_v15  ;;  %11610 = vmatpush3.msra.mxu0 %v5987_v29  ;;  %v15639_v15 = vld [vmem:[#allocation4 + $0xf] sm:$0xff]  ;;  %v6373_v29 = vld [vmem:[#allocation16 + $0x4f0] sm:$0xff] }
 0x847   : > { %11566 = vmatprep.subr.mxu1 %v5896_v56  ;;  %11611 = vmatprep.subr.mxu0 %v5986_v3 }
 0x848   : > { %11567 = vmatpush3.msra.mxu1 %v5896_v56  ;;  %11612 = vmatpush3.msra.mxu0 %v5986_v3  ;;  %v6372_v56 = vld [vmem:[#allocation16 + $0x4e8] sm:$0xff]  ;;  %v6074_v3 = vld [vmem:[#allocation16 + $0x300] sm:$0xff] }
 0x849   : > { %11568 = vmatprep.subr.mxu1 %v5895_v38  ;;  %11613 = vmatprep.subr.mxu0 %v5985_v58 }
 0x84a   : > { %11569 = vmatpush3.msra.mxu1 %v5895_v38  ;;  %11614 = vmatpush3.msra.mxu0 %v5985_v58  ;;  %v6371_v38 = vld [vmem:[#allocation16 + $0x4e0] sm:$0xff]  ;;  %v6279_v58 = vld [vmem:[#allocation16 + $0x478] sm:$0xff] }
 0x84b   : > { %11570 = vmatprep.subr.mxu1 %v5894_v26  ;;  %11615 = vmatprep.subr.mxu0 %v5984_v40 }
 0x84c   : > { %11571 = vmatpush3.msra.mxu1 %v5894_v26  ;;  %11616 = vmatpush3.msra.mxu0 %v5984_v40  ;;  %v15643_v26 = vld [vmem:[#allocation4 + $0xe] sm:$0xff] }
 0x84d   : > { %11572 = vmatprep.subr.mxu1 %v5893_v45  ;;  %11617 = vmatprep.subr.mxu0 %v5983_v9  ;;  %v6370_v40 = vld [vmem:[#allocation16 + $0x4d8] sm:$0xff] }
 0x84e   : > { %11573 = vmatpush3.msra.mxu1 %v5893_v45  ;;  %11618 = vmatpush3.msra.mxu0 %v5983_v9  ;;  %v6369_v45 = vld [vmem:[#allocation16 + $0x4d0] sm:$0xff]  ;;  %v6277_v9 = vld [vmem:[#allocation16 + $0x468] sm:$0xff] }
 0x84f   : > { %11574 = vmatprep.subr.mxu1 %v5892_v49  ;;  %11619 = vmatprep.subr.mxu0 %v5982_v60 }
 0x850   : > { %11575 = vmatpush3.msra.mxu1 %v5892_v49  ;;  %11620 = vmatpush3.msra.mxu0 %v5982_v60  ;;  %v6368_v49 = vld [vmem:[#allocation16 + $0x4c8] sm:$0xff]  ;;  %v6276_v60 = vld [vmem:[#allocation16 + $0x460] sm:$0xff] }
 0x851   : > { %11576 = vmatprep.subr.mxu1 %v5891_v1  ;;  %11621 = vmatprep.subr.mxu0 %v5981_v54 }
 0x852   : > { %11577 = vmatpush3.msra.mxu1 %v5891_v1  ;;  %11622 = vmatpush3.msra.mxu0 %v5981_v54  ;;  %v6367_v1 = vld [vmem:[#allocation16 + $0x4c0] sm:$0xff]  ;;  %v6275_v54 = vld [vmem:[#allocation16 + $0x458] sm:$0xff] }
 0x853   : > { %11578 = vmatprep.subr.mxu1 %v5890_v19  ;;  %11623 = vmatprep.subr.mxu0 %v5980_v23 }
 0x854   : > { %11579 = vmatpush3.msra.mxu1 %v5890_v19  ;;  %11624 = vmatpush3.msra.mxu0 %v5980_v23  ;;  %v6366_v19 = vld [vmem:[#allocation16 + $0x4b8] sm:$0xff]  ;;  %v6365_v23 = vld [vmem:[#allocation16 + $0x4b0] sm:$0xff] }
 0x855   : > { %11580 = vmatprep.subr.mxu1 %v5889_v14  ;;  %11625 = vmatprep.subr.mxu0 %v5979_v55 }
 0x856   : > { %11581 = vmatpush3.msra.mxu1 %v5889_v14  ;;  %11626 = vmatpush3.msra.mxu0 %v5979_v55  ;;  %v6273_v14 = vld [vmem:[#allocation16 + $0x448] sm:$0xff] }
 0x857   : > { %11582 = vmatprep.subr.mxu1 %v5888_v27  ;;  %11628 = vmatmul.mubr.f32.vlgmr.msra.gmra.mxu0 %v15633_v52  ;;  %v6364_v55 = vld [vmem:[#allocation16 + $0x4a8] sm:$0xff] }
 0x858   : > { %11583 = vmatpush3.msra.mxu1 %v5888_v27  ;;  %11665 = vmatprep.subr.mxu0 %v6184_v62  ;;  %v6272_v27 = vld [vmem:[#allocation16 + $0x440] sm:$0xff] }
 0x859   : > { %11584 = vmatprep.subr.mxu1 %v5887_v18  ;;  %11666 = vmatpush3.msra.mxu0 %v6184_v62  ;;  %v6363_v62 = vld [vmem:[#allocation16 + $0x4a0] sm:$0xff] }
 0x85a   : > { %11585 = vmatpush3.msra.mxu1 %v5887_v18  ;;  %11697 = vmatprep.mubr.f32.mxu0 %v6167_v2  ;;  %v6271_v18 = vld [vmem:[#allocation16 + $0x438] sm:$0xff]  ;;  %v6361_v2 = vld [vmem:[#allocation16 + $0x490] sm:$0xff] }
 0x85b   : > { %11586 = vmatprep.subr.mxu1 %v5886_v50  ;;  %11667 = vmatprep.subr.mxu0 %v6183_v39 }
 0x85c   : > { %11587 = vmatpush3.msra.mxu1 %v5886_v50  ;;  %11668 = vmatpush3.msra.mxu0 %v6183_v39  ;;  %v6362_v50 = vld [vmem:[#allocation16 + $0x498] sm:$0xff]  ;;  %v6270_v39 = vld [vmem:[#allocation16 + $0x430] sm:$0xff] }
 0x85d   : > { %11588 = vmatprep.subr.mxu1 %v5885_v46  ;;  %11669 = vmatprep.subr.mxu0 %v6182_v59 }
 0x85e   : > { %11589 = vmatpush3.msra.mxu1 %v5885_v46  ;;  %11670 = vmatpush3.msra.mxu0 %v6182_v59  ;;  %v6269_v46 = vld [vmem:[#allocation16 + $0x428] sm:$0xff] }
 0x85f   : > { %11590 = vmatprep.subr.mxu1 %v5884_v13  ;;  %11671 = vmatprep.subr.mxu0 %v6181_v57  ;;  %v6360_v59 = vld [vmem:[#allocation16 + $0x488] sm:$0xff] }
 0x860   : > { %11591 = vmatpush3.msra.mxu1 %v5884_v13  ;;  %11672 = vmatpush3.msra.mxu0 %v6181_v57  ;;  %v6268_v13 = vld [vmem:[#allocation16 + $0x420] sm:$0xff] }
 0x861   : > { %11593 = vmatmul.mubr.f32.vlgmr.msra.gmra.mxu1 %v15636_v36  ;;  %11630 = vmatprep.subr.mxu1 %v6089_v10  ;;  %v6359_v57 = vld [vmem:[#allocation16 + $0x480] sm:$0xff] }
 0x862   : > { %11631 = vmatpush3.msra.mxu1 %v6089_v10  ;;  %11662 = vmatprep.mubr.f32.mxu1 %v6072_v24  ;;  %v6267_v10 = vld [vmem:[#allocation16 + $0x418] sm:$0xff] }
 0x863   : > { %11673 = vmatprep.subr.mxu0 %v6180_v63  ;;  %11632 = vmatprep.subr.mxu1 %v6088_v17  ;;  %v15647_v24 = vld [vmem:[#allocation4 + $0x11] sm:$0xff] }
 0x864   : > { %11674 = vmatpush3.msra.mxu0 %v6180_v63  ;;  %11633 = vmatpush3.msra.mxu1 %v6088_v17  ;;  %v6564_v63 = vld [vmem:[#allocation16 + $0x5f8] sm:$0xff]  ;;  %v6266_v17 = vld [vmem:[#allocation16 + $0x410] sm:$0xff] }
 0x865   : > { %11675 = vmatprep.subr.mxu0 %v6179_v35  ;;  %11634 = vmatprep.subr.mxu1 %v6087_v61 }
 0x866   : > { %11676 = vmatpush3.msra.mxu0 %v6179_v35  ;;  %11635 = vmatpush3.msra.mxu1 %v6087_v61  ;;  %v6563_v35 = vld [vmem:[#allocation16 + $0x5f0] sm:$0xff]  ;;  %v6265_v61 = vld [vmem:[#allocation16 + $0x408] sm:$0xff] }
 0x867   : > { %11677 = vmatprep.subr.mxu0 %v6178_v30  ;;  %11636 = vmatprep.subr.mxu1 %v6086_v7 }
 0x868   : > { %11678 = vmatpush3.msra.mxu0 %v6178_v30  ;;  %11637 = vmatpush3.msra.mxu1 %v6086_v7  ;;  %v6562_v30 = vld [vmem:[#allocation16 + $0x5e8] sm:$0xff]  ;;  %v6264_v7 = vld [vmem:[#allocation16 + $0x400] sm:$0xff] }
 0x869   : > { %11679 = vmatprep.subr.mxu0 %v6177_v32  ;;  %11638 = vmatprep.subr.mxu1 %v6085_v0 }
 0x86a   : > { %11680 = vmatpush3.msra.mxu0 %v6177_v32  ;;  %11639 = vmatpush3.msra.mxu1 %v6085_v0  ;;  %v6561_v32 = vld [vmem:[#allocation16 + $0x5e0] sm:$0xff]  ;;  %v6469_v0 = vld [vmem:[#allocation16 + $0x578] sm:$0xff] }
 0x86b   : > { %11681 = vmatprep.subr.mxu0 %v6176_v31  ;;  %11640 = vmatprep.subr.mxu1 %v6084_v37 }
 0x86c   : > { %11682 = vmatpush3.msra.mxu0 %v6176_v31  ;;  %11641 = vmatpush3.msra.mxu1 %v6084_v37  ;;  %v6560_v31 = vld [vmem:[#allocation16 + $0x5d8] sm:$0xff]  ;;  %v6468_v37 = vld [vmem:[#allocation16 + $0x570] sm:$0xff] }
 0x86d   : > { %11683 = vmatprep.subr.mxu0 %v6175_v4  ;;  %11642 = vmatprep.subr.mxu1 %v6083_v22 }
 0x86e   : > { %11684 = vmatpush3.msra.mxu0 %v6175_v4  ;;  %11643 = vmatpush3.msra.mxu1 %v6083_v22  ;;  %v6467_v4 = vld [vmem:[#allocation16 + $0x568] sm:$0xff] }
 0x86f   : > { %11685 = vmatprep.subr.mxu0 %v6174_v33  ;;  %11644 = vmatprep.subr.mxu1 %v6082_v21  ;;  %v6558_v22 = vld [vmem:[#allocation16 + $0x5c8] sm:$0xff] }
 0x870   : > { %11686 = vmatpush3.msra.mxu0 %v6174_v33  ;;  %11645 = vmatpush3.msra.mxu1 %v6082_v21  ;;  %v6466_v33 = vld [vmem:[#allocation16 + $0x560] sm:$0xff]  ;;  %v6465_v21 = vld [vmem:[#allocation16 + $0x558] sm:$0xff] }
 0x871   : > { %11687 = vmatprep.subr.mxu0 %v6173_v12  ;;  %11646 = vmatprep.subr.mxu1 %v6081_v42 }
 0x872   : > { %11688 = vmatpush3.msra.mxu0 %v6173_v12  ;;  %11647 = vmatpush3.msra.mxu1 %v6081_v42  ;;  %v6556_v12 = vld [vmem:[#allocation16 + $0x5b8] sm:$0xff]  ;;  %v6555_v42 = vld [vmem:[#allocation16 + $0x5b0] sm:$0xff] }
 0x873   : > { %11689 = vmatprep.subr.mxu0 %v6172_v20  ;;  %11648 = vmatprep.subr.mxu1 %v6080_v47 }
 0x874   : > { %11690 = vmatpush3.msra.mxu0 %v6172_v20  ;;  %11649 = vmatpush3.msra.mxu1 %v6080_v47  ;;  %v6463_v20 = vld [vmem:[#allocation16 + $0x548] sm:$0xff] }
 0x875   : > { %11691 = vmatprep.subr.mxu0 %v6171_v44  ;;  %11650 = vmatprep.subr.mxu1 %v6079_v8  ;;  %v6554_v47 = vld [vmem:[#allocation16 + $0x5a8] sm:$0xff] }
 0x876   : > { %11692 = vmatpush3.msra.mxu0 %v6171_v44  ;;  %11651 = vmatpush3.msra.mxu1 %v6079_v8  ;;  %v6462_v44 = vld [vmem:[#allocation16 + $0x540] sm:$0xff] }
 0x877   : > { %11693 = vmatprep.subr.mxu0 %v6170_v11  ;;  %11652 = vmatprep.subr.mxu1 %v6078_v16  ;;  %v6553_v8 = vld [vmem:[#allocation16 + $0x5a0] sm:$0xff] }
 0x878   : > { %11694 = vmatpush3.msra.mxu0 %v6170_v11  ;;  %11653 = vmatpush3.msra.mxu1 %v6078_v16  ;;  %v6461_v11 = vld [vmem:[#allocation16 + $0x538] sm:$0xff] }
 0x879   : > { %11695 = vmatprep.subr.mxu0 %v6169_v51  ;;  %11654 = vmatprep.subr.mxu1 %v6077_v6  ;;  %v6552_v16 = vld [vmem:[#allocation16 + $0x598] sm:$0xff] }
 0x87a   : > { %11696 = vmatpush3.msra.mxu0 %v6169_v51  ;;  %11655 = vmatpush3.msra.mxu1 %v6077_v6  ;;  %v6460_v51 = vld [vmem:[#allocation16 + $0x530] sm:$0xff] }
 0x87b   : > { %11698 = vmatmul.mubr.f32.vlgmr.msra.gmra.mxu0 %v15639_v15  ;;  %11735 = vmatprep.subr.mxu0 %v6374_v25  ;;  %v6551_v6 = vld [vmem:[#allocation16 + $0x590] sm:$0xff] }
 0x87c   : > { %11656 = vmatprep.subr.mxu1 %v6076_v5  ;;  %11736 = vmatpush3.msra.mxu0 %v6374_v25  ;;  %v6459_v25 = vld [vmem:[#allocation16 + $0x528] sm:$0xff] }
 0x87d   : > { %11767 = vmatprep.mubr.f32.mxu0 %v15624_v34  ;;  %11657 = vmatpush3.msra.mxu1 %v6076_v5  ;;  %v6278_v34 = vld [vmem:[#allocation16 + $0x470] sm:$0xff]  ;;  %v6550_v5 = vld [vmem:[#allocation16 + $0x588] sm:$0xff] }
 0x87e   : > { %11737 = vmatprep.subr.mxu0 %v6373_v29  ;;  %11658 = vmatprep.subr.mxu1 %v6075_v48 }
 0x87f   : > { %11738 = vmatpush3.msra.mxu0 %v6373_v29  ;;  %11659 = vmatpush3.msra.mxu1 %v6075_v48  ;;  %v6458_v29 = vld [vmem:[#allocation16 + $0x520] sm:$0xff] }
 0x880   : > { %11739 = vmatprep.subr.mxu0 %v6372_v56  ;;  %11660 = vmatprep.subr.mxu1 %v6074_v3  ;;  %v6549_v48 = vld [vmem:[#allocation16 + $0x580] sm:$0xff] }
 0x881   : > { %11740 = vmatpush3.msra.mxu0 %v6372_v56  ;;  %11661 = vmatpush3.msra.mxu1 %v6074_v3  ;;  %v6457_v56 = vld [vmem:[#allocation16 + $0x518] sm:$0xff] }
 0x882   : > { %11741 = vmatprep.subr.mxu0 %v6371_v38  ;;  %11663 = vmatmul.mubr.f32.vlgmr.msra.gmra.mxu1 %v15643_v26  ;;  %v6754_v3 = vld [vmem:[#allocation16 + $0x6f8] sm:$0xff] }
 0x883   : > { %11700 = vmatprep.subr.mxu1 %v6279_v58  ;;  %11742 = vmatpush3.msra.mxu0 %v6371_v38  ;;  %v6456_v38 = vld [vmem:[#allocation16 + $0x510] sm:$0xff] }
 0x884   : > { %11701 = vmatpush3.msra.mxu1 %v6279_v58  ;;  %11732 = vmatprep.mubr.f32.mxu1 %v15617_v53  ;;  %v6274_v53 = vld [vmem:[#allocation16 + $0x450] sm:$0xff]  ;;  %v15653_v58 = vld [vmem:[#allocation4 + $0x13] sm:$0xff] }
 0x885   : > { %11743 = vmatprep.subr.mxu0 %v6370_v40  ;;  %11702 = vmatprep.subr.mxu1 %v6278_v34 }
 0x886   : > { %11744 = vmatpush3.msra.mxu0 %v6370_v40  ;;  %11703 = vmatpush3.msra.mxu1 %v6278_v34  ;;  %v6753_v40 = vld [vmem:[#allocation16 + $0x6f0] sm:$0xff]  ;;  %v6455_v34 = vld [vmem:[#allocation16 + $0x508] sm:$0xff] }
 0x887   : > { %11745 = vmatprep.subr.mxu0 %v6369_v45  ;;  %11704 = vmatprep.subr.mxu1 %v6277_v9 }
 0x888   : > { %11746 = vmatpush3.msra.mxu0 %v6369_v45  ;;  %11705 = vmatpush3.msra.mxu1 %v6277_v9  ;;  %v6752_v45 = vld [vmem:[#allocation16 + $0x6e8] sm:$0xff]  ;;  %v6454_v9 = vld [vmem:[#allocation16 + $0x500] sm:$0xff] }
 0x889   : > { %11747 = vmatprep.subr.mxu0 %v6368_v49  ;;  %11706 = vmatprep.subr.mxu1 %v6276_v60 }
 0x88a   : > { %11748 = vmatpush3.msra.mxu0 %v6368_v49  ;;  %11707 = vmatpush3.msra.mxu1 %v6276_v60  ;;  %v6751_v49 = vld [vmem:[#allocation16 + $0x6e0] sm:$0xff]  ;;  %v6659_v60 = vld [vmem:[#allocation16 + $0x678] sm:$0xff] }
 0x88b   : > { %11749 = vmatprep.subr.mxu0 %v6367_v1  ;;  %11708 = vmatprep.subr.mxu1 %v6275_v54 }
 0x88c   : > { %11750 = vmatpush3.msra.mxu0 %v6367_v1  ;;  %11709 = vmatpush3.msra.mxu1 %v6275_v54  ;;  %v15657_v1 = vld [vmem:[#allocation4 + $0x12] sm:$0xff] }
 0x88d   : > { %11751 = vmatprep.subr.mxu0 %v6366_v19  ;;  %11710 = vmatprep.subr.mxu1 %v6274_v53  ;;  %v6750_v54 = vld [vmem:[#allocation16 + $0x6d8] sm:$0xff] }
 0x88e   : > { %11752 = vmatpush3.msra.mxu0 %v6366_v19  ;;  %11711 = vmatpush3.msra.mxu1 %v6274_v53  ;;  %v6749_v19 = vld [vmem:[#allocation16 + $0x6d0] sm:$0xff]  ;;  %v6657_v53 = vld [vmem:[#allocation16 + $0x668] sm:$0xff] }
 0x88f   : > { %11753 = vmatprep.subr.mxu0 %v6365_v23  ;;  %11712 = vmatprep.subr.mxu1 %v6273_v14 }
 0x890   : > { %11754 = vmatpush3.msra.mxu0 %v6365_v23  ;;  %11713 = vmatpush3.msra.mxu1 %v6273_v14  ;;  %v6748_v23 = vld [vmem:[#allocation16 + $0x6c8] sm:$0xff]  ;;  %v6656_v14 = vld [vmem:[#allocation16 + $0x660] sm:$0xff] }
 0x891   : > { %11755 = vmatprep.subr.mxu0 %v6364_v55  ;;  %11714 = vmatprep.subr.mxu1 %v6272_v27 }
 0x892   : > { %11756 = vmatpush3.msra.mxu0 %v6364_v55  ;;  %11715 = vmatpush3.msra.mxu1 %v6272_v27  ;;  %v6747_v55 = vld [vmem:[#allocation16 + $0x6c0] sm:$0xff]  ;;  %v6655_v27 = vld [vmem:[#allocation16 + $0x658] sm:$0xff] }
 0x893   : > { %11757 = vmatprep.subr.mxu0 %v6363_v62  ;;  %11716 = vmatprep.subr.mxu1 %v6271_v18 }
 0x894   : > { %11758 = vmatpush3.msra.mxu0 %v6363_v62  ;;  %11717 = vmatpush3.msra.mxu1 %v6271_v18  ;;  %v6746_v62 = vld [vmem:[#allocation16 + $0x6b8] sm:$0xff]  ;;  %v6745_v18 = vld [vmem:[#allocation16 + $0x6b0] sm:$0xff] }
 0x895   : > { %11759 = vmatprep.subr.mxu0 %v6362_v50  ;;  %11718 = vmatprep.subr.mxu1 %v6270_v39 }
 0x896   : > { %11760 = vmatpush3.msra.mxu0 %v6362_v50  ;;  %11719 = vmatpush3.msra.mxu1 %v6270_v39  ;;  %v6653_v50 = vld [vmem:[#allocation16 + $0x648] sm:$0xff] }
 0x897   : > { %11761 = vmatprep.subr.mxu0 %v6361_v2  ;;  %11720 = vmatprep.subr.mxu1 %v6269_v46  ;;  %v6744_v39 = vld [vmem:[#allocation16 + $0x6a8] sm:$0xff] }
 0x898   : > { %11762 = vmatpush3.msra.mxu0 %v6361_v2  ;;  %11721 = vmatpush3.msra.mxu1 %v6269_v46  ;;  %v6652_v2 = vld [vmem:[#allocation16 + $0x640] sm:$0xff] }
 0x899   : > { %11763 = vmatprep.subr.mxu0 %v6360_v59  ;;  %11722 = vmatprep.subr.mxu1 %v6268_v13  ;;  %v6743_v46 = vld [vmem:[#allocation16 + $0x6a0] sm:$0xff] }
 0x89a   : > { %11764 = vmatpush3.msra.mxu0 %v6360_v59  ;;  %11723 = vmatpush3.msra.mxu1 %v6268_v13  ;;  %v6651_v59 = vld [vmem:[#allocation16 + $0x638] sm:$0xff] }
 0x89b   : > { %11765 = vmatprep.subr.mxu0 %v6359_v57  ;;  %11724 = vmatprep.subr.mxu1 %v6267_v10  ;;  %v6742_v13 = vld [vmem:[#allocation16 + $0x698] sm:$0xff] }
 0x89c   : > { %11766 = vmatpush3.msra.mxu0 %v6359_v57  ;;  %11725 = vmatpush3.msra.mxu1 %v6267_v10  ;;  %v6650_v57 = vld [vmem:[#allocation16 + $0x630] sm:$0xff] }
 0x89d   : > { %11768 = vmatmul.mubr.f32.vlgmr.msra.gmra.mxu0 %v15647_v24  ;;  %11805 = vmatprep.subr.mxu0 %v6564_v63  ;;  %v6741_v10 = vld [vmem:[#allocation16 + $0x690] sm:$0xff] }
 0x89e   : > { %11726 = vmatprep.subr.mxu1 %v6266_v17  ;;  %11806 = vmatpush3.msra.mxu0 %v6564_v63  ;;  %v6649_v63 = vld [vmem:[#allocation16 + $0x628] sm:$0xff] }
 0x89f   : > { %11837 = vmatprep.mubr.f32.mxu0 %v15627_v28  ;;  %11727 = vmatpush3.msra.mxu1 %v6266_v17  ;;  %v6559_v28 = vld [vmem:[#allocation16 + $0x5d0] sm:$0xff]  ;;  %v6740_v17 = vld [vmem:[#allocation16 + $0x688] sm:$0xff] }
 0x8a0   : > { %11807 = vmatprep.subr.mxu0 %v6563_v35  ;;  %11728 = vmatprep.subr.mxu1 %v6265_v61 }
 0x8a1   : > { %11808 = vmatpush3.msra.mxu0 %v6563_v35  ;;  %11729 = vmatpush3.msra.mxu1 %v6265_v61  ;;  %v6648_v35 = vld [vmem:[#allocation16 + $0x620] sm:$0xff] }
 0x8a2   : > { %11809 = vmatprep.subr.mxu0 %v6562_v30  ;;  %11730 = vmatprep.subr.mxu1 %v6264_v7  ;;  %v6739_v61 = vld [vmem:[#allocation16 + $0x680] sm:$0xff] }
 0x8a3   : > { %11810 = vmatpush3.msra.mxu0 %v6562_v30  ;;  %11731 = vmatpush3.msra.mxu1 %v6264_v7  ;;  %v6647_v30 = vld [vmem:[#allocation16 + $0x618] sm:$0xff] }
 0x8a4   : > { %11811 = vmatprep.subr.mxu0 %v6561_v32  ;;  %11733 = vmatmul.mubr.f32.vlgmr.msra.gmra.mxu1 %v15621_v43  ;;  %v6557_v43 = vld [vmem:[#allocation16 + $0x5c0] sm:$0xff]  ;;  %v6944_v7 = vld [vmem:[#allocation16 + $0x7f8] sm:$0xff] }
 0x8a5   : > { %11770 = vmatprep.subr.mxu1 %v6469_v0  ;;  %11812 = vmatpush3.msra.mxu0 %v6561_v32  ;;  %v6646_v32 = vld [vmem:[#allocation16 + $0x610] sm:$0xff] }
 0x8a6   : > { %11771 = vmatpush3.msra.mxu1 %v6469_v0  ;;  %11802 = vmatprep.mubr.f32.mxu1 %v15630_v41  ;;  %v6464_v41 = vld [vmem:[#allocation16 + $0x550] sm:$0xff]  ;;  %v15661_v0 = vld [vmem:[#allocation4 + $0x15] sm:$0xff] }
 0x8a7   : > { %11813 = vmatprep.subr.mxu0 %v6560_v31  ;;  %11772 = vmatprep.subr.mxu1 %v6468_v37 }
 0x8a8   : > { %11814 = vmatpush3.msra.mxu0 %v6560_v31  ;;  %11773 = vmatpush3.msra.mxu1 %v6468_v37  ;;  %v6943_v31 = vld [vmem:[#allocation16 + $0x7f0] sm:$0xff]  ;;  %v6645_v37 = vld [vmem:[#allocation16 + $0x608] sm:$0xff] }
 0x8a9   : > { %11815 = vmatprep.subr.mxu0 %v6559_v28  ;;  %11774 = vmatprep.subr.mxu1 %v6467_v4 }
 0x8aa   : > { %11816 = vmatpush3.msra.mxu0 %v6559_v28  ;;  %11775 = vmatpush3.msra.mxu1 %v6467_v4  ;;  %v6942_v28 = vld [vmem:[#allocation16 + $0x7e8] sm:$0xff]  ;;  %v6644_v4 = vld [vmem:[#allocation16 + $0x600] sm:$0xff] }
 0x8ab   : > { %11817 = vmatprep.subr.mxu0 %v6558_v22  ;;  %11776 = vmatprep.subr.mxu1 %v6466_v33 }
 0x8ac   : > { %11818 = vmatpush3.msra.mxu0 %v6558_v22  ;;  %11777 = vmatpush3.msra.mxu1 %v6466_v33  ;;  %v6941_v22 = vld [vmem:[#allocation16 + $0x7e0] sm:$0xff]  ;;  %v6849_v33 = vld [vmem:[#allocation16 + $0x778] sm:$0xff] }
 0x8ad   : > { %11819 = vmatprep.subr.mxu0 %v6557_v43  ;;  %11778 = vmatprep.subr.mxu1 %v6465_v21 }
 0x8ae   : > { %11820 = vmatpush3.msra.mxu0 %v6557_v43  ;;  %11779 = vmatpush3.msra.mxu1 %v6465_v21  ;;  %v15665_v43 = vld [vmem:[#allocation4 + $0x14] sm:$0xff]  ;;  %v6940_v21 = vld [vmem:[#allocation16 + $0x7d8] sm:$0xff] }
 0x8af   : > { %11821 = vmatprep.subr.mxu0 %v6556_v12  ;;  %11780 = vmatprep.subr.mxu1 %v6464_v41 }
 0x8b0   : > { %11822 = vmatpush3.msra.mxu0 %v6556_v12  ;;  %11781 = vmatpush3.msra.mxu1 %v6464_v41  ;;  %v6939_v12 = vld [vmem:[#allocation16 + $0x7d0] sm:$0xff]  ;;  %v6847_v41 = vld [vmem:[#allocation16 + $0x768] sm:$0xff] }
 0x8b1   : > { %11823 = vmatprep.subr.mxu0 %v6555_v42  ;;  %11782 = vmatprep.subr.mxu1 %v6463_v20 }
 0x8b2   : > { %11824 = vmatpush3.msra.mxu0 %v6555_v42  ;;  %11783 = vmatpush3.msra.mxu1 %v6463_v20  ;;  %v6938_v42 = vld [vmem:[#allocation16 + $0x7c8] sm:$0xff]  ;;  %v6846_v20 = vld [vmem:[#allocation16 + $0x760] sm:$0xff] }
 0x8b3   : > { %11825 = vmatprep.subr.mxu0 %v6554_v47  ;;  %11784 = vmatprep.subr.mxu1 %v6462_v44 }
 0x8b4   : > { %11826 = vmatpush3.msra.mxu0 %v6554_v47  ;;  %11785 = vmatpush3.msra.mxu1 %v6462_v44  ;;  %v6937_v47 = vld [vmem:[#allocation16 + $0x7c0] sm:$0xff]  ;;  %v6845_v44 = vld [vmem:[#allocation16 + $0x758] sm:$0xff] }
 0x8b5   : > { %11827 = vmatprep.subr.mxu0 %v6553_v8  ;;  %11786 = vmatprep.subr.mxu1 %v6461_v11 }
 0x8b6   : > { %11828 = vmatpush3.msra.mxu0 %v6553_v8  ;;  %11787 = vmatpush3.msra.mxu1 %v6461_v11  ;;  %v6936_v8 = vld [vmem:[#allocation16 + $0x7b8] sm:$0xff]  ;;  %v6935_v11 = vld [vmem:[#allocation16 + $0x7b0] sm:$0xff] }
 0x8b7   : > { %11829 = vmatprep.subr.mxu0 %v6552_v16  ;;  %11788 = vmatprep.subr.mxu1 %v6460_v51 }
 0x8b8   : > { %11830 = vmatpush3.msra.mxu0 %v6552_v16  ;;  %11789 = vmatpush3.msra.mxu1 %v6460_v51  ;;  %v6843_v16 = vld [vmem:[#allocation16 + $0x748] sm:$0xff] }
 0x8b9   : > { %11831 = vmatprep.subr.mxu0 %v6551_v6  ;;  %11790 = vmatprep.subr.mxu1 %v6459_v25  ;;  %v6934_v51 = vld [vmem:[#allocation16 + $0x7a8] sm:$0xff] }
 0x8ba   : > { %11832 = vmatpush3.msra.mxu0 %v6551_v6  ;;  %11791 = vmatpush3.msra.mxu1 %v6459_v25  ;;  %v6842_v6 = vld [vmem:[#allocation16 + $0x740] sm:$0xff] }
 0x8bb   : > { %11833 = vmatprep.subr.mxu0 %v6550_v5  ;;  %11792 = vmatprep.subr.mxu1 %v6458_v29  ;;  %v6933_v25 = vld [vmem:[#allocation16 + $0x7a0] sm:$0xff] }
 0x8bc   : > { %11834 = vmatpush3.msra.mxu0 %v6550_v5  ;;  %11793 = vmatpush3.msra.mxu1 %v6458_v29  ;;  %v6841_v5 = vld [vmem:[#allocation16 + $0x738] sm:$0xff] }
 0x8bd   : > { %11835 = vmatprep.subr.mxu0 %v6549_v48  ;;  %11794 = vmatprep.subr.mxu1 %v6457_v56  ;;  %v6932_v29 = vld [vmem:[#allocation16 + $0x798] sm:$0xff] }
 0x8be   : > { %11836 = vmatpush3.msra.mxu0 %v6549_v48  ;;  %11795 = vmatpush3.msra.mxu1 %v6457_v56  ;;  %v6840_v48 = vld [vmem:[#allocation16 + $0x730] sm:$0xff] }
 0x8bf   : > { %11838 = vmatmul.mubr.f32.vlgmr.msra.gmra.mxu0 %v15653_v58  ;;  %11875 = vmatprep.subr.mxu0 %v6754_v3  ;;  %v6931_v56 = vld [vmem:[#allocation16 + $0x790] sm:$0xff] }
 0x8c0   : > { %11796 = vmatprep.subr.mxu1 %v6456_v38  ;;  %11876 = vmatpush3.msra.mxu0 %v6754_v3  ;;  %v6839_v3 = vld [vmem:[#allocation16 + $0x728] sm:$0xff] }
 0x8c1   : > { %11907 = vmatprep.mubr.f32.mxu0 %v15633_v52  ;;  %11797 = vmatpush3.msra.mxu1 %v6456_v38  ;;  %v6658_v52 = vld [vmem:[#allocation16 + $0x670] sm:$0xff]  ;;  %v6930_v38 = vld [vmem:[#allocation16 + $0x788] sm:$0xff] }
 0x8c2   : > { %11877 = vmatprep.subr.mxu0 %v6753_v40  ;;  %11798 = vmatprep.subr.mxu1 %v6455_v34 }
 0x8c3   : > { %11878 = vmatpush3.msra.mxu0 %v6753_v40  ;;  %11799 = vmatpush3.msra.mxu1 %v6455_v34  ;;  %v6838_v40 = vld [vmem:[#allocation16 + $0x720] sm:$0xff] }
 0x8c4   : > { %11879 = vmatprep.subr.mxu0 %v6752_v45  ;;  %11800 = vmatprep.subr.mxu1 %v6454_v9  ;;  %v6929_v34 = vld [vmem:[#allocation16 + $0x780] sm:$0xff] }
 0x8c5   : > { %11880 = vmatpush3.msra.mxu0 %v6752_v45  ;;  %11801 = vmatpush3.msra.mxu1 %v6454_v9  ;;  %v6837_v45 = vld [vmem:[#allocation16 + $0x718] sm:$0xff] }
 0x8c6   : > { %11881 = vmatprep.subr.mxu0 %v6751_v49  ;;  %11803 = vmatmul.mubr.f32.vlgmr.msra.gmra.mxu1 %v15657_v1  ;;  %v7134_v9 = vld [vmem:[#allocation16 + $0x8f8] sm:$0xff] }
 0x8c7   : > { %11840 = vmatprep.subr.mxu1 %v6659_v60  ;;  %11882 = vmatpush3.msra.mxu0 %v6751_v49  ;;  %v6836_v49 = vld [vmem:[#allocation16 + $0x710] sm:$0xff] }
 0x8c8   : > { %11841 = vmatpush3.msra.mxu1 %v6659_v60  ;;  %11872 = vmatprep.mubr.f32.mxu1 %v15636_v36  ;;  %v6654_v36 = vld [vmem:[#allocation16 + $0x650] sm:$0xff]  ;;  %v15669_v60 = vld [vmem:[#allocation4 + $0x17] sm:$0xff] }
 0x8c9   : > { %11883 = vmatprep.subr.mxu0 %v6750_v54  ;;  %11842 = vmatprep.subr.mxu1 %v6658_v52 }
 0x8ca   : > { %11884 = vmatpush3.msra.mxu0 %v6750_v54  ;;  %11843 = vmatpush3.msra.mxu1 %v6658_v52  ;;  %v7133_v54 = vld [vmem:[#allocation16 + $0x8f0] sm:$0xff]  ;;  %v6835_v52 = vld [vmem:[#allocation16 + $0x708] sm:$0xff] }
 0x8cb   : > { %11885 = vmatprep.subr.mxu0 %v6749_v19  ;;  %11844 = vmatprep.subr.mxu1 %v6657_v53 }
 0x8cc   : > { %11886 = vmatpush3.msra.mxu0 %v6749_v19  ;;  %11845 = vmatpush3.msra.mxu1 %v6657_v53  ;;  %v7132_v19 = vld [vmem:[#allocation16 + $0x8e8] sm:$0xff]  ;;  %v6834_v53 = vld [vmem:[#allocation16 + $0x700] sm:$0xff] }
 0x8cd   : > { %11887 = vmatprep.subr.mxu0 %v6748_v23  ;;  %11846 = vmatprep.subr.mxu1 %v6656_v14 }
 0x8ce   : > { %11888 = vmatpush3.msra.mxu0 %v6748_v23  ;;  %11847 = vmatpush3.msra.mxu1 %v6656_v14  ;;  %v7131_v23 = vld [vmem:[#allocation16 + $0x8e0] sm:$0xff]  ;;  %v7039_v14 = vld [vmem:[#allocation16 + $0x878] sm:$0xff] }
 0x8cf   : > { %11889 = vmatprep.subr.mxu0 %v6747_v55  ;;  %11848 = vmatprep.subr.mxu1 %v6655_v27 }
 0x8d0   : > { %11890 = vmatpush3.msra.mxu0 %v6747_v55  ;;  %11849 = vmatpush3.msra.mxu1 %v6655_v27  ;;  %v15673_v55 = vld [vmem:[#allocation4 + $0x16] sm:$0xff]  ;;  %v7130_v27 = vld [vmem:[#allocation16 + $0x8d8] sm:$0xff] }
 0x8d1   : > { %11891 = vmatprep.subr.mxu0 %v6746_v62  ;;  %11850 = vmatprep.subr.mxu1 %v6654_v36 }
 0x8d2   : > { %11892 = vmatpush3.msra.mxu0 %v6746_v62  ;;  %11851 = vmatpush3.msra.mxu1 %v6654_v36  ;;  %v7022_v62 = vld [vmem:[#allocation4 + $0x10] sm:$0xff]  ;;  %v7129_v36 = vld [vmem:[#allocation16 + $0x8d0] sm:$0xff] }
 0x8d3   : > { %11893 = vmatprep.subr.mxu0 %v6745_v18  ;;  %11852 = vmatprep.subr.mxu1 %v6653_v50 }
 0x8d4   : > { %11894 = vmatpush3.msra.mxu0 %v6745_v18  ;;  %11853 = vmatpush3.msra.mxu1 %v6653_v50  ;;  %v7037_v18 = vld [vmem:[#allocation16 + $0x868] sm:$0xff] }
 0x8d5   : > { %11895 = vmatprep.subr.mxu0 %v6744_v39  ;;  %11854 = vmatprep.subr.mxu1 %v6652_v2  ;;  %v7128_v50 = vld [vmem:[#allocation16 + $0x8c8] sm:$0xff] }
 0x8d6   : > { %11896 = vmatpush3.msra.mxu0 %v6744_v39  ;;  %11855 = vmatpush3.msra.mxu1 %v6652_v2  ;;  %v7036_v39 = vld [vmem:[#allocation16 + $0x860] sm:$0xff] }
 0x8d7   : > { %11897 = vmatprep.subr.mxu0 %v6743_v46  ;;  %11856 = vmatprep.subr.mxu1 %v6651_v59  ;;  %v7127_v2 = vld [vmem:[#allocation16 + $0x8c0] sm:$0xff] }
 0x8d8   : > { %11898 = vmatpush3.msra.mxu0 %v6743_v46  ;;  %11857 = vmatpush3.msra.mxu1 %v6651_v59  ;;  %v7035_v46 = vld [vmem:[#allocation16 + $0x858] sm:$0xff] }
 0x8d9   : > { %11899 = vmatprep.subr.mxu0 %v6742_v13  ;;  %11858 = vmatprep.subr.mxu1 %v6650_v57  ;;  %v7126_v59 = vld [vmem:[#allocation16 + $0x8b8] sm:$0xff] }
 0x8da   : > { %11900 = vmatpush3.msra.mxu0 %v6742_v13  ;;  %11859 = vmatpush3.msra.mxu1 %v6650_v57  ;;  %v7034_v13 = vld [vmem:[#allocation16 + $0x850] sm:$0xff] }
 0x8db   : > { %11901 = vmatprep.subr.mxu0 %v6741_v10  ;;  %11860 = vmatprep.subr.mxu1 %v6649_v63  ;;  %v7125_v57 = vld [vmem:[#allocation16 + $0x8b0] sm:$0xff] }
 0x8dc   : > { %11902 = vmatpush3.msra.mxu0 %v6741_v10  ;;  %11861 = vmatpush3.msra.mxu1 %v6649_v63  ;;  %v7033_v10 = vld [vmem:[#allocation16 + $0x848] sm:$0xff] }
 0x8dd   : > { %11903 = vmatprep.subr.mxu0 %v6740_v17  ;;  %11862 = vmatprep.subr.mxu1 %v6648_v35  ;;  %v7124_v63 = vld [vmem:[#allocation16 + $0x8a8] sm:$0xff] }
 0x8de   : > { %11904 = vmatpush3.msra.mxu0 %v6740_v17  ;;  %11863 = vmatpush3.msra.mxu1 %v6648_v35  ;;  %v7032_v17 = vld [vmem:[#allocation16 + $0x840] sm:$0xff] }
 0x8df   : > { %11905 = vmatprep.subr.mxu0 %v6739_v61  ;;  %11864 = vmatprep.subr.mxu1 %v6647_v30  ;;  %v7123_v35 = vld [vmem:[#allocation16 + $0x8a0] sm:$0xff] }
 0x8e0   : > { %11906 = vmatpush3.msra.mxu0 %v6739_v61  ;;  %11865 = vmatpush3.msra.mxu1 %v6647_v30  ;;  %v7031_v61 = vld [vmem:[#allocation16 + $0x838] sm:$0xff] }
 0x8e1   : > { %11908 = vmatmul.mubr.f32.vlgmr.msra.gmra.mxu0 %v15661_v0  ;;  %11945 = vmatprep.subr.mxu0 %v6944_v7  ;;  %v7122_v30 = vld [vmem:[#allocation16 + $0x898] sm:$0xff] }
 0x8e2   : > { %11866 = vmatprep.subr.mxu1 %v6646_v32  ;;  %11946 = vmatpush3.msra.mxu0 %v6944_v7  ;;  %v7030_v7 = vld [vmem:[#allocation16 + $0x830] sm:$0xff] }
 0x8e3   : > { %11977 = vmatprep.mubr.f32.mxu0 %v15639_v15  ;;  %11867 = vmatpush3.msra.mxu1 %v6646_v32  ;;  %v6848_v15 = vld [vmem:[#allocation16 + $0x770] sm:$0xff] }
 0x8e4   : > { %11947 = vmatprep.subr.mxu0 %v6943_v31  ;;  %11868 = vmatprep.subr.mxu1 %v6645_v37  ;;  %v7121_v32 = vld [vmem:[#allocation16 + $0x890] sm:$0xff] }
 0x8e5   : > { %11948 = vmatpush3.msra.mxu0 %v6943_v31  ;;  %11869 = vmatpush3.msra.mxu1 %v6645_v37  ;;  %v7029_v31 = vld [vmem:[#allocation16 + $0x828] sm:$0xff] }
 0x8e6   : > { %11949 = vmatprep.subr.mxu0 %v6942_v28  ;;  %11870 = vmatprep.subr.mxu1 %v6644_v4  ;;  %v7120_v37 = vld [vmem:[#allocation16 + $0x888] sm:$0xff] }
 0x8e7   : > { %11950 = vmatpush3.msra.mxu0 %v6942_v28  ;;  %11871 = vmatpush3.msra.mxu1 %v6644_v4  ;;  %v7028_v28 = vld [vmem:[#allocation16 + $0x820] sm:$0xff] }
 0x8e8   : > { %11951 = vmatprep.subr.mxu0 %v6941_v22  ;;  %11873 = vmatmul.mubr.f32.vlgmr.msra.gmra.mxu1 %v15665_v43  ;;  %v7119_v4 = vld [vmem:[#allocation16 + $0x880] sm:$0xff] }
 0x8e9   : > { %11910 = vmatprep.subr.mxu1 %v6849_v33  ;;  %11952 = vmatpush3.msra.mxu0 %v6941_v22  ;;  %v7027_v22 = vld [vmem:[#allocation16 + $0x818] sm:$0xff] }
 0x8ea   : > { %11911 = vmatpush3.msra.mxu1 %v6849_v33  ;;  %11942 = vmatprep.mubr.f32.mxu1 %v15643_v26  ;;  %v6844_v26 = vld [vmem:[#allocation16 + $0x750] sm:$0xff]  ;;  %v7324_v33 = vld [vmem:[#allocation16 + $0x9f8] sm:$0xff] }
 0x8eb   : > { %11953 = vmatprep.subr.mxu0 %v6940_v21  ;;  %11912 = vmatprep.subr.mxu1 %v6848_v15 }
 0x8ec   : > { %11954 = vmatpush3.msra.mxu0 %v6940_v21  ;;  %11913 = vmatpush3.msra.mxu1 %v6848_v15  ;;  %v7026_v21 = vld [vmem:[#allocation16 + $0x810] sm:$0xff]  ;;  %v15676_v15 = vld [vmem:[#allocation4 + $0x19] sm:$0xff] }
 0x8ed   : > { %11955 = vmatprep.subr.mxu0 %v6939_v12  ;;  %11914 = vmatprep.subr.mxu1 %v6847_v41 }
 0x8ee   : > { %11956 = vmatpush3.msra.mxu0 %v6939_v12  ;;  %11915 = vmatpush3.msra.mxu1 %v6847_v41  ;;  %v7323_v12 = vld [vmem:[#allocation16 + $0x9f0] sm:$0xff]  ;;  %v7025_v41 = vld [vmem:[#allocation16 + $0x808] sm:$0xff] }
 0x8ef   : > { %11957 = vmatprep.subr.mxu0 %v6938_v42  ;;  %11916 = vmatprep.subr.mxu1 %v6846_v20 }
 0x8f0   : > { %11958 = vmatpush3.msra.mxu0 %v6938_v42  ;;  %11917 = vmatpush3.msra.mxu1 %v6846_v20  ;;  %v7322_v42 = vld [vmem:[#allocation16 + $0x9e8] sm:$0xff]  ;;  %v7024_v20 = vld [vmem:[#allocation16 + $0x800] sm:$0xff] }
 0x8f1   : > { %11959 = vmatprep.subr.mxu0 %v6937_v47  ;;  %11918 = vmatprep.subr.mxu1 %v6845_v44 }
 0x8f2   : > { %11960 = vmatpush3.msra.mxu0 %v6937_v47  ;;  %11919 = vmatpush3.msra.mxu1 %v6845_v44  ;;  %v7321_v47 = vld [vmem:[#allocation16 + $0x9e0] sm:$0xff]  ;;  %v7229_v44 = vld [vmem:[#allocation16 + $0x978] sm:$0xff] }
 0x8f3   : > { %11961 = vmatprep.subr.mxu0 %v6936_v8  ;;  %11920 = vmatprep.subr.mxu1 %v6844_v26 }
 0x8f4   : > { %11962 = vmatpush3.msra.mxu0 %v6936_v8  ;;  %11921 = vmatpush3.msra.mxu1 %v6844_v26  ;;  %v15680_v8 = vld [vmem:[#allocation4 + $0x18] sm:$0xff]  ;;  %v7320_v26 = vld [vmem:[#allocation16 + $0x9d8] sm:$0xff] }
 0x8f5   : > { %11963 = vmatprep.subr.mxu0 %v6935_v11  ;;  %11922 = vmatprep.subr.mxu1 %v6843_v16 }
 0x8f6   : > { %11964 = vmatpush3.msra.mxu0 %v6935_v11  ;;  %11923 = vmatpush3.msra.mxu1 %v6843_v16  ;;  %v7319_v11 = vld [vmem:[#allocation16 + $0x9d0] sm:$0xff]  ;;  %v7227_v16 = vld [vmem:[#allocation16 + $0x968] sm:$0xff] }
 0x8f7   : > { %11965 = vmatprep.subr.mxu0 %v6934_v51  ;;  %11924 = vmatprep.subr.mxu1 %v6842_v6 }
 0x8f8   : > { %11966 = vmatpush3.msra.mxu0 %v6934_v51  ;;  %11925 = vmatpush3.msra.mxu1 %v6842_v6  ;;  %v7318_v51 = vld [vmem:[#allocation16 + $0x9c8] sm:$0xff]  ;;  %v7226_v6 = vld [vmem:[#allocation16 + $0x960] sm:$0xff] }
 0x8f9   : > { %11967 = vmatprep.subr.mxu0 %v6933_v25  ;;  %11926 = vmatprep.subr.mxu1 %v6841_v5 }
 0x8fa   : > { %11968 = vmatpush3.msra.mxu0 %v6933_v25  ;;  %11927 = vmatpush3.msra.mxu1 %v6841_v5  ;;  %v7317_v25 = vld [vmem:[#allocation16 + $0x9c0] sm:$0xff]  ;;  %v7225_v5 = vld [vmem:[#allocation16 + $0x958] sm:$0xff] }
 0x8fb   : > { %11969 = vmatprep.subr.mxu0 %v6932_v29  ;;  %11928 = vmatprep.subr.mxu1 %v6840_v48 }
 0x8fc   : > { %11970 = vmatpush3.msra.mxu0 %v6932_v29  ;;  %11929 = vmatpush3.msra.mxu1 %v6840_v48  ;;  %v7316_v29 = vld [vmem:[#allocation16 + $0x9b8] sm:$0xff]  ;;  %v7315_v48 = vld [vmem:[#allocation16 + $0x9b0] sm:$0xff] }
 0x8fd   : > { %11971 = vmatprep.subr.mxu0 %v6931_v56  ;;  %11930 = vmatprep.subr.mxu1 %v6839_v3 }
 0x8fe   : > { %11972 = vmatpush3.msra.mxu0 %v6931_v56  ;;  %11931 = vmatpush3.msra.mxu1 %v6839_v3  ;;  %v7223_v56 = vld [vmem:[#allocation16 + $0x948] sm:$0xff] }
 0x8ff   : > { %11973 = vmatprep.subr.mxu0 %v6930_v38  ;;  %11932 = vmatprep.subr.mxu1 %v6838_v40  ;;  %v7314_v3 = vld [vmem:[#allocation16 + $0x9a8] sm:$0xff] }
 0x900   : > { %11974 = vmatpush3.msra.mxu0 %v6930_v38  ;;  %11933 = vmatpush3.msra.mxu1 %v6838_v40  ;;  %v7222_v38 = vld [vmem:[#allocation16 + $0x940] sm:$0xff] }
 0x901   : > { %11975 = vmatprep.subr.mxu0 %v6929_v34  ;;  %11934 = vmatprep.subr.mxu1 %v6837_v45  ;;  %v7313_v40 = vld [vmem:[#allocation16 + $0x9a0] sm:$0xff] }
 0x902   : > { %11976 = vmatpush3.msra.mxu0 %v6929_v34  ;;  %11935 = vmatpush3.msra.mxu1 %v6837_v45  ;;  %v7221_v34 = vld [vmem:[#allocation16 + $0x938] sm:$0xff] }
 0x903   : > { %11978 = vmatmul.mubr.f32.vlgmr.msra.gmra.mxu0 %v15669_v60  ;;  %12015 = vmatprep.subr.mxu0 %v7134_v9  ;;  %v7312_v45 = vld [vmem:[#allocation16 + $0x998] sm:$0xff] }
 0x904   : > { %11936 = vmatprep.subr.mxu1 %v6836_v49  ;;  %12016 = vmatpush3.msra.mxu0 %v7134_v9  ;;  %v7220_v9 = vld [vmem:[#allocation16 + $0x930] sm:$0xff] }
 0x905   : > { %12047 = vmatprep.mubr.f32.mxu0 %v15647_v24  ;;  %11937 = vmatpush3.msra.mxu1 %v6836_v49  ;;  %v7038_v24 = vld [vmem:[#allocation16 + $0x870] sm:$0xff] }
 0x906   : > { %12017 = vmatprep.subr.mxu0 %v7133_v54  ;;  %11938 = vmatprep.subr.mxu1 %v6835_v52  ;;  %v7311_v49 = vld [vmem:[#allocation16 + $0x990] sm:$0xff] }
 0x907   : > { %12018 = vmatpush3.msra.mxu0 %v7133_v54  ;;  %11939 = vmatpush3.msra.mxu1 %v6835_v52  ;;  %v7219_v54 = vld [vmem:[#allocation16 + $0x928] sm:$0xff] }
 0x908   : > { %12019 = vmatprep.subr.mxu0 %v7132_v19  ;;  %11940 = vmatprep.subr.mxu1 %v6834_v53  ;;  %v7310_v52 = vld [vmem:[#allocation16 + $0x988] sm:$0xff] }
 0x909   : > { %12020 = vmatpush3.msra.mxu0 %v7132_v19  ;;  %11941 = vmatpush3.msra.mxu1 %v6834_v53  ;;  %v7218_v19 = vld [vmem:[#allocation16 + $0x920] sm:$0xff] }
 0x90a   : > { %12021 = vmatprep.subr.mxu0 %v7131_v23  ;;  %11943 = vmatmul.mubr.f32.vlgmr.msra.gmra.mxu1 %v15673_v55  ;;  %v7309_v53 = vld [vmem:[#allocation16 + $0x980] sm:$0xff] }
 0x90b   : > { %11980 = vmatprep.subr.mxu1 %v7039_v14  ;;  %12022 = vmatpush3.msra.mxu0 %v7131_v23  ;;  %v7217_v23 = vld [vmem:[#allocation16 + $0x918] sm:$0xff] }
 0x90c   : > { %11981 = vmatpush3.msra.mxu1 %v7039_v14  ;;  %12012 = vmatprep.mubr.f32.mxu1 %v7022_v62  ;;  %v7514_v14 = vld [vmem:[#allocation16 + $0xaf8] sm:$0xff]  ;;  %v7513_v62 = vld [vmem:[#allocation16 + $0xaf0] sm:$0xff] }
 0x90d   : > { %12023 = vmatprep.subr.mxu0 %v7130_v27  ;;  %11982 = vmatprep.subr.mxu1 %v7038_v24 }
 0x90e   : > { %12024 = vmatpush3.msra.mxu0 %v7130_v27  ;;  %11983 = vmatpush3.msra.mxu1 %v7038_v24  ;;  %v7216_v27 = vld [vmem:[#allocation16 + $0x910] sm:$0xff]  ;;  %v7308_v24 = vld [vmem:[#allocation4 + $0x1b] sm:$0xff] }
 0x90f   : > { %12025 = vmatprep.subr.mxu0 %v7129_v36  ;;  %11984 = vmatprep.subr.mxu1 %v7037_v18 }
 0x910   : > { %12026 = vmatpush3.msra.mxu0 %v7129_v36  ;;  %11985 = vmatpush3.msra.mxu1 %v7037_v18  ;;  %v7215_v36 = vld [vmem:[#allocation16 + $0x908] sm:$0xff] }
 0x911   : > { %12027 = vmatprep.subr.mxu0 %v7128_v50  ;;  %11986 = vmatprep.subr.mxu1 %v7036_v39  ;;  %v7512_v18 = vld [vmem:[#allocation16 + $0xae8] sm:$0xff] }
 0x912   : > { %12028 = vmatpush3.msra.mxu0 %v7128_v50  ;;  %11987 = vmatpush3.msra.mxu1 %v7036_v39  ;;  %v7214_v50 = vld [vmem:[#allocation16 + $0x900] sm:$0xff] }
 0x913   : > { %12029 = vmatprep.subr.mxu0 %v7127_v2  ;;  %11988 = vmatprep.subr.mxu1 %v7035_v46  ;;  %v7511_v39 = vld [vmem:[#allocation16 + $0xae0] sm:$0xff] }
 0x914   : > { %12030 = vmatpush3.msra.mxu0 %v7127_v2  ;;  %11989 = vmatpush3.msra.mxu1 %v7035_v46  ;;  %v7419_v2 = vld [vmem:[#allocation16 + $0xa78] sm:$0xff]  ;;  %v15685_v46 = vld [vmem:[#allocation4 + $0x1a] sm:$0xff] }
 0x915   : > { %12031 = vmatprep.subr.mxu0 %v7126_v59  ;;  %11990 = vmatprep.subr.mxu1 %v7034_v13 }
 0x916   : > { %12032 = vmatpush3.msra.mxu0 %v7126_v59  ;;  %11991 = vmatpush3.msra.mxu1 %v7034_v13  ;;  %v7510_v59 = vld [vmem:[#allocation16 + $0xad8] sm:$0xff]  ;;  %v7509_v13 = vld [vmem:[#allocation16 + $0xad0] sm:$0xff] }
 0x917   : > { %12033 = vmatprep.subr.mxu0 %v7125_v57  ;;  %11992 = vmatprep.subr.mxu1 %v7033_v10 }
 0x918   : > { %12034 = vmatpush3.msra.mxu0 %v7125_v57  ;;  %11993 = vmatpush3.msra.mxu1 %v7033_v10  ;;  %v7417_v57 = vld [vmem:[#allocation16 + $0xa68] sm:$0xff] }
 0x919   : > { %12035 = vmatprep.subr.mxu0 %v7124_v63  ;;  %11994 = vmatprep.subr.mxu1 %v7032_v17  ;;  %v7508_v10 = vld [vmem:[#allocation16 + $0xac8] sm:$0xff] }
 0x91a   : > { %12036 = vmatpush3.msra.mxu0 %v7124_v63  ;;  %11995 = vmatpush3.msra.mxu1 %v7032_v17  ;;  %v7416_v63 = vld [vmem:[#allocation16 + $0xa60] sm:$0xff] }
 0x91b   : > { %12037 = vmatprep.subr.mxu0 %v7123_v35  ;;  %11996 = vmatprep.subr.mxu1 %v7031_v61  ;;  %v7507_v17 = vld [vmem:[#allocation16 + $0xac0] sm:$0xff] }
 0x91c   : > { %12038 = vmatpush3.msra.mxu0 %v7123_v35  ;;  %11997 = vmatpush3.msra.mxu1 %v7031_v61  ;;  %v7415_v35 = vld [vmem:[#allocation16 + $0xa58] sm:$0xff] }
 0x91d   : > { %12039 = vmatprep.subr.mxu0 %v7122_v30  ;;  %11998 = vmatprep.subr.mxu1 %v7030_v7  ;;  %v7506_v61 = vld [vmem:[#allocation16 + $0xab8] sm:$0xff] }
 0x91e   : > { %12040 = vmatpush3.msra.mxu0 %v7122_v30  ;;  %11999 = vmatpush3.msra.mxu1 %v7030_v7  ;;  %v7505_v30 = vld [vmem:[#allocation16 + $0xab0] sm:$0xff]  ;;  %v7413_v7 = vld [vmem:[#allocation16 + $0xa48] sm:$0xff] }
 0x91f   : > { %12041 = vmatprep.subr.mxu0 %v7121_v32  ;;  %12000 = vmatprep.subr.mxu1 %v7029_v31 }
 0x920   : > { %12042 = vmatpush3.msra.mxu0 %v7121_v32  ;;  %12001 = vmatpush3.msra.mxu1 %v7029_v31  ;;  %v7504_v32 = vld [vmem:[#allocation16 + $0xaa8] sm:$0xff]  ;;  %v7412_v31 = vld [vmem:[#allocation16 + $0xa40] sm:$0xff] }
 0x921   : > { %12043 = vmatprep.subr.mxu0 %v7120_v37  ;;  %12002 = vmatprep.subr.mxu1 %v7028_v28 }
 0x922   : > { %12044 = vmatpush3.msra.mxu0 %v7120_v37  ;;  %12003 = vmatpush3.msra.mxu1 %v7028_v28  ;;  %v7503_v37 = vld [vmem:[#allocation16 + $0xaa0] sm:$0xff]  ;;  %v7411_v28 = vld [vmem:[#allocation16 + $0xa38] sm:$0xff] }
 0x923   : > { %12045 = vmatprep.subr.mxu0 %v7119_v4  ;;  %12004 = vmatprep.subr.mxu1 %v7027_v22 }
 0x924   : > { %12046 = vmatpush3.msra.mxu0 %v7119_v4  ;;  %12005 = vmatpush3.msra.mxu1 %v7027_v22  ;;  %v7502_v4 = vld [vmem:[#allocation16 + $0xa98] sm:$0xff]  ;;  %v7410_v22 = vld [vmem:[#allocation16 + $0xa30] sm:$0xff] }
 0x925   : > { %12048 = vmatmul.mubr.f32.vlgmr.msra.gmra.mxu0 %v15676_v15  ;;  %12085 = vmatprep.subr.mxu0 %v7324_v33 }
 0x926   : > { %12006 = vmatprep.subr.mxu1 %v7026_v21  ;;  %12086 = vmatpush3.msra.mxu0 %v7324_v33  ;;  %v7501_v33 = vld [vmem:[#allocation16 + $0xa90] sm:$0xff] }
 0x927   : > { %12117 = vmatprep.mubr.f32.mxu0 %v15653_v58  ;;  %12007 = vmatpush3.msra.mxu1 %v7026_v21  ;;  %v7228_v58 = vld [vmem:[#allocation16 + $0x970] sm:$0xff]  ;;  %v7409_v21 = vld [vmem:[#allocation16 + $0xa28] sm:$0xff] }
 0x928   : > { %12087 = vmatprep.subr.mxu0 %v7323_v12  ;;  %12008 = vmatprep.subr.mxu1 %v7025_v41 }
 0x929   : > { %12088 = vmatpush3.msra.mxu0 %v7323_v12  ;;  %12009 = vmatpush3.msra.mxu1 %v7025_v41  ;;  %v7500_v12 = vld [vmem:[#allocation16 + $0xa88] sm:$0xff]  ;;  %v7408_v41 = vld [vmem:[#allocation16 + $0xa20] sm:$0xff] }
 0x92a   : > { %12089 = vmatprep.subr.mxu0 %v7322_v42  ;;  %12010 = vmatprep.subr.mxu1 %v7024_v20 }
 0x92b   : > { %12090 = vmatpush3.msra.mxu0 %v7322_v42  ;;  %12011 = vmatpush3.msra.mxu1 %v7024_v20  ;;  %v7499_v42 = vld [vmem:[#allocation16 + $0xa80] sm:$0xff]  ;;  %v7407_v20 = vld [vmem:[#allocation16 + $0xa18] sm:$0xff] }
 0x92c   : > { %12091 = vmatprep.subr.mxu0 %v7321_v47  ;;  %12013 = vmatmul.mubr.f32.vlgmr.msra.gmra.mxu1 %v15680_v8 }
 0x92d   : > { %12050 = vmatprep.subr.mxu1 %v7229_v44  ;;  %12092 = vmatpush3.msra.mxu0 %v7321_v47  ;;  %v7704_v47 = vld [vmem:[#allocation16 + $0xbf8] sm:$0xff] }
 0x92e   : > { %12051 = vmatpush3.msra.mxu1 %v7229_v44  ;;  %12082 = vmatprep.mubr.f32.mxu1 %v15657_v1  ;;  %v7224_v1 = vld [vmem:[#allocation16 + $0x950] sm:$0xff] }
 0x92f   : > { %12093 = vmatprep.subr.mxu0 %v7320_v26  ;;  %12052 = vmatprep.subr.mxu1 %v7228_v58  ;;  %v7406_v44 = vld [vmem:[#allocation16 + $0xa10] sm:$0xff] }
 0x930   : > { %12094 = vmatpush3.msra.mxu0 %v7320_v26  ;;  %12053 = vmatpush3.msra.mxu1 %v7228_v58  ;;  %v7498_v26 = vld [vmem:[#allocation4 + $0x1d] sm:$0xff] }
 0x931   : > { %12095 = vmatprep.subr.mxu0 %v7319_v11  ;;  %12054 = vmatprep.subr.mxu1 %v7227_v16  ;;  %v7703_v58 = vld [vmem:[#allocation16 + $0xbf0] sm:$0xff] }
 0x932   : > { %12096 = vmatpush3.msra.mxu0 %v7319_v11  ;;  %12055 = vmatpush3.msra.mxu1 %v7227_v16  ;;  %v7405_v11 = vld [vmem:[#allocation16 + $0xa08] sm:$0xff] }
 0x933   : > { %12097 = vmatprep.subr.mxu0 %v7318_v51  ;;  %12056 = vmatprep.subr.mxu1 %v7226_v6  ;;  %v7702_v16 = vld [vmem:[#allocation16 + $0xbe8] sm:$0xff] }
 0x934   : > { %12098 = vmatpush3.msra.mxu0 %v7318_v51  ;;  %12057 = vmatpush3.msra.mxu1 %v7226_v6  ;;  %v7404_v51 = vld [vmem:[#allocation16 + $0xa00] sm:$0xff] }
 0x935   : > { %12099 = vmatprep.subr.mxu0 %v7317_v25  ;;  %12058 = vmatprep.subr.mxu1 %v7225_v5  ;;  %v7701_v6 = vld [vmem:[#allocation16 + $0xbe0] sm:$0xff] }
 0x936   : > { %12100 = vmatpush3.msra.mxu0 %v7317_v25  ;;  %12059 = vmatpush3.msra.mxu1 %v7225_v5  ;;  %v7609_v25 = vld [vmem:[#allocation16 + $0xb78] sm:$0xff]  ;;  %v7403_v5 = vld [vmem:[#allocation4 + $0x1c] sm:$0xff] }
 0x937   : > { %12101 = vmatprep.subr.mxu0 %v7316_v29  ;;  %12060 = vmatprep.subr.mxu1 %v7224_v1 }
 0x938   : > { %12102 = vmatpush3.msra.mxu0 %v7316_v29  ;;  %12061 = vmatpush3.msra.mxu1 %v7224_v1  ;;  %v7700_v29 = vld [vmem:[#allocation16 + $0xbd8] sm:$0xff]  ;;  %v7608_v1 = vld [vmem:[#allocation16 + $0xb70] sm:$0xff] }
 0x939   : > { %12103 = vmatprep.subr.mxu0 %v7315_v48  ;;  %12062 = vmatprep.subr.mxu1 %v7223_v56 }
 0x93a   : > { %12104 = vmatpush3.msra.mxu0 %v7315_v48  ;;  %12063 = vmatpush3.msra.mxu1 %v7223_v56  ;;  %v7607_v48 = vld [vmem:[#allocation16 + $0xb68] sm:$0xff] }
 0x93b   : > { %12105 = vmatprep.subr.mxu0 %v7314_v3  ;;  %12064 = vmatprep.subr.mxu1 %v7222_v38  ;;  %v7698_v56 = vld [vmem:[#allocation16 + $0xbc8] sm:$0xff] }
 0x93c   : > { %12106 = vmatpush3.msra.mxu0 %v7314_v3  ;;  %12065 = vmatpush3.msra.mxu1 %v7222_v38  ;;  %v7606_v3 = vld [vmem:[#allocation16 + $0xb60] sm:$0xff] }
 0x93d   : > { %12107 = vmatprep.subr.mxu0 %v7313_v40  ;;  %12066 = vmatprep.subr.mxu1 %v7221_v34  ;;  %v7697_v38 = vld [vmem:[#allocation16 + $0xbc0] sm:$0xff] }
 0x93e   : > { %12108 = vmatpush3.msra.mxu0 %v7313_v40  ;;  %12067 = vmatpush3.msra.mxu1 %v7221_v34  ;;  %v7605_v40 = vld [vmem:[#allocation16 + $0xb58] sm:$0xff] }
 0x93f   : > { %12109 = vmatprep.subr.mxu0 %v7312_v45  ;;  %12068 = vmatprep.subr.mxu1 %v7220_v9  ;;  %v7696_v34 = vld [vmem:[#allocation16 + $0xbb8] sm:$0xff] }
 0x940   : > { %12110 = vmatpush3.msra.mxu0 %v7312_v45  ;;  %12069 = vmatpush3.msra.mxu1 %v7220_v9  ;;  %v7695_v45 = vld [vmem:[#allocation16 + $0xbb0] sm:$0xff]  ;;  %v7603_v9 = vld [vmem:[#allocation16 + $0xb48] sm:$0xff] }
 0x941   : > { %12111 = vmatprep.subr.mxu0 %v7311_v49  ;;  %12070 = vmatprep.subr.mxu1 %v7219_v54 }
 0x942   : > { %12112 = vmatpush3.msra.mxu0 %v7311_v49  ;;  %12071 = vmatpush3.msra.mxu1 %v7219_v54  ;;  %v7694_v49 = vld [vmem:[#allocation16 + $0xba8] sm:$0xff]  ;;  %v7602_v54 = vld [vmem:[#allocation16 + $0xb40] sm:$0xff] }
 0x943   : > { %12113 = vmatprep.subr.mxu0 %v7310_v52  ;;  %12072 = vmatprep.subr.mxu1 %v7218_v19 }
 0x944   : > { %12114 = vmatpush3.msra.mxu0 %v7310_v52  ;;  %12073 = vmatpush3.msra.mxu1 %v7218_v19  ;;  %v7693_v52 = vld [vmem:[#allocation16 + $0xba0] sm:$0xff]  ;;  %v7601_v19 = vld [vmem:[#allocation16 + $0xb38] sm:$0xff] }
 0x945   : > { %12115 = vmatprep.subr.mxu0 %v7309_v53  ;;  %12074 = vmatprep.subr.mxu1 %v7217_v23 }
 0x946   : > { %12116 = vmatpush3.msra.mxu0 %v7309_v53  ;;  %12075 = vmatpush3.msra.mxu1 %v7217_v23  ;;  %v7692_v53 = vld [vmem:[#allocation16 + $0xb98] sm:$0xff]  ;;  %v7600_v23 = vld [vmem:[#allocation16 + $0xb30] sm:$0xff] }
 0x947   : > { %12118 = vmatmul.mubr.f32.vlgmr.msra.gmra.mxu0 %v7308_v24  ;;  %12155 = vmatprep.subr.mxu0 %v7514_v14  ;;  %v7690_v24 = vld [vmem:[#allocation16 + $0xb88] sm:$0xff] }
 0x948   : > { %12076 = vmatprep.subr.mxu1 %v7216_v27  ;;  %12156 = vmatpush3.msra.mxu0 %v7514_v14  ;;  %v7691_v14 = vld [vmem:[#allocation16 + $0xb90] sm:$0xff] }
 0x949   : > { %12187 = vmatprep.mubr.f32.mxu0 %v15661_v0  ;;  %12077 = vmatpush3.msra.mxu1 %v7216_v27  ;;  %v7418_v0 = vld [vmem:[#allocation16 + $0xa70] sm:$0xff]  ;;  %v7599_v27 = vld [vmem:[#allocation16 + $0xb28] sm:$0xff] }
 0x94a   : > { %12157 = vmatprep.subr.mxu0 %v7513_v62  ;;  %12078 = vmatprep.subr.mxu1 %v7215_v36 }
 0x94b   : > { %12158 = vmatpush3.msra.mxu0 %v7513_v62  ;;  %12079 = vmatpush3.msra.mxu1 %v7215_v36  ;;  %v7598_v62 = vld [vmem:[#allocation16 + $0xb20] sm:$0xff] }
 0x94c   : > { %12159 = vmatprep.subr.mxu0 %v7512_v18  ;;  %12080 = vmatprep.subr.mxu1 %v7214_v50  ;;  %v7689_v36 = vld [vmem:[#allocation16 + $0xb80] sm:$0xff] }
 0x94d   : > { %12160 = vmatpush3.msra.mxu0 %v7512_v18  ;;  %12081 = vmatpush3.msra.mxu1 %v7214_v50  ;;  %v7597_v18 = vld [vmem:[#allocation16 + $0xb18] sm:$0xff] }
 0x94e   : > { %12161 = vmatprep.subr.mxu0 %v7511_v39  ;;  %12083 = vmatmul.mubr.f32.vlgmr.msra.gmra.mxu1 %v15685_v46  ;;  %v7894_v50 = vld [vmem:[#allocation16 + $0xcf8] sm:$0xff] }
 0x94f   : > { %12120 = vmatprep.subr.mxu1 %v7419_v2  ;;  %12162 = vmatpush3.msra.mxu0 %v7511_v39  ;;  %v7596_v39 = vld [vmem:[#allocation16 + $0xb10] sm:$0xff] }
 0x950   : > { %12121 = vmatpush3.msra.mxu1 %v7419_v2  ;;  %12152 = vmatprep.mubr.f32.mxu1 %v15665_v43  ;;  %v7414_v43 = vld [vmem:[#allocation16 + $0xa50] sm:$0xff] }
 0x951   : > { %12163 = vmatprep.subr.mxu0 %v7510_v59  ;;  %12122 = vmatprep.subr.mxu1 %v7418_v0  ;;  %v7688_v2 = vld [vmem:[#allocation4 + $0x1f] sm:$0xff] }
 0x952   : > { %12164 = vmatpush3.msra.mxu0 %v7510_v59  ;;  %12123 = vmatpush3.msra.mxu1 %v7418_v0  ;;  %v7893_v59 = vld [vmem:[#allocation16 + $0xcf0] sm:$0xff]  ;;  %v7595_v0 = vld [vmem:[#allocation16 + $0xb08] sm:$0xff] }
 0x953   : > { %12165 = vmatprep.subr.mxu0 %v7509_v13  ;;  %12124 = vmatprep.subr.mxu1 %v7417_v57 }
 0x954   : > { %12166 = vmatpush3.msra.mxu0 %v7509_v13  ;;  %12125 = vmatpush3.msra.mxu1 %v7417_v57  ;;  %v7892_v13 = vld [vmem:[#allocation16 + $0xce8] sm:$0xff]  ;;  %v7594_v57 = vld [vmem:[#allocation16 + $0xb00] sm:$0xff] }
 0x955   : > { %12167 = vmatprep.subr.mxu0 %v7508_v10  ;;  %12126 = vmatprep.subr.mxu1 %v7416_v63 }
 0x956   : > { %12168 = vmatpush3.msra.mxu0 %v7508_v10  ;;  %12127 = vmatpush3.msra.mxu1 %v7416_v63  ;;  %v7891_v10 = vld [vmem:[#allocation16 + $0xce0] sm:$0xff]  ;;  %v7799_v63 = vld [vmem:[#allocation16 + $0xc78] sm:$0xff] }
 0x957   : > { %12169 = vmatprep.subr.mxu0 %v7507_v17  ;;  %12128 = vmatprep.subr.mxu1 %v7415_v35 }
 0x958   : > { %12170 = vmatpush3.msra.mxu0 %v7507_v17  ;;  %12129 = vmatpush3.msra.mxu1 %v7415_v35  ;;  %v7593_v17 = vld [vmem:[#allocation4 + $0x1e] sm:$0xff]  ;;  %v7890_v35 = vld [vmem:[#allocation16 + $0xcd8] sm:$0xff] }
 0x959   : > { %12171 = vmatprep.subr.mxu0 %v7506_v61  ;;  %12130 = vmatprep.subr.mxu1 %v7414_v43 }
 0x95a   : > { %12172 = vmatpush3.msra.mxu0 %v7506_v61  ;;  %12131 = vmatpush3.msra.mxu1 %v7414_v43  ;;  %v7798_v61 = vld [vmem:[#allocation16 + $0xc70] sm:$0xff]  ;;  %v7797_v43 = vld [vmem:[#allocation16 + $0xc68] sm:$0xff] }
 0x95b   : > { %12173 = vmatprep.subr.mxu0 %v7505_v30  ;;  %12132 = vmatprep.subr.mxu1 %v7413_v7 }
 0x95c   : > { %12174 = vmatpush3.msra.mxu0 %v7505_v30  ;;  %12133 = vmatpush3.msra.mxu1 %v7413_v7  ;;  %v7888_v30 = vld [vmem:[#allocation16 + $0xcc8] sm:$0xff]  ;;  %v7796_v7 = vld [vmem:[#allocation16 + $0xc60] sm:$0xff] }
 0x95d   : > { %12175 = vmatprep.subr.mxu0 %v7504_v32  ;;  %12134 = vmatprep.subr.mxu1 %v7412_v31 }
 0x95e   : > { %12176 = vmatpush3.msra.mxu0 %v7504_v32  ;;  %12135 = vmatpush3.msra.mxu1 %v7412_v31  ;;  %v7887_v32 = vld [vmem:[#allocation16 + $0xcc0] sm:$0xff]  ;;  %v7795_v31 = vld [vmem:[#allocation16 + $0xc58] sm:$0xff] }
 0x95f   : > { %12177 = vmatprep.subr.mxu0 %v7503_v37  ;;  %12136 = vmatprep.subr.mxu1 %v7411_v28 }
 0x960   : > { %12178 = vmatpush3.msra.mxu0 %v7503_v37  ;;  %12137 = vmatpush3.msra.mxu1 %v7411_v28  ;;  %v7886_v37 = vld [vmem:[#allocation16 + $0xcb8] sm:$0xff]  ;;  %v7885_v28 = vld [vmem:[#allocation16 + $0xcb0] sm:$0xff] }
 0x961   : > { %12179 = vmatprep.subr.mxu0 %v7502_v4  ;;  %12138 = vmatprep.subr.mxu1 %v7410_v22 }
 0x962   : > { %12180 = vmatpush3.msra.mxu0 %v7502_v4  ;;  %12139 = vmatpush3.msra.mxu1 %v7410_v22  ;;  %v7793_v4 = vld [vmem:[#allocation16 + $0xc48] sm:$0xff] }
 0x963   : > { %12181 = vmatprep.subr.mxu0 %v7501_v33  ;;  %12140 = vmatprep.subr.mxu1 %v7409_v21  ;;  %v7884_v22 = vld [vmem:[#allocation16 + $0xca8] sm:$0xff] }
 0x964   : > { %12182 = vmatpush3.msra.mxu0 %v7501_v33  ;;  %12141 = vmatpush3.msra.mxu1 %v7409_v21  ;;  %v7792_v33 = vld [vmem:[#allocation16 + $0xc40] sm:$0xff] }
 0x965   : > { %12183 = vmatprep.subr.mxu0 %v7500_v12  ;;  %12142 = vmatprep.subr.mxu1 %v7408_v41  ;;  %v7883_v21 = vld [vmem:[#allocation16 + $0xca0] sm:$0xff] }
 0x966   : > { %12184 = vmatpush3.msra.mxu0 %v7500_v12  ;;  %12143 = vmatpush3.msra.mxu1 %v7408_v41  ;;  %v7791_v12 = vld [vmem:[#allocation16 + $0xc38] sm:$0xff] }
 0x967   : > { %12185 = vmatprep.subr.mxu0 %v7499_v42  ;;  %12144 = vmatprep.subr.mxu1 %v7407_v20  ;;  %v7882_v41 = vld [vmem:[#allocation16 + $0xc98] sm:$0xff] }
 0x968   : > { %12186 = vmatpush3.msra.mxu0 %v7499_v42  ;;  %12145 = vmatpush3.msra.mxu1 %v7407_v20  ;;  %v7790_v42 = vld [vmem:[#allocation16 + $0xc30] sm:$0xff] }
 0x969   : > { %12188 = vmatmul.mubr.f32.vlgmr.msra.gmra.mxu0 %v7498_v26  ;;  %12225 = vmatprep.subr.mxu0 %v7704_v47  ;;  %v7881_v20 = vld [vmem:[#allocation16 + $0xc90] sm:$0xff]  ;;  %v7788_v26 = vld [vmem:[#allocation16 + $0xc20] sm:$0xff] }
 0x96a   : > { %12146 = vmatprep.subr.mxu1 %v7406_v44  ;;  %12226 = vmatpush3.msra.mxu0 %v7704_v47  ;;  %v7789_v47 = vld [vmem:[#allocation16 + $0xc28] sm:$0xff] }
 0x96b   : > { %12257 = vmatprep.mubr.f32.mxu0 %v15669_v60  ;;  %12147 = vmatpush3.msra.mxu1 %v7406_v44  ;;  %v7699_v60 = vld [vmem:[#allocation16 + $0xbd0] sm:$0xff]  ;;  %v7880_v44 = vld [vmem:[#allocation16 + $0xc88] sm:$0xff] }
 0x96c   : > { %12227 = vmatprep.subr.mxu0 %v7703_v58  ;;  %12148 = vmatprep.subr.mxu1 %v7405_v11 }
 0x96d   : > { %12228 = vmatpush3.msra.mxu0 %v7703_v58  ;;  %12149 = vmatpush3.msra.mxu1 %v7405_v11  ;;  %v7879_v58 = vld [vmem:[#allocation16 + $0xc80] sm:$0xff]  ;;  %v7787_v11 = vld [vmem:[#allocation16 + $0xc18] sm:$0xff] }
 0x96e   : > { %12229 = vmatprep.subr.mxu0 %v7702_v16  ;;  %12150 = vmatprep.subr.mxu1 %v7404_v51 }
 0x96f   : > { %12230 = vmatpush3.msra.mxu0 %v7702_v16  ;;  %12151 = vmatpush3.msra.mxu1 %v7404_v51  ;;  %v7786_v16 = vld [vmem:[#allocation16 + $0xc10] sm:$0xff] }
 0x970   : > { %12231 = vmatprep.subr.mxu0 %v7701_v6  ;;  %12153 = vmatmul.mubr.f32.vlgmr.msra.gmra.mxu1 %v7403_v5  ;;  %v7878_v51 = vld [vmem:[#allocation4 + $0x21] sm:$0xff]  ;;  %v7989_v5 = vld [vmem:[#allocation16 + $0xd78] sm:$0xff] }
 0x971   : > { %12190 = vmatprep.subr.mxu1 %v7609_v25  ;;  %12232 = vmatpush3.msra.mxu0 %v7701_v6  ;;  %v7785_v6 = vld [vmem:[#allocation16 + $0xc08] sm:$0xff] }
 0x972   : > { %12191 = vmatpush3.msra.mxu1 %v7609_v25  ;;  %12222 = vmatprep.mubr.f32.mxu1 %v15673_v55  ;;  %v7604_v55 = vld [vmem:[#allocation16 + $0xb50] sm:$0xff]  ;;  %v7784_v25 = vld [vmem:[#allocation16 + $0xc00] sm:$0xff] }
 0x973   : > { %12233 = vmatprep.subr.mxu0 %v7700_v29  ;;  %12192 = vmatprep.subr.mxu1 %v7608_v1 }
 0x974   : > { %12234 = vmatpush3.msra.mxu0 %v7700_v29  ;;  %12193 = vmatpush3.msra.mxu1 %v7608_v1  ;;  %v7783_v29 = vld [vmem:[#allocation4 + $0x20] sm:$0xff] }
 0x975   : > { %12235 = vmatprep.subr.mxu0 %v7699_v60  ;;  %12194 = vmatprep.subr.mxu1 %v7607_v48  ;;  %v7988_v1 = vld [vmem:[#allocation16 + $0xd70] sm:$0xff] }
 0x976   : > { %12236 = vmatpush3.msra.mxu0 %v7699_v60  ;;  %12195 = vmatpush3.msra.mxu1 %v7607_v48  ;;  %v7987_v60 = vld [vmem:[#allocation16 + $0xd68] sm:$0xff]  ;;  %v7986_v48 = vld [vmem:[#allocation16 + $0xd60] sm:$0xff] }
 0x977   : > { %12237 = vmatprep.subr.mxu0 %v7698_v56  ;;  %12196 = vmatprep.subr.mxu1 %v7606_v3 }
 0x978   : > { %12238 = vmatpush3.msra.mxu0 %v7698_v56  ;;  %12197 = vmatpush3.msra.mxu1 %v7606_v3  ;;  %v7985_v56 = vld [vmem:[#allocation16 + $0xd58] sm:$0xff]  ;;  %v7984_v3 = vld [vmem:[#allocation16 + $0xd50] sm:$0xff] }
 0x979   : > { %12239 = vmatprep.subr.mxu0 %v7697_v38  ;;  %12198 = vmatprep.subr.mxu1 %v7605_v40 }
 0x97a   : > { %12240 = vmatpush3.msra.mxu0 %v7697_v38  ;;  %12199 = vmatpush3.msra.mxu1 %v7605_v40  ;;  %v7983_v38 = vld [vmem:[#allocation16 + $0xd48] sm:$0xff]  ;;  %v7982_v40 = vld [vmem:[#allocation16 + $0xd40] sm:$0xff] }
 0x97b   : > { %12241 = vmatprep.subr.mxu0 %v7696_v34  ;;  %12200 = vmatprep.subr.mxu1 %v7604_v55 }
 0x97c   : > { %12242 = vmatpush3.msra.mxu0 %v7696_v34  ;;  %12201 = vmatpush3.msra.mxu1 %v7604_v55  ;;  %v7981_v34 = vld [vmem:[#allocation16 + $0xd38] sm:$0xff]  ;;  %v7979_v55 = vld [vmem:[#allocation16 + $0xd28] sm:$0xff] }
 0x97d   : > { %12243 = vmatprep.subr.mxu0 %v7695_v45  ;;  %12202 = vmatprep.subr.mxu1 %v7603_v9 }
 0x97e   : > { %12244 = vmatpush3.msra.mxu0 %v7695_v45  ;;  %12203 = vmatpush3.msra.mxu1 %v7603_v9  ;;  %v7978_v45 = vld [vmem:[#allocation16 + $0xd20] sm:$0xff]  ;;  %v7977_v9 = vld [vmem:[#allocation16 + $0xd18] sm:$0xff] }
 0x97f   : > { %12245 = vmatprep.subr.mxu0 %v7694_v49  ;;  %12204 = vmatprep.subr.mxu1 %v7602_v54 }
 0x980   : > { %12246 = vmatpush3.msra.mxu0 %v7694_v49  ;;  %12205 = vmatpush3.msra.mxu1 %v7602_v54  ;;  %v7976_v49 = vld [vmem:[#allocation16 + $0xd10] sm:$0xff]  ;;  %v7975_v54 = vld [vmem:[#allocation16 + $0xd08] sm:$0xff] }
 0x981   : > { %12247 = vmatprep.subr.mxu0 %v7693_v52  ;;  %12206 = vmatprep.subr.mxu1 %v7601_v19 }
 0x982   : > { %12248 = vmatpush3.msra.mxu0 %v7693_v52  ;;  %12207 = vmatpush3.msra.mxu1 %v7601_v19  ;;  %v7974_v52 = vld [vmem:[#allocation16 + $0xd00] sm:$0xff]  ;;  %v7973_v19 = vld [vmem:[#allocation4 + $0x22] sm:$0xff] }
 0x983   : > { %12249 = vmatprep.subr.mxu0 %v7692_v53  ;;  %12208 = vmatprep.subr.mxu1 %v7600_v23 }
 0x984   : > { %12250 = vmatpush3.msra.mxu0 %v7692_v53  ;;  %12209 = vmatpush3.msra.mxu1 %v7600_v23  ;;  %v11454_v53 = vpop.f32.mrf.mxu1 }
 0x985   : > { %12251 = vmatprep.subr.mxu0 %v7691_v14  ;;  %12210 = vmatprep.subr.mxu1 %v7599_v27 }
 0x986   : > { %12252 = vmatpush3.msra.mxu0 %v7691_v14  ;;  %12211 = vmatpush3.msra.mxu1 %v7599_v27  ;;  %v5608_v23 = vpop.f32.mrf.mxu1  ;;  %v11489_v14 = vpop.f32.mrf.mxu0 }
 0x987   : > { %12253 = vmatprep.subr.mxu0 %v7690_v24  ;;  %12212 = vmatprep.subr.mxu1 %v7598_v62 }
 0x988   : > { %12254 = vmatpush3.msra.mxu0 %v7690_v24  ;;  %12213 = vmatpush3.msra.mxu1 %v7598_v62  ;;  %v11524_v27 = vpop.f32.mrf.mxu1  ;;  %v5689_v24 = vadd.f32 %v11489_v14, %v11454_v53  ;;  %v5683_v62 = vpop.f32.mrf.mxu0 }
 0x989   : > { %12255 = vmatprep.subr.mxu0 %v7689_v36  ;;  %12214 = vmatprep.subr.mxu1 %v7597_v18 }
 0x98a   : > { %12256 = vmatpush3.msra.mxu0 %v7689_v36  ;;  %12215 = vmatpush3.msra.mxu1 %v7597_v18  ;;  %v5776_v36 = vpop.f32.mrf.mxu1  ;;  %v5684_v18 = vadd.f32 %v5683_v62, %v5608_v23 }
 0x98b   : > { %12258 = vmatmul.mubr.f32.vlgmr.msra.gmra.mxu0 %v7688_v2  ;;  %12295 = vmatprep.subr.mxu0 %v7894_v50 }
 0x98c   : > { %12216 = vmatprep.subr.mxu1 %v7596_v39  ;;  %12296 = vmatpush3.msra.mxu0 %v7894_v50  ;;  %v5786_v50 = vadd.f32 %v11524_v27, %v5689_v24  ;;  %v11594_v2 = vpop.f32.mrf.mxu1 }
 0x98d   : > { %12327 = vmatprep.mubr.f32.mxu0 %v15676_v15  ;;  %12217 = vmatpush3.msra.mxu1 %v7596_v39  ;;  %v7889_v15 = vld [vmem:[#allocation16 + $0xcd0] sm:$0xff]  ;;  %v11559_v39 = vpop.f32.mrf.mxu0 }
 0x98e   : > { %12297 = vmatprep.subr.mxu0 %v7893_v59  ;;  %12218 = vmatprep.subr.mxu1 %v7595_v0 }
 0x98f   : > { %12298 = vmatpush3.msra.mxu0 %v7893_v59  ;;  %12219 = vmatpush3.msra.mxu1 %v7595_v0  ;;  %v5785_v59 = vadd.f32 %v5776_v36, %v5684_v18  ;;  %v5881_v0 = vadd.f32 %v11559_v39, %v5786_v50 }
 0x990   : > { %12299 = vmatprep.subr.mxu0 %v7892_v13  ;;  %12220 = vmatprep.subr.mxu1 %v7594_v57 }
 0x991   : > { %12300 = vmatpush3.msra.mxu0 %v7892_v13  ;;  %12221 = vmatpush3.msra.mxu1 %v7594_v57  ;;  %v5871_v13 = vpop.f32.mrf.mxu0  ;;  %v5966_v57 = vpop.f32.mrf.mxu1 }
 0x992   : > { %12301 = vmatprep.subr.mxu0 %v7891_v10  ;;  %12223 = vmatmul.mubr.f32.vlgmr.msra.gmra.mxu1 %v7593_v17 }
 0x993   : > { %12260 = vmatprep.subr.mxu1 %v7799_v63  ;;  %12302 = vmatpush3.msra.mxu0 %v7891_v10  ;;  %v5880_v10 = vadd.f32 %v5871_v13, %v5785_v59  ;;  %v11629_v17 = vpop.f32.mrf.mxu0 }
 0x994   : > { %12261 = vmatpush3.msra.mxu1 %v7799_v63  ;;  %12292 = vmatprep.mubr.f32.mxu1 %v15680_v8  ;;  %v7794_v8 = vld [vmem:[#allocation16 + $0xc50] sm:$0xff]  ;;  %v5976_v63 = vadd.f32 %v11594_v2, %v5881_v0 }
 0x995   : > { %12303 = vmatprep.subr.mxu0 %v7890_v35  ;;  %12262 = vmatprep.subr.mxu1 %v7798_v61 }
 0x996   : > { %12304 = vmatpush3.msra.mxu0 %v7890_v35  ;;  %12263 = vmatpush3.msra.mxu1 %v7798_v61  ;;  %v11664_v35 = vpop.f32.mrf.mxu1  ;;  %v5975_v61 = vadd.f32 %v5966_v57, %v5880_v10 }
 0x997   : > { %12305 = vmatprep.subr.mxu0 %v7889_v15  ;;  %12264 = vmatprep.subr.mxu1 %v7797_v43 }
 0x998   : > { %12306 = vmatpush3.msra.mxu0 %v7889_v15  ;;  %12265 = vmatpush3.msra.mxu1 %v7797_v43  ;;  %v6071_v15 = vadd.f32 %v11629_v17, %v5976_v63  ;;  %v6061_v43 = vpop.f32.mrf.mxu0 }
 0x999   : > { %12307 = vmatprep.subr.mxu0 %v7888_v30  ;;  %12266 = vmatprep.subr.mxu1 %v7796_v7 }
 0x99a   : > { %12308 = vmatpush3.msra.mxu0 %v7888_v30  ;;  %12267 = vmatpush3.msra.mxu1 %v7796_v7  ;;  %v6156_v30 = vpop.f32.mrf.mxu1  ;;  %v6166_v7 = vadd.f32 %v11664_v35, %v6071_v15 }
 0x99b   : > { %12309 = vmatprep.subr.mxu0 %v7887_v32  ;;  %12268 = vmatprep.subr.mxu1 %v7795_v31 }
 0x99c   : > { %12310 = vmatpush3.msra.mxu0 %v7887_v32  ;;  %12269 = vmatpush3.msra.mxu1 %v7795_v31  ;;  %v6070_v32 = vadd.f32 %v6061_v43, %v5975_v61  ;;  %v11699_v31 = vpop.f32.mrf.mxu0 }
 0x99d   : > { %12311 = vmatprep.subr.mxu0 %v7886_v37  ;;  %12270 = vmatprep.subr.mxu1 %v7794_v8 }
 0x99e   : > { %12312 = vmatpush3.msra.mxu0 %v7886_v37  ;;  %12271 = vmatpush3.msra.mxu1 %v7794_v8  ;;  %v11734_v37 = vpop.f32.mrf.mxu1  ;;  %v6165_v8 = vadd.f32 %v6156_v30, %v6070_v32 }
 0x99f   : > { %12313 = vmatprep.subr.mxu0 %v7885_v28  ;;  %12272 = vmatprep.subr.mxu1 %v7793_v4 }
 0x9a0   : > { %12314 = vmatpush3.msra.mxu0 %v7885_v28  ;;  %12273 = vmatpush3.msra.mxu1 %v7793_v4  ;;  %v6261_v28 = vadd.f32 %v11699_v31, %v6166_v7  ;;  %v6251_v4 = vpop.f32.mrf.mxu0 }
 0x9a1   : > { %12315 = vmatprep.subr.mxu0 %v7884_v22  ;;  %12274 = vmatprep.subr.mxu1 %v7792_v33 }
 0x9a2   : > { %12316 = vmatpush3.msra.mxu0 %v7884_v22  ;;  %12275 = vmatpush3.msra.mxu1 %v7792_v33  ;;  %v6346_v22 = vpop.f32.mrf.mxu1  ;;  %v6356_v33 = vadd.f32 %v11734_v37, %v6261_v28 }
 0x9a3   : > { %12317 = vmatprep.subr.mxu0 %v7883_v21  ;;  %12276 = vmatprep.subr.mxu1 %v7791_v12 }
 0x9a4   : > { %12318 = vmatpush3.msra.mxu0 %v7883_v21  ;;  %12277 = vmatpush3.msra.mxu1 %v7791_v12  ;;  %v6260_v21 = vadd.f32 %v6251_v4, %v6165_v8  ;;  %v11769_v12 = vpop.f32.mrf.mxu0 }
 0x9a5   : > { %12319 = vmatprep.subr.mxu0 %v7882_v41  ;;  %12278 = vmatprep.subr.mxu1 %v7790_v42 }
 0x9a6   : > { %12320 = vmatpush3.msra.mxu0 %v7882_v41  ;;  %12279 = vmatpush3.msra.mxu1 %v7790_v42  ;;  %v11804_v41 = vpop.f32.mrf.mxu1  ;;  %v6355_v42 = vadd.f32 %v6346_v22, %v6260_v21 }
 0x9a7   : > { %12321 = vmatprep.subr.mxu0 %v7881_v20  ;;  %12280 = vmatprep.subr.mxu1 %v7789_v47 }
 0x9a8   : > { %12322 = vmatpush3.msra.mxu0 %v7881_v20  ;;  %12281 = vmatpush3.msra.mxu1 %v7789_v47  ;;  %v6451_v20 = vadd.f32 %v11769_v12, %v6356_v33  ;;  %v6441_v47 = vpop.f32.mrf.mxu0 }
 0x9a9   : > { %12323 = vmatprep.subr.mxu0 %v7880_v44  ;;  %12282 = vmatprep.subr.mxu1 %v7788_v26 }
 0x9aa   : > { %12324 = vmatpush3.msra.mxu0 %v7880_v44  ;;  %12283 = vmatpush3.msra.mxu1 %v7788_v26  ;;  %v6536_v44 = vpop.f32.mrf.mxu1  ;;  %v6546_v26 = vadd.f32 %v11804_v41, %v6451_v20 }
 0x9ab   : > { %12325 = vmatprep.subr.mxu0 %v7879_v58  ;;  %12284 = vmatprep.subr.mxu1 %v7787_v11 }
 0x9ac   : > { %12326 = vmatpush3.msra.mxu0 %v7879_v58  ;;  %12285 = vmatpush3.msra.mxu1 %v7787_v11  ;;  %v6450_v58 = vadd.f32 %v6441_v47, %v6355_v42  ;;  %v11839_v11 = vpop.f32.mrf.mxu0 }
 0x9ad   : > { %12328 = vmatmul.mubr.f32.vlgmr.msra.gmra.mxu0 %v7878_v51  ;;  %12286 = vmatprep.subr.mxu1 %v7786_v16 }
 0x9ae   : > { %12287 = vmatpush3.msra.mxu1 %v7786_v16  ;;  %v11874_v16 = vpop.f32.mrf.mxu1  ;;  %v6545_v51 = vadd.f32 %v6536_v44, %v6450_v58  ;;  %v8255_v44 = vld [vmem:[#allocation18] ss:$0 sm:$0xff] }
 0x9af   : > { %12288 = vmatprep.subr.mxu1 %v7785_v6 }
 0x9b0   : > { %12289 = vmatpush3.msra.mxu1 %v7785_v6  ;;  %v6641_v6 = vadd.f32 %v11839_v11, %v6546_v26 }
 0x9b1   : > { %12290 = vmatprep.subr.mxu1 %v7784_v25 }
 0x9b2   : > { %12291 = vmatpush3.msra.mxu1 %v7784_v25  ;;  %v6631_v25 = vpop.f32.mrf.mxu0 }
 0x9b3   : > { %12293 = vmatmul.mubr.f32.vlgmr.msra.gmra.mxu1 %v7783_v29  ;;  %12330 = vmatprep.subr.mxu1 %v7989_v5  ;;  %v6736_v29 = vadd.f32 %v11874_v16, %v6641_v6 }
 0x9b4   : > { %12331 = vmatpush3.msra.mxu1 %v7989_v5  ;;  %12362 = vmatprep.mubr.f32.mxu1 %v15685_v46  ;;  %v7980_v46 = vld [vmem:[#allocation16 + $0xd30] sm:$0xff]  ;;  %v6726_v5 = vpop.f32.mrf.mxu1 }
 0x9b5   : > { %12332 = vmatprep.subr.mxu1 %v7988_v1 }
 0x9b6   : > { %12333 = vmatpush3.msra.mxu1 %v7988_v1  ;;  %v6640_v1 = vadd.f32 %v6631_v25, %v6545_v51 }
 0x9b7   : > { %12334 = vmatprep.subr.mxu1 %v7987_v60 }
 0x9b8   : > { %12335 = vmatpush3.msra.mxu1 %v7987_v60  ;;  %v11909_v60 = vpop.f32.mrf.mxu0 }
 0x9b9   : > { %12336 = vmatprep.subr.mxu1 %v7986_v48 }
 0x9ba   : > { %12337 = vmatpush3.msra.mxu1 %v7986_v48 }
 0x9bb   : > { %12338 = vmatprep.subr.mxu1 %v7985_v56 }
 0x9bc   : > { %12339 = vmatpush3.msra.mxu1 %v7985_v56  ;;  %v6735_v56 = vadd.f32 %v6726_v5, %v6640_v1 }
 0x9bd   : > { %12340 = vmatprep.subr.mxu1 %v7984_v3 }
 0x9be   : > { %12341 = vmatpush3.msra.mxu1 %v7984_v3  ;;  %v6831_v3 = vadd.f32 %v11909_v60, %v6736_v29 }
 0x9bf   : > { %12342 = vmatprep.subr.mxu1 %v7983_v38 }
 0x9c0   : > { %12343 = vmatpush3.msra.mxu1 %v7983_v38  ;;  %v6821_v38 = vpop.f32.mrf.mxu0 }
 0x9c1   : > { %12344 = vmatprep.subr.mxu1 %v7982_v40 }
 0x9c2   : > { %12345 = vmatpush3.msra.mxu1 %v7982_v40 }
 0x9c3   : > { %12346 = vmatprep.subr.mxu1 %v7981_v34 }
 0x9c4   : > { %12347 = vmatpush3.msra.mxu1 %v7981_v34 }
 0x9c5   : > { %12348 = vmatprep.subr.mxu1 %v7980_v46 }
 0x9c6   : > { %12349 = vmatpush3.msra.mxu1 %v7980_v46  ;;  %v6830_v46 = vadd.f32 %v6821_v38, %v6735_v56 }
 0x9c7   : > { %12350 = vmatprep.subr.mxu1 %v7979_v55 }
 0x9c8   : > { %12351 = vmatpush3.msra.mxu1 %v7979_v55  ;;  %v11979_v55 = vpop.f32.mrf.mxu0 }
 0x9c9   : > { %12352 = vmatprep.subr.mxu1 %v7978_v45 }
 0x9ca   : > { %12353 = vmatpush3.msra.mxu1 %v7978_v45  ;;  %v11944_v48 = vpop.f32.mrf.mxu1 }
 0x9cb   : > { %12354 = vmatprep.subr.mxu1 %v7977_v9  ;;  %v6926_v34 = vadd.f32 %v11944_v48, %v6831_v3 }
 0x9cc   : > { %12355 = vmatpush3.msra.mxu1 %v7977_v9  ;;  %v6916_v40 = vpop.f32.mrf.mxu1 }
 0x9cd   : > { %12356 = vmatprep.subr.mxu1 %v7976_v49  ;;  %v6925_v9 = vadd.f32 %v6916_v40, %v6830_v46 }
 0x9ce   : > { %12357 = vmatpush3.msra.mxu1 %v7976_v49  ;;  %v7021_v49 = vadd.f32 %v11979_v55, %v6926_v34 }
 0x9cf   : > { %12358 = vmatprep.subr.mxu1 %v7975_v54 }
 0x9d0   : > { %12359 = vmatpush3.msra.mxu1 %v7975_v54  ;;  %v7011_v54 = vpop.f32.mrf.mxu0 }
 0x9d1   : > { %12360 = vmatprep.subr.mxu1 %v7974_v52  ;;  %v7020_v53 = vadd.f32 %v7011_v54, %v6925_v9 }
 0x9d2   : > { %12361 = vmatpush3.msra.mxu1 %v7974_v52 }
 0x9d3   : > { %12363 = vmatmul.mubr.f32.vlgmr.msra.gmra.mxu1 %v7973_v19 }
 0x9e5   : > { %v12049_v23 = vpop.f32.mrf.mxu0 }
 0x9e7   : > { %v7201_v62 = vpop.f32.mrf.mxu0 }
 0x9ec   : > { %v12014_v45 = vpop.f32.mrf.mxu1 }
 0x9ed   : > { %v7116_v19 = vadd.f32 %v12014_v45, %v7021_v49 }
 0x9ee   : > { %v7106_v52 = vpop.f32.mrf.mxu1 }
 0x9ef   : > { %v7115_v27 = vadd.f32 %v7106_v52, %v7020_v53  ;;  %v7211_v24 = vadd.f32 %v12049_v23, %v7116_v19 }
 0x9f1   : > { %v7210_v50 = vadd.f32 %v7201_v62, %v7115_v27 }
 0xa07   : > { %v12119_v39 = vpop.f32.mrf.mxu0 }
 0xa09   : > { %v7391_v13 = vpop.f32.mrf.mxu0 }
 0xa0e   : > { %v12084_v14 = vpop.f32.mrf.mxu1 }
 0xa0f   : > { %v7306_v18 = vadd.f32 %v12084_v14, %v7211_v24 }
 0xa10   : > { %v7296_v36 = vpop.f32.mrf.mxu1 }
 0xa11   : > { %v7305_v59 = vadd.f32 %v7296_v36, %v7210_v50  ;;  %v7401_v0 = vadd.f32 %v12119_v39, %v7306_v18 }
 0xa13   : > { %v7400_v63 = vadd.f32 %v7391_v13, %v7305_v59 }
 0xa29   : > { %v12189_v17 = vpop.f32.mrf.mxu0 }
 0xa2b   : > { %v7581_v43 = vpop.f32.mrf.mxu0 }
 0xa30   : > { %v12154_v2 = vpop.f32.mrf.mxu1 }
 0xa31   : > { %v7496_v10 = vadd.f32 %v12154_v2, %v7401_v0 }
 0xa32   : > { %v7486_v57 = vpop.f32.mrf.mxu1 }
 0xa33   : > { %v7495_v61 = vadd.f32 %v7486_v57, %v7400_v63  ;;  %v7591_v15 = vadd.f32 %v12189_v17, %v7496_v10 }
 0xa35   : > { %v7590_v32 = vadd.f32 %v7581_v43, %v7495_v61 }
 0xa4b   : > { %v12259_v31 = vpop.f32.mrf.mxu0 }
 0xa4d   : > { %v7771_v4 = vpop.f32.mrf.mxu0 }
 0xa52   : > { %v12224_v35 = vpop.f32.mrf.mxu1 }
 0xa53   : > { %v7686_v7 = vadd.f32 %v12224_v35, %v7591_v15 }
 0xa54   : > { %v7676_v30 = vpop.f32.mrf.mxu1 }
 0xa55   : > { %v7685_v8 = vadd.f32 %v7676_v30, %v7590_v32  ;;  %v7781_v28 = vadd.f32 %v12259_v31, %v7686_v7 }
 0xa57   : > { %v7780_v21 = vadd.f32 %v7771_v4, %v7685_v8 }
 0xa6d   : > { %v12329_v12 = vpop.f32.mrf.mxu0 }
 0xa6f   : > { %v7961_v20 = vpop.f32.mrf.mxu0 }
 0xa73   : > { %v12294_v37 = vpop.f32.mrf.mxu1 }
 0xa74   : > { %v7876_v33 = vadd.f32 %v12294_v37, %v7781_v28 }
 0xa75   : > { %v7866_v22 = vpop.f32.mrf.mxu1 }
 0xa76   : > { %v7875_v41 = vadd.f32 %v7866_v22, %v7780_v21  ;;  %v7971_v42 = vadd.f32 %v12329_v12, %v7876_v33 }
 0xa78   : > { %v7970_v58 = vadd.f32 %v7961_v20, %v7875_v41 }
 0xa93   : > { %v12364_v47 = vpop.f32.mrf.mxu1 }
 0xa94   : > { %v8066_v26 = vadd.f32 %v12364_v47, %v7971_v42 }
 0xa95   : > { %v8056_v11 = vpop.f32.mrf.mxu1 }
 0xa96   : > { %v8075_v16 = vadd.f32 %v8255_v44, %v8066_v26  ;;  %v8065_v51 = vadd.f32 %v8056_v11, %v7970_v58 }
 0xa98   : > { %8077 = vst [vmem:[%s484_s11 + $0x8] sm:$0xff] %v8075_v16  ;;  %v8074_v6 = vadd.f32 %v8255_v44, %v8065_v51 }
 0xa9a   : > { %8076 = vst [vmem:[%s484_s11] sm:$0xff] %v8074_v6 }
 0xa9b PF: > { %s25_s13 = sadd.s32 1, %s12731_s13  }
 0xa9c   : > { %p22_p8 = scmp.ge.s32.totalorder %s25_s13, 4  }
 0xa9e   :  { %24 = sbr.rel (!%p22_p8) target bundleno = 5 (0x5), region = 127 }
 0xaa3   :  { %8099 = vsyncpa [#allocation6], 1 }
 0xaa4   :  { %8101 = vsyncpa [#allocation6 + $0x1], 1 }
 0xaa5   :  { %8102 = vsyncpa [#allocation8], 1 }
 0xaa6   :  { %8103 = vsyncpa [#allocation11], 1 }
 0xaa7   :  { %8104 = vsyncpa [#allocation14], 1 }
 0xaa8   :  { %8105 = vsyncpa [#allocation17], 1 }

</bundles_post_ra>
